<compile_context>
chip_gen: v5e
topology: v5e:2x2
jax: 0.10.0
libtpu: 0.0.40
codegen_flags: <defaults>
</compile_context>

<pallas_src>
import jax
import jax.numpy as jnp
from jax.experimental import pallas as pl
from jax.experimental.pallas import tpu as pltpu

# ----------------------------- configuration -------------------------------
B, T = 2, 16
MTOT = B * T
WHISPER_DIM = 32          # cfg.whisper_dim (1024 in prod, small here)
CHROMA_DIM = 24           # cfg.chromagram_dim
HIDDEN = 32               # hidden_size
VOCOS_DIM = 32            # cfg.encoder/decoder.vocos_dim
VOCOS_INTER = 64          # cfg.encoder/decoder.vocos_intermediate_dim
VOCOS_LAYERS = 2          # cfg.encoder/decoder.vocos_num_layers
CODEBOOK_SIZE = 64
CODEBOOK_DIM = 8
NUM_QUANTIZERS = 1
COMMITMENT = 0.15
CODEBOOK_LOSS_WEIGHT = 1.0
LN_EPS = 1e-6

IN_DIM = WHISPER_DIM + CHROMA_DIM        # fused [whisper|chroma] input width
OUT_DIM = WHISPER_DIM + CHROMA_DIM       # fused [whisper|chroma] head width
OUT_PAD = 128                            # lane-dense (unmasked) output width
IDX_COL = OUT_PAD - 2                    # VQ index packed here (exact in f32)
LOSS_COL = OUT_PAD - 1                   # codebook loss packed here
SLAB_W = 128                             # slab lane width

PAD0 = 8                                 # sublane-aligned data offset in halo
PAD_ROWS = PAD0 + MTOT + PAD0            # halo scratch rows (48)

assert HIDDEN == VOCOS_DIM, "toy config assumes hidden_size == vocos_dim"
assert OUT_DIM + 2 <= OUT_PAD
assert (T & (T - 1)) == 0, "mask trick below uses T power-of-two"


# ----------------------- packed-parameter slab layouts ----------------------
def _mat_entries():
    """bf16 matrix slab: every MXU weight, one after another (row offsets)."""
    e = [("in_proj", IN_DIM, HIDDEN)]                       # [wi_w ; ci_w]
    for pfx in ("enc", "dec"):
        # tap-major stacked embed conv weight: row k*Cin+ci = torch w[co,ci,k]
        e.append((f"{pfx}.embed_w", 7 * HIDDEN, VOCOS_DIM))
        for l in range(VOCOS_LAYERS):
            e.append((f"{pfx}.cnx{l}.w1", VOCOS_DIM, VOCOS_INTER))
            e.append((f"{pfx}.cnx{l}.w2", VOCOS_INTER, VOCOS_DIM))
        e.append((f"{pfx}.proj_w", VOCOS_DIM, HIDDEN))
    # fused [whisper_output_layer | chromagram_output_layer]; cols >=OUT_DIM
    # stay zero in the slab so the padded head columns are exact zeros.
    e.append(("out_w", HIDDEN, OUT_DIM))
    return e


def _vec_entries():
    """f32 vector slab: biases / LN gains / gammas / dw taps / FVQ tables."""
    e = [("in_b", 1, HIDDEN)]                               # wi_b + ci_b fused
    for pfx in ("enc", "dec"):
        e += [(f"{pfx}.embed_b", 1, VOCOS_DIM),
              (f"{pfx}.norm_g", 1, VOCOS_DIM),
              (f"{pfx}.norm_b", 1, VOCOS_DIM)]
        for l in range(VOCOS_LAYERS):
            e += [(f"{pfx}.cnx{l}.dw_w", 7, VOCOS_DIM),     # torch [C,1,7]^T
                  (f"{pfx}.cnx{l}.dw_b", 1, VOCOS_DIM),
                  (f"{pfx}.cnx{l}.ln_g", 1, VOCOS_DIM),
                  (f"{pfx}.cnx{l}.ln_b", 1, VOCOS_DIM),
                  (f"{pfx}.cnx{l}.b1", 1, VOCOS_INTER),
                  (f"{pfx}.cnx{l}.b2", 1, VOCOS_DIM),
                  (f"{pfx}.cnx{l}.gamma", 1, VOCOS_DIM)]
        e += [(f"{pfx}.final_ln_g", 1, VOCOS_DIM),
              (f"{pfx}.final_ln_b", 1, VOCOS_DIM),
              (f"{pfx}.proj_b", 1, HIDDEN)]
    e += [("vq.in_w", HIDDEN, CODEBOOK_DIM),
          ("vq.in_b", 1, CODEBOOK_DIM),
          ("vq.codebook", CODEBOOK_SIZE, CODEBOOK_DIM),
          ("vq.out_w", CODEBOOK_DIM, HIDDEN),
          ("vq.out_b", 1, HIDDEN),
          ("out_b", 1, OUT_DIM)]
    return e


def _layout(entries):
    layout, off = {}, 0
    for name, rows, cols in entries:
        layout[name] = (off, rows, cols)
        off += rows
    return layout, ((off + 7) // 8) * 8      # pad total rows to sublane tile


MAT_LAYOUT, MAT_ROWS = _layout(_mat_entries())
VEC_LAYOUT, VEC_ROWS = _layout(_vec_entries())


# --------------------------------- the kernel --------------------------------
def coco_kernel(x_ref, mat_ref, vec_ref, out_ref, pad_ref):
    # --- slab accessors (static row offsets -> zero-cost slicing) -----------
    def mat(name, full_width=False):
        off, r, c = MAT_LAYOUT[name]
        return mat_ref[off:off + r, :] if full_width else mat_ref[off:off + r, :c]

    def vec(name, full_width=False):
        off, r, c = VEC_LAYOUT[name]
        return vec_ref[off:off + r, :] if full_width else vec_ref[off:off + r, :c]

    # Zero the halo scratch once; only rows [PAD0, PAD0+MTOT) are rewritten by
    # the convolutions, so the +-3 halo rows stay zero for the whole forward.
    pad_ref[...] = jnp.zeros_like(pad_ref)

    # Per-row tap-validity masks shared by every k=7 convolution.  Both batches
    # are processed stacked on the sublane axis; a tap k (offset d = k-3) is
    # valid for row r iff 0 <= (r mod T) + d < T, which also blocks any
    # cross-batch leakage of the shifted reads below.
    row = jax.lax.broadcasted_iota(jnp.int32, (MTOT, 1), 0)
    t_in = row & (T - 1)
    masks = [((t_in + (k - 3)) >= 0) & ((t_in + (k - 3)) < T) for k in range(7)]

    # --- fused ops ------------------------------------------------------------
    def layernorm(x, g, b):
        inv_n = 1.0 / x.shape[-1]
        mean = jnp.sum(x, axis=-1, keepdims=True) * inv_n
        ex2 = jnp.sum(x * x, axis=-1, keepdims=True) * inv_n
        var = jnp.maximum(ex2 - mean * mean, 0.0)
        return (x - mean) * jax.lax.rsqrt(var + LN_EPS) * g + b

    def gelu(x):  # exact (erf) GELU, matching torch.nn.GELU() default
        return 0.5 * x * (1.0 + jax.lax.erf(x * 0.7071067811865476))

    def linear(x, w_name, b_name, full_width=False):
        y = jnp.dot(x.astype(jnp.bfloat16), mat(w_name, full_width),
                    preferred_element_type=jnp.float32)
        return y + vec(b_name, full_width)

    def conv7_dense(x, w_name, b_name):
        """Conv1d(k=7, pad=3) over time as 7 tap matmuls on the MXU (bf16)."""
        pad_ref[PAD0:PAD0 + MTOT, :] = x              # one store for BOTH batches
        xp = pad_ref[...].astype(jnp.bfloat16)        # [PAD_ROWS, Cin]
        off, _, cout = MAT_LAYOUT[w_name]
        acc = None
        for k in range(7):
            tap = jnp.where(masks[k], xp[PAD0 - 3 + k:PAD0 - 3 + k + MTOT, :], 0.0)
            wk = mat_ref[off + k * HIDDEN:off + (k + 1) * HIDDEN, :cout]
            d = jnp.dot(tap, wk, preferred_element_type=jnp.float32)
            acc = d if acc is None else acc + d
        return acc + vec(b_name)

    def conv7_depthwise(x, blk):
        """Depthwise Conv1d(k=7, pad=3, groups=C) on the VPU (f32)."""
        pad_ref[PAD0:PAD0 + MTOT, :] = x
        xp = pad_ref[...]
        dw = vec(f"{blk}.dw_w")                       # [7, C]
        acc = None
        for k in range(7):
            tap = jnp.where(masks[k], xp[PAD0 - 3 + k:PAD0 - 3 + k + MTOT, :], 0.0)
            term = tap * dw[k:k + 1, :]
            acc = term if acc is None else acc + term
        return acc + vec(f"{blk}.dw_b")

    def backbone(x, pfx):
        """VocosBackbone + the Sequential's trailing Linear(vocos_dim, hidden)."""
        y = conv7_dense(x, f"{pfx}.embed_w", f"{pfx}.embed_b")
        y = layernorm(y, vec(f"{pfx}.norm_g"), vec(f"{pfx}.norm_b"))
        for l in range(VOCOS_LAYERS):
            blk = f"{pfx}.cnx{l}"
            res = y
            h = conv7_depthwise(y, blk)
            h = layernorm(h, vec(f"{blk}.ln_g"), vec(f"{blk}.ln_b"))
            h = linear(h, f"{blk}.w1", f"{blk}.b1")
            h = gelu(h)
            h = linear(h, f"{blk}.w2", f"{blk}.b2")
            y = res + h * vec(f"{blk}.gamma")
        y = layernorm(y, vec(f"{pfx}.final_ln_g"), vec(f"{pfx}.final_ln_b"))
        return linear(y, f"{pfx}.proj_w", f"{pfx}.proj_b")

    def fvq(z):
        """ResidualVQ with one FactorizedVectorQuantize (use_l2_normlize=True).
        Kept in f32 so the nearest-codeword argmax is exact."""
        ze = (jnp.dot(z, vec("vq.in_w"), preferred_element_type=jnp.float32)
              + vec("vq.in_b"))                                      # [M, D]
        cb = vec("vq.codebook")                                      # [K, D]
        ze_n = ze * jax.lax.rsqrt(
            jnp.maximum(jnp.sum(ze * ze, -1, keepdims=True), 1e-24))
        cb_n = cb * jax.lax.rsqrt(
            jnp.maximum(jnp.sum(cb * cb, -1, keepdims=True), 1e-24))
        # unit vectors: argmin ||ze_n - cb_n||^2  ==  argmax (ze_n . cb_n)
        sim = jnp.dot(ze_n, cb_n.T, preferred_element_type=jnp.float32)  # [M,K]
        smax = jnp.max(sim, axis=-1, keepdims=True)
        lane = jax.lax.broadcasted_iota(jnp.int32, sim.shape, 1)
        idx = jnp.min(jnp.where(sim >= smax, lane, CODEBOOK_SIZE),
                      axis=-1, keepdims=True)                        # [M,1] i32
        onehot = (lane == idx).astype(jnp.float32)
        # dequantize with the UN-normalized codebook (DAC-style FVQ)
        # TODO(synk): replace with a gather at production codebook sizes.
        zq = jnp.dot(onehot, cb, preferred_element_type=jnp.float32)  # [M, D]
        diff = ze - zq
        sq = jnp.sum(jnp.sum(diff * diff, axis=-1, keepdims=True),
                     axis=0, keepdims=True)                          # [1, 1]
        # TODO(synk): commit/codebook MSE uses un-normalized ze & codeword;
        # verify against the reference FVQ's use_l2_normlize loss convention.
        q = (jnp.dot(zq, vec("vq.out_w"), preferred_element_type=jnp.float32)
             + vec("vq.out_b"))                                      # [M, H]
        return q, idx, sq

    # --------------------------- forward pass -------------------------------
    # fused whisper|chroma input projection (one bf16 matmul)
    x = linear(x_ref[...], "in_proj", "in_b")                        # [M, H]

    z = backbone(x, "enc")                                           # [M, H]
    q, idx, sq = fvq(z)
    # (all_codebook_losses + all_commit_losses).mean() for N=1 quantizer
    loss = sq * ((COMMITMENT + CODEBOOK_LOSS_WEIGHT) /
                 float(MTOT * CODEBOOK_DIM))                         # [1, 1]
    xr = backbone(q, "dec")                                          # [M, H]

    # fused [whisper|chroma] output head, padded to 128 lanes (cols >= OUT_DIM
    # are exact zeros); pack the VQ index and the loss into those padding
    # columns so the kernel does ONE lane-dense, unmasked output store.
    head = linear(xr, "out_w", "out_b", full_width=True)             # [M, 128]
    col = jax.lax.broadcasted_iota(jnp.int32, (MTOT, OUT_PAD), 1)
    packed = head + jnp.where(col == IDX_COL, idx.astype(jnp.float32), 0.0)
    packed = packed + jnp.where(col == LOSS_COL, loss, 0.0)
    out_ref[...] = packed


# ------------------------------ full forward --------------------------------
@jax.jit
def coco_forward(mat_slab, vec_slab, whisper_feats, chromagram_feats):
    b_, t_, _ = whisper_feats.shape
    m = b_ * t_
    # fuse the two input projections into one matmul: concat features once here
    xcat = jnp.concatenate(
        [whisper_feats.reshape(m, WHISPER_DIM),
         chromagram_feats.reshape(m, CHROMA_DIM)], axis=-1).astype(jnp.bfloat16)

    out = pl.pallas_call(
        coco_kernel,
        out_shape=jax.ShapeDtypeStruct((m, OUT_PAD), jnp.float32),
        scratch_shapes=[pltpu.VMEM((PAD_ROWS, VOCOS_DIM), jnp.float32)],
        compiler_params=pltpu.CompilerParams(
            vmem_limit_bytes=32 * 1024 * 1024),
    )(xcat, mat_slab, vec_slab)

    whisper_rec = out[:, :WHISPER_DIM].reshape(b_, t_, WHISPER_DIM)
    chroma_rec = out[:, WHISPER_DIM:OUT_DIM].reshape(b_, t_, CHROMA_DIM)
    all_indices = out[:, IDX_COL].astype(jnp.int32).reshape(1, b_, t_)
    codebook_loss = out[0, LOSS_COL]
    return whisper_rec, chroma_rec, codebook_loss, all_indices


# ------------------------------ parameter init -------------------------------
def init_params(key):
    keys = iter(jax.random.split(key, 64))

    def tn(shape, std=0.02):
        # trunc_normal_(std=0.02) truncation is negligible -> plain normal
        return std * jax.random.normal(next(keys), shape, jnp.float32)

    p = {}
    # fused [whisper_input_layer ; chromagram_input_layer]
    p["in_proj"] = tn((IN_DIM, HIDDEN))
    p["in_b"] = jnp.zeros((1, HIDDEN))
    for pfx in ("enc", "dec"):
        p[f"{pfx}.embed_w"] = tn((7 * HIDDEN, VOCOS_DIM))   # tap-major stacked
        p[f"{pfx}.embed_b"] = jnp.zeros((1, VOCOS_DIM))
        p[f"{pfx}.norm_g"] = jnp.ones((1, VOCOS_DIM))
        p[f"{pfx}.norm_b"] = jnp.zeros((1, VOCOS_DIM))
        for l in range(VOCOS_LAYERS):
            p[f"{pfx}.cnx{l}.dw_w"] = tn((7, VOCOS_DIM))
            p[f"{pfx}.cnx{l}.dw_b"] = jnp.zeros((1, VOCOS_DIM))
            p[f"{pfx}.cnx{l}.ln_g"] = jnp.ones((1, VOCOS_DIM))
            p[f"{pfx}.cnx{l}.ln_b"] = jnp.zeros((1, VOCOS_DIM))
            p[f"{pfx}.cnx{l}.w1"] = tn((VOCOS_DIM, VOCOS_INTER))
            p[f"{pfx}.cnx{l}.b1"] = jnp.zeros((1, VOCOS_INTER))
            p[f"{pfx}.cnx{l}.w2"] = tn((VOCOS_INTER, VOCOS_DIM))
            p[f"{pfx}.cnx{l}.b2"] = jnp.zeros((1, VOCOS_DIM))
            p[f"{pfx}.cnx{l}.gamma"] = jnp.full(
                (1, VOCOS_DIM), 1.0 / VOCOS_LAYERS, jnp.float32)  # layer scale
        p[f"{pfx}.final_ln_g"] = jnp.ones((1, VOCOS_DIM))
        p[f"{pfx}.final_ln_b"] = jnp.zeros((1, VOCOS_DIM))
        p[f"{pfx}.proj_w"] = tn((VOCOS_DIM, HIDDEN))
        p[f"{pfx}.proj_b"] = jnp.zeros((1, HIDDEN))
    p["vq.in_w"] = tn((HIDDEN, CODEBOOK_DIM))
    p["vq.in_b"] = jnp.zeros((1, CODEBOOK_DIM))
    p["vq.codebook"] = jax.random.normal(
        next(keys), (CODEBOOK_SIZE, CODEBOOK_DIM), jnp.float32)   # nn.Embedding
    p["vq.out_w"] = tn((CODEBOOK_DIM, HIDDEN))
    p["vq.out_b"] = jnp.zeros((1, HIDDEN))
    # fused [whisper_output_layer | chromagram_output_layer]
    p["out_w"] = tn((HIDDEN, OUT_DIM))
    p["out_b"] = jnp.zeros((1, OUT_DIM))
    return p


def pack_params(p):
    """Consolidate all parameters into 2 slabs (one bf16 for MXU operands,
    one f32 for vectors / FVQ tables) -> 3 prologue DMAs total."""
    mat = jnp.zeros((MAT_ROWS, SLAB_W), jnp.float32)
    for name, (off, r, c) in MAT_LAYOUT.items():
        mat = mat.at[off:off + r, :c].set(p[name])
    vec = jnp.zeros((VEC_ROWS, SLAB_W), jnp.float32)
    for name, (off, r, c) in VEC_LAYOUT.items():
        vec = vec.at[off:off + r, :c].set(p[name])
    return mat.astype(jnp.bfloat16), vec


# ---------------------------------- main -------------------------------------
if __name__ == "__main__":
    key = jax.random.PRNGKey(0)
    kp, kw, kc = jax.random.split(key, 3)
    mat_slab, vec_slab = pack_params(init_params(kp))

    whisper_feats = jax.random.normal(kw, (B, T, WHISPER_DIM), jnp.float32)
    chromagram_feats = jax.random.normal(kc, (B, T, CHROMA_DIM), jnp.float32)

    whisper_rec, chroma_rec, codebook_loss, all_indices = coco_forward(
        mat_slab, vec_slab, whisper_feats, chromagram_feats)
    jax.block_until_ready((whisper_rec, chroma_rec, codebook_loss, all_indices))

    assert whisper_rec.shape == (B, T, WHISPER_DIM)
    assert chroma_rec.shape == (B, T, CHROMA_DIM)
    assert codebook_loss.shape == ()
    assert all_indices.shape == (NUM_QUANTIZERS, B, T)
    assert all_indices.dtype == jnp.int32
    assert bool(jnp.all(jnp.isfinite(whisper_rec)))
    assert bool(jnp.all(jnp.isfinite(chroma_rec)))
    assert bool(jnp.isfinite(codebook_loss))
    assert bool(jnp.all((all_indices >= 0) & (all_indices < CODEBOOK_SIZE)))
    print("KERNEL_OK")
</pallas_src>

<mosaic_0001>
module attributes {stable_mosaic.version = 11 : i64} {
  func.func @coco_kernel(%arg0: memref<32x56xbf16, #tpu.memory_space<vmem>>, %arg1: memref<984x128xbf16, #tpu.memory_space<vmem>>, %arg2: memref<176x128xf32, #tpu.memory_space<vmem>>, %arg3: memref<32x128xf32, #tpu.memory_space<vmem>>, %arg4: memref<48x32xf32, #tpu.memory_space<vmem>>) attributes {dimension_semantics = [], scalar_prefetch = 0 : i64, scratch_operands = 1 : i64, tpu.core_type = #tpu.core_type<tc>} {
    %cst = arith.constant 0.000000e+00 : f32
    %0 = vector.broadcast %cst : f32 to vector<48x32xf32>
    %c0 = arith.constant 0 : index
    %c0_0 = arith.constant 0 : index
    %1 = vector.load %arg4[%c0, %c0_0] : memref<48x32xf32, #tpu.memory_space<vmem>>, vector<48x32xf32>
    tpu.vector_store %arg4[%c0, %c0_0], %0 {strides = array<i32>} : memref<48x32xf32, #tpu.memory_space<vmem>>, vector<48x32xf32>,
    %2 = tpu.iota {dimensions = array<i32: 0>} : vector<32x1xi32>
    %c15_i32 = arith.constant 15 : i32
    %3 = vector.broadcast %c15_i32 : i32 to vector<32x1xi32>
    %4 = arith.andi %2, %3 : vector<32x1xi32>
    %c-3_i32 = arith.constant -3 : i32
    %5 = vector.broadcast %c-3_i32 : i32 to vector<32x1xi32>
    %6 = arith.addi %4, %5 : vector<32x1xi32>
    %c0_i32 = arith.constant 0 : i32
    %7 = vector.broadcast %c0_i32 : i32 to vector<32x1xi32>
    %8 = arith.cmpi sge, %6, %7 : vector<32x1xi32>
    %c-3_i32_1 = arith.constant -3 : i32
    %9 = vector.broadcast %c-3_i32_1 : i32 to vector<32x1xi32>
    %10 = arith.addi %4, %9 : vector<32x1xi32>
    %c16_i32 = arith.constant 16 : i32
    %11 = vector.broadcast %c16_i32 : i32 to vector<32x1xi32>
    %12 = arith.cmpi slt, %10, %11 : vector<32x1xi32>
    %13 = arith.andi %8, %12 : vector<32x1xi1>
    %c-2_i32 = arith.constant -2 : i32
    %14 = vector.broadcast %c-2_i32 : i32 to vector<32x1xi32>
    %15 = arith.addi %4, %14 : vector<32x1xi32>
    %c0_i32_2 = arith.constant 0 : i32
    %16 = vector.broadcast %c0_i32_2 : i32 to vector<32x1xi32>
    %17 = arith.cmpi sge, %15, %16 : vector<32x1xi32>
    %c-2_i32_3 = arith.constant -2 : i32
    %18 = vector.broadcast %c-2_i32_3 : i32 to vector<32x1xi32>
    %19 = arith.addi %4, %18 : vector<32x1xi32>
    %c16_i32_4 = arith.constant 16 : i32
    %20 = vector.broadcast %c16_i32_4 : i32 to vector<32x1xi32>
    %21 = arith.cmpi slt, %19, %20 : vector<32x1xi32>
    %22 = arith.andi %17, %21 : vector<32x1xi1>
    %c-1_i32 = arith.constant -1 : i32
    %23 = vector.broadcast %c-1_i32 : i32 to vector<32x1xi32>
    %24 = arith.addi %4, %23 : vector<32x1xi32>
    %c0_i32_5 = arith.constant 0 : i32
    %25 = vector.broadcast %c0_i32_5 : i32 to vector<32x1xi32>
    %26 = arith.cmpi sge, %24, %25 : vector<32x1xi32>
    %c-1_i32_6 = arith.constant -1 : i32
    %27 = vector.broadcast %c-1_i32_6 : i32 to vector<32x1xi32>
    %28 = arith.addi %4, %27 : vector<32x1xi32>
    %c16_i32_7 = arith.constant 16 : i32
    %29 = vector.broadcast %c16_i32_7 : i32 to vector<32x1xi32>
    %30 = arith.cmpi slt, %28, %29 : vector<32x1xi32>
    %31 = arith.andi %26, %30 : vector<32x1xi1>
    %c0_i32_8 = arith.constant 0 : i32
    %32 = vector.broadcast %c0_i32_8 : i32 to vector<32x1xi32>
    %33 = arith.addi %4, %32 : vector<32x1xi32>
    %c0_i32_9 = arith.constant 0 : i32
    %34 = vector.broadcast %c0_i32_9 : i32 to vector<32x1xi32>
    %35 = arith.cmpi sge, %33, %34 : vector<32x1xi32>
    %c0_i32_10 = arith.constant 0 : i32
    %36 = vector.broadcast %c0_i32_10 : i32 to vector<32x1xi32>
    %37 = arith.addi %4, %36 : vector<32x1xi32>
    %c16_i32_11 = arith.constant 16 : i32
    %38 = vector.broadcast %c16_i32_11 : i32 to vector<32x1xi32>
    %39 = arith.cmpi slt, %37, %38 : vector<32x1xi32>
    %40 = arith.andi %35, %39 : vector<32x1xi1>
    %c1_i32 = arith.constant 1 : i32
    %41 = vector.broadcast %c1_i32 : i32 to vector<32x1xi32>
    %42 = arith.addi %4, %41 : vector<32x1xi32>
    %c0_i32_12 = arith.constant 0 : i32
    %43 = vector.broadcast %c0_i32_12 : i32 to vector<32x1xi32>
    %44 = arith.cmpi sge, %42, %43 : vector<32x1xi32>
    %c1_i32_13 = arith.constant 1 : i32
    %45 = vector.broadcast %c1_i32_13 : i32 to vector<32x1xi32>
    %46 = arith.addi %4, %45 : vector<32x1xi32>
    %c16_i32_14 = arith.constant 16 : i32
    %47 = vector.broadcast %c16_i32_14 : i32 to vector<32x1xi32>
    %48 = arith.cmpi slt, %46, %47 : vector<32x1xi32>
    %49 = arith.andi %44, %48 : vector<32x1xi1>
    %c2_i32 = arith.constant 2 : i32
    %50 = vector.broadcast %c2_i32 : i32 to vector<32x1xi32>
    %51 = arith.addi %4, %50 : vector<32x1xi32>
    %c0_i32_15 = arith.constant 0 : i32
    %52 = vector.broadcast %c0_i32_15 : i32 to vector<32x1xi32>
    %53 = arith.cmpi sge, %51, %52 : vector<32x1xi32>
    %c2_i32_16 = arith.constant 2 : i32
    %54 = vector.broadcast %c2_i32_16 : i32 to vector<32x1xi32>
    %55 = arith.addi %4, %54 : vector<32x1xi32>
    %c16_i32_17 = arith.constant 16 : i32
    %56 = vector.broadcast %c16_i32_17 : i32 to vector<32x1xi32>
    %57 = arith.cmpi slt, %55, %56 : vector<32x1xi32>
    %58 = arith.andi %53, %57 : vector<32x1xi1>
    %c3_i32 = arith.constant 3 : i32
    %59 = vector.broadcast %c3_i32 : i32 to vector<32x1xi32>
    %60 = arith.addi %4, %59 : vector<32x1xi32>
    %c0_i32_18 = arith.constant 0 : i32
    %61 = vector.broadcast %c0_i32_18 : i32 to vector<32x1xi32>
    %62 = arith.cmpi sge, %60, %61 : vector<32x1xi32>
    %c3_i32_19 = arith.constant 3 : i32
    %63 = vector.broadcast %c3_i32_19 : i32 to vector<32x1xi32>
    %64 = arith.addi %4, %63 : vector<32x1xi32>
    %c16_i32_20 = arith.constant 16 : i32
    %65 = vector.broadcast %c16_i32_20 : i32 to vector<32x1xi32>
    %66 = arith.cmpi slt, %64, %65 : vector<32x1xi32>
    %67 = arith.andi %62, %66 : vector<32x1xi1>
    %c0_21 = arith.constant 0 : index
    %c0_22 = arith.constant 0 : index
    %68 = vector.load %arg0[%c0_21, %c0_22] : memref<32x56xbf16, #tpu.memory_space<vmem>>, vector<32x56xbf16>
    %c0_23 = arith.constant 0 : index
    %c0_24 = arith.constant 0 : index
    %69 = vector.load %arg1[%c0_23, %c0_24] : memref<984x128xbf16, #tpu.memory_space<vmem>>, vector<56x32xbf16>
    %cst_25 = arith.constant dense<0.000000e+00> : vector<32x32xf32>
    %70 = tpu.matmul %68, %69, %cst_25 {dimension_numbers = #tpu.dot_dimension_numbers<[1], [0], [0], [1], [0, 0, 1, 1], [], []>} : vector<32x56xbf16>, vector<56x32xbf16>, vector<32x32xf32> -> vector<32x32xf32>
    %c0_26 = arith.constant 0 : index
    %c0_27 = arith.constant 0 : index
    %71 = vector.load %arg2[%c0_26, %c0_27] : memref<176x128xf32, #tpu.memory_space<vmem>>, vector<1x32xf32>
    %72 = vector.broadcast %71 : vector<1x32xf32> to vector<32x32xf32>
    %73 = arith.addf %70, %72 : vector<32x32xf32>
    %c8 = arith.constant 8 : index
    %c0_28 = arith.constant 0 : index
    %74 = vector.load %arg4[%c8, %c0_28] : memref<48x32xf32, #tpu.memory_space<vmem>>, vector<32x32xf32>
    tpu.vector_store %arg4[%c8, %c0_28], %73 {strides = array<i32>} : memref<48x32xf32, #tpu.memory_space<vmem>>, vector<32x32xf32>,
    %c0_29 = arith.constant 0 : index
    %c0_30 = arith.constant 0 : index
    %75 = vector.load %arg4[%c0_29, %c0_30] : memref<48x32xf32, #tpu.memory_space<vmem>>, vector<48x32xf32>
    %76 = arith.truncf %75 : vector<48x32xf32> to vector<48x32xbf16>
    %77 = vector.extract_strided_slice %76 {offsets = [5, 0], sizes = [32, 32], strides = [1, 1]} : vector<48x32xbf16> to vector<32x32xbf16>
    %cst_31 = arith.constant 0.000000e+00 : f32
    %78 = arith.truncf %cst_31 : f32 to bf16
    %79 = vector.shape_cast %13 : vector<32x1xi1> to vector<32x1xi1>
    %80 = vector.broadcast %79 : vector<32x1xi1> to vector<32x32xi1>
    %81 = vector.broadcast %78 : bf16 to vector<32x32xbf16>
    %82 = arith.select %80, %77, %81 : vector<32x32xi1>, vector<32x32xbf16>
    %c56 = arith.constant 56 : index
    %c0_32 = arith.constant 0 : index
    %83 = vector.load %arg1[%c56, %c0_32] : memref<984x128xbf16, #tpu.memory_space<vmem>>, vector<32x32xbf16>
    %cst_33 = arith.constant dense<0.000000e+00> : vector<32x32xf32>
    %84 = tpu.matmul %82, %83, %cst_33 {dimension_numbers = #tpu.dot_dimension_numbers<[1], [0], [0], [1], [0, 0, 1, 1], [], []>} : vector<32x32xbf16>, vector<32x32xbf16>, vector<32x32xf32> -> vector<32x32xf32>
    %85 = vector.extract_strided_slice %76 {offsets = [6, 0], sizes = [32, 32], strides = [1, 1]} : vector<48x32xbf16> to vector<32x32xbf16>
    %cst_34 = arith.constant 0.000000e+00 : f32
    %86 = arith.truncf %cst_34 : f32 to bf16
    %87 = vector.shape_cast %22 : vector<32x1xi1> to vector<32x1xi1>
    %88 = vector.broadcast %87 : vector<32x1xi1> to vector<32x32xi1>
    %89 = vector.broadcast %86 : bf16 to vector<32x32xbf16>
    %90 = arith.select %88, %85, %89 : vector<32x32xi1>, vector<32x32xbf16>
    %c88 = arith.constant 88 : index
    %c0_35 = arith.constant 0 : index
    %91 = vector.load %arg1[%c88, %c0_35] : memref<984x128xbf16, #tpu.memory_space<vmem>>, vector<32x32xbf16>
    %cst_36 = arith.constant dense<0.000000e+00> : vector<32x32xf32>
    %92 = tpu.matmul %90, %91, %cst_36 {dimension_numbers = #tpu.dot_dimension_numbers<[1], [0], [0], [1], [0, 0, 1, 1], [], []>} : vector<32x32xbf16>, vector<32x32xbf16>, vector<32x32xf32> -> vector<32x32xf32>
    %93 = arith.addf %84, %92 : vector<32x32xf32>
    %94 = vector.extract_strided_slice %76 {offsets = [7, 0], sizes = [32, 32], strides = [1, 1]} : vector<48x32xbf16> to vector<32x32xbf16>
    %cst_37 = arith.constant 0.000000e+00 : f32
    %95 = arith.truncf %cst_37 : f32 to bf16
    %96 = vector.shape_cast %31 : vector<32x1xi1> to vector<32x1xi1>
    %97 = vector.broadcast %96 : vector<32x1xi1> to vector<32x32xi1>
    %98 = vector.broadcast %95 : bf16 to vector<32x32xbf16>
    %99 = arith.select %97, %94, %98 : vector<32x32xi1>, vector<32x32xbf16>
    %c120 = arith.constant 120 : index
    %c0_38 = arith.constant 0 : index
    %100 = vector.load %arg1[%c120, %c0_38] : memref<984x128xbf16, #tpu.memory_space<vmem>>, vector<32x32xbf16>
    %cst_39 = arith.constant dense<0.000000e+00> : vector<32x32xf32>
    %101 = tpu.matmul %99, %100, %cst_39 {dimension_numbers = #tpu.dot_dimension_numbers<[1], [0], [0], [1], [0, 0, 1, 1], [], []>} : vector<32x32xbf16>, vector<32x32xbf16>, vector<32x32xf32> -> vector<32x32xf32>
    %102 = arith.addf %93, %101 : vector<32x32xf32>
    %103 = vector.extract_strided_slice %76 {offsets = [8, 0], sizes = [32, 32], strides = [1, 1]} : vector<48x32xbf16> to vector<32x32xbf16>
    %cst_40 = arith.constant 0.000000e+00 : f32
    %104 = arith.truncf %cst_40 : f32 to bf16
    %105 = vector.shape_cast %40 : vector<32x1xi1> to vector<32x1xi1>
    %106 = vector.broadcast %105 : vector<32x1xi1> to vector<32x32xi1>
    %107 = vector.broadcast %104 : bf16 to vector<32x32xbf16>
    %108 = arith.select %106, %103, %107 : vector<32x32xi1>, vector<32x32xbf16>
    %c152 = arith.constant 152 : index
    %c0_41 = arith.constant 0 : index
    %109 = vector.load %arg1[%c152, %c0_41] : memref<984x128xbf16, #tpu.memory_space<vmem>>, vector<32x32xbf16>
    %cst_42 = arith.constant dense<0.000000e+00> : vector<32x32xf32>
    %110 = tpu.matmul %108, %109, %cst_42 {dimension_numbers = #tpu.dot_dimension_numbers<[1], [0], [0], [1], [0, 0, 1, 1], [], []>} : vector<32x32xbf16>, vector<32x32xbf16>, vector<32x32xf32> -> vector<32x32xf32>
    %111 = arith.addf %102, %110 : vector<32x32xf32>
    %112 = vector.extract_strided_slice %76 {offsets = [9, 0], sizes = [32, 32], strides = [1, 1]} : vector<48x32xbf16> to vector<32x32xbf16>
    %cst_43 = arith.constant 0.000000e+00 : f32
    %113 = arith.truncf %cst_43 : f32 to bf16
    %114 = vector.shape_cast %49 : vector<32x1xi1> to vector<32x1xi1>
    %115 = vector.broadcast %114 : vector<32x1xi1> to vector<32x32xi1>
    %116 = vector.broadcast %113 : bf16 to vector<32x32xbf16>
    %117 = arith.select %115, %112, %116 : vector<32x32xi1>, vector<32x32xbf16>
    %c184 = arith.constant 184 : index
    %c0_44 = arith.constant 0 : index
    %118 = vector.load %arg1[%c184, %c0_44] : memref<984x128xbf16, #tpu.memory_space<vmem>>, vector<32x32xbf16>
    %cst_45 = arith.constant dense<0.000000e+00> : vector<32x32xf32>
    %119 = tpu.matmul %117, %118, %cst_45 {dimension_numbers = #tpu.dot_dimension_numbers<[1], [0], [0], [1], [0, 0, 1, 1], [], []>} : vector<32x32xbf16>, vector<32x32xbf16>, vector<32x32xf32> -> vector<32x32xf32>
    %120 = arith.addf %111, %119 : vector<32x32xf32>
    %121 = vector.extract_strided_slice %76 {offsets = [10, 0], sizes = [32, 32], strides = [1, 1]} : vector<48x32xbf16> to vector<32x32xbf16>
    %cst_46 = arith.constant 0.000000e+00 : f32
    %122 = arith.truncf %cst_46 : f32 to bf16
    %123 = vector.shape_cast %58 : vector<32x1xi1> to vector<32x1xi1>
    %124 = vector.broadcast %123 : vector<32x1xi1> to vector<32x32xi1>
    %125 = vector.broadcast %122 : bf16 to vector<32x32xbf16>
    %126 = arith.select %124, %121, %125 : vector<32x32xi1>, vector<32x32xbf16>
    %c216 = arith.constant 216 : index
    %c0_47 = arith.constant 0 : index
    %127 = vector.load %arg1[%c216, %c0_47] : memref<984x128xbf16, #tpu.memory_space<vmem>>, vector<32x32xbf16>
    %cst_48 = arith.constant dense<0.000000e+00> : vector<32x32xf32>
    %128 = tpu.matmul %126, %127, %cst_48 {dimension_numbers = #tpu.dot_dimension_numbers<[1], [0], [0], [1], [0, 0, 1, 1], [], []>} : vector<32x32xbf16>, vector<32x32xbf16>, vector<32x32xf32> -> vector<32x32xf32>
    %129 = arith.addf %120, %128 : vector<32x32xf32>
    %130 = vector.extract_strided_slice %76 {offsets = [11, 0], sizes = [32, 32], strides = [1, 1]} : vector<48x32xbf16> to vector<32x32xbf16>
    %cst_49 = arith.constant 0.000000e+00 : f32
    %131 = arith.truncf %cst_49 : f32 to bf16
    %132 = vector.shape_cast %67 : vector<32x1xi1> to vector<32x1xi1>
    %133 = vector.broadcast %132 : vector<32x1xi1> to vector<32x32xi1>
    %134 = vector.broadcast %131 : bf16 to vector<32x32xbf16>
    %135 = arith.select %133, %130, %134 : vector<32x32xi1>, vector<32x32xbf16>
    %c248 = arith.constant 248 : index
    %c0_50 = arith.constant 0 : index
    %136 = vector.load %arg1[%c248, %c0_50] : memref<984x128xbf16, #tpu.memory_space<vmem>>, vector<32x32xbf16>
    %cst_51 = arith.constant dense<0.000000e+00> : vector<32x32xf32>
    %137 = tpu.matmul %135, %136, %cst_51 {dimension_numbers = #tpu.dot_dimension_numbers<[1], [0], [0], [1], [0, 0, 1, 1], [], []>} : vector<32x32xbf16>, vector<32x32xbf16>, vector<32x32xf32> -> vector<32x32xf32>
    %138 = arith.addf %129, %137 : vector<32x32xf32>
    %c1 = arith.constant 1 : index
    %c0_52 = arith.constant 0 : index
    %139 = vector.load %arg2[%c1, %c0_52] : memref<176x128xf32, #tpu.memory_space<vmem>>, vector<1x32xf32>
    %140 = vector.broadcast %139 : vector<1x32xf32> to vector<32x32xf32>
    %141 = arith.addf %138, %140 : vector<32x32xf32>
    %c2 = arith.constant 2 : index
    %c0_53 = arith.constant 0 : index
    %142 = vector.load %arg2[%c2, %c0_53] : memref<176x128xf32, #tpu.memory_space<vmem>>, vector<1x32xf32>
    %c3 = arith.constant 3 : index
    %c0_54 = arith.constant 0 : index
    %143 = vector.load %arg2[%c3, %c0_54] : memref<176x128xf32, #tpu.memory_space<vmem>>, vector<1x32xf32>
    %cst_55 = arith.constant dense<0.000000e+00> : vector<32xf32>
    %144 = vector.multi_reduction <add>, %141, %cst_55 [1] : vector<32x32xf32> to vector<32xf32>
    %145 = vector.shape_cast %144 : vector<32xf32> to vector<32x1xf32>
    %cst_56 = arith.constant 3.125000e-02 : f32
    %146 = vector.broadcast %cst_56 : f32 to vector<32x1xf32>
    %147 = arith.mulf %145, %146 : vector<32x1xf32>
    %148 = arith.mulf %141, %141 : vector<32x32xf32>
    %cst_57 = arith.constant dense<0.000000e+00> : vector<32xf32>
    %149 = vector.multi_reduction <add>, %148, %cst_57 [1] : vector<32x32xf32> to vector<32xf32>
    %150 = vector.shape_cast %149 : vector<32xf32> to vector<32x1xf32>
    %cst_58 = arith.constant 3.125000e-02 : f32
    %151 = vector.broadcast %cst_58 : f32 to vector<32x1xf32>
    %152 = arith.mulf %150, %151 : vector<32x1xf32>
    %153 = arith.mulf %147, %147 : vector<32x1xf32>
    %154 = arith.subf %152, %153 : vector<32x1xf32>
    %cst_59 = arith.constant 0.000000e+00 : f32
    %155 = vector.broadcast %cst_59 : f32 to vector<32x1xf32>
    %156 = arith.maximumf %154, %155 : vector<32x1xf32>
    %157 = vector.broadcast %147 : vector<32x1xf32> to vector<32x32xf32>
    %158 = arith.subf %141, %157 : vector<32x32xf32>
    %cst_60 = arith.constant 9.99999997E-7 : f32
    %159 = vector.broadcast %cst_60 : f32 to vector<32x1xf32>
    %160 = arith.addf %156, %159 : vector<32x1xf32>
    %161 = math.rsqrt %160 : vector<32x1xf32>
    %162 = vector.broadcast %161 : vector<32x1xf32> to vector<32x32xf32>
    %163 = arith.mulf %158, %162 : vector<32x32xf32>
    %164 = vector.broadcast %142 : vector<1x32xf32> to vector<32x32xf32>
    %165 = arith.mulf %163, %164 : vector<32x32xf32>
    %166 = vector.broadcast %143 : vector<1x32xf32> to vector<32x32xf32>
    %167 = arith.addf %165, %166 : vector<32x32xf32>
    %c8_61 = arith.constant 8 : index
    %c0_62 = arith.constant 0 : index
    %168 = vector.load %arg4[%c8_61, %c0_62] : memref<48x32xf32, #tpu.memory_space<vmem>>, vector<32x32xf32>
    tpu.vector_store %arg4[%c8_61, %c0_62], %167 {strides = array<i32>} : memref<48x32xf32, #tpu.memory_space<vmem>>, vector<32x32xf32>,
    %c0_63 = arith.constant 0 : index
    %c0_64 = arith.constant 0 : index
    %169 = vector.load %arg4[%c0_63, %c0_64] : memref<48x32xf32, #tpu.memory_space<vmem>>, vector<48x32xf32>
    %c4 = arith.constant 4 : index
    %c0_65 = arith.constant 0 : index
    %170 = vector.load %arg2[%c4, %c0_65] : memref<176x128xf32, #tpu.memory_space<vmem>>, vector<7x32xf32>
    %171 = vector.extract_strided_slice %169 {offsets = [5, 0], sizes = [32, 32], strides = [1, 1]} : vector<48x32xf32> to vector<32x32xf32>
    %cst_66 = arith.constant 0.000000e+00 : f32
    %172 = vector.shape_cast %13 : vector<32x1xi1> to vector<32x1xi1>
    %173 = vector.broadcast %172 : vector<32x1xi1> to vector<32x32xi1>
    %174 = vector.broadcast %cst_66 : f32 to vector<32x32xf32>
    %175 = arith.select %173, %171, %174 : vector<32x32xi1>, vector<32x32xf32>
    %176 = vector.extract_strided_slice %170 {offsets = [0, 0], sizes = [1, 32], strides = [1, 1]} : vector<7x32xf32> to vector<1x32xf32>
    %177 = vector.broadcast %176 : vector<1x32xf32> to vector<32x32xf32>
    %178 = arith.mulf %175, %177 : vector<32x32xf32>
    %179 = vector.extract_strided_slice %169 {offsets = [6, 0], sizes = [32, 32], strides = [1, 1]} : vector<48x32xf32> to vector<32x32xf32>
    %cst_67 = arith.constant 0.000000e+00 : f32
    %180 = vector.shape_cast %22 : vector<32x1xi1> to vector<32x1xi1>
    %181 = vector.broadcast %180 : vector<32x1xi1> to vector<32x32xi1>
    %182 = vector.broadcast %cst_67 : f32 to vector<32x32xf32>
    %183 = arith.select %181, %179, %182 : vector<32x32xi1>, vector<32x32xf32>
    %184 = vector.extract_strided_slice %170 {offsets = [1, 0], sizes = [1, 32], strides = [1, 1]} : vector<7x32xf32> to vector<1x32xf32>
    %185 = vector.broadcast %184 : vector<1x32xf32> to vector<32x32xf32>
    %186 = arith.mulf %183, %185 : vector<32x32xf32>
    %187 = arith.addf %178, %186 : vector<32x32xf32>
    %188 = vector.extract_strided_slice %169 {offsets = [7, 0], sizes = [32, 32], strides = [1, 1]} : vector<48x32xf32> to vector<32x32xf32>
    %cst_68 = arith.constant 0.000000e+00 : f32
    %189 = vector.shape_cast %31 : vector<32x1xi1> to vector<32x1xi1>
    %190 = vector.broadcast %189 : vector<32x1xi1> to vector<32x32xi1>
    %191 = vector.broadcast %cst_68 : f32 to vector<32x32xf32>
    %192 = arith.select %190, %188, %191 : vector<32x32xi1>, vector<32x32xf32>
    %193 = vector.extract_strided_slice %170 {offsets = [2, 0], sizes = [1, 32], strides = [1, 1]} : vector<7x32xf32> to vector<1x32xf32>
    %194 = vector.broadcast %193 : vector<1x32xf32> to vector<32x32xf32>
    %195 = arith.mulf %192, %194 : vector<32x32xf32>
    %196 = arith.addf %187, %195 : vector<32x32xf32>
    %197 = vector.extract_strided_slice %169 {offsets = [8, 0], sizes = [32, 32], strides = [1, 1]} : vector<48x32xf32> to vector<32x32xf32>
    %cst_69 = arith.constant 0.000000e+00 : f32
    %198 = vector.shape_cast %40 : vector<32x1xi1> to vector<32x1xi1>
    %199 = vector.broadcast %198 : vector<32x1xi1> to vector<32x32xi1>
    %200 = vector.broadcast %cst_69 : f32 to vector<32x32xf32>
    %201 = arith.select %199, %197, %200 : vector<32x32xi1>, vector<32x32xf32>
    %202 = vector.extract_strided_slice %170 {offsets = [3, 0], sizes = [1, 32], strides = [1, 1]} : vector<7x32xf32> to vector<1x32xf32>
    %203 = vector.broadcast %202 : vector<1x32xf32> to vector<32x32xf32>
    %204 = arith.mulf %201, %203 : vector<32x32xf32>
    %205 = arith.addf %196, %204 : vector<32x32xf32>
    %206 = vector.extract_strided_slice %169 {offsets = [9, 0], sizes = [32, 32], strides = [1, 1]} : vector<48x32xf32> to vector<32x32xf32>
    %cst_70 = arith.constant 0.000000e+00 : f32
    %207 = vector.shape_cast %49 : vector<32x1xi1> to vector<32x1xi1>
    %208 = vector.broadcast %207 : vector<32x1xi1> to vector<32x32xi1>
    %209 = vector.broadcast %cst_70 : f32 to vector<32x32xf32>
    %210 = arith.select %208, %206, %209 : vector<32x32xi1>, vector<32x32xf32>
    %211 = vector.extract_strided_slice %170 {offsets = [4, 0], sizes = [1, 32], strides = [1, 1]} : vector<7x32xf32> to vector<1x32xf32>
    %212 = vector.broadcast %211 : vector<1x32xf32> to vector<32x32xf32>
    %213 = arith.mulf %210, %212 : vector<32x32xf32>
    %214 = arith.addf %205, %213 : vector<32x32xf32>
    %215 = vector.extract_strided_slice %169 {offsets = [10, 0], sizes = [32, 32], strides = [1, 1]} : vector<48x32xf32> to vector<32x32xf32>
    %cst_71 = arith.constant 0.000000e+00 : f32
    %216 = vector.shape_cast %58 : vector<32x1xi1> to vector<32x1xi1>
    %217 = vector.broadcast %216 : vector<32x1xi1> to vector<32x32xi1>
    %218 = vector.broadcast %cst_71 : f32 to vector<32x32xf32>
    %219 = arith.select %217, %215, %218 : vector<32x32xi1>, vector<32x32xf32>
    %220 = vector.extract_strided_slice %170 {offsets = [5, 0], sizes = [1, 32], strides = [1, 1]} : vector<7x32xf32> to vector<1x32xf32>
    %221 = vector.broadcast %220 : vector<1x32xf32> to vector<32x32xf32>
    %222 = arith.mulf %219, %221 : vector<32x32xf32>
    %223 = arith.addf %214, %222 : vector<32x32xf32>
    %224 = vector.extract_strided_slice %169 {offsets = [11, 0], sizes = [32, 32], strides = [1, 1]} : vector<48x32xf32> to vector<32x32xf32>
    %cst_72 = arith.constant 0.000000e+00 : f32
    %225 = vector.shape_cast %67 : vector<32x1xi1> to vector<32x1xi1>
    %226 = vector.broadcast %225 : vector<32x1xi1> to vector<32x32xi1>
    %227 = vector.broadcast %cst_72 : f32 to vector<32x32xf32>
    %228 = arith.select %226, %224, %227 : vector<32x32xi1>, vector<32x32xf32>
    %229 = vector.extract_strided_slice %170 {offsets = [6, 0], sizes = [1, 32], strides = [1, 1]} : vector<7x32xf32> to vector<1x32xf32>
    %230 = vector.broadcast %229 : vector<1x32xf32> to vector<32x32xf32>
    %231 = arith.mulf %228, %230 : vector<32x32xf32>
    %232 = arith.addf %223, %231 : vector<32x32xf32>
    %c11 = arith.constant 11 : index
    %c0_73 = arith.constant 0 : index
    %233 = vector.load %arg2[%c11, %c0_73] : memref<176x128xf32, #tpu.memory_space<vmem>>, vector<1x32xf32>
    %234 = vector.broadcast %233 : vector<1x32xf32> to vector<32x32xf32>
    %235 = arith.addf %232, %234 : vector<32x32xf32>
    %c12 = arith.constant 12 : index
    %c0_74 = arith.constant 0 : index
    %236 = vector.load %arg2[%c12, %c0_74] : memref<176x128xf32, #tpu.memory_space<vmem>>, vector<1x32xf32>
    %c13 = arith.constant 13 : index
    %c0_75 = arith.constant 0 : index
    %237 = vector.load %arg2[%c13, %c0_75] : memref<176x128xf32, #tpu.memory_space<vmem>>, vector<1x32xf32>
    %cst_76 = arith.constant dense<0.000000e+00> : vector<32xf32>
    %238 = vector.multi_reduction <add>, %235, %cst_76 [1] : vector<32x32xf32> to vector<32xf32>
    %239 = vector.shape_cast %238 : vector<32xf32> to vector<32x1xf32>
    %cst_77 = arith.constant 3.125000e-02 : f32
    %240 = vector.broadcast %cst_77 : f32 to vector<32x1xf32>
    %241 = arith.mulf %239, %240 : vector<32x1xf32>
    %242 = arith.mulf %235, %235 : vector<32x32xf32>
    %cst_78 = arith.constant dense<0.000000e+00> : vector<32xf32>
    %243 = vector.multi_reduction <add>, %242, %cst_78 [1] : vector<32x32xf32> to vector<32xf32>
    %244 = vector.shape_cast %243 : vector<32xf32> to vector<32x1xf32>
    %cst_79 = arith.constant 3.125000e-02 : f32
    %245 = vector.broadcast %cst_79 : f32 to vector<32x1xf32>
    %246 = arith.mulf %244, %245 : vector<32x1xf32>
    %247 = arith.mulf %241, %241 : vector<32x1xf32>
    %248 = arith.subf %246, %247 : vector<32x1xf32>
    %cst_80 = arith.constant 0.000000e+00 : f32
    %249 = vector.broadcast %cst_80 : f32 to vector<32x1xf32>
    %250 = arith.maximumf %248, %249 : vector<32x1xf32>
    %251 = vector.broadcast %241 : vector<32x1xf32> to vector<32x32xf32>
    %252 = arith.subf %235, %251 : vector<32x32xf32>
    %cst_81 = arith.constant 9.99999997E-7 : f32
    %253 = vector.broadcast %cst_81 : f32 to vector<32x1xf32>
    %254 = arith.addf %250, %253 : vector<32x1xf32>
    %255 = math.rsqrt %254 : vector<32x1xf32>
    %256 = vector.broadcast %255 : vector<32x1xf32> to vector<32x32xf32>
    %257 = arith.mulf %252, %256 : vector<32x32xf32>
    %258 = vector.broadcast %236 : vector<1x32xf32> to vector<32x32xf32>
    %259 = arith.mulf %257, %258 : vector<32x32xf32>
    %260 = vector.broadcast %237 : vector<1x32xf32> to vector<32x32xf32>
    %261 = arith.addf %259, %260 : vector<32x32xf32>
    %262 = arith.truncf %261 : vector<32x32xf32> to vector<32x32xbf16>
    %c280 = arith.constant 280 : index
    %c0_82 = arith.constant 0 : index
    %263 = vector.load %arg1[%c280, %c0_82] : memref<984x128xbf16, #tpu.memory_space<vmem>>, vector<32x64xbf16>
    %cst_83 = arith.constant dense<0.000000e+00> : vector<32x64xf32>
    %264 = tpu.matmul %262, %263, %cst_83 {dimension_numbers = #tpu.dot_dimension_numbers<[1], [0], [0], [1], [0, 0, 1, 1], [], []>} : vector<32x32xbf16>, vector<32x64xbf16>, vector<32x64xf32> -> vector<32x64xf32>
    %c14 = arith.constant 14 : index
    %c0_84 = arith.constant 0 : index
    %265 = vector.load %arg2[%c14, %c0_84] : memref<176x128xf32, #tpu.memory_space<vmem>>, vector<1x64xf32>
    %266 = vector.broadcast %265 : vector<1x64xf32> to vector<32x64xf32>
    %267 = arith.addf %264, %266 : vector<32x64xf32>
    %cst_85 = arith.constant 5.000000e-01 : f32
    %268 = vector.broadcast %cst_85 : f32 to vector<32x64xf32>
    %269 = arith.mulf %268, %267 : vector<32x64xf32>
    %cst_86 = arith.constant 0.707106769 : f32
    %270 = vector.broadcast %cst_86 : f32 to vector<32x64xf32>
    %271 = arith.mulf %267, %270 : vector<32x64xf32>
    %272 = math.erf %271 : vector<32x64xf32>
    %cst_87 = arith.constant 1.000000e+00 : f32
    %273 = vector.broadcast %cst_87 : f32 to vector<32x64xf32>
    %274 = arith.addf %273, %272 : vector<32x64xf32>
    %275 = arith.mulf %269, %274 : vector<32x64xf32>
    %276 = arith.truncf %275 : vector<32x64xf32> to vector<32x64xbf16>
    %c312 = arith.constant 312 : index
    %c0_88 = arith.constant 0 : index
    %277 = vector.load %arg1[%c312, %c0_88] : memref<984x128xbf16, #tpu.memory_space<vmem>>, vector<64x32xbf16>
    %cst_89 = arith.constant dense<0.000000e+00> : vector<32x32xf32>
    %278 = tpu.matmul %276, %277, %cst_89 {dimension_numbers = #tpu.dot_dimension_numbers<[1], [0], [0], [1], [0, 0, 1, 1], [], []>} : vector<32x64xbf16>, vector<64x32xbf16>, vector<32x32xf32> -> vector<32x32xf32>
    %c15 = arith.constant 15 : index
    %c0_90 = arith.constant 0 : index
    %279 = vector.load %arg2[%c15, %c0_90] : memref<176x128xf32, #tpu.memory_space<vmem>>, vector<1x32xf32>
    %280 = vector.broadcast %279 : vector<1x32xf32> to vector<32x32xf32>
    %281 = arith.addf %278, %280 : vector<32x32xf32>
    %c16 = arith.constant 16 : index
    %c0_91 = arith.constant 0 : index
    %282 = vector.load %arg2[%c16, %c0_91] : memref<176x128xf32, #tpu.memory_space<vmem>>, vector<1x32xf32>
    %283 = vector.broadcast %282 : vector<1x32xf32> to vector<32x32xf32>
    %284 = arith.mulf %281, %283 : vector<32x32xf32>
    %285 = arith.addf %167, %284 : vector<32x32xf32>
    %c8_92 = arith.constant 8 : index
    %c0_93 = arith.constant 0 : index
    %286 = vector.load %arg4[%c8_92, %c0_93] : memref<48x32xf32, #tpu.memory_space<vmem>>, vector<32x32xf32>
    tpu.vector_store %arg4[%c8_92, %c0_93], %285 {strides = array<i32>} : memref<48x32xf32, #tpu.memory_space<vmem>>, vector<32x32xf32>,
    %c0_94 = arith.constant 0 : index
    %c0_95 = arith.constant 0 : index
    %287 = vector.load %arg4[%c0_94, %c0_95] : memref<48x32xf32, #tpu.memory_space<vmem>>, vector<48x32xf32>
    %c17 = arith.constant 17 : index
    %c0_96 = arith.constant 0 : index
    %288 = vector.load %arg2[%c17, %c0_96] : memref<176x128xf32, #tpu.memory_space<vmem>>, vector<7x32xf32>
    %289 = vector.extract_strided_slice %287 {offsets = [5, 0], sizes = [32, 32], strides = [1, 1]} : vector<48x32xf32> to vector<32x32xf32>
    %cst_97 = arith.constant 0.000000e+00 : f32
    %290 = vector.shape_cast %13 : vector<32x1xi1> to vector<32x1xi1>
    %291 = vector.broadcast %290 : vector<32x1xi1> to vector<32x32xi1>
    %292 = vector.broadcast %cst_97 : f32 to vector<32x32xf32>
    %293 = arith.select %291, %289, %292 : vector<32x32xi1>, vector<32x32xf32>
    %294 = vector.extract_strided_slice %288 {offsets = [0, 0], sizes = [1, 32], strides = [1, 1]} : vector<7x32xf32> to vector<1x32xf32>
    %295 = vector.broadcast %294 : vector<1x32xf32> to vector<32x32xf32>
    %296 = arith.mulf %293, %295 : vector<32x32xf32>
    %297 = vector.extract_strided_slice %287 {offsets = [6, 0], sizes = [32, 32], strides = [1, 1]} : vector<48x32xf32> to vector<32x32xf32>
    %cst_98 = arith.constant 0.000000e+00 : f32
    %298 = vector.shape_cast %22 : vector<32x1xi1> to vector<32x1xi1>
    %299 = vector.broadcast %298 : vector<32x1xi1> to vector<32x32xi1>
    %300 = vector.broadcast %cst_98 : f32 to vector<32x32xf32>
    %301 = arith.select %299, %297, %300 : vector<32x32xi1>, vector<32x32xf32>
    %302 = vector.extract_strided_slice %288 {offsets = [1, 0], sizes = [1, 32], strides = [1, 1]} : vector<7x32xf32> to vector<1x32xf32>
    %303 = vector.broadcast %302 : vector<1x32xf32> to vector<32x32xf32>
    %304 = arith.mulf %301, %303 : vector<32x32xf32>
    %305 = arith.addf %296, %304 : vector<32x32xf32>
    %306 = vector.extract_strided_slice %287 {offsets = [7, 0], sizes = [32, 32], strides = [1, 1]} : vector<48x32xf32> to vector<32x32xf32>
    %cst_99 = arith.constant 0.000000e+00 : f32
    %307 = vector.shape_cast %31 : vector<32x1xi1> to vector<32x1xi1>
    %308 = vector.broadcast %307 : vector<32x1xi1> to vector<32x32xi1>
    %309 = vector.broadcast %cst_99 : f32 to vector<32x32xf32>
    %310 = arith.select %308, %306, %309 : vector<32x32xi1>, vector<32x32xf32>
    %311 = vector.extract_strided_slice %288 {offsets = [2, 0], sizes = [1, 32], strides = [1, 1]} : vector<7x32xf32> to vector<1x32xf32>
    %312 = vector.broadcast %311 : vector<1x32xf32> to vector<32x32xf32>
    %313 = arith.mulf %310, %312 : vector<32x32xf32>
    %314 = arith.addf %305, %313 : vector<32x32xf32>
    %315 = vector.extract_strided_slice %287 {offsets = [8, 0], sizes = [32, 32], strides = [1, 1]} : vector<48x32xf32> to vector<32x32xf32>
    %cst_100 = arith.constant 0.000000e+00 : f32
    %316 = vector.shape_cast %40 : vector<32x1xi1> to vector<32x1xi1>
    %317 = vector.broadcast %316 : vector<32x1xi1> to vector<32x32xi1>
    %318 = vector.broadcast %cst_100 : f32 to vector<32x32xf32>
    %319 = arith.select %317, %315, %318 : vector<32x32xi1>, vector<32x32xf32>
    %320 = vector.extract_strided_slice %288 {offsets = [3, 0], sizes = [1, 32], strides = [1, 1]} : vector<7x32xf32> to vector<1x32xf32>
    %321 = vector.broadcast %320 : vector<1x32xf32> to vector<32x32xf32>
    %322 = arith.mulf %319, %321 : vector<32x32xf32>
    %323 = arith.addf %314, %322 : vector<32x32xf32>
    %324 = vector.extract_strided_slice %287 {offsets = [9, 0], sizes = [32, 32], strides = [1, 1]} : vector<48x32xf32> to vector<32x32xf32>
    %cst_101 = arith.constant 0.000000e+00 : f32
    %325 = vector.shape_cast %49 : vector<32x1xi1> to vector<32x1xi1>
    %326 = vector.broadcast %325 : vector<32x1xi1> to vector<32x32xi1>
    %327 = vector.broadcast %cst_101 : f32 to vector<32x32xf32>
    %328 = arith.select %326, %324, %327 : vector<32x32xi1>, vector<32x32xf32>
    %329 = vector.extract_strided_slice %288 {offsets = [4, 0], sizes = [1, 32], strides = [1, 1]} : vector<7x32xf32> to vector<1x32xf32>
    %330 = vector.broadcast %329 : vector<1x32xf32> to vector<32x32xf32>
    %331 = arith.mulf %328, %330 : vector<32x32xf32>
    %332 = arith.addf %323, %331 : vector<32x32xf32>
    %333 = vector.extract_strided_slice %287 {offsets = [10, 0], sizes = [32, 32], strides = [1, 1]} : vector<48x32xf32> to vector<32x32xf32>
    %cst_102 = arith.constant 0.000000e+00 : f32
    %334 = vector.shape_cast %58 : vector<32x1xi1> to vector<32x1xi1>
    %335 = vector.broadcast %334 : vector<32x1xi1> to vector<32x32xi1>
    %336 = vector.broadcast %cst_102 : f32 to vector<32x32xf32>
    %337 = arith.select %335, %333, %336 : vector<32x32xi1>, vector<32x32xf32>
    %338 = vector.extract_strided_slice %288 {offsets = [5, 0], sizes = [1, 32], strides = [1, 1]} : vector<7x32xf32> to vector<1x32xf32>
    %339 = vector.broadcast %338 : vector<1x32xf32> to vector<32x32xf32>
    %340 = arith.mulf %337, %339 : vector<32x32xf32>
    %341 = arith.addf %332, %340 : vector<32x32xf32>
    %342 = vector.extract_strided_slice %287 {offsets = [11, 0], sizes = [32, 32], strides = [1, 1]} : vector<48x32xf32> to vector<32x32xf32>
    %cst_103 = arith.constant 0.000000e+00 : f32
    %343 = vector.shape_cast %67 : vector<32x1xi1> to vector<32x1xi1>
    %344 = vector.broadcast %343 : vector<32x1xi1> to vector<32x32xi1>
    %345 = vector.broadcast %cst_103 : f32 to vector<32x32xf32>
    %346 = arith.select %344, %342, %345 : vector<32x32xi1>, vector<32x32xf32>
    %347 = vector.extract_strided_slice %288 {offsets = [6, 0], sizes = [1, 32], strides = [1, 1]} : vector<7x32xf32> to vector<1x32xf32>
    %348 = vector.broadcast %347 : vector<1x32xf32> to vector<32x32xf32>
    %349 = arith.mulf %346, %348 : vector<32x32xf32>
    %350 = arith.addf %341, %349 : vector<32x32xf32>
    %c24 = arith.constant 24 : index
    %c0_104 = arith.constant 0 : index
    %351 = vector.load %arg2[%c24, %c0_104] : memref<176x128xf32, #tpu.memory_space<vmem>>, vector<1x32xf32>
    %352 = vector.broadcast %351 : vector<1x32xf32> to vector<32x32xf32>
    %353 = arith.addf %350, %352 : vector<32x32xf32>
    %c25 = arith.constant 25 : index
    %c0_105 = arith.constant 0 : index
    %354 = vector.load %arg2[%c25, %c0_105] : memref<176x128xf32, #tpu.memory_space<vmem>>, vector<1x32xf32>
    %c26 = arith.constant 26 : index
    %c0_106 = arith.constant 0 : index
    %355 = vector.load %arg2[%c26, %c0_106] : memref<176x128xf32, #tpu.memory_space<vmem>>, vector<1x32xf32>
    %cst_107 = arith.constant dense<0.000000e+00> : vector<32xf32>
    %356 = vector.multi_reduction <add>, %353, %cst_107 [1] : vector<32x32xf32> to vector<32xf32>
    %357 = vector.shape_cast %356 : vector<32xf32> to vector<32x1xf32>
    %cst_108 = arith.constant 3.125000e-02 : f32
    %358 = vector.broadcast %cst_108 : f32 to vector<32x1xf32>
    %359 = arith.mulf %357, %358 : vector<32x1xf32>
    %360 = arith.mulf %353, %353 : vector<32x32xf32>
    %cst_109 = arith.constant dense<0.000000e+00> : vector<32xf32>
    %361 = vector.multi_reduction <add>, %360, %cst_109 [1] : vector<32x32xf32> to vector<32xf32>
    %362 = vector.shape_cast %361 : vector<32xf32> to vector<32x1xf32>
    %cst_110 = arith.constant 3.125000e-02 : f32
    %363 = vector.broadcast %cst_110 : f32 to vector<32x1xf32>
    %364 = arith.mulf %362, %363 : vector<32x1xf32>
    %365 = arith.mulf %359, %359 : vector<32x1xf32>
    %366 = arith.subf %364, %365 : vector<32x1xf32>
    %cst_111 = arith.constant 0.000000e+00 : f32
    %367 = vector.broadcast %cst_111 : f32 to vector<32x1xf32>
    %368 = arith.maximumf %366, %367 : vector<32x1xf32>
    %369 = vector.broadcast %359 : vector<32x1xf32> to vector<32x32xf32>
    %370 = arith.subf %353, %369 : vector<32x32xf32>
    %cst_112 = arith.constant 9.99999997E-7 : f32
    %371 = vector.broadcast %cst_112 : f32 to vector<32x1xf32>
    %372 = arith.addf %368, %371 : vector<32x1xf32>
    %373 = math.rsqrt %372 : vector<32x1xf32>
    %374 = vector.broadcast %373 : vector<32x1xf32> to vector<32x32xf32>
    %375 = arith.mulf %370, %374 : vector<32x32xf32>
    %376 = vector.broadcast %354 : vector<1x32xf32> to vector<32x32xf32>
    %377 = arith.mulf %375, %376 : vector<32x32xf32>
    %378 = vector.broadcast %355 : vector<1x32xf32> to vector<32x32xf32>
    %379 = arith.addf %377, %378 : vector<32x32xf32>
    %380 = arith.truncf %379 : vector<32x32xf32> to vector<32x32xbf16>
    %c376 = arith.constant 376 : index
    %c0_113 = arith.constant 0 : index
    %381 = vector.load %arg1[%c376, %c0_113] : memref<984x128xbf16, #tpu.memory_space<vmem>>, vector<32x64xbf16>
    %cst_114 = arith.constant dense<0.000000e+00> : vector<32x64xf32>
    %382 = tpu.matmul %380, %381, %cst_114 {dimension_numbers = #tpu.dot_dimension_numbers<[1], [0], [0], [1], [0, 0, 1, 1], [], []>} : vector<32x32xbf16>, vector<32x64xbf16>, vector<32x64xf32> -> vector<32x64xf32>
    %c27 = arith.constant 27 : index
    %c0_115 = arith.constant 0 : index
    %383 = vector.load %arg2[%c27, %c0_115] : memref<176x128xf32, #tpu.memory_space<vmem>>, vector<1x64xf32>
    %384 = vector.broadcast %383 : vector<1x64xf32> to vector<32x64xf32>
    %385 = arith.addf %382, %384 : vector<32x64xf32>
    %cst_116 = arith.constant 5.000000e-01 : f32
    %386 = vector.broadcast %cst_116 : f32 to vector<32x64xf32>
    %387 = arith.mulf %386, %385 : vector<32x64xf32>
    %cst_117 = arith.constant 0.707106769 : f32
    %388 = vector.broadcast %cst_117 : f32 to vector<32x64xf32>
    %389 = arith.mulf %385, %388 : vector<32x64xf32>
    %390 = math.erf %389 : vector<32x64xf32>
    %cst_118 = arith.constant 1.000000e+00 : f32
    %391 = vector.broadcast %cst_118 : f32 to vector<32x64xf32>
    %392 = arith.addf %391, %390 : vector<32x64xf32>
    %393 = arith.mulf %387, %392 : vector<32x64xf32>
    %394 = arith.truncf %393 : vector<32x64xf32> to vector<32x64xbf16>
    %c408 = arith.constant 408 : index
    %c0_119 = arith.constant 0 : index
    %395 = vector.load %arg1[%c408, %c0_119] : memref<984x128xbf16, #tpu.memory_space<vmem>>, vector<64x32xbf16>
    %cst_120 = arith.constant dense<0.000000e+00> : vector<32x32xf32>
    %396 = tpu.matmul %394, %395, %cst_120 {dimension_numbers = #tpu.dot_dimension_numbers<[1], [0], [0], [1], [0, 0, 1, 1], [], []>} : vector<32x64xbf16>, vector<64x32xbf16>, vector<32x32xf32> -> vector<32x32xf32>
    %c28 = arith.constant 28 : index
    %c0_121 = arith.constant 0 : index
    %397 = vector.load %arg2[%c28, %c0_121] : memref<176x128xf32, #tpu.memory_space<vmem>>, vector<1x32xf32>
    %398 = vector.broadcast %397 : vector<1x32xf32> to vector<32x32xf32>
    %399 = arith.addf %396, %398 : vector<32x32xf32>
    %c29 = arith.constant 29 : index
    %c0_122 = arith.constant 0 : index
    %400 = vector.load %arg2[%c29, %c0_122] : memref<176x128xf32, #tpu.memory_space<vmem>>, vector<1x32xf32>
    %401 = vector.broadcast %400 : vector<1x32xf32> to vector<32x32xf32>
    %402 = arith.mulf %399, %401 : vector<32x32xf32>
    %403 = arith.addf %285, %402 : vector<32x32xf32>
    %c30 = arith.constant 30 : index
    %c0_123 = arith.constant 0 : index
    %404 = vector.load %arg2[%c30, %c0_123] : memref<176x128xf32, #tpu.memory_space<vmem>>, vector<1x32xf32>
    %c31 = arith.constant 31 : index
    %c0_124 = arith.constant 0 : index
    %405 = vector.load %arg2[%c31, %c0_124] : memref<176x128xf32, #tpu.memory_space<vmem>>, vector<1x32xf32>
    %cst_125 = arith.constant dense<0.000000e+00> : vector<32xf32>
    %406 = vector.multi_reduction <add>, %403, %cst_125 [1] : vector<32x32xf32> to vector<32xf32>
    %407 = vector.shape_cast %406 : vector<32xf32> to vector<32x1xf32>
    %cst_126 = arith.constant 3.125000e-02 : f32
    %408 = vector.broadcast %cst_126 : f32 to vector<32x1xf32>
    %409 = arith.mulf %407, %408 : vector<32x1xf32>
    %410 = arith.mulf %403, %403 : vector<32x32xf32>
    %cst_127 = arith.constant dense<0.000000e+00> : vector<32xf32>
    %411 = vector.multi_reduction <add>, %410, %cst_127 [1] : vector<32x32xf32> to vector<32xf32>
    %412 = vector.shape_cast %411 : vector<32xf32> to vector<32x1xf32>
    %cst_128 = arith.constant 3.125000e-02 : f32
    %413 = vector.broadcast %cst_128 : f32 to vector<32x1xf32>
    %414 = arith.mulf %412, %413 : vector<32x1xf32>
    %415 = arith.mulf %409, %409 : vector<32x1xf32>
    %416 = arith.subf %414, %415 : vector<32x1xf32>
    %cst_129 = arith.constant 0.000000e+00 : f32
    %417 = vector.broadcast %cst_129 : f32 to vector<32x1xf32>
    %418 = arith.maximumf %416, %417 : vector<32x1xf32>
    %419 = vector.broadcast %409 : vector<32x1xf32> to vector<32x32xf32>
    %420 = arith.subf %403, %419 : vector<32x32xf32>
    %cst_130 = arith.constant 9.99999997E-7 : f32
    %421 = vector.broadcast %cst_130 : f32 to vector<32x1xf32>
    %422 = arith.addf %418, %421 : vector<32x1xf32>
    %423 = math.rsqrt %422 : vector<32x1xf32>
    %424 = vector.broadcast %423 : vector<32x1xf32> to vector<32x32xf32>
    %425 = arith.mulf %420, %424 : vector<32x32xf32>
    %426 = vector.broadcast %404 : vector<1x32xf32> to vector<32x32xf32>
    %427 = arith.mulf %425, %426 : vector<32x32xf32>
    %428 = vector.broadcast %405 : vector<1x32xf32> to vector<32x32xf32>
    %429 = arith.addf %427, %428 : vector<32x32xf32>
    %430 = arith.truncf %429 : vector<32x32xf32> to vector<32x32xbf16>
    %c472 = arith.constant 472 : index
    %c0_131 = arith.constant 0 : index
    %431 = vector.load %arg1[%c472, %c0_131] : memref<984x128xbf16, #tpu.memory_space<vmem>>, vector<32x32xbf16>
    %cst_132 = arith.constant dense<0.000000e+00> : vector<32x32xf32>
    %432 = tpu.matmul %430, %431, %cst_132 {dimension_numbers = #tpu.dot_dimension_numbers<[1], [0], [0], [1], [0, 0, 1, 1], [], []>} : vector<32x32xbf16>, vector<32x32xbf16>, vector<32x32xf32> -> vector<32x32xf32>
    %c32 = arith.constant 32 : index
    %c0_133 = arith.constant 0 : index
    %433 = vector.load %arg2[%c32, %c0_133] : memref<176x128xf32, #tpu.memory_space<vmem>>, vector<1x32xf32>
    %434 = vector.broadcast %433 : vector<1x32xf32> to vector<32x32xf32>
    %435 = arith.addf %432, %434 : vector<32x32xf32>
    %c65 = arith.constant 65 : index
    %c0_134 = arith.constant 0 : index
    %436 = vector.load %arg2[%c65, %c0_134] : memref<176x128xf32, #tpu.memory_space<vmem>>, vector<32x8xf32>
    %cst_135 = arith.constant dense<0.000000e+00> : vector<32x8xf32>
    %437 = tpu.matmul %435, %436, %cst_135 {dimension_numbers = #tpu.dot_dimension_numbers<[1], [0], [0], [1], [0, 0, 1, 1], [], []>} : vector<32x32xf32>, vector<32x8xf32>, vector<32x8xf32> -> vector<32x8xf32>
    %c97 = arith.constant 97 : index
    %c0_136 = arith.constant 0 : index
    %438 = vector.load %arg2[%c97, %c0_136] : memref<176x128xf32, #tpu.memory_space<vmem>>, vector<1x8xf32>
    %439 = vector.broadcast %438 : vector<1x8xf32> to vector<32x8xf32>
    %440 = arith.addf %437, %439 : vector<32x8xf32>
    %c98 = arith.constant 98 : index
    %c0_137 = arith.constant 0 : index
    %441 = vector.load %arg2[%c98, %c0_137] : memref<176x128xf32, #tpu.memory_space<vmem>>, vector<64x8xf32>
    %442 = arith.mulf %440, %440 : vector<32x8xf32>
    %cst_138 = arith.constant dense<0.000000e+00> : vector<32xf32>
    %443 = vector.multi_reduction <add>, %442, %cst_138 [1] : vector<32x8xf32> to vector<32xf32>
    %444 = vector.shape_cast %443 : vector<32xf32> to vector<32x1xf32>
    %cst_139 = arith.constant 1.000000e-24 : f32
    %445 = vector.broadcast %cst_139 : f32 to vector<32x1xf32>
    %446 = arith.maximumf %444, %445 : vector<32x1xf32>
    %447 = math.rsqrt %446 : vector<32x1xf32>
    %448 = vector.broadcast %447 : vector<32x1xf32> to vector<32x8xf32>
    %449 = arith.mulf %440, %448 : vector<32x8xf32>
    %450 = arith.mulf %441, %441 : vector<64x8xf32>
    %cst_140 = arith.constant dense<0.000000e+00> : vector<64xf32>
    %451 = vector.multi_reduction <add>, %450, %cst_140 [1] : vector<64x8xf32> to vector<64xf32>
    %452 = vector.shape_cast %451 : vector<64xf32> to vector<64x1xf32>
    %cst_141 = arith.constant 1.000000e-24 : f32
    %453 = vector.broadcast %cst_141 : f32 to vector<64x1xf32>
    %454 = arith.maximumf %452, %453 : vector<64x1xf32>
    %455 = math.rsqrt %454 : vector<64x1xf32>
    %456 = vector.broadcast %455 : vector<64x1xf32> to vector<64x8xf32>
    %457 = arith.mulf %441, %456 : vector<64x8xf32>
    %458 = tpu.transpose %457, [1, 0] : vector<64x8xf32> -> vector<8x64xf32>
    %cst_142 = arith.constant dense<0.000000e+00> : vector<32x64xf32>
    %459 = tpu.matmul %449, %458, %cst_142 {dimension_numbers = #tpu.dot_dimension_numbers<[1], [0], [0], [1], [0, 0, 1, 1], [], []>} : vector<32x8xf32>, vector<8x64xf32>, vector<32x64xf32> -> vector<32x64xf32>
    %cst_143 = arith.constant dense<0xFF800000> : vector<32xf32>
    %460 = vector.multi_reduction <maximumf>, %459, %cst_143 [1] : vector<32x64xf32> to vector<32xf32>
    %461 = vector.shape_cast %460 : vector<32xf32> to vector<32x1xf32>
    %462 = tpu.iota {dimensions = array<i32: 1>} : vector<32x64xi32>
    %463 = vector.broadcast %461 : vector<32x1xf32> to vector<32x64xf32>
    %464 = arith.cmpf oge, %459, %463 : vector<32x64xf32>
    %c64_i32 = arith.constant 64 : i32
    %465 = vector.broadcast %c64_i32 : i32 to vector<32x64xi32>
    %466 = arith.select %464, %462, %465 : vector<32x64xi1>, vector<32x64xi32>
    %cst_144 = arith.constant dense<2147483647> : vector<32xi32>
    %467 = vector.multi_reduction <minsi>, %466, %cst_144 [1] : vector<32x64xi32> to vector<32xi32>
    %468 = vector.shape_cast %467 : vector<32xi32> to vector<32x1xi32>
    %469 = vector.broadcast %468 : vector<32x1xi32> to vector<32x64xi32>
    %470 = arith.cmpi eq, %462, %469 : vector<32x64xi32>
    %471 = arith.extui %470 : vector<32x64xi1> to vector<32x64xi32>
    %472 = arith.sitofp %471 : vector<32x64xi32> to vector<32x64xf32>
    %cst_145 = arith.constant dense<0.000000e+00> : vector<32x8xf32>
    %473 = tpu.matmul %472, %441, %cst_145 {dimension_numbers = #tpu.dot_dimension_numbers<[1], [0], [0], [1], [0, 0, 1, 1], [], []>} : vector<32x64xf32>, vector<64x8xf32>, vector<32x8xf32> -> vector<32x8xf32>
    %474 = arith.subf %440, %473 : vector<32x8xf32>
    %475 = arith.mulf %474, %474 : vector<32x8xf32>
    %cst_146 = arith.constant dense<0.000000e+00> : vector<32xf32>
    %476 = vector.multi_reduction <add>, %475, %cst_146 [1] : vector<32x8xf32> to vector<32xf32>
    %477 = vector.shape_cast %476 : vector<32xf32> to vector<32x1xf32>
    %cst_147 = arith.constant dense<0.000000e+00> : vector<1xf32>
    %478 = vector.multi_reduction <add>, %477, %cst_147 [0] : vector<32x1xf32> to vector<1xf32>
    %479 = vector.shape_cast %478 : vector<1xf32> to vector<1x1xf32>
    %c162 = arith.constant 162 : index
    %c0_148 = arith.constant 0 : index
    %480 = vector.load %arg2[%c162, %c0_148] : memref<176x128xf32, #tpu.memory_space<vmem>>, vector<8x32xf32>
    %cst_149 = arith.constant dense<0.000000e+00> : vector<32x32xf32>
    %481 = tpu.matmul %473, %480, %cst_149 {dimension_numbers = #tpu.dot_dimension_numbers<[1], [0], [0], [1], [0, 0, 1, 1], [], []>} : vector<32x8xf32>, vector<8x32xf32>, vector<32x32xf32> -> vector<32x32xf32>
    %c170 = arith.constant 170 : index
    %c0_150 = arith.constant 0 : index
    %482 = vector.load %arg2[%c170, %c0_150] : memref<176x128xf32, #tpu.memory_space<vmem>>, vector<1x32xf32>
    %483 = vector.broadcast %482 : vector<1x32xf32> to vector<32x32xf32>
    %484 = arith.addf %481, %483 : vector<32x32xf32>
    %cst_151 = arith.constant 0.00449218741 : f32
    %485 = vector.broadcast %cst_151 : f32 to vector<1x1xf32>
    %486 = arith.mulf %479, %485 : vector<1x1xf32>
    %c8_152 = arith.constant 8 : index
    %c0_153 = arith.constant 0 : index
    %487 = vector.load %arg4[%c8_152, %c0_153] : memref<48x32xf32, #tpu.memory_space<vmem>>, vector<32x32xf32>
    tpu.vector_store %arg4[%c8_152, %c0_153], %484 {strides = array<i32>} : memref<48x32xf32, #tpu.memory_space<vmem>>, vector<32x32xf32>,
    %c0_154 = arith.constant 0 : index
    %c0_155 = arith.constant 0 : index
    %488 = vector.load %arg4[%c0_154, %c0_155] : memref<48x32xf32, #tpu.memory_space<vmem>>, vector<48x32xf32>
    %489 = arith.truncf %488 : vector<48x32xf32> to vector<48x32xbf16>
    %490 = vector.extract_strided_slice %489 {offsets = [5, 0], sizes = [32, 32], strides = [1, 1]} : vector<48x32xbf16> to vector<32x32xbf16>
    %cst_156 = arith.constant 0.000000e+00 : f32
    %491 = arith.truncf %cst_156 : f32 to bf16
    %492 = vector.shape_cast %13 : vector<32x1xi1> to vector<32x1xi1>
    %493 = vector.broadcast %492 : vector<32x1xi1> to vector<32x32xi1>
    %494 = vector.broadcast %491 : bf16 to vector<32x32xbf16>
    %495 = arith.select %493, %490, %494 : vector<32x32xi1>, vector<32x32xbf16>
    %c504 = arith.constant 504 : index
    %c0_157 = arith.constant 0 : index
    %496 = vector.load %arg1[%c504, %c0_157] : memref<984x128xbf16, #tpu.memory_space<vmem>>, vector<32x32xbf16>
    %cst_158 = arith.constant dense<0.000000e+00> : vector<32x32xf32>
    %497 = tpu.matmul %495, %496, %cst_158 {dimension_numbers = #tpu.dot_dimension_numbers<[1], [0], [0], [1], [0, 0, 1, 1], [], []>} : vector<32x32xbf16>, vector<32x32xbf16>, vector<32x32xf32> -> vector<32x32xf32>
    %498 = vector.extract_strided_slice %489 {offsets = [6, 0], sizes = [32, 32], strides = [1, 1]} : vector<48x32xbf16> to vector<32x32xbf16>
    %cst_159 = arith.constant 0.000000e+00 : f32
    %499 = arith.truncf %cst_159 : f32 to bf16
    %500 = vector.shape_cast %22 : vector<32x1xi1> to vector<32x1xi1>
    %501 = vector.broadcast %500 : vector<32x1xi1> to vector<32x32xi1>
    %502 = vector.broadcast %499 : bf16 to vector<32x32xbf16>
    %503 = arith.select %501, %498, %502 : vector<32x32xi1>, vector<32x32xbf16>
    %c536 = arith.constant 536 : index
    %c0_160 = arith.constant 0 : index
    %504 = vector.load %arg1[%c536, %c0_160] : memref<984x128xbf16, #tpu.memory_space<vmem>>, vector<32x32xbf16>
    %cst_161 = arith.constant dense<0.000000e+00> : vector<32x32xf32>
    %505 = tpu.matmul %503, %504, %cst_161 {dimension_numbers = #tpu.dot_dimension_numbers<[1], [0], [0], [1], [0, 0, 1, 1], [], []>} : vector<32x32xbf16>, vector<32x32xbf16>, vector<32x32xf32> -> vector<32x32xf32>
    %506 = arith.addf %497, %505 : vector<32x32xf32>
    %507 = vector.extract_strided_slice %489 {offsets = [7, 0], sizes = [32, 32], strides = [1, 1]} : vector<48x32xbf16> to vector<32x32xbf16>
    %cst_162 = arith.constant 0.000000e+00 : f32
    %508 = arith.truncf %cst_162 : f32 to bf16
    %509 = vector.shape_cast %31 : vector<32x1xi1> to vector<32x1xi1>
    %510 = vector.broadcast %509 : vector<32x1xi1> to vector<32x32xi1>
    %511 = vector.broadcast %508 : bf16 to vector<32x32xbf16>
    %512 = arith.select %510, %507, %511 : vector<32x32xi1>, vector<32x32xbf16>
    %c568 = arith.constant 568 : index
    %c0_163 = arith.constant 0 : index
    %513 = vector.load %arg1[%c568, %c0_163] : memref<984x128xbf16, #tpu.memory_space<vmem>>, vector<32x32xbf16>
    %cst_164 = arith.constant dense<0.000000e+00> : vector<32x32xf32>
    %514 = tpu.matmul %512, %513, %cst_164 {dimension_numbers = #tpu.dot_dimension_numbers<[1], [0], [0], [1], [0, 0, 1, 1], [], []>} : vector<32x32xbf16>, vector<32x32xbf16>, vector<32x32xf32> -> vector<32x32xf32>
    %515 = arith.addf %506, %514 : vector<32x32xf32>
    %516 = vector.extract_strided_slice %489 {offsets = [8, 0], sizes = [32, 32], strides = [1, 1]} : vector<48x32xbf16> to vector<32x32xbf16>
    %cst_165 = arith.constant 0.000000e+00 : f32
    %517 = arith.truncf %cst_165 : f32 to bf16
    %518 = vector.shape_cast %40 : vector<32x1xi1> to vector<32x1xi1>
    %519 = vector.broadcast %518 : vector<32x1xi1> to vector<32x32xi1>
    %520 = vector.broadcast %517 : bf16 to vector<32x32xbf16>
    %521 = arith.select %519, %516, %520 : vector<32x32xi1>, vector<32x32xbf16>
    %c600 = arith.constant 600 : index
    %c0_166 = arith.constant 0 : index
    %522 = vector.load %arg1[%c600, %c0_166] : memref<984x128xbf16, #tpu.memory_space<vmem>>, vector<32x32xbf16>
    %cst_167 = arith.constant dense<0.000000e+00> : vector<32x32xf32>
    %523 = tpu.matmul %521, %522, %cst_167 {dimension_numbers = #tpu.dot_dimension_numbers<[1], [0], [0], [1], [0, 0, 1, 1], [], []>} : vector<32x32xbf16>, vector<32x32xbf16>, vector<32x32xf32> -> vector<32x32xf32>
    %524 = arith.addf %515, %523 : vector<32x32xf32>
    %525 = vector.extract_strided_slice %489 {offsets = [9, 0], sizes = [32, 32], strides = [1, 1]} : vector<48x32xbf16> to vector<32x32xbf16>
    %cst_168 = arith.constant 0.000000e+00 : f32
    %526 = arith.truncf %cst_168 : f32 to bf16
    %527 = vector.shape_cast %49 : vector<32x1xi1> to vector<32x1xi1>
    %528 = vector.broadcast %527 : vector<32x1xi1> to vector<32x32xi1>
    %529 = vector.broadcast %526 : bf16 to vector<32x32xbf16>
    %530 = arith.select %528, %525, %529 : vector<32x32xi1>, vector<32x32xbf16>
    %c632 = arith.constant 632 : index
    %c0_169 = arith.constant 0 : index
    %531 = vector.load %arg1[%c632, %c0_169] : memref<984x128xbf16, #tpu.memory_space<vmem>>, vector<32x32xbf16>
    %cst_170 = arith.constant dense<0.000000e+00> : vector<32x32xf32>
    %532 = tpu.matmul %530, %531, %cst_170 {dimension_numbers = #tpu.dot_dimension_numbers<[1], [0], [0], [1], [0, 0, 1, 1], [], []>} : vector<32x32xbf16>, vector<32x32xbf16>, vector<32x32xf32> -> vector<32x32xf32>
    %533 = arith.addf %524, %532 : vector<32x32xf32>
    %534 = vector.extract_strided_slice %489 {offsets = [10, 0], sizes = [32, 32], strides = [1, 1]} : vector<48x32xbf16> to vector<32x32xbf16>
    %cst_171 = arith.constant 0.000000e+00 : f32
    %535 = arith.truncf %cst_171 : f32 to bf16
    %536 = vector.shape_cast %58 : vector<32x1xi1> to vector<32x1xi1>
    %537 = vector.broadcast %536 : vector<32x1xi1> to vector<32x32xi1>
    %538 = vector.broadcast %535 : bf16 to vector<32x32xbf16>
    %539 = arith.select %537, %534, %538 : vector<32x32xi1>, vector<32x32xbf16>
    %c664 = arith.constant 664 : index
    %c0_172 = arith.constant 0 : index
    %540 = vector.load %arg1[%c664, %c0_172] : memref<984x128xbf16, #tpu.memory_space<vmem>>, vector<32x32xbf16>
    %cst_173 = arith.constant dense<0.000000e+00> : vector<32x32xf32>
    %541 = tpu.matmul %539, %540, %cst_173 {dimension_numbers = #tpu.dot_dimension_numbers<[1], [0], [0], [1], [0, 0, 1, 1], [], []>} : vector<32x32xbf16>, vector<32x32xbf16>, vector<32x32xf32> -> vector<32x32xf32>
    %542 = arith.addf %533, %541 : vector<32x32xf32>
    %543 = vector.extract_strided_slice %489 {offsets = [11, 0], sizes = [32, 32], strides = [1, 1]} : vector<48x32xbf16> to vector<32x32xbf16>
    %cst_174 = arith.constant 0.000000e+00 : f32
    %544 = arith.truncf %cst_174 : f32 to bf16
    %545 = vector.shape_cast %67 : vector<32x1xi1> to vector<32x1xi1>
    %546 = vector.broadcast %545 : vector<32x1xi1> to vector<32x32xi1>
    %547 = vector.broadcast %544 : bf16 to vector<32x32xbf16>
    %548 = arith.select %546, %543, %547 : vector<32x32xi1>, vector<32x32xbf16>
    %c696 = arith.constant 696 : index
    %c0_175 = arith.constant 0 : index
    %549 = vector.load %arg1[%c696, %c0_175] : memref<984x128xbf16, #tpu.memory_space<vmem>>, vector<32x32xbf16>
    %cst_176 = arith.constant dense<0.000000e+00> : vector<32x32xf32>
    %550 = tpu.matmul %548, %549, %cst_176 {dimension_numbers = #tpu.dot_dimension_numbers<[1], [0], [0], [1], [0, 0, 1, 1], [], []>} : vector<32x32xbf16>, vector<32x32xbf16>, vector<32x32xf32> -> vector<32x32xf32>
    %551 = arith.addf %542, %550 : vector<32x32xf32>
    %c33 = arith.constant 33 : index
    %c0_177 = arith.constant 0 : index
    %552 = vector.load %arg2[%c33, %c0_177] : memref<176x128xf32, #tpu.memory_space<vmem>>, vector<1x32xf32>
    %553 = vector.broadcast %552 : vector<1x32xf32> to vector<32x32xf32>
    %554 = arith.addf %551, %553 : vector<32x32xf32>
    %c34 = arith.constant 34 : index
    %c0_178 = arith.constant 0 : index
    %555 = vector.load %arg2[%c34, %c0_178] : memref<176x128xf32, #tpu.memory_space<vmem>>, vector<1x32xf32>
    %c35 = arith.constant 35 : index
    %c0_179 = arith.constant 0 : index
    %556 = vector.load %arg2[%c35, %c0_179] : memref<176x128xf32, #tpu.memory_space<vmem>>, vector<1x32xf32>
    %cst_180 = arith.constant dense<0.000000e+00> : vector<32xf32>
    %557 = vector.multi_reduction <add>, %554, %cst_180 [1] : vector<32x32xf32> to vector<32xf32>
    %558 = vector.shape_cast %557 : vector<32xf32> to vector<32x1xf32>
    %cst_181 = arith.constant 3.125000e-02 : f32
    %559 = vector.broadcast %cst_181 : f32 to vector<32x1xf32>
    %560 = arith.mulf %558, %559 : vector<32x1xf32>
    %561 = arith.mulf %554, %554 : vector<32x32xf32>
    %cst_182 = arith.constant dense<0.000000e+00> : vector<32xf32>
    %562 = vector.multi_reduction <add>, %561, %cst_182 [1] : vector<32x32xf32> to vector<32xf32>
    %563 = vector.shape_cast %562 : vector<32xf32> to vector<32x1xf32>
    %cst_183 = arith.constant 3.125000e-02 : f32
    %564 = vector.broadcast %cst_183 : f32 to vector<32x1xf32>
    %565 = arith.mulf %563, %564 : vector<32x1xf32>
    %566 = arith.mulf %560, %560 : vector<32x1xf32>
    %567 = arith.subf %565, %566 : vector<32x1xf32>
    %cst_184 = arith.constant 0.000000e+00 : f32
    %568 = vector.broadcast %cst_184 : f32 to vector<32x1xf32>
    %569 = arith.maximumf %567, %568 : vector<32x1xf32>
    %570 = vector.broadcast %560 : vector<32x1xf32> to vector<32x32xf32>
    %571 = arith.subf %554, %570 : vector<32x32xf32>
    %cst_185 = arith.constant 9.99999997E-7 : f32
    %572 = vector.broadcast %cst_185 : f32 to vector<32x1xf32>
    %573 = arith.addf %569, %572 : vector<32x1xf32>
    %574 = math.rsqrt %573 : vector<32x1xf32>
    %575 = vector.broadcast %574 : vector<32x1xf32> to vector<32x32xf32>
    %576 = arith.mulf %571, %575 : vector<32x32xf32>
    %577 = vector.broadcast %555 : vector<1x32xf32> to vector<32x32xf32>
    %578 = arith.mulf %576, %577 : vector<32x32xf32>
    %579 = vector.broadcast %556 : vector<1x32xf32> to vector<32x32xf32>
    %580 = arith.addf %578, %579 : vector<32x32xf32>
    %c8_186 = arith.constant 8 : index
    %c0_187 = arith.constant 0 : index
    %581 = vector.load %arg4[%c8_186, %c0_187] : memref<48x32xf32, #tpu.memory_space<vmem>>, vector<32x32xf32>
    tpu.vector_store %arg4[%c8_186, %c0_187], %580 {strides = array<i32>} : memref<48x32xf32, #tpu.memory_space<vmem>>, vector<32x32xf32>,
    %c0_188 = arith.constant 0 : index
    %c0_189 = arith.constant 0 : index
    %582 = vector.load %arg4[%c0_188, %c0_189] : memref<48x32xf32, #tpu.memory_space<vmem>>, vector<48x32xf32>
    %c36 = arith.constant 36 : index
    %c0_190 = arith.constant 0 : index
    %583 = vector.load %arg2[%c36, %c0_190] : memref<176x128xf32, #tpu.memory_space<vmem>>, vector<7x32xf32>
    %584 = vector.extract_strided_slice %582 {offsets = [5, 0], sizes = [32, 32], strides = [1, 1]} : vector<48x32xf32> to vector<32x32xf32>
    %cst_191 = arith.constant 0.000000e+00 : f32
    %585 = vector.shape_cast %13 : vector<32x1xi1> to vector<32x1xi1>
    %586 = vector.broadcast %585 : vector<32x1xi1> to vector<32x32xi1>
    %587 = vector.broadcast %cst_191 : f32 to vector<32x32xf32>
    %588 = arith.select %586, %584, %587 : vector<32x32xi1>, vector<32x32xf32>
    %589 = vector.extract_strided_slice %583 {offsets = [0, 0], sizes = [1, 32], strides = [1, 1]} : vector<7x32xf32> to vector<1x32xf32>
    %590 = vector.broadcast %589 : vector<1x32xf32> to vector<32x32xf32>
    %591 = arith.mulf %588, %590 : vector<32x32xf32>
    %592 = vector.extract_strided_slice %582 {offsets = [6, 0], sizes = [32, 32], strides = [1, 1]} : vector<48x32xf32> to vector<32x32xf32>
    %cst_192 = arith.constant 0.000000e+00 : f32
    %593 = vector.shape_cast %22 : vector<32x1xi1> to vector<32x1xi1>
    %594 = vector.broadcast %593 : vector<32x1xi1> to vector<32x32xi1>
    %595 = vector.broadcast %cst_192 : f32 to vector<32x32xf32>
    %596 = arith.select %594, %592, %595 : vector<32x32xi1>, vector<32x32xf32>
    %597 = vector.extract_strided_slice %583 {offsets = [1, 0], sizes = [1, 32], strides = [1, 1]} : vector<7x32xf32> to vector<1x32xf32>
    %598 = vector.broadcast %597 : vector<1x32xf32> to vector<32x32xf32>
    %599 = arith.mulf %596, %598 : vector<32x32xf32>
    %600 = arith.addf %591, %599 : vector<32x32xf32>
    %601 = vector.extract_strided_slice %582 {offsets = [7, 0], sizes = [32, 32], strides = [1, 1]} : vector<48x32xf32> to vector<32x32xf32>
    %cst_193 = arith.constant 0.000000e+00 : f32
    %602 = vector.shape_cast %31 : vector<32x1xi1> to vector<32x1xi1>
    %603 = vector.broadcast %602 : vector<32x1xi1> to vector<32x32xi1>
    %604 = vector.broadcast %cst_193 : f32 to vector<32x32xf32>
    %605 = arith.select %603, %601, %604 : vector<32x32xi1>, vector<32x32xf32>
    %606 = vector.extract_strided_slice %583 {offsets = [2, 0], sizes = [1, 32], strides = [1, 1]} : vector<7x32xf32> to vector<1x32xf32>
    %607 = vector.broadcast %606 : vector<1x32xf32> to vector<32x32xf32>
    %608 = arith.mulf %605, %607 : vector<32x32xf32>
    %609 = arith.addf %600, %608 : vector<32x32xf32>
    %610 = vector.extract_strided_slice %582 {offsets = [8, 0], sizes = [32, 32], strides = [1, 1]} : vector<48x32xf32> to vector<32x32xf32>
    %cst_194 = arith.constant 0.000000e+00 : f32
    %611 = vector.shape_cast %40 : vector<32x1xi1> to vector<32x1xi1>
    %612 = vector.broadcast %611 : vector<32x1xi1> to vector<32x32xi1>
    %613 = vector.broadcast %cst_194 : f32 to vector<32x32xf32>
    %614 = arith.select %612, %610, %613 : vector<32x32xi1>, vector<32x32xf32>
    %615 = vector.extract_strided_slice %583 {offsets = [3, 0], sizes = [1, 32], strides = [1, 1]} : vector<7x32xf32> to vector<1x32xf32>
    %616 = vector.broadcast %615 : vector<1x32xf32> to vector<32x32xf32>
    %617 = arith.mulf %614, %616 : vector<32x32xf32>
    %618 = arith.addf %609, %617 : vector<32x32xf32>
    %619 = vector.extract_strided_slice %582 {offsets = [9, 0], sizes = [32, 32], strides = [1, 1]} : vector<48x32xf32> to vector<32x32xf32>
    %cst_195 = arith.constant 0.000000e+00 : f32
    %620 = vector.shape_cast %49 : vector<32x1xi1> to vector<32x1xi1>
    %621 = vector.broadcast %620 : vector<32x1xi1> to vector<32x32xi1>
    %622 = vector.broadcast %cst_195 : f32 to vector<32x32xf32>
    %623 = arith.select %621, %619, %622 : vector<32x32xi1>, vector<32x32xf32>
    %624 = vector.extract_strided_slice %583 {offsets = [4, 0], sizes = [1, 32], strides = [1, 1]} : vector<7x32xf32> to vector<1x32xf32>
    %625 = vector.broadcast %624 : vector<1x32xf32> to vector<32x32xf32>
    %626 = arith.mulf %623, %625 : vector<32x32xf32>
    %627 = arith.addf %618, %626 : vector<32x32xf32>
    %628 = vector.extract_strided_slice %582 {offsets = [10, 0], sizes = [32, 32], strides = [1, 1]} : vector<48x32xf32> to vector<32x32xf32>
    %cst_196 = arith.constant 0.000000e+00 : f32
    %629 = vector.shape_cast %58 : vector<32x1xi1> to vector<32x1xi1>
    %630 = vector.broadcast %629 : vector<32x1xi1> to vector<32x32xi1>
    %631 = vector.broadcast %cst_196 : f32 to vector<32x32xf32>
    %632 = arith.select %630, %628, %631 : vector<32x32xi1>, vector<32x32xf32>
    %633 = vector.extract_strided_slice %583 {offsets = [5, 0], sizes = [1, 32], strides = [1, 1]} : vector<7x32xf32> to vector<1x32xf32>
    %634 = vector.broadcast %633 : vector<1x32xf32> to vector<32x32xf32>
    %635 = arith.mulf %632, %634 : vector<32x32xf32>
    %636 = arith.addf %627, %635 : vector<32x32xf32>
    %637 = vector.extract_strided_slice %582 {offsets = [11, 0], sizes = [32, 32], strides = [1, 1]} : vector<48x32xf32> to vector<32x32xf32>
    %cst_197 = arith.constant 0.000000e+00 : f32
    %638 = vector.shape_cast %67 : vector<32x1xi1> to vector<32x1xi1>
    %639 = vector.broadcast %638 : vector<32x1xi1> to vector<32x32xi1>
    %640 = vector.broadcast %cst_197 : f32 to vector<32x32xf32>
    %641 = arith.select %639, %637, %640 : vector<32x32xi1>, vector<32x32xf32>
    %642 = vector.extract_strided_slice %583 {offsets = [6, 0], sizes = [1, 32], strides = [1, 1]} : vector<7x32xf32> to vector<1x32xf32>
    %643 = vector.broadcast %642 : vector<1x32xf32> to vector<32x32xf32>
    %644 = arith.mulf %641, %643 : vector<32x32xf32>
    %645 = arith.addf %636, %644 : vector<32x32xf32>
    %c43 = arith.constant 43 : index
    %c0_198 = arith.constant 0 : index
    %646 = vector.load %arg2[%c43, %c0_198] : memref<176x128xf32, #tpu.memory_space<vmem>>, vector<1x32xf32>
    %647 = vector.broadcast %646 : vector<1x32xf32> to vector<32x32xf32>
    %648 = arith.addf %645, %647 : vector<32x32xf32>
    %c44 = arith.constant 44 : index
    %c0_199 = arith.constant 0 : index
    %649 = vector.load %arg2[%c44, %c0_199] : memref<176x128xf32, #tpu.memory_space<vmem>>, vector<1x32xf32>
    %c45 = arith.constant 45 : index
    %c0_200 = arith.constant 0 : index
    %650 = vector.load %arg2[%c45, %c0_200] : memref<176x128xf32, #tpu.memory_space<vmem>>, vector<1x32xf32>
    %cst_201 = arith.constant dense<0.000000e+00> : vector<32xf32>
    %651 = vector.multi_reduction <add>, %648, %cst_201 [1] : vector<32x32xf32> to vector<32xf32>
    %652 = vector.shape_cast %651 : vector<32xf32> to vector<32x1xf32>
    %cst_202 = arith.constant 3.125000e-02 : f32
    %653 = vector.broadcast %cst_202 : f32 to vector<32x1xf32>
    %654 = arith.mulf %652, %653 : vector<32x1xf32>
    %655 = arith.mulf %648, %648 : vector<32x32xf32>
    %cst_203 = arith.constant dense<0.000000e+00> : vector<32xf32>
    %656 = vector.multi_reduction <add>, %655, %cst_203 [1] : vector<32x32xf32> to vector<32xf32>
    %657 = vector.shape_cast %656 : vector<32xf32> to vector<32x1xf32>
    %cst_204 = arith.constant 3.125000e-02 : f32
    %658 = vector.broadcast %cst_204 : f32 to vector<32x1xf32>
    %659 = arith.mulf %657, %658 : vector<32x1xf32>
    %660 = arith.mulf %654, %654 : vector<32x1xf32>
    %661 = arith.subf %659, %660 : vector<32x1xf32>
    %cst_205 = arith.constant 0.000000e+00 : f32
    %662 = vector.broadcast %cst_205 : f32 to vector<32x1xf32>
    %663 = arith.maximumf %661, %662 : vector<32x1xf32>
    %664 = vector.broadcast %654 : vector<32x1xf32> to vector<32x32xf32>
    %665 = arith.subf %648, %664 : vector<32x32xf32>
    %cst_206 = arith.constant 9.99999997E-7 : f32
    %666 = vector.broadcast %cst_206 : f32 to vector<32x1xf32>
    %667 = arith.addf %663, %666 : vector<32x1xf32>
    %668 = math.rsqrt %667 : vector<32x1xf32>
    %669 = vector.broadcast %668 : vector<32x1xf32> to vector<32x32xf32>
    %670 = arith.mulf %665, %669 : vector<32x32xf32>
    %671 = vector.broadcast %649 : vector<1x32xf32> to vector<32x32xf32>
    %672 = arith.mulf %670, %671 : vector<32x32xf32>
    %673 = vector.broadcast %650 : vector<1x32xf32> to vector<32x32xf32>
    %674 = arith.addf %672, %673 : vector<32x32xf32>
    %675 = arith.truncf %674 : vector<32x32xf32> to vector<32x32xbf16>
    %c728 = arith.constant 728 : index
    %c0_207 = arith.constant 0 : index
    %676 = vector.load %arg1[%c728, %c0_207] : memref<984x128xbf16, #tpu.memory_space<vmem>>, vector<32x64xbf16>
    %cst_208 = arith.constant dense<0.000000e+00> : vector<32x64xf32>
    %677 = tpu.matmul %675, %676, %cst_208 {dimension_numbers = #tpu.dot_dimension_numbers<[1], [0], [0], [1], [0, 0, 1, 1], [], []>} : vector<32x32xbf16>, vector<32x64xbf16>, vector<32x64xf32> -> vector<32x64xf32>
    %c46 = arith.constant 46 : index
    %c0_209 = arith.constant 0 : index
    %678 = vector.load %arg2[%c46, %c0_209] : memref<176x128xf32, #tpu.memory_space<vmem>>, vector<1x64xf32>
    %679 = vector.broadcast %678 : vector<1x64xf32> to vector<32x64xf32>
    %680 = arith.addf %677, %679 : vector<32x64xf32>
    %cst_210 = arith.constant 5.000000e-01 : f32
    %681 = vector.broadcast %cst_210 : f32 to vector<32x64xf32>
    %682 = arith.mulf %681, %680 : vector<32x64xf32>
    %cst_211 = arith.constant 0.707106769 : f32
    %683 = vector.broadcast %cst_211 : f32 to vector<32x64xf32>
    %684 = arith.mulf %680, %683 : vector<32x64xf32>
    %685 = math.erf %684 : vector<32x64xf32>
    %cst_212 = arith.constant 1.000000e+00 : f32
    %686 = vector.broadcast %cst_212 : f32 to vector<32x64xf32>
    %687 = arith.addf %686, %685 : vector<32x64xf32>
    %688 = arith.mulf %682, %687 : vector<32x64xf32>
    %689 = arith.truncf %688 : vector<32x64xf32> to vector<32x64xbf16>
    %c760 = arith.constant 760 : index
    %c0_213 = arith.constant 0 : index
    %690 = vector.load %arg1[%c760, %c0_213] : memref<984x128xbf16, #tpu.memory_space<vmem>>, vector<64x32xbf16>
    %cst_214 = arith.constant dense<0.000000e+00> : vector<32x32xf32>
    %691 = tpu.matmul %689, %690, %cst_214 {dimension_numbers = #tpu.dot_dimension_numbers<[1], [0], [0], [1], [0, 0, 1, 1], [], []>} : vector<32x64xbf16>, vector<64x32xbf16>, vector<32x32xf32> -> vector<32x32xf32>
    %c47 = arith.constant 47 : index
    %c0_215 = arith.constant 0 : index
    %692 = vector.load %arg2[%c47, %c0_215] : memref<176x128xf32, #tpu.memory_space<vmem>>, vector<1x32xf32>
    %693 = vector.broadcast %692 : vector<1x32xf32> to vector<32x32xf32>
    %694 = arith.addf %691, %693 : vector<32x32xf32>
    %c48 = arith.constant 48 : index
    %c0_216 = arith.constant 0 : index
    %695 = vector.load %arg2[%c48, %c0_216] : memref<176x128xf32, #tpu.memory_space<vmem>>, vector<1x32xf32>
    %696 = vector.broadcast %695 : vector<1x32xf32> to vector<32x32xf32>
    %697 = arith.mulf %694, %696 : vector<32x32xf32>
    %698 = arith.addf %580, %697 : vector<32x32xf32>
    %c8_217 = arith.constant 8 : index
    %c0_218 = arith.constant 0 : index
    %699 = vector.load %arg4[%c8_217, %c0_218] : memref<48x32xf32, #tpu.memory_space<vmem>>, vector<32x32xf32>
    tpu.vector_store %arg4[%c8_217, %c0_218], %698 {strides = array<i32>} : memref<48x32xf32, #tpu.memory_space<vmem>>, vector<32x32xf32>,
    %c0_219 = arith.constant 0 : index
    %c0_220 = arith.constant 0 : index
    %700 = vector.load %arg4[%c0_219, %c0_220] : memref<48x32xf32, #tpu.memory_space<vmem>>, vector<48x32xf32>
    %c49 = arith.constant 49 : index
    %c0_221 = arith.constant 0 : index
    %701 = vector.load %arg2[%c49, %c0_221] : memref<176x128xf32, #tpu.memory_space<vmem>>, vector<7x32xf32>
    %702 = vector.extract_strided_slice %700 {offsets = [5, 0], sizes = [32, 32], strides = [1, 1]} : vector<48x32xf32> to vector<32x32xf32>
    %cst_222 = arith.constant 0.000000e+00 : f32
    %703 = vector.shape_cast %13 : vector<32x1xi1> to vector<32x1xi1>
    %704 = vector.broadcast %703 : vector<32x1xi1> to vector<32x32xi1>
    %705 = vector.broadcast %cst_222 : f32 to vector<32x32xf32>
    %706 = arith.select %704, %702, %705 : vector<32x32xi1>, vector<32x32xf32>
    %707 = vector.extract_strided_slice %701 {offsets = [0, 0], sizes = [1, 32], strides = [1, 1]} : vector<7x32xf32> to vector<1x32xf32>
    %708 = vector.broadcast %707 : vector<1x32xf32> to vector<32x32xf32>
    %709 = arith.mulf %706, %708 : vector<32x32xf32>
    %710 = vector.extract_strided_slice %700 {offsets = [6, 0], sizes = [32, 32], strides = [1, 1]} : vector<48x32xf32> to vector<32x32xf32>
    %cst_223 = arith.constant 0.000000e+00 : f32
    %711 = vector.shape_cast %22 : vector<32x1xi1> to vector<32x1xi1>
    %712 = vector.broadcast %711 : vector<32x1xi1> to vector<32x32xi1>
    %713 = vector.broadcast %cst_223 : f32 to vector<32x32xf32>
    %714 = arith.select %712, %710, %713 : vector<32x32xi1>, vector<32x32xf32>
    %715 = vector.extract_strided_slice %701 {offsets = [1, 0], sizes = [1, 32], strides = [1, 1]} : vector<7x32xf32> to vector<1x32xf32>
    %716 = vector.broadcast %715 : vector<1x32xf32> to vector<32x32xf32>
    %717 = arith.mulf %714, %716 : vector<32x32xf32>
    %718 = arith.addf %709, %717 : vector<32x32xf32>
    %719 = vector.extract_strided_slice %700 {offsets = [7, 0], sizes = [32, 32], strides = [1, 1]} : vector<48x32xf32> to vector<32x32xf32>
    %cst_224 = arith.constant 0.000000e+00 : f32
    %720 = vector.shape_cast %31 : vector<32x1xi1> to vector<32x1xi1>
    %721 = vector.broadcast %720 : vector<32x1xi1> to vector<32x32xi1>
    %722 = vector.broadcast %cst_224 : f32 to vector<32x32xf32>
    %723 = arith.select %721, %719, %722 : vector<32x32xi1>, vector<32x32xf32>
    %724 = vector.extract_strided_slice %701 {offsets = [2, 0], sizes = [1, 32], strides = [1, 1]} : vector<7x32xf32> to vector<1x32xf32>
    %725 = vector.broadcast %724 : vector<1x32xf32> to vector<32x32xf32>
    %726 = arith.mulf %723, %725 : vector<32x32xf32>
    %727 = arith.addf %718, %726 : vector<32x32xf32>
    %728 = vector.extract_strided_slice %700 {offsets = [8, 0], sizes = [32, 32], strides = [1, 1]} : vector<48x32xf32> to vector<32x32xf32>
    %cst_225 = arith.constant 0.000000e+00 : f32
    %729 = vector.shape_cast %40 : vector<32x1xi1> to vector<32x1xi1>
    %730 = vector.broadcast %729 : vector<32x1xi1> to vector<32x32xi1>
    %731 = vector.broadcast %cst_225 : f32 to vector<32x32xf32>
    %732 = arith.select %730, %728, %731 : vector<32x32xi1>, vector<32x32xf32>
    %733 = vector.extract_strided_slice %701 {offsets = [3, 0], sizes = [1, 32], strides = [1, 1]} : vector<7x32xf32> to vector<1x32xf32>
    %734 = vector.broadcast %733 : vector<1x32xf32> to vector<32x32xf32>
    %735 = arith.mulf %732, %734 : vector<32x32xf32>
    %736 = arith.addf %727, %735 : vector<32x32xf32>
    %737 = vector.extract_strided_slice %700 {offsets = [9, 0], sizes = [32, 32], strides = [1, 1]} : vector<48x32xf32> to vector<32x32xf32>
    %cst_226 = arith.constant 0.000000e+00 : f32
    %738 = vector.shape_cast %49 : vector<32x1xi1> to vector<32x1xi1>
    %739 = vector.broadcast %738 : vector<32x1xi1> to vector<32x32xi1>
    %740 = vector.broadcast %cst_226 : f32 to vector<32x32xf32>
    %741 = arith.select %739, %737, %740 : vector<32x32xi1>, vector<32x32xf32>
    %742 = vector.extract_strided_slice %701 {offsets = [4, 0], sizes = [1, 32], strides = [1, 1]} : vector<7x32xf32> to vector<1x32xf32>
    %743 = vector.broadcast %742 : vector<1x32xf32> to vector<32x32xf32>
    %744 = arith.mulf %741, %743 : vector<32x32xf32>
    %745 = arith.addf %736, %744 : vector<32x32xf32>
    %746 = vector.extract_strided_slice %700 {offsets = [10, 0], sizes = [32, 32], strides = [1, 1]} : vector<48x32xf32> to vector<32x32xf32>
    %cst_227 = arith.constant 0.000000e+00 : f32
    %747 = vector.shape_cast %58 : vector<32x1xi1> to vector<32x1xi1>
    %748 = vector.broadcast %747 : vector<32x1xi1> to vector<32x32xi1>
    %749 = vector.broadcast %cst_227 : f32 to vector<32x32xf32>
    %750 = arith.select %748, %746, %749 : vector<32x32xi1>, vector<32x32xf32>
    %751 = vector.extract_strided_slice %701 {offsets = [5, 0], sizes = [1, 32], strides = [1, 1]} : vector<7x32xf32> to vector<1x32xf32>
    %752 = vector.broadcast %751 : vector<1x32xf32> to vector<32x32xf32>
    %753 = arith.mulf %750, %752 : vector<32x32xf32>
    %754 = arith.addf %745, %753 : vector<32x32xf32>
    %755 = vector.extract_strided_slice %700 {offsets = [11, 0], sizes = [32, 32], strides = [1, 1]} : vector<48x32xf32> to vector<32x32xf32>
    %cst_228 = arith.constant 0.000000e+00 : f32
    %756 = vector.shape_cast %67 : vector<32x1xi1> to vector<32x1xi1>
    %757 = vector.broadcast %756 : vector<32x1xi1> to vector<32x32xi1>
    %758 = vector.broadcast %cst_228 : f32 to vector<32x32xf32>
    %759 = arith.select %757, %755, %758 : vector<32x32xi1>, vector<32x32xf32>
    %760 = vector.extract_strided_slice %701 {offsets = [6, 0], sizes = [1, 32], strides = [1, 1]} : vector<7x32xf32> to vector<1x32xf32>
    %761 = vector.broadcast %760 : vector<1x32xf32> to vector<32x32xf32>
    %762 = arith.mulf %759, %761 : vector<32x32xf32>
    %763 = arith.addf %754, %762 : vector<32x32xf32>
    %c56_229 = arith.constant 56 : index
    %c0_230 = arith.constant 0 : index
    %764 = vector.load %arg2[%c56_229, %c0_230] : memref<176x128xf32, #tpu.memory_space<vmem>>, vector<1x32xf32>
    %765 = vector.broadcast %764 : vector<1x32xf32> to vector<32x32xf32>
    %766 = arith.addf %763, %765 : vector<32x32xf32>
    %c57 = arith.constant 57 : index
    %c0_231 = arith.constant 0 : index
    %767 = vector.load %arg2[%c57, %c0_231] : memref<176x128xf32, #tpu.memory_space<vmem>>, vector<1x32xf32>
    %c58 = arith.constant 58 : index
    %c0_232 = arith.constant 0 : index
    %768 = vector.load %arg2[%c58, %c0_232] : memref<176x128xf32, #tpu.memory_space<vmem>>, vector<1x32xf32>
    %cst_233 = arith.constant dense<0.000000e+00> : vector<32xf32>
    %769 = vector.multi_reduction <add>, %766, %cst_233 [1] : vector<32x32xf32> to vector<32xf32>
    %770 = vector.shape_cast %769 : vector<32xf32> to vector<32x1xf32>
    %cst_234 = arith.constant 3.125000e-02 : f32
    %771 = vector.broadcast %cst_234 : f32 to vector<32x1xf32>
    %772 = arith.mulf %770, %771 : vector<32x1xf32>
    %773 = arith.mulf %766, %766 : vector<32x32xf32>
    %cst_235 = arith.constant dense<0.000000e+00> : vector<32xf32>
    %774 = vector.multi_reduction <add>, %773, %cst_235 [1] : vector<32x32xf32> to vector<32xf32>
    %775 = vector.shape_cast %774 : vector<32xf32> to vector<32x1xf32>
    %cst_236 = arith.constant 3.125000e-02 : f32
    %776 = vector.broadcast %cst_236 : f32 to vector<32x1xf32>
    %777 = arith.mulf %775, %776 : vector<32x1xf32>
    %778 = arith.mulf %772, %772 : vector<32x1xf32>
    %779 = arith.subf %777, %778 : vector<32x1xf32>
    %cst_237 = arith.constant 0.000000e+00 : f32
    %780 = vector.broadcast %cst_237 : f32 to vector<32x1xf32>
    %781 = arith.maximumf %779, %780 : vector<32x1xf32>
    %782 = vector.broadcast %772 : vector<32x1xf32> to vector<32x32xf32>
    %783 = arith.subf %766, %782 : vector<32x32xf32>
    %cst_238 = arith.constant 9.99999997E-7 : f32
    %784 = vector.broadcast %cst_238 : f32 to vector<32x1xf32>
    %785 = arith.addf %781, %784 : vector<32x1xf32>
    %786 = math.rsqrt %785 : vector<32x1xf32>
    %787 = vector.broadcast %786 : vector<32x1xf32> to vector<32x32xf32>
    %788 = arith.mulf %783, %787 : vector<32x32xf32>
    %789 = vector.broadcast %767 : vector<1x32xf32> to vector<32x32xf32>
    %790 = arith.mulf %788, %789 : vector<32x32xf32>
    %791 = vector.broadcast %768 : vector<1x32xf32> to vector<32x32xf32>
    %792 = arith.addf %790, %791 : vector<32x32xf32>
    %793 = arith.truncf %792 : vector<32x32xf32> to vector<32x32xbf16>
    %c824 = arith.constant 824 : index
    %c0_239 = arith.constant 0 : index
    %794 = vector.load %arg1[%c824, %c0_239] : memref<984x128xbf16, #tpu.memory_space<vmem>>, vector<32x64xbf16>
    %cst_240 = arith.constant dense<0.000000e+00> : vector<32x64xf32>
    %795 = tpu.matmul %793, %794, %cst_240 {dimension_numbers = #tpu.dot_dimension_numbers<[1], [0], [0], [1], [0, 0, 1, 1], [], []>} : vector<32x32xbf16>, vector<32x64xbf16>, vector<32x64xf32> -> vector<32x64xf32>
    %c59 = arith.constant 59 : index
    %c0_241 = arith.constant 0 : index
    %796 = vector.load %arg2[%c59, %c0_241] : memref<176x128xf32, #tpu.memory_space<vmem>>, vector<1x64xf32>
    %797 = vector.broadcast %796 : vector<1x64xf32> to vector<32x64xf32>
    %798 = arith.addf %795, %797 : vector<32x64xf32>
    %cst_242 = arith.constant 5.000000e-01 : f32
    %799 = vector.broadcast %cst_242 : f32 to vector<32x64xf32>
    %800 = arith.mulf %799, %798 : vector<32x64xf32>
    %cst_243 = arith.constant 0.707106769 : f32
    %801 = vector.broadcast %cst_243 : f32 to vector<32x64xf32>
    %802 = arith.mulf %798, %801 : vector<32x64xf32>
    %803 = math.erf %802 : vector<32x64xf32>
    %cst_244 = arith.constant 1.000000e+00 : f32
    %804 = vector.broadcast %cst_244 : f32 to vector<32x64xf32>
    %805 = arith.addf %804, %803 : vector<32x64xf32>
    %806 = arith.mulf %800, %805 : vector<32x64xf32>
    %807 = arith.truncf %806 : vector<32x64xf32> to vector<32x64xbf16>
    %c856 = arith.constant 856 : index
    %c0_245 = arith.constant 0 : index
    %808 = vector.load %arg1[%c856, %c0_245] : memref<984x128xbf16, #tpu.memory_space<vmem>>, vector<64x32xbf16>
    %cst_246 = arith.constant dense<0.000000e+00> : vector<32x32xf32>
    %809 = tpu.matmul %807, %808, %cst_246 {dimension_numbers = #tpu.dot_dimension_numbers<[1], [0], [0], [1], [0, 0, 1, 1], [], []>} : vector<32x64xbf16>, vector<64x32xbf16>, vector<32x32xf32> -> vector<32x32xf32>
    %c60 = arith.constant 60 : index
    %c0_247 = arith.constant 0 : index
    %810 = vector.load %arg2[%c60, %c0_247] : memref<176x128xf32, #tpu.memory_space<vmem>>, vector<1x32xf32>
    %811 = vector.broadcast %810 : vector<1x32xf32> to vector<32x32xf32>
    %812 = arith.addf %809, %811 : vector<32x32xf32>
    %c61 = arith.constant 61 : index
    %c0_248 = arith.constant 0 : index
    %813 = vector.load %arg2[%c61, %c0_248] : memref<176x128xf32, #tpu.memory_space<vmem>>, vector<1x32xf32>
    %814 = vector.broadcast %813 : vector<1x32xf32> to vector<32x32xf32>
    %815 = arith.mulf %812, %814 : vector<32x32xf32>
    %816 = arith.addf %698, %815 : vector<32x32xf32>
    %c62 = arith.constant 62 : index
    %c0_249 = arith.constant 0 : index
    %817 = vector.load %arg2[%c62, %c0_249] : memref<176x128xf32, #tpu.memory_space<vmem>>, vector<1x32xf32>
    %c63 = arith.constant 63 : index
    %c0_250 = arith.constant 0 : index
    %818 = vector.load %arg2[%c63, %c0_250] : memref<176x128xf32, #tpu.memory_space<vmem>>, vector<1x32xf32>
    %cst_251 = arith.constant dense<0.000000e+00> : vector<32xf32>
    %819 = vector.multi_reduction <add>, %816, %cst_251 [1] : vector<32x32xf32> to vector<32xf32>
    %820 = vector.shape_cast %819 : vector<32xf32> to vector<32x1xf32>
    %cst_252 = arith.constant 3.125000e-02 : f32
    %821 = vector.broadcast %cst_252 : f32 to vector<32x1xf32>
    %822 = arith.mulf %820, %821 : vector<32x1xf32>
    %823 = arith.mulf %816, %816 : vector<32x32xf32>
    %cst_253 = arith.constant dense<0.000000e+00> : vector<32xf32>
    %824 = vector.multi_reduction <add>, %823, %cst_253 [1] : vector<32x32xf32> to vector<32xf32>
    %825 = vector.shape_cast %824 : vector<32xf32> to vector<32x1xf32>
    %cst_254 = arith.constant 3.125000e-02 : f32
    %826 = vector.broadcast %cst_254 : f32 to vector<32x1xf32>
    %827 = arith.mulf %825, %826 : vector<32x1xf32>
    %828 = arith.mulf %822, %822 : vector<32x1xf32>
    %829 = arith.subf %827, %828 : vector<32x1xf32>
    %cst_255 = arith.constant 0.000000e+00 : f32
    %830 = vector.broadcast %cst_255 : f32 to vector<32x1xf32>
    %831 = arith.maximumf %829, %830 : vector<32x1xf32>
    %832 = vector.broadcast %822 : vector<32x1xf32> to vector<32x32xf32>
    %833 = arith.subf %816, %832 : vector<32x32xf32>
    %cst_256 = arith.constant 9.99999997E-7 : f32
    %834 = vector.broadcast %cst_256 : f32 to vector<32x1xf32>
    %835 = arith.addf %831, %834 : vector<32x1xf32>
    %836 = math.rsqrt %835 : vector<32x1xf32>
    %837 = vector.broadcast %836 : vector<32x1xf32> to vector<32x32xf32>
    %838 = arith.mulf %833, %837 : vector<32x32xf32>
    %839 = vector.broadcast %817 : vector<1x32xf32> to vector<32x32xf32>
    %840 = arith.mulf %838, %839 : vector<32x32xf32>
    %841 = vector.broadcast %818 : vector<1x32xf32> to vector<32x32xf32>
    %842 = arith.addf %840, %841 : vector<32x32xf32>
    %843 = arith.truncf %842 : vector<32x32xf32> to vector<32x32xbf16>
    %c920 = arith.constant 920 : index
    %c0_257 = arith.constant 0 : index
    %844 = vector.load %arg1[%c920, %c0_257] : memref<984x128xbf16, #tpu.memory_space<vmem>>, vector<32x32xbf16>
    %cst_258 = arith.constant dense<0.000000e+00> : vector<32x32xf32>
    %845 = tpu.matmul %843, %844, %cst_258 {dimension_numbers = #tpu.dot_dimension_numbers<[1], [0], [0], [1], [0, 0, 1, 1], [], []>} : vector<32x32xbf16>, vector<32x32xbf16>, vector<32x32xf32> -> vector<32x32xf32>
    %c64 = arith.constant 64 : index
    %c0_259 = arith.constant 0 : index
    %846 = vector.load %arg2[%c64, %c0_259] : memref<176x128xf32, #tpu.memory_space<vmem>>, vector<1x32xf32>
    %847 = vector.broadcast %846 : vector<1x32xf32> to vector<32x32xf32>
    %848 = arith.addf %845, %847 : vector<32x32xf32>
    %849 = arith.truncf %848 : vector<32x32xf32> to vector<32x32xbf16>
    %c952 = arith.constant 952 : index
    %c0_260 = arith.constant 0 : index
    %850 = vector.load %arg1[%c952, %c0_260] : memref<984x128xbf16, #tpu.memory_space<vmem>>, vector<32x128xbf16>
    %cst_261 = arith.constant dense<0.000000e+00> : vector<32x128xf32>
    %851 = tpu.matmul %849, %850, %cst_261 {dimension_numbers = #tpu.dot_dimension_numbers<[1], [0], [0], [1], [0, 0, 1, 1], [], []>} : vector<32x32xbf16>, vector<32x128xbf16>, vector<32x128xf32> -> vector<32x128xf32>
    %c171 = arith.constant 171 : index
    %c0_262 = arith.constant 0 : index
    %852 = vector.load %arg2[%c171, %c0_262] : memref<176x128xf32, #tpu.memory_space<vmem>>, vector<1x128xf32>
    %853 = vector.broadcast %852 : vector<1x128xf32> to vector<32x128xf32>
    %854 = arith.addf %851, %853 : vector<32x128xf32>
    %855 = tpu.iota {dimensions = array<i32: 1>} : vector<32x128xi32>
    %c126_i32 = arith.constant 126 : i32
    %856 = vector.broadcast %c126_i32 : i32 to vector<32x128xi32>
    %857 = arith.cmpi eq, %855, %856 : vector<32x128xi32>
    %858 = arith.sitofp %468 : vector<32x1xi32> to vector<32x1xf32>
    %cst_263 = arith.constant 0.000000e+00 : f32
    %859 = vector.shape_cast %858 : vector<32x1xf32> to vector<32x1xf32>
    %860 = vector.broadcast %859 : vector<32x1xf32> to vector<32x128xf32>
    %861 = vector.broadcast %cst_263 : f32 to vector<32x128xf32>
    %862 = arith.select %857, %860, %861 : vector<32x128xi1>, vector<32x128xf32>
    %863 = arith.addf %854, %862 : vector<32x128xf32>
    %c127_i32 = arith.constant 127 : i32
    %864 = vector.broadcast %c127_i32 : i32 to vector<32x128xi32>
    %865 = arith.cmpi eq, %855, %864 : vector<32x128xi32>
    %cst_264 = arith.constant 0.000000e+00 : f32
    %866 = vector.shape_cast %486 : vector<1x1xf32> to vector<1x1xf32>
    %867 = vector.broadcast %866 : vector<1x1xf32> to vector<32x128xf32>
    %868 = vector.broadcast %cst_264 : f32 to vector<32x128xf32>
    %869 = arith.select %865, %867, %868 : vector<32x128xi1>, vector<32x128xf32>
    %870 = arith.addf %863, %869 : vector<32x128xf32>
    %c0_265 = arith.constant 0 : index
    %c0_266 = arith.constant 0 : index
    %871 = vector.load %arg3[%c0_265, %c0_266] : memref<32x128xf32, #tpu.memory_space<vmem>>, vector<32x128xf32>
    tpu.vector_store %arg3[%c0_265, %c0_266], %870 {strides = array<i32>} : memref<32x128xf32, #tpu.memory_space<vmem>>, vector<32x128xf32>,
    return
  }
}

</mosaic_0001>

<bundles_post_ra>
// kernel: coco_forward.1
= control target key start
LH: loop header
LB: loop body
LE: loop exit
PB: predicated region body
PF: predicated region fallthrough
CT: control target
= control target key end

     0   :  { %8 = vsyncpa [#allocation4], 0  ;;  %s8869_s0 = inlined_call_operand.vmem [shape: bf16[32,56], index: 0, kind: input, shape index: {}]   ;;  %s8870_s1 = inlined_call_operand.hbm [shape: bf16[984,128], index: 1, kind: input, shape index: {}]   ;;  %s8871_s2 = inlined_call_operand.hbm [shape: f32[176,128], index: 2, kind: input, shape index: {}]   ;;  %s8872_s3 = inlined_call_operand.vmem [shape: f32[32,128], index: 3, kind: output, shape index: {}]  }
   0x1   :  { %s16_s14 = sshll.u32 %s8870_s1, 4  ;;  %s17_s14 = int_to_ptr.hbm [resolvable:$true] %s16_s14 }
   0x2   :  { %9 = vsyncpa [#allocation6], 0  ;;  %s6026_s15 = smov [#allocation3]   ;;  %s29_s19 = sshll.u32 %s8871_s2, 4  ;;  %s30_s19 = int_to_ptr.hbm [resolvable:$true] %s29_s19 }
   0x3   :  { %s18_s16 = sshll.u32 %s6026_s15, 4  ;;  %s6027_s20 = smov 64   ;;  %s19_s16 = int_to_ptr.vmem [resolvable:$true] %s18_s16 }
   0x4   :  { %s6028_s21 = smov 4   ;;  %s6029_s22 = smov [#allocation5]  }
   0x5   :  { %24 = dma.hbm_to_vmem [thread:$0]  %s17_s14, 7872, %s19_s16, [#allocation4], %s6027_s20, %s6027_s20, %s6028_s21  }
   0x6   :  { %s31_s23 = sshll.u32 %s6029_s22, 4  ;;  %s6030_s24 = smov 128   ;;  %s32_s23 = int_to_ptr.vmem [resolvable:$true] %s31_s23 }
   0x7   :  { %s6031_s25 = smov 8  }
   0x8   :  { %37 = dma.hbm_to_vmem [thread:$0]  %s30_s19, 2816, %s32_s23, [#allocation6], %s6030_s24, %s6030_s24, %s6031_s25  }
   0x9   :  { %6022 = dma.done.wait [#allocation4], 7872  }
   0xa   :  { %6023 = vsyncadd [#allocation4], 4294959424 }
   0xb   :  { %6024 = dma.done.wait [#allocation6], 2816  }
   0xc   :  { %6025 = vsyncadd [#allocation6], 4294964480  ;;  %v183_v0 = vld [vmem:[#allocation3 + $0x18] sm:$0xf]  ;;  %vm224_vm0 = vcmask 1043456   ;;  %vm8884_vm1 = vcmask 261120   ;;  %v8887_v10 = vlaneseq }
   0xd   :  { %v209_v1 = vunpack.c.l.b16 %v183_v0  ;;  %v5742_v4 = vld [vmem:[#allocation3 + $0x10] sm:$0xff]  ;;  %v8881_v5 = vmov 0.0   ;;  %v5741_v6 = vld [vmem:[#allocation3 + $0x8] sm:$0xff]  ;;  %v5740_v7 = vld [vmem:[#allocation3] sm:$0xff]  ;;  %vm217_vm2 = vcmask 457728   ;;  %vm6033_vm5 = vmmov 1  }
   0xe   :  { %51 = vst.msk [vmem:[#allocation2 + $0x8] sm:$0xff] %vm8884_vm1, %v8881_v5  ;;  %v5738_v8 = vld [vmem:[%s8869_s0] sm:$0xff]  ;;  %v5739_v9 = vld [vmem:[%s8869_s0 + $0x8] sm:$0xff]  ;;  %v57_v11 = vshrl.u32 %v8887_v10, 7  ;;  %vm6088_vm6 = vmpackc.low %vm6033_vm5, %vm6033_vm5  ;;  %v9036_v16 = vmov 0  ;;  %v8888_v17 = vmov 0  }
   0xf   :  { %v213_v2 = vpack.c.b16 %v209_v1, %v209_v1  ;;  %50 = vst.msk [vmem:[#allocation2] sm:$0xff] %vm8884_vm1, %v8881_v5  ;;  %v9037_v16 = vsel %vm6088_vm6, 4294967295, %v9036_v16  ;;  %v6099_v21 = vsel %vm6088_vm6, 65537, %v8888_v17  ;;  %v6133_v38 = vunpack.c.l.b16 %v8888_v17 }
  0x10   :  { %52 = vst.msk [vmem:[#allocation2 + $0x10] sm:$0xff] %vm8884_vm1, %v8881_v5  ;;  %v61_v12 = vand.u32 15, %v57_v11  ;;  %v59_v15 = vadd.s32 16, %v57_v11  ;;  %v58_v19 = vadd.s32 8, %v57_v11  ;;  %v6110_v26 = vshrl.u32 %v6099_v21, 16 }
  0x11   :  { %v226_v3 = vsel %vm224_vm0, %v213_v2, 0  ;;  %53 = vst.msk [vmem:[#allocation2 + $0x18] sm:$0xff] %vm8884_vm1, %v8881_v5  ;;  %v6124_v32 = vshll.u32 %v6099_v21, 16  ;;  %vm8883_vm13 = vcmask 1042432   ;;  %v6137_v41 = vunpack.c.h.b16 %v8888_v17 }
  0x12   :  { %232 = vmatpush.bf16.msra.mxu0 %v226_v3  ;;  %54 = vst.msk [vmem:[#allocation2 + $0x20] sm:$0xff] %vm8884_vm1, %v8881_v5  ;;  %v6080_v13 = vadd.s32 4294967293, %v61_v12  ;;  %v6086_v14 = vadd.s32 4294967294, %v61_v12  ;;  %v6094_v20 = vand.u32 15, %v59_v15  ;;  %v6101_v24 = vand.u32 15, %v58_v19 }
  0x13   :  { %55 = vst.msk [vmem:[#allocation2 + $0x28] sm:$0xff] %vm8884_vm1, %v8881_v5  ;;  %v294_v36 = vrot.slane %v6110_v26, 5  ;;  %v6130_v37 = vadd.s32 4294967295, %v61_v12  ;;  %v297_v40 = vrot.slane %v6124_v32, 6  ;;  %vm382_vm15 = vcmask 1046532  }
  0x14   :  { %vm8880_vm3 = vcmp.ge.s32.totalorder %v6080_v13, 0  ;;  %vm8879_vm7 = vcmp.ge.s32.totalorder %v6086_v14, 0  ;;  %v6107_v25 = vadd.s32 4294967293, %v6094_v20  ;;  %v6118_v30 = vadd.s32 3, %v6101_v24 }
  0x15   :  { %vm271_vm4 = vmpackc.low %vm8880_vm3, %vm8880_vm3  ;;  %v6121_v31 = vadd.s32 4294967294, %v6094_v20  ;;  %v6143_v46 = vrot.slane %v6099_v21, 5  ;;  %vm279_vm0 = vsmask.f32 2304  ;;  %v6154_v53 = vor.u32 %v297_v40, %v294_v36 }
  0x16   :  { %233 = vmatpush.bf16.msra.mxu0 %v5742_v4  ;;  %v275_v18 = vsel %vm271_vm4, 65537, %v8888_v17  ;;  %vm373_vm8 = vmpackc.low %vm8879_vm7, %vm8879_vm7  ;;  %9038 = vst [vmem:[#allocation9_spill] sm:$0xff] %v6107_v25  ;;  %vm8874_vm9 = vcmp.ge.s32.totalorder %v6107_v25, 0  ;;  %vm8875_vm12 = vcmp.lt.s32.totalorder %v6118_v30, 16  ;;  %v251_v47 = vld [vmem:[#allocation2] sm:$0xff]  ;;  %v60_v54 = vadd.s32 24, %v57_v11 }
  0x17   :  { %v283_v22 = vshrl.u32 %v275_v18, 16  ;;  %v286_v23 = vshll.u32 %v275_v18, 16  ;;  %v377_v27 = vsel %vm373_vm8, 65537, %v8888_v17  ;;  %vm273_vm10 = vmpackc.low %vm8874_vm9, %vm8874_vm9  ;;  %9039 = vst [vmem:[#allocation10_spill] sm:$0xff] %v6121_v31  ;;  %vm8873_vm11 = vcmp.ge.s32.totalorder %v6121_v31, 0 }
  0x18   :  { %v384_v33 = vrot.slane %v377_v27, 5  ;;  %v277_v34 = vsel %vm273_vm10, 65537, %v8888_v17  ;;  %vm375_vm14 = vmpackc.low %vm8873_vm11, %vm8873_vm11  ;;  %vm280_vm4 = vsmask.f32 6416  ;;  %v6167_v60 = vpack.c.bf16 %v251_v47, %v251_v47 }
  0x19   :  { %v285_v28 = vrot.slane %v283_v22, 5  ;;  %v288_v29 = vrot.slane %v286_v23, 6  ;;  %v302_v43 = vshrl.u32 %v277_v34, 16  ;;  %v305_v44 = vshll.u32 %v277_v34, 16  ;;  %vm6157_vm8 = vmor %vm8883_vm13, %vm382_vm15 }
  0x1a   :  { %234 = vmatpush.bf16.msra.mxu0 %v5741_v6  ;;  %v395_v39 = vunpack.c.l.b16 %v384_v33  ;;  %v396_v42 = vunpack.c.h.b16 %v384_v33  ;;  %v385_v45 = vrot.slane %v384_v33, 4  ;;  %v379_v51 = vsel %vm375_vm14, 65537, %v8888_v17  ;;  %vm6174_vm14 = vmor %vm279_vm0, %vm280_vm4 }
  0x1b   :  { %v289_v35 = vor.u32 %v288_v29, %v285_v28  ;;  %v304_v57 = vrot.slane %v302_v43, 5  ;;  %v307_v58 = vrot.slane %v305_v44, 6  ;;  %v6170_v61 = vrot.slane %v6143_v46, 4  ;;  %v5744_v43 = vld [vmem:[#allocation3 + $0x24] sm:$0xff] }
  0x1c   :  { %vm6150_vm5 = vcmp.ne.s32.totalorder %v395_v39, %v6133_v38  ;;  %vm6162_vm10 = vcmp.ne.s32.totalorder %v396_v42, %v6137_v41  ;;  %v1155_v63 = vrot.slane %v6110_v26, 6  ;;  %v1158_v0 = vrot.slane %v6124_v32, 7  ;;  %v5746_v42 = vld [vmem:[#allocation3 + $0x34] sm:$0xff]  ;;  %5803 = vmatpush.bf16.msra.mxu2 %v5744_v43 }
  0x1d   :  { %v290_v48 = vrot.slane %v289_v35, 4  ;;  %v321_v49 = vunpack.c.l.b16 %v289_v35  ;;  %v322_v50 = vunpack.c.h.b16 %v289_v35  ;;  %v389_v1 = vrot.slane %v379_v51, 5  ;;  %vm401_vm0 = vmpackc.low %vm6162_vm10, %vm6150_vm5  ;;  %v6250_v51 = vld [vmem:[#allocation5] ss:$0 sm:$0xff]  ;;  %482 = vmatpush.bf16.msra.mxu1 %v5746_v42  ;;  %5801 = vmatpush.bf16.msra.mxu3 %v5746_v42 }
  0x1e   :  { %235 = vmatpush.bf16.msra.mxu0 %v5740_v7  ;;  %v6190_v4 = vand.u32 15, %v60_v54  ;;  %v387_v6 = vsel %vm6157_vm8, %v385_v45, %v6143_v46  ;;  %v6203_v11 = vrot.slane %v6154_v53, 4  ;;  %v308_v12 = vor.u32 %v307_v58, %v304_v57 }
  0x1f   :  { %vm6181_vm15 = vcmp.ne.s32.totalorder %v321_v49, %v6133_v38  ;;  %vm8878_vm4 = vcmp.ge.s32.totalorder %v6130_v37, 0  ;;  %v6213_v18 = vor.u32 %v1158_v0, %v1155_v63  ;;  %v6218_v23 = vsel %vm6157_vm8, %v6170_v61, %v389_v1 }
  0x20   :  { %v6211_v15 = vadd.s32 3, %v6190_v4  ;;  %v402_v27 = vunpack.c.l.b16 %v387_v6  ;;  %v403_v28 = vunpack.c.h.b16 %v387_v6  ;;  %v6221_v29 = vsel %vm401_vm0, %v6167_v60, 0  ;;  %vm580_vm9 = vmpackc.low %vm8878_vm4, %vm8878_vm4 }
  0x21   :  { %5410 = vmatmul.msk.bf16.vlgmr.msra.gmra.mxu0 %vm217_vm2, %v5738_v8  ;;  %9052 = vst [vmem:[#allocation11_spill] sm:$0xff] %v6221_v29  ;;  %v391_v33 = vrot.slane %v389_v1, 4  ;;  %vm1149_vm5 = vsmask.f32 1280  ;;  %vm1150_vm10 = vsmask.f32 5392  ;;  %v6229_v35 = vsel %vm6174_vm14, %v6203_v11, %v308_v12 }
  0x22   :  { %v6240_v40 = vadd.s32 4294967295, %v6094_v20  ;;  %v310_v44 = vrot.slane %v308_v12, 4  ;;  %vm8876_vm0 = vcmp.lt.s32.totalorder %v6211_v15, 16  ;;  %v1160_v45 = vrot.slane %v6213_v18, 4  ;;  %v5745_v20 = vld [vmem:[#allocation3 + $0x2c] sm:$0xff]  ;;  %559 = vmatpush.bf16.msrb.mxu0 %v5744_v43 }
  0x23   :  { %v6255_v52 = vsel %vm6157_vm8, %v391_v33, %v6143_v46  ;;  %v409_v54 = vunpack.c.l.b16 %v6218_v23  ;;  %v410_v56 = vunpack.c.h.b16 %v6218_v23  ;;  %v9057_v58 = vmov 0  ;;  %vm1144_vm8 = vmpackc.low %vm8876_vm0, %vm8876_vm0  ;;  %483 = vmatpush.bf16.msra.mxu1 %v5745_v20  ;;  %5802 = vmatpush.bf16.msra.mxu3 %v5745_v20 }
  0x24   :  { %9054 = vst [vmem:[#allocation13_spill] sm:$0xff] %v6240_v40  ;;  %v335_v46 = vunpack.c.l.b16 %v6229_v35  ;;  %v336_v55 = vunpack.c.h.b16 %v6229_v35  ;;  %v1191_v63 = vunpack.c.l.b16 %v6213_v18  ;;  %v6280_v0 = vsel %vm6174_vm14, %v310_v44, %v6154_v53 }
  0x25   :  { %v9063_v1 = vmov 0  ;;  %v9065_v2 = vmov 0  ;;  %v1148_v3 = vsel %vm1144_vm8, 65537, %v8888_v17  ;;  %v342_v33 = vunpack.c.l.b16 %v6280_v0 }
  0x26   :  { %v6309_v44 = vrot.slane %v6124_v32, 5  ;;  %vm588_vm8 = vsmask.f32 3328  ;;  %vm589_vm0 = vsmask.f32 7440  ;;  %vm6329_vm4 = vcmp.ne.s32.totalorder %v410_v56, %v6137_v41 }
  0x27   :  { %v9082_v56 = vmov 0  ;;  %vm6353_vm13 = vcmp.ne.s32.totalorder %v335_v46, %v6133_v38  ;;  %v9106_v57 = vmov 0 }
  0x31   :  { %5411 = vmatmul.msk.bf16.gmra.mxu0 %vm217_vm2, %v5739_v9  ;;  %vm1142_vm2 = vmpackc.low %vm8875_vm12, %vm8875_vm12  ;;  %v299_v9 = vsel %vm6174_vm14, %v290_v48, %v6154_v53  ;;  %v1192_v53 = vunpack.c.h.b16 %v6213_v18 }
  0x32   :  { %v1146_v59 = vsel %vm1142_vm2, 65537, %v8888_v17  ;;  %vm6186_vm2 = vcmp.ne.s32.totalorder %v322_v50, %v6137_v41  ;;  %v328_v34 = vunpack.c.l.b16 %v299_v9  ;;  %v329_v36 = vunpack.c.h.b16 %v299_v9  ;;  %vm6245_vm12 = vmor %vm1149_vm5, %vm1150_vm10 }
  0x33   :  { %v1162_v7 = vshrl.u32 %v1146_v59, 16  ;;  %v1165_v8 = vshll.u32 %v1146_v59, 16  ;;  %vm327_vm11 = vmpackc.low %vm6186_vm2, %vm6181_vm15  ;;  %v584_v50 = vsel %vm580_vm9, 65537, %v8888_v17  ;;  %vm6266_vm9 = vcmp.ne.s32.totalorder %v403_v28, %v6137_v41 }
  0x34   :  { %v6237_v39 = vsel %vm327_vm11, %v6167_v60, 0  ;;  %vm6261_vm11 = vcmp.ne.s32.totalorder %v402_v27, %v6133_v38  ;;  %v9060_v59 = vmov 0  ;;  %vm8877_vm15 = vcmp.ge.s32.totalorder %v6240_v40, 0 }
  0x35   :  { %v1164_v19 = vrot.slane %v1162_v7, 6  ;;  %v1167_v22 = vrot.slane %v1165_v8, 7  ;;  %9053 = vst [vmem:[#allocation12_spill] sm:$0xff] %v6237_v39  ;;  %v9058_v58 = vsel %vm6261_vm11, 4294967295, %v9057_v58  ;;  %v9061_v59 = vsel %vm6266_vm9, 4294967295, %v9060_v59  ;;  %vm582_vm14 = vmpackc.low %vm8877_vm15, %vm8877_vm15 }
  0x36   :  { %9059 = vst [vmem:[#allocation14_spill] sm:$0xff] %v9058_v58  ;;  %vm6283_vm2 = vcmp.ne.s32.totalorder %v328_v34, %v6133_v38  ;;  %vm6288_vm5 = vcmp.ne.s32.totalorder %v329_v36, %v6137_v41  ;;  %v416_v7 = vunpack.c.l.b16 %v6255_v52  ;;  %v1182_v8 = vshrl.u32 %v1148_v3, 16 }
  0x37   :  { %v1168_v47 = vor.u32 %v1167_v22, %v1164_v19  ;;  %9062 = vst [vmem:[#allocation15_spill] sm:$0xff] %v9061_v59  ;;  %v9064_v1 = vsel %vm6283_vm2, 4294967295, %v9063_v1  ;;  %v9066_v2 = vsel %vm6288_vm5, 4294967295, %v9065_v2  ;;  %v1185_v9 = vshll.u32 %v1148_v3, 16 }
  0x38   :  { %v592_v12 = vshll.u32 %v584_v50, 16  ;;  %v595_v23 = vshrl.u32 %v584_v50, 16  ;;  %v607_v27 = vrot.slane %v6110_v26, 4  ;;  %v417_v28 = vunpack.c.h.b16 %v6255_v52 }
  0x39   :  { %v1169_v6 = vsel %vm6245_vm12, %v1160_v45, %v1168_v47  ;;  %v1170_v22 = vrot.slane %v1168_v47, 4  ;;  %v343_v34 = vunpack.c.h.b16 %v6280_v0  ;;  %v1184_v36 = vrot.slane %v1182_v8, 6  ;;  %v5743_v47 = vld [vmem:[#allocation3 + $0x1c] sm:$0xff] }
  0x3a   :  { %v1198_v35 = vunpack.c.l.b16 %v1169_v6  ;;  %v1187_v42 = vrot.slane %v1185_v9, 7  ;;  %v1199_v43 = vunpack.c.h.b16 %v1169_v6  ;;  %vm6312_vm10 = vcmp.ne.s32.totalorder %v1191_v63, %v6133_v38  ;;  %560 = vmatpush.bf16.msrb.mxu0 %v5743_v47  ;;  %5804 = vmatpush.bf16.msra.mxu2 %v5743_v47 }
  0x3b   :  { %v9067_v50 = vmov 0  ;;  %v586_v3 = vsel %vm582_vm14, 65537, %v8888_v17  ;;  %v6320_v20 = vsel %vm6245_vm12, %v1170_v22, %v6213_v18  ;;  %v597_v6 = vrot.slane %v595_v23, 4  ;;  %v5750_v18 = vld [vmem:[#allocation3 + $0x54] sm:$0xff] }
  0x3c   :  { %v9068_v50 = vsel %vm6312_vm10, 4294967295, %v9067_v50  ;;  %v608_v8 = vor.u32 %v607_v27, %v6309_v44  ;;  %vm6324_vm15 = vcmp.ne.s32.totalorder %v409_v54, %v6133_v38  ;;  %v9070_v9 = vmov 0  ;;  %809 = vmatpush.bf16.msrb.mxu1 %v5750_v18 }
  0x3d   :  { %9069 = vst [vmem:[#allocation16_spill] sm:$0xff] %v9068_v50  ;;  %v9071_v9 = vsel %vm6324_vm15, 4294967295, %v9070_v9  ;;  %v9073_v63 = vmov 0  ;;  %vm6334_vm14 = vcmp.ne.s32.totalorder %v1192_v53, %v6137_v41  ;;  %v615_v22 = vshrl.u32 %v586_v3, 16 }
  0x3e   :  { %9072 = vst [vmem:[#allocation17_spill] sm:$0xff] %v9071_v9  ;;  %v9074_v63 = vsel %vm6329_vm4, 4294967295, %v9073_v63  ;;  %v6338_v27 = vor.u32 %v1187_v42, %v1184_v36  ;;  %vm6341_vm7 = vcmp.ne.s32.totalorder %v1198_v35, %v6133_v38  ;;  %v9079_v54 = vmov 0 }
  0x3f   :  { %9075 = vst [vmem:[#allocation18_spill] sm:$0xff] %v9074_v63  ;;  %v9080_v54 = vsel %vm6341_vm7, 4294967295, %v9079_v54  ;;  %vm6346_vm3 = vcmp.ne.s32.totalorder %v1199_v43, %v6137_v41  ;;  %v6350_v53 = vrot.slane %v608_v8, 4  ;;  %v9088_v35 = vmov 0  ;;  %vm6365_vm7 = vmor %vm588_vm8, %vm589_vm0 }
  0x40   :  { %9081 = vst [vmem:[#allocation20_spill] sm:$0xff] %v9080_v54  ;;  %v9083_v56 = vsel %vm6346_vm3, 4294967295, %v9082_v56  ;;  %v1205_v36 = vunpack.c.l.b16 %v6320_v20  ;;  %vm6410_vm0 = vcmp.ne.s32.totalorder %v416_v7, %v6133_v38  ;;  %v9109_v58 = vmov 0 }
  0x41   :  { %9084 = vst [vmem:[#allocation21_spill] sm:$0xff] %v9083_v56  ;;  %v9118_v42 = vmov 0  ;;  %v9154_v56 = vmov 0 }
  0x9e   :  { %v237_v62 = vpop.f32.mrf.mxu0 }
  0x9f   :  { %v238_v19 = vadd.f32 %v6250_v51, %v237_v62  ;;  %v594_v62 = vrot.slane %v592_v12, 5  ;;  %v9076_v12 = vmov 0 }
  0xa0   :  { %v9077_v12 = vsel %vm6334_vm14, 4294967295, %v9076_v12 }
  0xa1   :  { %247 = vst.msk [vmem:[#allocation2 + $0x8] sm:$0xff] %vm8884_vm1, %v238_v19  ;;  %v611_v19 = vshll.u32 %v586_v3, 16  ;;  %v630_v23 = vunpack.c.l.b16 %v594_v62  ;;  %v598_v47 = vor.u32 %v597_v6, %v594_v62  ;;  %v9085_v3 = vmov 0 }
  0xa2   :  { %9078 = vst [vmem:[#allocation19_spill] sm:$0xff] %v9077_v12  ;;  %v9086_v3 = vsel %vm6353_vm13, 4294967295, %v9085_v3  ;;  %vm6358_vm1 = vcmp.ne.s32.totalorder %v336_v55, %v6137_v41  ;;  %v617_v6 = vrot.slane %v615_v22, 4  ;;  %v631_v8 = vunpack.c.h.b16 %v594_v62  ;;  %v5755_v12 = vld [vmem:[#allocation3 + $0x7c] sm:$0xff] }
  0xa3   :  { %9087 = vst [vmem:[#allocation22_spill] sm:$0xff] %v9086_v3  ;;  %v9089_v35 = vsel %vm6358_vm1, 4294967295, %v9088_v35  ;;  %v613_v43 = vrot.slane %v611_v19, 5  ;;  %v599_v17 = vrot.slane %v598_v47, 4  ;;  %vm6384_vm8 = vcmp.ne.s32.totalorder %v630_v23, %v6133_v38 }
  0xa4   :  { %9090 = vst [vmem:[#allocation23_spill] sm:$0xff] %v9089_v35  ;;  %vm6389_vm13 = vcmp.ne.s32.totalorder %v631_v8, %v6137_v41  ;;  %vm9097_vm1 = vcmask 261120   ;;  %v6402_v23 = vsel %vm6245_vm12, %v1160_v45, %v6338_v27  ;;  %v5748_v8 = vld [vmem:[#allocation3 + $0x44] sm:$0xff]  ;;  %v9125_v22 = vmov 0 }
  0xa5   :  { %v618_v62 = vor.u32 %v617_v6, %v613_v43  ;;  %v9098_v6 = vmov 0  ;;  %v1212_v55 = vunpack.c.l.b16 %v6402_v23  ;;  %738 = vmatpush.bf16.msrb.mxu3 %v5748_v8  ;;  %v1213_v18 = vunpack.c.h.b16 %v6402_v23  ;;  %v5749_v8 = vld [vmem:[#allocation3 + $0x4c] sm:$0xff]  ;;  %v5756_v23 = vld [vmem:[#allocation3 + $0x84] sm:$0xff] }
  0xa6   :  { %v239_v5 = vpop.f32.mrf.mxu0  ;;  %v9099_v6 = vsel %vm6410_vm0, 4294967295, %v9098_v6  ;;  %vm9104_vm0 = vmpackc.low %vm6266_vm9, %vm6261_vm11  ;;  %810 = vmatpush.bf16.msrb.mxu1 %v5749_v8  ;;  %1299 = vmatpush.bf16.msra.mxu0 %v5756_v23  ;;  %v6536_v23 = vadd.s32 1, %v6101_v24 }
  0xa7   :  { %v240_v46 = vadd.f32 %v6250_v51, %v239_v5  ;;  %v614_v5 = vsel %vm6365_vm7, %v6350_v53, %v613_v43  ;;  %v604_v43 = vsel %vm6365_vm7, %v599_v17, %v6309_v44  ;;  %9100 = vst [vmem:[#allocation24_spill] sm:$0xff] %v9099_v6  ;;  %v619_v17 = vrot.slane %v618_v62, 4  ;;  %vm9121_vm9 = vmpackc.low %vm6334_vm14, %vm6312_vm10 }
  0xa8   :  { %v252_v48 = vld [vmem:[#allocation2 + $0x8] sm:$0xff]  ;;  %v637_v49 = vunpack.c.l.b16 %v604_v43  ;;  %v638_v52 = vunpack.c.h.b16 %v604_v43  ;;  %v644_v62 = vunpack.c.l.b16 %v614_v5  ;;  %v645_v10 = vunpack.c.h.b16 %v614_v5 }
  0xa9   :  { %248 = vst.msk [vmem:[#allocation2 + $0x10] sm:$0xff] %vm9097_vm1, %v240_v46  ;;  %v6394_v47 = vpack.c.bf16 %v252_v48, %v252_v48  ;;  %vm6415_vm1 = vcmp.ne.s32.totalorder %v417_v28, %v6137_v41  ;;  %v9101_v48 = vmov 0  ;;  %v350_v46 = vunpack.c.h.b16 %v6203_v11 }
  0xaa   :  { %v9102_v48 = vsel %vm6415_vm1, 4294967295, %v9101_v48  ;;  %vm9105_vm1 = vmpackc.low %vm6288_vm5, %vm6283_vm2  ;;  %v624_v5 = vsel %vm6365_vm7, %v619_v17, %v6309_v44  ;;  %vm6461_vm12 = vcmp.ne.s32.totalorder %v637_v49, %v6133_v38  ;;  %vm6466_vm11 = vcmp.ne.s32.totalorder %v638_v52, %v6137_v41  ;;  %1300 = vmatpush.bf16.msra.mxu0 %v5755_v12 }
  0xab   :  { %9103 = vst [vmem:[#allocation25_spill] sm:$0xff] %v9102_v48  ;;  %v431_v7 = vsel %vm9104_vm0, %v6394_v47, 0  ;;  %v357_v28 = vsel %vm9105_vm1, %v6394_v47, 0  ;;  %vm6445_vm0 = vcmp.ne.s32.totalorder %v342_v33, %v6133_v38  ;;  %vm6452_vm1 = vcmp.ne.s32.totalorder %v343_v34, %v6137_v41  ;;  %vm9122_vm5 = vmpackc.low %vm6389_vm13, %vm6384_vm8 }
  0xac   :  { %v445_v43 = vunpack.c.l.b16 %v431_v7  ;;  %v501_v45 = vunpack.c.l.b16 %v357_v28  ;;  %v9107_v57 = vsel %vm6445_vm0, 4294967295, %v9106_v57  ;;  %v9110_v58 = vsel %vm6452_vm1, 4294967295, %v9109_v58  ;;  %vm9128_vm13 = vmpackc.low %vm6466_vm11, %vm6461_vm12 }
  0xad   :  { %9108 = vst [vmem:[#allocation26_spill] sm:$0xff] %v9107_v57  ;;  %v9112_v33 = vmov 0  ;;  %v9115_v7 = vmov 0  ;;  %v9117_v34 = vunpack.c.l.b16 %v6237_v39  ;;  %v767_v44 = vsel %vm6088_vm6, %v6394_v47, 0 }
  0xae   :  { %9111 = vst [vmem:[#allocation27_spill] sm:$0xff] %v9110_v58  ;;  %v9113_v33 = vsel %vm6461_vm12, 4294967295, %v9112_v33  ;;  %v9116_v7 = vsel %vm6466_vm11, 4294967295, %v9115_v7  ;;  %v242_v0 = vpop.f32.mrf.mxu0  ;;  %vm6476_vm7 = vcmp.ne.s32.totalorder %v1205_v36, %v6133_v38  ;;  %v1226_v17 = vsel %vm9121_vm9, %v6394_v47, 0  ;;  %vm9140_vm12 = vmpackc.low %vm6329_vm4, %vm6324_vm15 }
  0xaf   :  { %9114 = vst [vmem:[#allocation28_spill] sm:$0xff] %v9113_v33  ;;  %v505_v28 = vpack.c.b16 %v501_v45, %v9117_v34  ;;  %v9119_v42 = vsel %vm6476_vm7, 4294967295, %v9118_v42  ;;  %v6496_v36 = vsel %vm9122_vm5, %v6167_v60, 0  ;;  %v243_v45 = vadd.f32 %v6250_v51, %v242_v0  ;;  %v5747_v34 = vld [vmem:[#allocation3 + $0x3c] sm:$0xff] }
  0xb0   :  { %9120 = vst [vmem:[#allocation29_spill] sm:$0xff] %v9119_v42  ;;  %v9124_v49 = vunpack.c.l.b16 %v6221_v29  ;;  %vm6508_vm2 = vcmp.ne.s32.totalorder %v644_v62, %v6133_v38  ;;  %v666_v60 = vsel %vm9128_vm13, %v6394_v47, 0  ;;  %v253_v19 = vld [vmem:[#allocation2 + $0x10] sm:$0xff]  ;;  %vm9129_vm5 = vnez %v9080_v54  ;;  %739 = vmatpush.bf16.msrb.mxu3 %v5747_v34 }
  0xb1   :  { %9123 = vst [vmem:[#allocation30_spill] sm:$0xff] %v6496_v36  ;;  %v9126_v22 = vsel %vm6508_vm2, 4294967295, %v9125_v22  ;;  %v510_v0 = vshrl.u32 %v505_v28, 16  ;;  %v513_v50 = vshll.u32 %v505_v28, 16  ;;  %vm6523_vm9 = vcmp.ne.s32.totalorder %v645_v10, %v6137_v41 }
  0xb2   :  { %v6505_v52 = vpack.c.b16 %v445_v43, %v9124_v49  ;;  %9127 = vst [vmem:[#allocation31_spill] sm:$0xff] %v9126_v22  ;;  %v9130_v62 = vmov 0  ;;  %v651_v43 = vunpack.c.l.b16 %v624_v5  ;;  %vm9133_vm10 = vcmask 261120  }
  0xb3   :  { %v9131_v62 = vsel %vm6523_vm9, 4294967295, %v9130_v62  ;;  %249 = vst.msk [vmem:[#allocation2 + $0x18] sm:$0xff] %vm9133_vm10, %v243_v45  ;;  %v6528_v49 = vpack.c.bf16 %v253_v19, %v253_v19  ;;  %vm9134_vm13 = vnez %v9086_v3  ;;  %vm9135_vm14 = vnez %v9089_v35 }
  0xb4   :  { %9132 = vst [vmem:[#allocation32_spill] sm:$0xff] %v9131_v62  ;;  %v680_v8 = vunpack.c.l.b16 %v666_v60  ;;  %v6538_v10 = vunpack.c.l.b16 %v767_v44  ;;  %v9136_v45 = vunpack.c.h.b16 %v6320_v20  ;;  %v9137_v19 = vmov 0  ;;  %vm9149_vm4 = vmpackc.low %vm9135_vm14, %vm9134_vm13 }
  0xb5   :  { %v652_v29 = vunpack.c.h.b16 %v624_v5  ;;  %v6548_v39 = vadd.s32 1, %v6190_v4  ;;  %v6556_v44 = vsel %vm9140_vm12, %v6528_v49, 0  ;;  %v9141_v20 = vunpack.c.l.b16 %v6170_v61  ;;  %vm9148_vm12 = vmpackc.low %vm6346_vm3, %vm9129_vm5 }
  0xb6   :  { %vm6543_vm10 = vcmp.ne.s32.totalorder %v9136_v45, %v6137_v41  ;;  %v9142_v60 = vmov 0  ;;  %v9145_v5 = vunpack.c.h.b16 %v6170_v61  ;;  %v9146_v45 = vmov 0 }
  0xb7   :  { %v9138_v19 = vsel %vm6543_vm10, 4294967295, %v9137_v19  ;;  %vm6562_vm8 = vcmp.ne.s32.totalorder %v9141_v20, %v6133_v38  ;;  %v1227_v34 = vsel %vm9148_vm12, %v6528_v49, 0  ;;  %v1240_v28 = vunpack.c.l.b16 %v1226_v17 }
  0xb8   :  { %9139 = vst [vmem:[#allocation33_spill] sm:$0xff] %v9138_v19  ;;  %v9143_v60 = vsel %vm6562_vm8, 4294967295, %v9142_v60  ;;  %vm6569_vm11 = vcmp.ne.s32.totalorder %v9145_v5, %v6137_v41  ;;  %v358_v61 = vsel %vm9149_vm4, %v6528_v49, 0  ;;  %v6589_v20 = vrot.slane %v510_v0, 2 }
  0xb9   :  { %9144 = vst [vmem:[#allocation34_spill] sm:$0xff] %v9143_v60  ;;  %v9147_v45 = vsel %vm6569_vm11, 4294967295, %v9146_v45  ;;  %v6591_v5 = vrot.slane %v513_v50, 3  ;;  %v9150_v54 = vunpack.c.l.b16 %v6203_v11  ;;  %v9151_v17 = vmov 0 }
  0xba   :  { %vm6601_vm15 = vcmp.ne.s32.totalorder %v350_v46, %v6137_v41  ;;  %vm6606_vm5 = vcmp.ne.s32.totalorder %v651_v43, %v6133_v38  ;;  %v9157_v3 = vmov 0  ;;  %vm9160_vm4 = vnez %v9099_v6  ;;  %v244_v43 = vpop.f32.mrf.mxu0  ;;  %v254_v62 = vld [vmem:[#allocation2 + $0x18] sm:$0xff] }
  0xbb   :  { %vm6596_vm12 = vcmp.ne.s32.totalorder %v9150_v54, %v6133_v38  ;;  %v9155_v56 = vsel %vm6601_vm15, 4294967295, %v9154_v56  ;;  %v9158_v3 = vsel %vm6606_vm5, 4294967295, %v9157_v3  ;;  %vm9161_vm3 = vnez %v9102_v48 }
  0xbc   :  { %v9152_v17 = vsel %vm6596_vm12, 4294967295, %v9151_v17  ;;  %9156 = vst [vmem:[#allocation36_spill] sm:$0xff] %v9155_v56  ;;  %v768_v11 = vsel %vm6088_vm6, %v6528_v49, 0  ;;  %vm6618_vm14 = vcmp.ne.s32.totalorder %v1212_v55, %v6133_v38  ;;  %v9162_v50 = vmov 0  ;;  %vm9177_vm11 = vmpackc.low %vm9161_vm3, %vm9160_vm4 }
  0xbd   :  { %9153 = vst [vmem:[#allocation35_spill] sm:$0xff] %v9152_v17  ;;  %v9163_v50 = vsel %vm6618_vm14, 4294967295, %v9162_v50  ;;  %vm6623_vm15 = vcmp.ne.s32.totalorder %v1213_v18, %v6137_v41  ;;  %v9165_v12 = vmov 0  ;;  %v1241_v54 = vunpack.c.l.b16 %v1227_v34  ;;  %v5752_v34 = vld [vmem:[#allocation3 + $0x64] sm:$0xff] }
  0xbe   :  { %9159 = vst [vmem:[#allocation37_spill] sm:$0xff] %v9158_v3  ;;  %v9166_v12 = vsel %vm6623_vm15, 4294967295, %v9165_v12  ;;  %v9168_v46 = vunpack.c.l.b16 %v6496_v36  ;;  %vm8926_vm13 = vcmp.lt.s32.totalorder %v6536_v23, 16  ;;  %v446_v35 = vunpack.c.l.b16 %v6556_v44  ;;  %vm9172_vm15 = vmpackc.low %vm6523_vm9, %vm6508_vm2  ;;  %982 = vmatpush.bf16.msrb.mxu2 %v5752_v34 }
  0xbf   :  { %9164 = vst [vmem:[#allocation38_spill] sm:$0xff] %v9163_v50  ;;  %vm6632_vm6 = vcmp.ne.s32.totalorder %v652_v29, %v6137_v41  ;;  %v9169_v55 = vmov 0  ;;  %v667_v18 = vsel %vm9172_vm15, %v6528_v49, 0  ;;  %vm8928_vm14 = vcmp.lt.s32.totalorder %v6548_v39, 16  ;;  %vm835_vm12 = vmpackc.low %vm8926_vm13, %vm8926_vm13 }
  0xc0   :  { %9167 = vst [vmem:[#allocation39_spill] sm:$0xff] %v9166_v12  ;;  %v684_v0 = vpack.c.b16 %v680_v8, %v9168_v46  ;;  %v9170_v55 = vsel %vm6632_vm6, 4294967295, %v9169_v55  ;;  %v245_v8 = vadd.f32 %v6250_v51, %v244_v43  ;;  %v502_v29 = vunpack.c.l.b16 %v358_v61  ;;  %vm6650_vm8 = vmpackc.low %vm8928_vm14, %vm8928_vm14 }
  0xc1   :  { %9171 = vst [vmem:[#allocation40_spill] sm:$0xff] %v9170_v55  ;;  %v1245_v44 = vpack.c.b16 %v1241_v54, %v1240_v28  ;;  %vm8937_vm15 = vmpackc.low %vm6452_vm1, %vm6445_vm0  ;;  %v6660_v61 = vunpack.c.l.b16 %v768_v11  ;;  %v9175_v54 = vmov 0   ;;  %vm9176_vm13 = vcmask 261120  }
  0xc2   :  { %v689_v46 = vshrl.u32 %v684_v0, 16  ;;  %v692_v28 = vshll.u32 %v684_v0, 16  ;;  %v839_v43 = vsel %vm835_vm12, 65537, %v9175_v54  ;;  %250 = vst.msk [vmem:[#allocation2 + $0x20] sm:$0xff] %vm9176_vm13, %v245_v8  ;;  %v6664_v9 = vpack.c.bf16 %v254_v62, %v254_v62  ;;  %vm8936_vm14 = vmpackc.low %vm6543_vm10, %vm6476_vm7  ;;  %v5751_v8 = vld [vmem:[#allocation3 + $0x5c] sm:$0xff] }
  0xc3   :  { %v681_v63 = vunpack.c.l.b16 %v667_v18  ;;  %v848_v36 = vrot.slane %v6110_v26, 7  ;;  %v1250_v51 = vshrl.u32 %v1245_v44, 16  ;;  %v841_v62 = vsel %vm6650_vm8, 65537, %v9175_v54  ;;  %983 = vmatpush.bf16.msrb.mxu2 %v5751_v8 }
  0xc4   :  { %v854_v11 = vshrl.u32 %v839_v43, 16  ;;  %v433_v0 = vsel %vm9177_vm11, %v6664_v9, 0  ;;  %v359_v26 = vsel %vm8937_vm15, %v6664_v9, 0  ;;  %v1253_v18 = vshll.u32 %v1245_v44, 16  ;;  %vm9178_vm11 = vmpackc.low %vm6632_vm6, %vm6606_vm5 }
  0xc5   :  { %v6690_v22 = vrot.slane %v689_v46, 3  ;;  %v447_v34 = vunpack.c.l.b16 %v433_v0  ;;  %v503_v59 = vunpack.c.l.b16 %v359_v26  ;;  %v1228_v6 = vsel %vm8936_vm14, %v6664_v9, 0 }
  0xc6   :  { %v6698_v48 = vrot.slane %v692_v28, 4  ;;  %v668_v44 = vsel %vm9178_vm11, %v6664_v9, 0  ;;  %v851_v46 = vor.u32 %v848_v36, %v6124_v32  ;;  %v856_v0 = vrot.slane %v854_v11, 7 }
  0xc7   :  { %v857_v26 = vshll.u32 %v839_v43, 16  ;;  %v450_v57 = vpack.c.b16 %v447_v34, %v446_v35  ;;  %v506_v19 = vpack.c.b16 %v503_v59, %v502_v29  ;;  %vm9179_vm8 = vnez %v9143_v60 }
  0xc8   :  { %vm9180_vm14 = vnez %v9147_v45  ;;  %v682_v28 = vunpack.c.l.b16 %v668_v44  ;;  %v852_v42 = vrot.slane %v848_v36, 4  ;;  %vm9181_vm12 = vnez %v9152_v17 }
  0xc9   :  { %vm9182_vm13 = vnez %v9155_v56  ;;  %v1242_v3 = vunpack.c.l.b16 %v1228_v6  ;;  %v6715_v8 = vrot.slane %v1250_v51, 1  ;;  %v6717_v32 = vrot.slane %v1253_v18, 2  ;;  %v255_v11 = vld [vmem:[#allocation2 + $0x20] sm:$0xff]  ;;  %vm9192_vm1 = vmpackc.low %vm9180_vm14, %vm9179_vm8 }
  0xca   :  { %v872_v43 = vshrl.u32 %v841_v62, 16  ;;  %v454_v35 = vrot.slane %v450_v57, 3  ;;  %v518_v59 = vshrl.u32 %v506_v19, 16  ;;  %v521_v29 = vshll.u32 %v506_v19, 16 }
  0xcb   :  { %vm9183_vm11 = vnez %v9163_v50  ;;  %vm9184_vm15 = vnez %v9166_v12  ;;  %v685_v36 = vpack.c.b16 %v682_v28, %v681_v63  ;;  %v6723_v34 = vpack.c.bf16 %v255_v11, %v255_v11 }
  0xcc   :  { %v859_v44 = vor.u32 %v857_v26, %v856_v0  ;;  %v6725_v55 = vrot.slane %v872_v43, 7  ;;  %v875_v6 = vshll.u32 %v841_v62, 16  ;;  %v9185_v51 = vrot.slane %v6505_v52, 3 }
  0xcd   :  { %vm9186_vm7 = vcmask 1044480   ;;  %v520_v57 = vrot.slane %v518_v59, 2  ;;  %v523_v58 = vrot.slane %v521_v29, 3  ;;  %vm9187_vm5 = vsmask.f32 4368 }
  0xce   :  { %v455_v18 = vsel %vm9186_vm7, %v9185_v51, %v454_v35  ;;  %vm9188_vm6 = vsmask.f32 256  ;;  %v861_v33 = vrot.slane %v856_v0, 4  ;;  %vm9191_vm10 = vcmask 261120   ;;  %vm9193_vm7 = vmpackc.low %vm9182_vm13, %vm9181_vm12 }
  0xcf   :  { %vm6732_vm0 = vmor %vm9188_vm6, %vm9187_vm5  ;;  %5420 = vmatmul.msk.bf16.vlgmr.msra.gmra.mxu1 %vm9191_vm10, %v455_v18  ;;  %v434_v63 = vsel %vm9192_vm1, %v6723_v34, 0  ;;  %v360_v52 = vsel %vm9193_vm7, %v6723_v34, 0  ;;  %v697_v0 = vshrl.u32 %v685_v36, 16  ;;  %v524_v26 = vor.u32 %v523_v58, %v520_v57 }
  0xd0   :  { %vm9194_vm6 = vmpackc.low %vm9184_vm15, %vm9183_vm11  ;;  %v448_v28 = vunpack.c.l.b16 %v434_v63  ;;  %v504_v43 = vunpack.c.l.b16 %v360_v52  ;;  %v700_v29 = vshll.u32 %v685_v36, 16  ;;  %v860_v11 = vsel %vm6732_vm0, %v852_v42, %v859_v44 }
  0xd1   :  { %v1229_v62 = vsel %vm9194_vm6, %v6723_v34, 0  ;;  %v877_v51 = vor.u32 %v875_v6, %v6725_v55  ;;  %v880_v18 = vunpack.c.l.b16 %v851_v46  ;;  %v9195_v17 = vor.u32 %v6591_v5, %v6589_v20  ;;  %vm9197_vm5 = vmmov %vm9191_vm10 }
  0xd2   :  { %v1243_v59 = vunpack.c.l.b16 %v1229_v62  ;;  %vm9196_vm1 = vsmask.f32 5376  ;;  %v451_v50 = vpack.c.b16 %v448_v28, %v448_v28  ;;  %v507_v56 = vpack.c.b16 %v504_v43, %v504_v43 }
  0xd3   :  { %v525_v12 = vsel %vm9196_vm1, %v9195_v17, %v524_v26  ;;  %v699_v58 = vrot.slane %v697_v0, 3  ;;  %v869_v36 = vsel %vm6732_vm0, %v861_v33, %v851_v46  ;;  %v881_v57 = vunpack.c.h.b16 %v851_v46  ;;  %v5754_v17 = vld [vmem:[#allocation3 + $0x74] sm:$0xff] }
  0xd4   :  { %v1246_v60 = vpack.c.b16 %v1243_v59, %v1242_v3  ;;  %5430 = vmatmul.msk.bf16.vlgmr.msrb.gmra.mxu0 %vm9197_vm5, %v525_v12  ;;  %vm6766_vm10 = vcmp.ne.s32.totalorder %v880_v18, %v6133_v38  ;;  %v9198_v44 = vmov 0  ;;  %v456_v6 = vrot.slane %v451_v50, 3 }
  0xd5   :  { %v9199_v44 = vsel %vm6766_vm10, 4294967295, %v9198_v44  ;;  %v527_v63 = vshrl.u32 %v507_v56, 16  ;;  %v530_v20 = vshll.u32 %v507_v56, 16  ;;  %v878_v3 = vsel %vm6732_vm0, %v852_v42, %v877_v51 }
  0xd6   :  { %9200 = vst [vmem:[#allocation41_spill] sm:$0xff] %v9199_v44  ;;  %v1258_v5 = vshrl.u32 %v1246_v60, 16  ;;  %v1261_v52 = vshll.u32 %v1246_v60, 16  ;;  %vm6773_vm7 = vcmp.ne.s32.totalorder %v881_v57, %v6137_v41  ;;  %v9201_v12 = vmov 0 }
  0xd7   :  { %v9202_v12 = vsel %vm6773_vm7, 4294967295, %v9201_v12  ;;  %v887_v33 = vunpack.c.l.b16 %v860_v11  ;;  %vm9203_vm6 = vcmask 1044480   ;;  %v529_v62 = vrot.slane %v527_v63, 2  ;;  %vm8959_vm1 = vmpackc.low %vm6773_vm7, %vm6766_vm10 }
  0xd8   :  { %v457_v46 = vsel %vm9203_vm6, %v454_v35, %v456_v6  ;;  %v532_v0 = vrot.slane %v530_v20, 3  ;;  %v702_v28 = vrot.slane %v700_v29, 4  ;;  %v1260_v56 = vrot.slane %v1258_v5, 1  ;;  %v5753_v29 = vld [vmem:[#allocation3 + $0x6c] sm:$0xff] }
  0xd9   :  { %5421 = vmatmul.msk.bf16.vlgmr.msra.gmra.mxu3 %vm9197_vm5, %v457_v46  ;;  %v888_v42 = vunpack.c.h.b16 %v860_v11  ;;  %vm6784_vm0 = vcmp.ne.s32.totalorder %v887_v33, %v6133_v38  ;;  %v9204_v60 = vmov 0  ;;  %v894_v50 = vunpack.c.l.b16 %v869_v36 }
  0xda   :  { %v9205_v60 = vsel %vm6784_vm0, 4294967295, %v9204_v60  ;;  %v533_v19 = vor.u32 %v532_v0, %v529_v62  ;;  %1116 = vmatpush.bf16.msra.mxu3 %v5754_v17  ;;  %v895_v35 = vunpack.c.h.b16 %v869_v36  ;;  %v901_v43 = vunpack.c.l.b16 %v878_v3  ;;  %v6861_v62 = vld [vmem:[#allocation2 + $0x28] sm:$0xff] }
  0xdb   :  { %v902_v59 = vunpack.c.h.b16 %v878_v3  ;;  %v1263_v51 = vrot.slane %v1261_v52, 2  ;;  %vm6789_vm6 = vcmp.ne.s32.totalorder %v888_v42, %v6137_v41  ;;  %v9206_v18 = vmov 0 }
  0xdc   :  { %v9207_v18 = vsel %vm6789_vm6, 4294967295, %v9206_v18  ;;  %vm6794_vm5 = vcmp.ne.s32.totalorder %v894_v50, %v6133_v38  ;;  %v9208_v11 = vmov 0  ;;  %v915_v36 = vsel %vm8959_vm1, %v6394_v47, 0  ;;  %vm9222_vm8 = vmpackc.low %vm6789_vm6, %vm6784_vm0 }
  0xdd   :  { %v9209_v11 = vsel %vm6794_vm5, 4294967295, %v9208_v11  ;;  %vm9211_vm11 = vsmask.f32 5376  ;;  %vm6810_vm12 = vcmp.ne.s32.totalorder %v895_v35, %v6137_v41  ;;  %v9212_v6 = vmov 0 }
  0xde   :  { %9210 = vst [vmem:[#allocation42_spill] sm:$0xff] %v9209_v11  ;;  %v534_v57 = vsel %vm9211_vm11, %v524_v26, %v533_v19  ;;  %v9213_v6 = vsel %vm6810_vm12, 4294967295, %v9212_v6  ;;  %vm6815_vm13 = vcmp.ne.s32.totalorder %v901_v43, %v6133_v38  ;;  %v9215_v63 = vmov 0  ;;  %vm8962_vm15 = vmpackc.low %vm6810_vm12, %vm6794_vm5  ;;  %1117 = vmatpush.bf16.msra.mxu3 %v5753_v29 }
  0xdf   :  { %9214 = vst [vmem:[#allocation43_spill] sm:$0xff] %v9213_v6  ;;  %v9216_v63 = vsel %vm6815_vm13, 4294967295, %v9215_v63  ;;  %vm6820_vm10 = vcmp.ne.s32.totalorder %v902_v59, %v6137_v41  ;;  %v9218_v20 = vmov 0  ;;  %vm9221_vm11 = vcmask 261120  }
  0xe0   :  { %9217 = vst [vmem:[#allocation44_spill] sm:$0xff] %v9216_v63  ;;  %v9219_v20 = vsel %vm6820_vm10, 4294967295, %v9218_v20  ;;  %5431 = vmatmul.msk.bf16.vlgmr.msra.gmra.mxu2 %vm9221_vm11, %v534_v57  ;;  %vm8967_vm1 = vsmask.f32 6400  ;;  %vm8964_vm7 = vsmask.f32 4352  ;;  %v6825_v26 = vor.u32 %v702_v28, %v699_v58  ;;  %vm8963_vm11 = vmpackc.low %vm6820_vm10, %vm6815_vm13 }
  0xe1   :  { %9220 = vst [vmem:[#allocation45_spill] sm:$0xff] %v9219_v20  ;;  %v916_v5 = vsel %vm9222_vm8, %v6528_v49, 0  ;;  %v783_v17 = vpack.c.b16 %v6660_v61, %v6538_v10  ;;  %v917_v58 = vsel %vm8962_vm15, %v6664_v9, 0  ;;  %v929_v52 = vunpack.c.l.b16 %v915_v36 }
  0xe2   :  { %v930_v3 = vunpack.c.l.b16 %v916_v5  ;;  %v1256_v33 = vor.u32 %v6717_v32, %v6715_v8  ;;  %v6851_v46 = vor.u32 %v1263_v51, %v1260_v56  ;;  %v695_v10 = vor.u32 %v6698_v48, %v6690_v22 }
  0xe3   :  { %v918_v61 = vsel %vm8963_vm11, %v6723_v34, 0  ;;  %v931_v0 = vunpack.c.l.b16 %v917_v58  ;;  %v1190_v50 = vrot.slane %v6338_v27, 4  ;;  %vm9223_vm8 = vcmask 261120  }
  0xe4   :  { %v932_v28 = vunpack.c.l.b16 %v918_v61  ;;  %v934_v42 = vpack.c.b16 %v930_v3, %v929_v52  ;;  %5450 = vmatmul.msk.bf16.vlgmr.msrb.gmra.mxu1 %vm9223_vm8, %v783_v17  ;;  %v704_v8 = vsel %vm8964_vm7, %v695_v10, %v6825_v26  ;;  %v658_v48 = vunpack.c.l.b16 %v6350_v53 }
  0xe5   :  { %v659_v22 = vunpack.c.h.b16 %v6350_v53  ;;  %v879_v32 = vrot.slane %v6725_v55, 4  ;;  %v6874_v35 = vpack.c.bf16 %v6861_v62, %v6861_v62  ;;  %v1219_v43 = vunpack.c.l.b16 %v1190_v50 }
  0xe6   :  { %v6870_v56 = vpack.c.b16 %v932_v28, %v931_v0  ;;  %v941_v19 = vshll.u32 %v934_v42, 16  ;;  %v1220_v27 = vunpack.c.h.b16 %v1190_v50  ;;  %vm6877_vm8 = vcmp.ne.s32.totalorder %v658_v48, %v6133_v38 }
  0xe7   :  { %v9224_v59 = vmov 0  ;;  %vm6882_vm15 = vcmp.ne.s32.totalorder %v659_v22, %v6137_v41  ;;  %v9226_v29 = vmov 0  ;;  %v908_v53 = vunpack.c.l.b16 %v879_v32 }
  0xe8   :  { %v9225_v59 = vsel %vm6877_vm8, 4294967295, %v9224_v59  ;;  %v9227_v29 = vsel %vm6882_vm15, 4294967295, %v9226_v29  ;;  %v1265_v55 = vsel %vm8967_vm1, %v1256_v33, %v6851_v46  ;;  %v946_v51 = vshll.u32 %v6870_v56, 16  ;;  %vm8970_vm7 = vmpackc.low %vm6882_vm15, %vm6877_vm8 }
  0xe9   :  { %vm1223_vm11 = vcmp.ne.s32.totalorder %v1219_v43, %v6133_v38  ;;  %v909_v36 = vunpack.c.h.b16 %v879_v32  ;;  %vm9228_vm5 = vcmask 261120   ;;  %v943_v57 = vrot.slane %v941_v19, 1 }
  0xea   :  { %5480 = vmatmul.msk.bf16.vlgmr.msra.gmra.mxu0 %vm9228_vm5, %v1265_v55  ;;  %vm1224_vm12 = vcmp.ne.s32.totalorder %v1220_v27, %v6137_v41  ;;  %v669_v5 = vsel %vm8970_vm7, %v6723_v34, 0  ;;  %vm912_vm1 = vcmp.ne.s32.totalorder %v908_v53, %v6133_v38  ;;  %v939_v17 = vshrl.u32 %v934_v42, 16 }
  0xeb   :  { %vm9229_vm13 = vnez %v9037_v16  ;;  %vm6906_vm10 = vmpackc.low %vm1224_vm12, %vm1223_vm11  ;;  %v9230_v52 = vmov 0  ;;  %v683_v3 = vunpack.c.l.b16 %v669_v5  ;;  %vm913_vm5 = vcmp.ne.s32.totalorder %v909_v36, %v6137_v41 }
  0xec   :  { %v770_v58 = vsel %vm9229_vm13, %v6723_v34, 0  ;;  %v9231_v52 = vsel %vm6906_vm10, 4294967295, %v9230_v52  ;;  %v6911_v33 = vrot.slane %v946_v51, 1  ;;  %v1230_v10 = vsel %vm6906_vm10, %v6874_v35, 0  ;;  %vm6916_vm7 = vmpackc.low %vm913_vm5, %vm912_vm1 }
  0xed   :  { %9232 = vst [vmem:[#allocation46_spill] sm:$0xff] %v9231_v52  ;;  %v9233_v61 = vmov 0  ;;  %v6921_v0 = vadd.s32 2, %v6101_v24  ;;  %v6924_v28 = vadd.s32 2, %v6190_v4  ;;  %v1244_v42 = vunpack.c.l.b16 %v1230_v10 }
  0xee   :  { %v9234_v61 = vsel %vm6916_vm7, 4294967295, %v9233_v61  ;;  %v686_v50 = vpack.c.b16 %v683_v3, %v683_v3  ;;  %v919_v48 = vsel %vm6916_vm7, %v6874_v35, 0  ;;  %vm9236_vm11 = vcmask 261120  }
  0xef   :  { %9235 = vst [vmem:[#allocation47_spill] sm:$0xff] %v9234_v61  ;;  %5440 = vmatmul.msk.bf16.vlgmr.msrb.gmra.mxu3 %vm9236_vm11, %v704_v8  ;;  %v944_v22 = vor.u32 %v943_v57, %v939_v17  ;;  %vm8975_vm1 = vcmp.lt.s32.totalorder %v6921_v0, 16  ;;  %vm8979_vm5 = vcmp.lt.s32.totalorder %v6924_v28, 16  ;;  %vm8980_vm10 = vcmask 1040384  }
  0xf0   :  { %v769_v24 = vsel %vm9229_vm13, %v6664_v9, 0  ;;  %v782_v4 = vunpack.c.l.b16 %v770_v58  ;;  %v1247_v32 = vpack.c.b16 %v1244_v42, %v1244_v42  ;;  %vm1008_vm12 = vmpackc.low %vm8975_vm1, %vm8975_vm1  ;;  %vm1016_vm0 = vcmask 1044484  }
  0xf1   :  { %vm9237_vm7 = vsmask.f32 7424  ;;  %v933_v19 = vunpack.c.l.b16 %v919_v48  ;;  %vm1010_vm11 = vmpackc.low %vm8979_vm5, %vm8979_vm5  ;;  %v1012_v43 = vsel %vm1008_vm12, 65537, %v9175_v54  ;;  %v1018_v27 = vrot.slane %v6099_v21, 7 }
  0xf2   :  { %v949_v8 = vsel %vm9237_vm7, %v944_v22, %v6911_v33  ;;  %v1267_v53 = vshrl.u32 %v1247_v32, 16  ;;  %v1270_v55 = vshll.u32 %v1247_v32, 16  ;;  %v706_v51 = vshrl.u32 %v686_v50, 16  ;;  %vm6946_vm6 = vmor %vm8980_vm10, %vm1016_vm0 }
  0xf3   :  { %v709_v36 = vshll.u32 %v686_v50, 16  ;;  %vm9240_vm1 = vcmask 261120   ;;  %v781_v5 = vunpack.c.l.b16 %v769_v24  ;;  %v1014_v17 = vsel %vm1010_vm11, 65537, %v9175_v54 }
  0xf4   :  { %5460 = vmatmul.msk.bf16.vlgmr.msrb.gmra.mxu2 %vm9240_vm1, %v949_v8  ;;  %v1019_v58 = vrot.slane %v1018_v27, 4  ;;  %v1020_v3 = vrot.slane %v1012_v43, 7  ;;  %v1269_v10 = vrot.slane %v1267_v53, 1  ;;  %v1272_v42 = vrot.slane %v1270_v55, 2  ;;  %vm9241_vm7 = vmmov %vm9240_vm1 }
  0xf5   :  { %v1026_v48 = vrot.slane %v1014_v17, 7  ;;  %v784_v21 = vpack.c.b16 %v782_v4, %v781_v5  ;;  %v936_v22 = vpack.c.b16 %v933_v19, %v933_v19  ;;  %v708_v61 = vrot.slane %v706_v51, 3  ;;  %vm9268_vm4 = vmmov %vm9240_vm1 }
  0xf6   :  { %v1021_v50 = vsel %vm6946_vm6, %v1019_v58, %v1020_v3  ;;  %v1022_v32 = vrot.slane %v1020_v3, 4  ;;  %v1273_v52 = vor.u32 %v1272_v42, %v1269_v10  ;;  %v711_v11 = vrot.slane %v709_v36, 4 }
  0xf7   :  { %v1027_v8 = vsel %vm6946_vm6, %v1019_v58, %v1026_v48  ;;  %5451 = vmatmul.msk.bf16.gmra.mxu1 %vm9241_vm7, %v784_v21  ;;  %v1036_v24 = vunpack.c.l.b16 %v1021_v50  ;;  %v1029_v43 = vunpack.c.l.b16 %v1018_v27  ;;  %v1030_v53 = vunpack.c.h.b16 %v1018_v27 }
  0xf8   :  { %v1024_v54 = vsel %vm6946_vm6, %v1022_v32, %v1018_v27  ;;  %v1037_v4 = vunpack.c.h.b16 %v1021_v50  ;;  %v9242_v55 = vmov 0  ;;  %v1050_v36 = vunpack.c.l.b16 %v1027_v8 }
  0xf9   :  { %v1043_v19 = vunpack.c.l.b16 %v1024_v54  ;;  %vm6960_vm0 = vcmp.ne.s32.totalorder %v1036_v24, %v6133_v38  ;;  %v1044_v51 = vunpack.c.h.b16 %v1024_v54  ;;  %v1051_v5 = vunpack.c.h.b16 %v1027_v8 }
  0xfa   :  { %v9243_v55 = vsel %vm6960_vm0, 4294967295, %v9242_v55  ;;  %vm9245_vm12 = vsmask.f32 6400  ;;  %v712_v58 = vor.u32 %v711_v11, %v708_v61  ;;  %v954_v3 = vshll.u32 %v936_v22, 16 }
  0xfb   :  { %9244 = vst [vmem:[#allocation48_spill] sm:$0xff] %v9243_v55  ;;  %v1274_v17 = vsel %vm9245_vm12, %v6851_v46, %v1273_v52  ;;  %vm6967_vm6 = vcmp.ne.s32.totalorder %v1037_v4, %v6137_v41  ;;  %v9246_v57 = vmov 0  ;;  %vm6973_vm11 = vcmp.ne.s32.totalorder %v1043_v19, %v6133_v38 }
  0xfc   :  { %v9247_v57 = vsel %vm6967_vm6, 4294967295, %v9246_v57  ;;  %5481 = vmatmul.msk.bf16.gmra.mxu0 %vm9240_vm1, %v1274_v17  ;;  %v9249_v27 = vmov 0  ;;  %vm6978_vm7 = vcmp.ne.s32.totalorder %v1044_v51, %v6137_v41  ;;  %v9252_v10 = vmov 0  ;;  %vm9269_vm1 = vmpackc.low %vm6967_vm6, %vm6960_vm0 }
  0xfd   :  { %9248 = vst [vmem:[#allocation49_spill] sm:$0xff] %v9247_v57  ;;  %v9250_v27 = vsel %vm6973_vm11, 4294967295, %v9249_v27  ;;  %v9253_v10 = vsel %vm6978_vm7, 4294967295, %v9252_v10  ;;  %vm6983_vm12 = vcmp.ne.s32.totalorder %v1050_v36, %v6133_v38  ;;  %v9255_v11 = vmov 0 }
  0xfe   :  { %9251 = vst [vmem:[#allocation50_spill] sm:$0xff] %v9250_v27  ;;  %v9256_v11 = vsel %vm6983_vm12, 4294967295, %v9255_v11  ;;  %vm6988_vm5 = vcmp.ne.s32.totalorder %v1051_v5, %v6137_v41  ;;  %v9258_v46 = vmov 0  ;;  %v950_v52 = vshrl.u32 %v6870_v56, 16 }
  0xff   :  { %9254 = vst [vmem:[#allocation51_spill] sm:$0xff] %v9253_v10  ;;  %v9259_v46 = vsel %vm6988_vm5, 4294967295, %v9258_v46  ;;  %vm6998_vm10 = vcmp.ne.s32.totalorder %v1029_v43, %v6133_v38  ;;  %v9261_v61 = vmov 0  ;;  %vm7003_vm8 = vcmp.ne.s32.totalorder %v1030_v53, %v6137_v41  ;;  %vm8985_vm15 = vmpackc.low %vm6988_vm5, %vm6983_vm12 }
 0x100   :  { %9257 = vst [vmem:[#allocation52_spill] sm:$0xff] %v9256_v11  ;;  %v9262_v61 = vsel %vm6998_vm10, 4294967295, %v9261_v61  ;;  %v9264_v42 = vmov 0  ;;  %vm9267_vm14 = vsmask.f32 4352  ;;  %v952_v21 = vor.u32 %v950_v52, %v6911_v33 }
 0x101   :  { %9260 = vst [vmem:[#allocation53_spill] sm:$0xff] %v9259_v46  ;;  %v9265_v42 = vsel %vm7003_vm8, 4294967295, %v9264_v42  ;;  %v713_v56 = vsel %vm9267_vm14, %v6825_v26, %v712_v58  ;;  %v956_v22 = vrot.slane %v954_v3, 1  ;;  %v1067_v50 = vsel %vm8985_vm15, %v6723_v34, 0  ;;  %vm8987_vm14 = vmpackc.low %vm7003_vm8, %vm6998_vm10 }
 0x102   :  { %9263 = vst [vmem:[#allocation54_spill] sm:$0xff] %v9262_v61  ;;  %5441 = vmatmul.msk.bf16.gmra.mxu3 %vm9268_vm4, %v713_v56  ;;  %v1065_v26 = vsel %vm9269_vm1, %v6528_v49, 0  ;;  %vm9270_vm4 = vmpackc.low %vm6978_vm7, %vm6973_vm11  ;;  %v1028_v34 = vrot.slane %v1026_v48, 4  ;;  %vm9271_vm15 = vsmask.f32 7424  ;;  %v1081_v8 = vunpack.c.l.b16 %v1067_v50 }
 0x103   :  { %9266 = vst [vmem:[#allocation55_spill] sm:$0xff] %v9265_v42  ;;  %v1066_v33 = vsel %vm9270_vm4, %v6664_v9, 0  ;;  %v957_v32 = vsel %vm9271_vm15, %v952_v21, %v956_v22  ;;  %vm9272_vm12 = vcmask 261120   ;;  %v1064_v49 = vsel %vm8987_vm14, %v6394_v47, 0 }
 0x104   :  { %5461 = vmatmul.msk.bf16.gmra.mxu2 %vm9272_vm12, %v957_v32  ;;  %v1079_v54 = vunpack.c.l.b16 %v1065_v26  ;;  %v1080_v24 = vunpack.c.l.b16 %v1066_v33  ;;  %v1057_v43 = vunpack.c.l.b16 %v1028_v34  ;;  %v1058_v53 = vunpack.c.h.b16 %v1028_v34 }
 0x105   :  { %v1078_v4 = vunpack.c.l.b16 %v1064_v49  ;;  %v9273_v48 = vmov 0  ;;  %v9276_v51 = vmov 0  ;;  %vm8994_vm12 = vcmask 1046528  }
 0x106   :  { %v1084_v19 = vpack.c.b16 %v1081_v8, %v1080_v24  ;;  %vm7050_vm1 = vcmp.ne.s32.totalorder %v1057_v43, %v6133_v38  ;;  %vm7055_vm15 = vcmp.ne.s32.totalorder %v1058_v53, %v6137_v41  ;;  %vm9279_vm14 = vcmask 261120  }
 0x107   :  { %v1083_v9 = vpack.c.b16 %v1079_v54, %v1078_v4  ;;  %v9274_v48 = vsel %vm7050_vm1, 4294967295, %v9273_v48  ;;  %v9277_v51 = vsel %vm7055_vm15, 4294967295, %v9276_v51  ;;  %vm8993_vm4 = vmpackc.low %vm7055_vm15, %vm7050_vm1  ;;  %vm9289_vm1 = vcmask 1041408  }
 0x108   :  { %9275 = vst [vmem:[#allocation56_spill] sm:$0xff] %v9274_v48  ;;  %v1088_v36 = vrot.slane %v1084_v19, 1  ;;  %v1068_v38 = vsel %vm8993_vm4, %v6874_v35, 0  ;;  %vm9280_vm10 = vmmov %vm9279_vm14  ;;  %vm9293_vm15 = vcmask 1040384  }
 0x109   :  { %9278 = vst [vmem:[#allocation57_spill] sm:$0xff] %v9277_v51  ;;  %v1087_v47 = vrot.slane %v1083_v9, 1  ;;  %v1082_v41 = vunpack.c.l.b16 %v1068_v38  ;;  %vm9283_vm4 = vmmov %vm9280_vm10 }
 0x10b   :  { %v1089_v5 = vsel %vm8994_vm12, %v1087_v47, %v1088_v36  ;;  %v1085_v17 = vpack.c.b16 %v1082_v41, %v1082_v41 }
 0x10d   :  { %v1090_v58 = vrot.slane %v1085_v17, 1 }
 0x10f   :  { %v1091_v3 = vsel %vm8994_vm12, %v1088_v36, %v1090_v58  ;;  %v5815_v58 = vld [vmem:[#allocation5 + $0x1] ss:$0 sm:$0xff] }
 0x112   :  { %5470 = vmatmul.msk.bf16.vlgmr.msra.gmra.mxu3 %vm9279_vm14, %v1089_v5  ;;  %vm9281_vm14 = vmmov %vm9280_vm10 }
 0x122   :  { %5471 = vmatmul.msk.bf16.gmra.mxu3 %vm9280_vm10, %v1091_v3 }
 0x14c   :  { %v485_v21 = vpop.f32.mrf.mxu1 }
 0x151   :  { %v562_v26 = vpop.f32.mrf.mxu0 }
 0x152   :  { %v563_v35 = vadd.f32 %v562_v26, %v485_v21 }
 0x154   :  { %v487_v34 = vpop.f32.mrf.mxu1 }
 0x159   :  { %v564_v49 = vpop.f32.mrf.mxu0 }
 0x15a   :  { %v565_v9 = vadd.f32 %v564_v49, %v487_v34 }
 0x15c   :  { %v490_v52 = vpop.f32.mrf.mxu3 }
 0x161   :  { %v812_v54 = vpop.f32.mrf.mxu1 }
 0x163   :  { %v567_v50 = vpop.f32.mrf.mxu2 }
 0x164   :  { %v492_v56 = vpop.f32.mrf.mxu3  ;;  %v568_v51 = vadd.f32 %v567_v50, %v490_v52 }
 0x167   :  { %v1302_v19 = vpop.f32.mrf.mxu0 }
 0x169   :  { %v814_v36 = vpop.f32.mrf.mxu1 }
 0x16b   :  { %v569_v32 = vpop.f32.mrf.mxu2 }
 0x16c   :  { %v570_v50 = vadd.f32 %v569_v32, %v492_v56 }
 0x16f   :  { %v1304_v42 = vpop.f32.mrf.mxu0 }
 0x172   :  { %v741_v22 = vpop.f32.mrf.mxu3 }
 0x173   :  { %v751_v43 = vadd.f32 %v741_v22, %v563_v35 }
 0x174   :  { %v817_v49 = vpop.f32.mrf.mxu1 }
 0x175   :  { %v822_v4 = vadd.f32 %v812_v54, %v751_v43 }
 0x177   :  { %v985_v24 = vpop.f32.mrf.mxu2 }
 0x178   :  { %v995_v47 = vadd.f32 %v985_v24, %v822_v4 }
 0x17a   :  { %v743_v33 = vpop.f32.mrf.mxu3 }
 0x17b   :  { %v752_v5 = vadd.f32 %v743_v33, %v565_v9  ;;  %v1307_v9 = vpop.f32.mrf.mxu0 }
 0x17d   :  { %v823_v3 = vadd.f32 %v814_v36, %v752_v5 }
 0x17f   :  { %v987_v38 = vpop.f32.mrf.mxu2 }
 0x180   :  { %v996_v21 = vadd.f32 %v987_v38, %v823_v3  ;;  %v819_v38 = vpop.f32.mrf.mxu1 }
 0x185   :  { %v746_v8 = vpop.f32.mrf.mxu3 }
 0x186   :  { %v753_v26 = vadd.f32 %v746_v8, %v568_v51 }
 0x187   :  { %v990_v24 = vpop.f32.mrf.mxu2 }
 0x188   :  { %v824_v52 = vadd.f32 %v817_v49, %v753_v26  ;;  %v1309_v26 = vpop.f32.mrf.mxu0 }
 0x18a   :  { %v997_v51 = vadd.f32 %v990_v24, %v824_v52 }
 0x18d   :  { %v748_v53 = vpop.f32.mrf.mxu3 }
 0x18e   :  { %v754_v8 = vadd.f32 %v748_v53, %v570_v50 }
 0x18f   :  { %v992_v32 = vpop.f32.mrf.mxu2 }
 0x195   :  { %v1119_v41 = vpop.f32.mrf.mxu3 }
 0x196   :  { %v1129_v17 = vadd.f32 %v1119_v41, %v995_v47 }
 0x198   :  { %v1312_v48 = vadd.f32 %v1302_v19, %v1129_v17 }
 0x19a   :  { %v7073_v61 = vadd.f32 %v5815_v58, %v1312_v48 }
 0x19c   :  { %v1324_v22 = vsel %vm9280_vm10, %v7073_v61, 0.0  ;;  %v1340_v34 = vmul.f32 %v7073_v61, %v7073_v61 }
 0x19d   :  { %v1121_v33 = vpop.f32.mrf.mxu3  ;;  %1325 = vadd.xlane.f32.xlu0 %v1324_v22 }
 0x19e   :  { %v1130_v54 = vadd.f32 %v1121_v33, %v996_v21  ;;  %v1344_v35 = vsel %vm9281_vm14, %v1340_v34, 0.0  ;;  %vm9282_vm14 = vmmov %vm9280_vm10 }
 0x19f   :  { %1345 = vadd.xlane.f32.xlu1 %v1344_v35 }
 0x1a0   :  { %v1313_v48 = vadd.f32 %v1304_v42, %v1130_v54  ;;  %v825_v42 = vadd.f32 %v819_v38, %v754_v8 }
 0x1a2   :  { %v7080_v43 = vadd.f32 %v5815_v58, %v1313_v48  ;;  %v998_v53 = vadd.f32 %v992_v32, %v825_v42 }
 0x1a4   :  { %v1327_v4 = vsel %vm9280_vm10, %v7080_v43, 0.0  ;;  %v1341_v19 = vmul.f32 %v7080_v43, %v7080_v43  ;;  %vm9284_vm10 = vmmov %vm9283_vm4 }
 0x1a5   :  { %v1124_v36 = vpop.f32.mrf.mxu3  ;;  %1328 = vadd.xlane.f32.xlu0 %v1327_v4 }
 0x1a6   :  { %v1131_v47 = vadd.f32 %v1124_v36, %v997_v51  ;;  %v1347_v5 = vsel %vm9282_vm14, %v1341_v19, 0.0  ;;  %vm9285_vm14 = vmmov %vm9283_vm4 }
 0x1a7   :  { %1348 = vadd.xlane.f32.xlu1 %v1347_v5 }
 0x1a8   :  { %v1314_v56 = vadd.f32 %v1307_v9, %v1131_v47 }
 0x1aa   :  { %v7087_v41 = vadd.f32 %v5815_v58, %v1314_v56 }
 0x1ac   :  { %v1330_v17 = vsel %vm9283_vm4, %v7087_v41, 0.0  ;;  %v1342_v34 = vmul.f32 %v7087_v41, %v7087_v41 }
 0x1ad   :  { %v1126_v3 = vpop.f32.mrf.mxu3  ;;  %1331 = vadd.xlane.f32.xlu2 %v1330_v17 }
 0x1ae   :  { %v1132_v21 = vadd.f32 %v1126_v3, %v998_v53  ;;  %v1350_v33 = vsel %vm9284_vm10, %v1342_v34, 0.0 }
 0x1b0   :  { %v1315_v22 = vadd.f32 %v1309_v26, %v1132_v21 }
 0x1b2   :  { %v7093_v49 = vadd.f32 %v5815_v58, %v1315_v22 }
 0x1b4   :  { %v1333_v54 = vsel %vm9285_vm14, %v7093_v49, 0.0  ;;  %v1343_v35 = vmul.f32 %v7093_v49, %v7093_v49 }
 0x1b5   :  { %1351 = vadd.xlane.f32.xlu2 %v1350_v33  ;;  %1334 = vadd.xlane.f32.xlu0 %v1333_v54 }
 0x1b6   :  { %v1353_v24 = vsel %vm9283_vm4, %v1343_v35, 0.0 }
 0x1b7   :  { %1354 = vadd.xlane.f32.xlu1 %v1353_v24 }
 0x210   :  { %v1326_v52 = vpop.xlane.xlu0 %1325 }
 0x211   :  { %v1336_v48 = vmul.f32 0.03125, %v1326_v52 }
 0x212   :  { %v1346_v50 = vpop.xlane.xlu1 %1345 }
 0x213   :  { %v1360_v51 = vmul.f32 %v1336_v48, %v1336_v48  ;;  %v1356_v8 = vmul.f32 0.03125, %v1346_v50 }
 0x215   :  { %v1364_v58 = vsub.f32 %v1356_v8, %v1360_v51 }
 0x217   :  { %v1368_v4 = vmax.f32 %v1364_v58, 0.0  ;;  %v1372_v58 = vsub.f32 %v7073_v61, %v1336_v48 }
 0x218   :  { %v1329_v19 = vpop.xlane.xlu0 %1328 }
 0x219   :  { %v1376_v9 = vadd.f32 1e-06, %v1368_v4  ;;  %v1337_v36 = vmul.f32 0.03125, %v1329_v19  ;;  %v7108_v4 = vld [vmem:[#allocation5 + $0x2] ss:$0 sm:$0xff] }
 0x21a   :  { %v1349_v47 = vpop.xlane.xlu1 %1348 }
 0x21b   :  { %5854 = vrsqrt.f32 %v1376_v9  ;;  %v1361_v5 = vmul.f32 %v1337_v36, %v1337_v36  ;;  %v1357_v38 = vmul.f32 0.03125, %v1349_v47  ;;  %vm1386_vm14 = vweird.f32 %v1376_v9 }
 0x21d   :  { %v1365_v42 = vsub.f32 %v1357_v38, %v1361_v5 }
 0x21f   :  { %v1369_v56 = vmax.f32 %v1365_v42, 0.0 }
 0x220   :  { %v1332_v32 = vpop.xlane.xlu2 %1331 }
 0x221   :  { %v5855_v53 = vpop.eup %5854  ;;  %v1377_v3 = vadd.f32 1e-06, %v1369_v56  ;;  %v7101_v26 = vmul.f32 0.03125, %v1332_v32  ;;  %v7112_v56 = vld [vmem:[#allocation5 + $0x3] ss:$0 sm:$0xff] }
 0x222   :  { %v1381_v17 = vmul.f32 %v5855_v53, %v1376_v9  ;;  %vm1387_vm10 = vweird.f32 %v5855_v53 }
 0x223   :  { %5856 = vrsqrt.f32 %v1377_v3  ;;  %v1362_v54 = vmul.f32 %v7101_v26, %v7101_v26  ;;  %vm1388_vm4 = vmor %vm1386_vm14, %vm1387_vm10  ;;  %vm9286_vm14 = vcmask 261120  }
 0x224   :  { %v1382_v21 = vmul.f32 %v5855_v53, %v1381_v17 }
 0x226   :  { %v1383_v22 = vmul.f32 0.5, %v1382_v21 }
 0x228   :  { %v1384_v34 = vsub.f32 1.5, %v1383_v22  ;;  %v1352_v33 = vpop.xlane.xlu2 %1351  ;;  %v1335_v24 = vpop.xlane.xlu0 %1334 }
 0x229   :  { %v1358_v35 = vmul.f32 0.03125, %v1352_v33  ;;  %v5857_v52 = vpop.eup %5856  ;;  %v7105_v51 = vmul.f32 0.03125, %v1335_v24  ;;  %v1373_v24 = vsub.f32 %v7080_v43, %v1337_v36 }
 0x22a   :  { %v1385_v50 = vmul.f32 %v5855_v53, %v1384_v34  ;;  %v1355_v8 = vpop.xlane.xlu1 %1354  ;;  %v1391_v19 = vmul.f32 %v5857_v52, %v1377_v3  ;;  %vm1397_vm10 = vweird.f32 %v5857_v52 }
 0x22b   :  { %v1366_v47 = vsub.f32 %v1358_v35, %v1362_v54  ;;  %v1359_v5 = vmul.f32 0.03125, %v1355_v8  ;;  %v1363_v42 = vmul.f32 %v7105_v51, %v7105_v51 }
 0x22c   :  { %v1389_v38 = vsel %vm1388_vm4, %v5855_v53, %v1385_v50  ;;  %v1392_v17 = vmul.f32 %v5857_v52, %v1391_v19  ;;  %vm1396_vm4 = vweird.f32 %v1377_v3  ;;  %v7131_v3 = vld [vmem:[#allocation5 + $0x4] sm:$0x7f] }
 0x22d   :  { %v1420_v32 = vmul.f32 %v1389_v38, %v1372_v58  ;;  %v1370_v9 = vmax.f32 %v1366_v47, 0.0  ;;  %v1367_v21 = vsub.f32 %v1359_v5, %v1363_v42  ;;  %vm1398_vm12 = vmor %vm1396_vm4, %vm1397_vm10  ;;  %v7124_v58 = vld [vmem:[#allocation2] sm:$0xff]  ;;  %v1374_v47 = vsub.f32 %v7087_v41, %v7101_v26 }
 0x22e   :  { %v1393_v34 = vmul.f32 0.5, %v1392_v17  ;;  %v1375_v42 = vsub.f32 %v7093_v49, %v7105_v51  ;;  %v9000_v43 = vrot.slane %v7124_v58, 5  ;;  %v7135_v36 = vperm.slane %v7131_v3, 0 }
 0x22f   :  { %v1425_v22 = vmul.f32 %v7108_v4, %v1420_v32  ;;  %v1378_v61 = vadd.f32 1e-06, %v1370_v9  ;;  %v1371_v48 = vmax.f32 %v1367_v21, 0.0  ;;  %v7139_v32 = vperm.slane %v7131_v3, 1 }
 0x230   :  { %v1394_v54 = vsub.f32 1.5, %v1393_v34  ;;  %v7148_v51 = vperm.slane %v7131_v3, 2  ;;  %vm9291_vm10 = vcmp.ge.s32.totalorder %v6086_v14, 0  ;;  %v9292_v27 = vrot.slane %v7124_v58, 7 }
 0x231   :  { %v7116_v33 = vadd.f32 %v7112_v56, %v1425_v22  ;;  %5858 = vrsqrt.f32 %v1378_v61  ;;  %v7118_v53 = vadd.f32 1e-06, %v1371_v48  ;;  %v7154_v48 = vperm.slane %v7131_v3, 3 }
 0x232   :  { %v1395_v35 = vmul.f32 %v5857_v52, %v1394_v54  ;;  %vm9023_vm4 = vcmask 1045504  }
 0x233   :  { %1434 = vst.msk [vmem:[#allocation2 + $0x8] sm:$0xff] %vm9286_vm14, %v7116_v33  ;;  %5860 = vrsqrt.f32 %v7118_v53 }
 0x234   :  { %v1399_v50 = vsel %vm1398_vm12, %v5857_v52, %v1395_v35  ;;  %v9002_v52 = vrot.slane %v7124_v58, 6  ;;  %vm9287_vm12 = vmmov %vm9286_vm14  ;;  %vm9288_vm14 = vcmask 1042432  }
 0x235   :  { %v1421_v8 = vmul.f32 %v1399_v50, %v1373_v24  ;;  %v7160_v24 = vperm.slane %v7131_v3, 4 }
 0x237   :  { %v5859_v19 = vpop.eup %5858  ;;  %v1426_v5 = vmul.f32 %v7108_v4, %v1421_v8 }
 0x238   :  { %v1401_v38 = vmul.f32 %v5859_v19, %v1378_v61 }
 0x239   :  { %v5861_v41 = vpop.eup %5860  ;;  %v7142_v26 = vadd.f32 %v7112_v56, %v1426_v5 }
 0x23a   :  { %v1402_v17 = vmul.f32 %v5859_v19, %v1401_v38  ;;  %v7144_v9 = vld [vmem:[#allocation2 + $0x8] sm:$0xff]  ;;  %v1411_v21 = vmul.f32 %v5861_v41, %v7118_v53 }
 0x23b   :  { %v1452_v22 = vrot.slane %v7144_v9, 5  ;;  %v1475_v34 = vrot.slane %v7144_v9, 6  ;;  %1435 = vst.msk [vmem:[#allocation2 + $0x10] sm:$0xff] %vm9287_vm12, %v7142_v26  ;;  %v1502_v35 = vrot.slane %v7144_v9, 7  ;;  %vm9290_vm12 = vcmp.ge.s32.totalorder %v6080_v13, 0 }
 0x23c   :  { %v1403_v54 = vmul.f32 0.5, %v1402_v17  ;;  %v1412_v50 = vmul.f32 %v5861_v41, %v1411_v21 }
 0x23d   :  { %v1453_v8 = vsel %vm9288_vm14, %v9000_v43, %v1452_v22  ;;  %v1476_v5 = vsel %vm9289_vm1, %v9002_v52, %v1475_v34  ;;  %v1503_v10 = vsel %vm9293_vm15, %v9292_v27, %v1502_v35  ;;  %vm9294_vm14 = vcmp.ge.s32.totalorder %v6130_v37, 0 }
 0x23e   :  { %v1404_v38 = vsub.f32 1.5, %v1403_v54  ;;  %v1464_v17 = vsel %vm9290_vm12, %v1453_v8, 0.0  ;;  %v1487_v49 = vsel %vm9291_vm10, %v1476_v5, 0.0  ;;  %v1413_v21 = vmul.f32 0.5, %v1412_v50 }
 0x23f   :  { %v1469_v55 = vmul.f32 %v7135_v36, %v1464_v17  ;;  %v1492_v43 = vmul.f32 %v7139_v32, %v1487_v49  ;;  %v1514_v57 = vsel %vm9294_vm14, %v1503_v10, 0.0  ;;  %vm1416_vm1 = vweird.f32 %v7118_v53 }
 0x240   :  { %v1405_v52 = vmul.f32 %v5859_v19, %v1404_v38  ;;  %v7181_v54 = vperm.slane %v7131_v3, 5  ;;  %vm9295_vm10 = vweird.f32 %v5859_v19  ;;  %vm9296_vm12 = vweird.f32 %v1378_v61 }
 0x241   :  { %vm1408_vm8 = vmor %vm9296_vm12, %vm9295_vm10  ;;  %v1414_v8 = vsub.f32 1.5, %v1413_v21  ;;  %vm1417_vm15 = vweird.f32 %v5861_v41  ;;  %v1496_v27 = vadd.f32 %v1492_v43, %v1469_v55  ;;  %v1519_v50 = vmul.f32 %v7148_v51, %v1514_v57 }
 0x242   :  { %v1409_v5 = vsel %vm1408_vm8, %v5859_v19, %v1405_v52  ;;  %v1532_v49 = vmul.f32 %v7154_v48, %v7144_v9  ;;  %v1542_v10 = vrot.slane %v7144_v9, 1  ;;  %v1569_v38 = vrot.slane %v7144_v9, 2  ;;  %v7190_v46 = vld [vmem:[#allocation2 + $0x10] sm:$0xff]  ;;  %vm1418_vm14 = vmor %vm1416_vm1, %vm1417_vm15 }
 0x243   :  { %v1422_v17 = vmul.f32 %v1409_v5, %v1374_v47  ;;  %v1415_v11 = vmul.f32 %v5861_v41, %v1414_v8  ;;  %v1523_v6 = vadd.f32 %v1519_v50, %v1496_v27  ;;  %v1596_v61 = vrot.slane %v7144_v9, 3 }
 0x244   :  { %v1543_v55 = vrot.slane %v7190_v46, 1  ;;  %v1570_v57 = vrot.slane %v7190_v46, 2  ;;  %v1597_v19 = vrot.slane %v7190_v46, 3  ;;  %v9012_v8 = vrot.slane %v7190_v46, 6 }
 0x245   :  { %v1427_v52 = vmul.f32 %v7108_v4, %v1422_v17  ;;  %v1419_v47 = vsel %vm1418_vm14, %v5861_v41, %v1415_v11  ;;  %v1536_v21 = vadd.f32 %v1532_v49, %v1523_v6  ;;  %vm9297_vm8 = vcmask 1046528  }
 0x246   :  { %v1423_v27 = vmul.f32 %v1419_v47, %v1375_v42  ;;  %v1544_v9 = vsel %vm9297_vm8, %v1542_v10, %v1543_v55  ;;  %v1571_v53 = vsel %vm9023_vm4, %v1569_v38, %v1570_v57  ;;  %vm9298_vm1 = vcmask 1044480  }
 0x247   :  { %v7204_v50 = vadd.f32 %v7112_v56, %v1427_v52  ;;  %v1560_v5 = vmul.f32 %v7160_v24, %v1544_v9  ;;  %v1598_v63 = vsel %vm9298_vm1, %v1596_v61, %v1597_v19  ;;  %v7209_v43 = vperm.slane %v7131_v3, 6  ;;  %v7231_v52 = vld [vmem:[#allocation5 + $0xb] ss:$0 sm:$0xff] }
 0x248   :  { %v1428_v11 = vmul.f32 %v7108_v4, %v1423_v27  ;;  %v9299_v6 = vrot.slane %v7190_v46, 5  ;;  %vm9300_vm10 = vcmask 1042432   ;;  %vm9301_vm12 = vcmask 1041408  }
 0x249   :  { %v1478_v41 = vsel %vm9301_vm12, %v1475_v34, %v9012_v8  ;;  %v9011_v49 = vrot.slane %v7190_v46, 7  ;;  %vm9302_vm15 = vcmask 261120   ;;  %v1564_v10 = vadd.f32 %v1560_v5, %v1536_v21 }
 0x24a   :  { %v1455_v42 = vsel %vm9300_vm10, %v1452_v22, %v9299_v6  ;;  %1436 = vst.msk [vmem:[#allocation2 + $0x18] sm:$0xff] %vm9302_vm15, %v7204_v50  ;;  %v1587_v38 = vmul.f32 %v7181_v54, %v1571_v53  ;;  %v1493_v4 = vmul.f32 %v7139_v32, %v1478_v41  ;;  %v7225_v17 = vadd.f32 %v7112_v56, %v1428_v11  ;;  %vm9304_vm8 = vmmov %vm9302_vm15 }
 0x24b   :  { %v1470_v3 = vmul.f32 %v7135_v36, %v1455_v42  ;;  %vm9303_vm14 = vcmask 1040384   ;;  %v1614_v61 = vmul.f32 %v7209_v43, %v1598_v63  ;;  %v1549_v63 = vrot.slane %v6861_v62, 1  ;;  %vm9305_vm1 = vmmov %vm9304_vm8 }
 0x24c   :  { %v1505_v22 = vsel %vm9303_vm14, %v1502_v35, %v9011_v49  ;;  %v1591_v34 = vadd.f32 %v1587_v38, %v1564_v10  ;;  %1437 = vst.msk [vmem:[#allocation2 + $0x20] sm:$0xff] %vm9304_vm8, %v7225_v17  ;;  %v1533_v35 = vmul.f32 %v7154_v48, %v7190_v46  ;;  %v1576_v38 = vrot.slane %v6861_v62, 2  ;;  %vm9306_vm10 = vmmov %vm9305_vm1 }
 0x24d   :  { %v1497_v47 = vadd.f32 %v1493_v4, %v1470_v3  ;;  %v1520_v21 = vmul.f32 %v7148_v51, %v1505_v22  ;;  %v1603_v3 = vrot.slane %v6861_v62, 3  ;;  %vm9307_vm12 = vcmask 1046528  }
 0x24e   :  { %v1618_v27 = vadd.f32 %v1614_v61, %v1591_v34  ;;  %vm9308_vm15 = vcmp.lt.s32.totalorder %v6536_v23, 16  ;;  %vm9309_vm14 = vcmp.lt.s32.totalorder %v6921_v0, 16  ;;  %vm9310_vm8 = vcmask 1044480  }
 0x24f   :  { %v1524_v9 = vadd.f32 %v1520_v21, %v1497_v47 }
 0x250   :  { %v7237_v56 = vadd.f32 %v7231_v52, %v1618_v27 }
 0x251   :  { %v7239_v53 = vld [vmem:[#allocation2 + $0x18] sm:$0xff]  ;;  %v1537_v41 = vadd.f32 %v1533_v35, %v1524_v9 }
 0x252   :  { %v1630_v5 = vsel %vm9305_vm1, %v7237_v56, 0.0  ;;  %v1646_v11 = vmul.f32 %v7237_v56, %v7237_v56  ;;  %v9010_v6 = vrot.slane %v7239_v53, 1  ;;  %v9009_v42 = vrot.slane %v7239_v53, 2 }
 0x253   :  { %1631 = vadd.xlane.f32.xlu2 %v1630_v5  ;;  %v9008_v10 = vrot.slane %v7239_v53, 3  ;;  %v7260_v61 = vld [vmem:[#allocation2 + $0x20] sm:$0xff]  ;;  %v1456_v47 = vrot.slane %v7239_v53, 5  ;;  %v1506_v5 = vrot.slane %v7239_v53, 7  ;;  %vm9311_vm1 = vcmp.lt.s32.totalorder %v6118_v30, 16 }
 0x254   :  { %v1650_v4 = vsel %vm9306_vm10, %v1646_v11, 0.0  ;;  %v1546_v22 = vsel %vm9307_vm12, %v1543_v55, %v9010_v6  ;;  %v1573_v34 = vsel %vm9023_vm4, %v1570_v57, %v9009_v42  ;;  %v1458_v55 = vrot.slane %v7260_v61, 5 }
 0x255   :  { %1651 = vadd.xlane.f32.xlu1 %v1650_v4  ;;  %v1556_v21 = vsel %vm9308_vm15, %v1546_v22, 0.0  ;;  %v1583_v62 = vsel %vm9309_vm14, %v1573_v34, 0.0  ;;  %v1600_v27 = vsel %vm9310_vm8, %v1597_v19, %v9008_v10  ;;  %v1479_v57 = vrot.slane %v7239_v53, 6 }
 0x256   :  { %v1561_v9 = vmul.f32 %v7160_v24, %v1556_v21  ;;  %v1481_v35 = vrot.slane %v7260_v61, 6  ;;  %v1588_v11 = vmul.f32 %v7181_v54, %v1583_v62  ;;  %v1610_v4 = vsel %vm9311_vm1, %v1600_v27, 0.0 }
 0x257   :  { %vm9312_vm10 = vcmask 1042432   ;;  %v1508_v34 = vrot.slane %v7260_v61, 7  ;;  %vm9313_vm12 = vcmask 1041408   ;;  %v1547_v42 = vrot.slane %v7260_v61, 1 }
 0x258   :  { %v1459_v22 = vsel %vm9312_vm10, %v1456_v47, %v1458_v55  ;;  %v1565_v19 = vadd.f32 %v1561_v9, %v1537_v41  ;;  %v1482_v21 = vsel %vm9313_vm12, %v1479_v57, %v1481_v35  ;;  %vm9314_vm15 = vcmask 1040384   ;;  %vm9317_vm8 = vmmov %vm9312_vm10 }
 0x259   :  { %v1472_v10 = vmul.f32 %v7135_v36, %v1459_v22  ;;  %v1495_v6 = vmul.f32 %v7139_v32, %v1482_v21  ;;  %v1509_v49 = vsel %vm9314_vm15, %v1506_v5, %v1508_v34  ;;  %v1574_v62 = vrot.slane %v7260_v61, 2 }
 0x25a   :  { %v1601_v8 = vrot.slane %v7260_v61, 3  ;;  %v1592_v27 = vadd.f32 %v1588_v11, %v1565_v19  ;;  %v1615_v55 = vmul.f32 %v7209_v43, %v1610_v4  ;;  %vm9315_vm14 = vcmask 1046528  }
 0x25b   :  { %v1550_v20 = vsel %vm9315_vm14, %v1547_v42, %v1549_v63  ;;  %v9316_v41 = vrot.slane %v7190_v46, 5  ;;  %v1499_v35 = vadd.f32 %v1495_v6, %v1472_v10  ;;  %v1522_v22 = vmul.f32 %v7148_v51, %v1509_v49 }
 0x25c   :  { %v1577_v21 = vsel %vm9023_vm4, %v1574_v62, %v1576_v38  ;;  %v1619_v44 = vadd.f32 %v1615_v55, %v1592_v27  ;;  %v1535_v34 = vmul.f32 %v7154_v48, %v7260_v61  ;;  %vm9318_vm1 = vcmp.lt.s32.totalorder %v6548_v39, 16 }
 0x25d   :  { %v1457_v9 = vsel %vm9317_vm8, %v9316_v41, %v1456_v47  ;;  %v1558_v11 = vsel %vm9318_vm1, %v1550_v20, 0.0  ;;  %v1526_v19 = vadd.f32 %v1522_v22, %v1499_v35  ;;  %vm9319_vm10 = vcmp.lt.s32.totalorder %v6924_v28, 16 }
 0x25e   :  { %v1585_v63 = vsel %vm9319_vm10, %v1577_v21, 0.0  ;;  %vm9320_vm12 = vcmask 1044480   ;;  %vm9321_vm15 = vcmp.ge.s32.totalorder %v6107_v25, 0  ;;  %v7304_v49 = vadd.f32 %v7231_v52, %v1619_v44 }
 0x25f   :  { %v1604_v4 = vsel %vm9320_vm12, %v1601_v8, %v1603_v3  ;;  %v1466_v6 = vsel %vm9321_vm15, %v1457_v9, 0.0  ;;  %v9322_v38 = vrot.slane %v7190_v46, 6  ;;  %vm9323_vm14 = vcmask 1041408  }
 0x260   :  { %v1471_v10 = vmul.f32 %v7135_v36, %v1466_v6  ;;  %v9324_v20 = vrot.slane %v7190_v46, 7  ;;  %vm9325_vm8 = vcmask 1040384   ;;  %v1539_v27 = vadd.f32 %v1535_v34, %v1526_v19 }
 0x261   :  { %v1480_v61 = vsel %vm9323_vm14, %v9322_v38, %v1479_v57  ;;  %v1563_v55 = vmul.f32 %v7160_v24, %v1558_v11  ;;  %vm9326_vm1 = vcmp.ge.s32.totalorder %v6121_v31, 0  ;;  %vm9327_vm10 = vcmp.ge.s32.totalorder %v6240_v40, 0 }
 0x262   :  { %v1507_v47 = vsel %vm9325_vm8, %v9324_v20, %v1506_v5  ;;  %v1489_v3 = vsel %vm9326_vm1, %v1480_v61, 0.0  ;;  %vm9328_vm12 = vcmask 261120   ;;  %v1647_v41 = vmul.f32 %v7304_v49, %v7304_v49 }
 0x263   :  { %v1516_v44 = vsel %vm9327_vm10, %v1507_v47, 0.0  ;;  %v1633_v36 = vsel %vm9328_vm12, %v7304_v49, 0.0  ;;  %vm9329_vm15 = vcmp.lt.s32.totalorder %v6211_v15, 16  ;;  %v1494_v57 = vmul.f32 %v7139_v32, %v1489_v3  ;;  %vm9330_vm14 = vmmov %vm9328_vm12 }
 0x264   :  { %v1612_v46 = vsel %vm9329_vm15, %v1604_v4, 0.0  ;;  %1634 = vadd.xlane.f32.xlu0 %v1633_v36  ;;  %v1567_v5 = vadd.f32 %v1563_v55, %v1539_v27  ;;  %v1590_v9 = vmul.f32 %v7181_v54, %v1585_v63  ;;  %v1653_v35 = vsel %vm9330_vm14, %v1647_v41, 0.0  ;;  %vm9336_vm10 = vmmov %vm9328_vm12 }
 0x265   :  { %v1498_v22 = vadd.f32 %v1494_v57, %v1471_v10  ;;  %v1521_v21 = vmul.f32 %v7148_v51, %v1516_v44  ;;  %1654 = vadd.xlane.f32.xlu2 %v1653_v35  ;;  %v1617_v11 = vmul.f32 %v7209_v43, %v1612_v46  ;;  %v9331_v19 = vrot.slane %v7239_v53, 1  ;;  %vm9337_vm12 = vmmov %vm9336_vm10 }
 0x266   :  { %v1594_v34 = vadd.f32 %v1590_v9, %v1567_v5  ;;  %vm9332_vm8 = vcmask 1046528   ;;  %v1534_v32 = vmul.f32 %v7154_v48, %v7239_v53  ;;  %v9333_v63 = vrot.slane %v7239_v53, 2  ;;  %vm9338_vm15 = vmmov %vm9336_vm10 }
 0x267   :  { %v1548_v6 = vsel %vm9332_vm8, %v9331_v19, %v1547_v42  ;;  %v1525_v4 = vadd.f32 %v1521_v21, %v1498_v22  ;;  %v9334_v47 = vrot.slane %v7239_v53, 3  ;;  %vm9335_vm1 = vcmask 1044480   ;;  %vm9339_vm14 = vmmov %vm9336_vm10  ;;  %v5758_v21 = vld [vmem:[#allocation3 + $0x94] sm:$0xff] }
 0x268   :  { %v1621_v38 = vadd.f32 %v1617_v11, %v1594_v34  ;;  %v1575_v61 = vsel %vm9023_vm4, %v9333_v63, %v1574_v62  ;;  %v1562_v51 = vmul.f32 %v7160_v24, %v1548_v6  ;;  %1772 = vmatpush.bf16.msra.mxu1 %v5758_v21 }
 0x269   :  { %v1538_v10 = vadd.f32 %v1534_v32, %v1525_v4  ;;  %v1602_v27 = vsel %vm9335_vm1, %v9334_v47, %v1601_v8  ;;  %v1589_v55 = vmul.f32 %v7181_v54, %v1575_v61 }
 0x26a   :  { %v7339_v20 = vadd.f32 %v7231_v52, %v1621_v38  ;;  %v1616_v62 = vmul.f32 %v7209_v43, %v1602_v27 }
 0x26b   :  { %v1566_v42 = vadd.f32 %v1562_v51, %v1538_v10 }
 0x26c   :  { %v1639_v48 = vsel %vm9336_vm10, %v7339_v20, 0.0  ;;  %v1649_v53 = vmul.f32 %v7339_v20, %v7339_v20 }
 0x26d   :  { %1640 = vadd.xlane.f32.xlu1 %v1639_v48  ;;  %v1593_v3 = vadd.f32 %v1589_v55, %v1566_v42  ;;  %v5757_v55 = vld [vmem:[#allocation3 + $0x8c] sm:$0xff] }
 0x26e   :  { %v1659_v41 = vsel %vm9339_vm14, %v1649_v53, 0.0  ;;  %1773 = vmatpush.bf16.msra.mxu1 %v5757_v55 }
 0x26f   :  { %v1620_v44 = vadd.f32 %v1616_v62, %v1593_v3 }
 0x271   :  { %v7349_v24 = vadd.f32 %v7231_v52, %v1620_v44 }
 0x273   :  { %v1636_v36 = vsel %vm9337_vm12, %v7349_v24, 0.0  ;;  %v1648_v8 = vmul.f32 %v7349_v24, %v7349_v24 }
 0x274   :  { %1637 = vadd.xlane.f32.xlu0 %v1636_v36 }
 0x275   :  { %v1656_v54 = vsel %vm9338_vm15, %v1648_v8, 0.0 }
 0x276   :  { %1657 = vadd.xlane.f32.xlu2 %v1656_v54 }
 0x27c   :  { %1660 = vadd.xlane.f32.xlu0 %v1659_v41 }
 0x2c6   :  { %v1632_v43 = vpop.xlane.xlu2 %1631 }
 0x2c7   :  { %v1642_v46 = vmul.f32 0.03125, %v1632_v43 }
 0x2c8   :  { %v1652_v52 = vpop.xlane.xlu1 %1651 }
 0x2c9   :  { %v1666_v57 = vmul.f32 %v1642_v46, %v1642_v46  ;;  %v1662_v5 = vmul.f32 0.03125, %v1652_v52 }
 0x2cb   :  { %v1670_v9 = vsub.f32 %v1662_v5, %v1666_v57 }
 0x2cd   :  { %v1674_v35 = vmax.f32 %v1670_v9, 0.0  ;;  %v1678_v9 = vsub.f32 %v7237_v56, %v1642_v46  ;;  %v5820_v46 = vld [vmem:[#allocation5 + $0xd] ss:$0 sm:$0xff] }
 0x2cf   :  { %v1682_v22 = vadd.f32 1e-06, %v1674_v35 }
 0x2d1   :  { %5862 = vrsqrt.f32 %v1682_v22  ;;  %vm1692_vm1 = vweird.f32 %v1682_v22 }
 0x2d7   :  { %v1635_v34 = vpop.xlane.xlu0 %1634  ;;  %v5863_v6 = vpop.eup %5862 }
 0x2d8   :  { %v1643_v11 = vmul.f32 0.03125, %v1635_v34  ;;  %v1655_v19 = vpop.xlane.xlu2 %1654  ;;  %v1687_v38 = vmul.f32 %v5863_v6, %v1682_v22  ;;  %vm1693_vm8 = vweird.f32 %v5863_v6 }
 0x2d9   :  { %v1663_v32 = vmul.f32 0.03125, %v1655_v19  ;;  %vm1694_vm10 = vmor %vm1692_vm1, %vm1693_vm8  ;;  %v5819_v19 = vld [vmem:[#allocation5 + $0xc] ss:$0 sm:$0xff]  ;;  %vm9340_vm8 = vcmask 261120  }
 0x2da   :  { %v1667_v4 = vmul.f32 %v1643_v11, %v1643_v11  ;;  %v1688_v61 = vmul.f32 %v5863_v6, %v1687_v38  ;;  %v1679_v22 = vsub.f32 %v7304_v49, %v1643_v11 }
 0x2dc   :  { %v1671_v63 = vsub.f32 %v1663_v32, %v1667_v4  ;;  %v1689_v47 = vmul.f32 0.5, %v1688_v61 }
 0x2de   :  { %v1675_v10 = vmax.f32 %v1671_v63, 0.0  ;;  %v1690_v27 = vsub.f32 1.5, %v1689_v47 }
 0x2e0   :  { %v1683_v51 = vadd.f32 1e-06, %v1675_v10  ;;  %v1691_v62 = vmul.f32 %v5863_v6, %v1690_v27  ;;  %v1641_v36 = vpop.xlane.xlu1 %1640 }
 0x2e1   :  { %v1645_v43 = vmul.f32 0.03125, %v1641_v36 }
 0x2e2   :  { %5864 = vrsqrt.f32 %v1683_v51  ;;  %v1695_v57 = vsel %vm1694_vm10, %v5863_v6, %v1691_v62  ;;  %vm1702_vm15 = vweird.f32 %v1683_v51 }
 0x2e3   :  { %v1726_v4 = vmul.f32 %v1695_v57, %v1678_v9  ;;  %v1669_v32 = vmul.f32 %v1645_v43, %v1645_v43 }
 0x2e5   :  { %v1731_v47 = vmul.f32 %v5819_v19, %v1726_v4  ;;  %v1681_v4 = vsub.f32 %v7339_v20, %v1645_v43 }
 0x2e7   :  { %v1638_v42 = vpop.xlane.xlu0 %1637 }
 0x2e8   :  { %v5865_v48 = vpop.eup %5864  ;;  %v1644_v3 = vmul.f32 0.03125, %v1638_v42 }
 0x2e9   :  { %v1697_v44 = vmul.f32 %v5865_v48, %v1683_v51  ;;  %v1658_v8 = vpop.xlane.xlu2 %1657  ;;  %vm1703_vm12 = vweird.f32 %v5865_v48 }
 0x2ea   :  { %v1668_v54 = vmul.f32 %v1644_v3, %v1644_v3  ;;  %v1664_v53 = vmul.f32 0.03125, %v1658_v8  ;;  %vm1704_vm14 = vmor %vm1702_vm15, %vm1703_vm12  ;;  %v1680_v9 = vsub.f32 %v7349_v24, %v1644_v3 }
 0x2eb   :  { %v1698_v41 = vmul.f32 %v5865_v48, %v1697_v44  ;;  %v1736_v44 = vadd.f32 %v5820_v46, %v1731_v47  ;;  %v5821_v47 = vld [vmem:[#allocation5 + $0xe] ss:$0 sm:$0xff] }
 0x2ec   :  { %v1672_v52 = vsub.f32 %v1664_v53, %v1668_v54 }
 0x2ed   :  { %v1699_v5 = vmul.f32 0.5, %v1698_v41 }
 0x2ee   :  { %v1676_v35 = vmax.f32 %v1672_v52, 0.0 }
 0x2ef   :  { %v1700_v21 = vsub.f32 1.5, %v1699_v5  ;;  %v1661_v34 = vpop.xlane.xlu0 %1660 }
 0x2f0   :  { %v1684_v38 = vadd.f32 1e-06, %v1676_v35  ;;  %v1665_v63 = vmul.f32 0.03125, %v1661_v34 }
 0x2f1   :  { %v1701_v61 = vmul.f32 %v5865_v48, %v1700_v21 }
 0x2f2   :  { %5866 = vrsqrt.f32 %v1684_v38  ;;  %v1673_v10 = vsub.f32 %v1665_v63, %v1669_v32  ;;  %vm1712_vm10 = vweird.f32 %v1684_v38 }
 0x2f3   :  { %v1705_v6 = vsel %vm1704_vm14, %v5865_v48, %v1701_v61 }
 0x2f4   :  { %v1727_v27 = vmul.f32 %v1705_v6, %v1679_v22  ;;  %v1677_v56 = vmax.f32 %v1673_v10, 0.0 }
 0x2f6   :  { %v1732_v42 = vmul.f32 %v5819_v19, %v1727_v27  ;;  %v1685_v55 = vadd.f32 1e-06, %v1677_v56 }
 0x2f8   :  { %v5867_v62 = vpop.eup %5866  ;;  %5868 = vrsqrt.f32 %v1685_v55  ;;  %v1737_v36 = vadd.f32 %v5820_v46, %v1732_v42  ;;  %vm1722_vm14 = vweird.f32 %v1685_v55 }
 0x2f9   :  { %v1707_v8 = vmul.f32 %v5867_v62, %v1684_v38  ;;  %vm1713_vm1 = vweird.f32 %v5867_v62 }
 0x2fa   :  { %v1740_v54 = vpack.c.bf16 %v1737_v36, %v1736_v44  ;;  %vm1714_vm12 = vmor %vm1712_vm10, %vm1713_vm1  ;;  %vm9341_vm1 = vcmask 261120  }
 0x2fb   :  { %v1708_v53 = vmul.f32 %v5867_v62, %v1707_v8 }
 0x2fc   :  { %5490 = vmatmul.msk.bf16.vlgmr.msra.gmra.mxu1 %vm9340_vm8, %v1740_v54 }
 0x2fd   :  { %v1709_v49 = vmul.f32 0.5, %v1708_v53 }
 0x2fe   :  { %v5869_v11 = vpop.eup %5868 }
 0x2ff   :  { %v1710_v51 = vsub.f32 1.5, %v1709_v49  ;;  %v1717_v48 = vmul.f32 %v5869_v11, %v1685_v55  ;;  %vm1723_vm15 = vweird.f32 %v5869_v11 }
 0x300   :  { %vm1724_vm8 = vmor %vm1722_vm14, %vm1723_vm15 }
 0x301   :  { %v1711_v41 = vmul.f32 %v5867_v62, %v1710_v51  ;;  %v1718_v52 = vmul.f32 %v5869_v11, %v1717_v48 }
 0x303   :  { %v1719_v57 = vmul.f32 0.5, %v1718_v52  ;;  %v1715_v5 = vsel %vm1714_vm12, %v5867_v62, %v1711_v41 }
 0x304   :  { %v1728_v21 = vmul.f32 %v1715_v5, %v1680_v9 }
 0x305   :  { %v1720_v35 = vsub.f32 1.5, %v1719_v57 }
 0x306   :  { %v1733_v61 = vmul.f32 %v5819_v19, %v1728_v21 }
 0x307   :  { %v1721_v34 = vmul.f32 %v5869_v11, %v1720_v35 }
 0x308   :  { %v1738_v10 = vadd.f32 %v5820_v46, %v1733_v61 }
 0x309   :  { %v1725_v32 = vsel %vm1724_vm8, %v5869_v11, %v1721_v34 }
 0x30a   :  { %v1729_v63 = vmul.f32 %v1725_v32, %v1681_v4 }
 0x30c   :  { %v1734_v22 = vmul.f32 %v5819_v19, %v1729_v63 }
 0x30e   :  { %v1739_v38 = vadd.f32 %v5820_v46, %v1734_v22 }
 0x310   :  { %v1741_v6 = vpack.c.bf16 %v1739_v38, %v1738_v10 }
 0x312   :  { %5491 = vmatmul.msk.bf16.gmra.mxu1 %vm9341_vm1, %v1741_v6 }
 0x379   :  { %v1775_v27 = vpop.f32.mrf.mxu1 }
 0x37a   :  { %v7365_v24 = vadd.f32 %v5821_v47, %v1775_v27 }
 0x37c   :  { %v7368_v3 = vmul.f32 0.70710677, %v7365_v24 }
 0x37e   :  { %v1793_v20 = vmul.f32 %v7368_v3, %v7368_v3 }
 0x380   :  { %v1794_v43 = vmin.f32 %v1793_v20, 16.0 }
 0x381   :  { %v1777_v44 = vpop.f32.mrf.mxu1 }
 0x382   :  { %v1806_v56 = vmul.f32 3.8918573e-05, %v1794_v43  ;;  %v7372_v36 = vadd.f32 %v5821_v47, %v1777_v44  ;;  %v1795_v53 = vmul.f32 2.1237322e-06, %v1794_v43 }
 0x384   :  { %v1807_v42 = vadd.f32 0.001143296, %v1806_v56  ;;  %v7375_v54 = vmul.f32 0.70710677, %v7372_v36  ;;  %v1796_v48 = vadd.f32 0.00028619796, %v1795_v53 }
 0x386   :  { %v1808_v55 = vmul.f32 %v1807_v42, %v1794_v43  ;;  %v1833_v49 = vmul.f32 %v7375_v54, %v7375_v54  ;;  %v1797_v35 = vmul.f32 %v1796_v48, %v1794_v43 }
 0x388   :  { %v1809_v19 = vadd.f32 0.014752088, %v1808_v55  ;;  %v1834_v51 = vmin.f32 %v1833_v49, 16.0  ;;  %v1798_v63 = vadd.f32 0.0036580483, %v1797_v35 }
 0x38a   :  { %v1810_v62 = vmul.f32 %v1809_v19, %v1794_v43  ;;  %v1835_v41 = vmul.f32 2.1237322e-06, %v1834_v51  ;;  %v1846_v52 = vmul.f32 3.8918573e-05, %v1834_v51  ;;  %v1799_v38 = vmul.f32 %v1798_v63, %v1794_v43 }
 0x38c   :  { %v1811_v46 = vadd.f32 0.112945676, %v1810_v62  ;;  %v1836_v5 = vadd.f32 0.00028619796, %v1835_v41  ;;  %v1847_v9 = vadd.f32 0.001143296, %v1846_v52 }
 0x38d   :  { %v1800_v19 = vadd.f32 0.05243302, %v1799_v38 }
 0x38e   :  { %v1812_v8 = vmul.f32 %v1811_v46, %v1794_v43  ;;  %v1848_v21 = vmul.f32 %v1847_v9, %v1834_v51  ;;  %v1837_v4 = vmul.f32 %v1836_v5, %v1834_v51 }
 0x38f   :  { %v1780_v20 = vpop.f32.mrf.mxu1  ;;  %v1801_v49 = vmul.f32 %v1800_v19, %v1794_v43 }
 0x390   :  { %v1813_v11 = vadd.f32 0.4994258, %v1812_v8  ;;  %v1849_v32 = vadd.f32 0.014752088, %v1848_v21  ;;  %v1838_v22 = vadd.f32 0.0036580483, %v1837_v4  ;;  %v7382_v42 = vadd.f32 %v5821_v47, %v1780_v20 }
 0x391   :  { %v1802_v9 = vadd.f32 0.18741608, %v1801_v49 }
 0x392   :  { %v1814_v57 = vmul.f32 %v1813_v11, %v1794_v43  ;;  %v1850_v61 = vmul.f32 %v1849_v32, %v1834_v51  ;;  %v1839_v27 = vmul.f32 %v1838_v22, %v1834_v51  ;;  %v7387_v44 = vmul.f32 0.70710677, %v7382_v42 }
 0x394   :  { %v7379_v34 = vadd.f32 1.0, %v1814_v57  ;;  %v1851_v10 = vadd.f32 0.112945676, %v1850_v61  ;;  %v1840_v46 = vadd.f32 0.05243302, %v1839_v27  ;;  %v1873_v11 = vmul.f32 %v7387_v44, %v7387_v44 }
 0x396   :  { %5870 = vrcp.f32 %v7379_v34  ;;  %v1852_v6 = vmul.f32 %v1851_v10, %v1834_v51  ;;  %v1841_v48 = vmul.f32 %v1840_v46, %v1834_v51  ;;  %v7393_v41 = vmin.f32 %v1873_v11, 16.0 }
 0x397   :  { %v1782_v52 = vpop.f32.mrf.mxu1  ;;  %v1825_v20 = vand.u32 2147483647, %v7379_v34  ;;  %vm1821_vm15 = vweird.f32 %v7379_v34 }
 0x398   :  { %v1853_v56 = vadd.f32 0.4994258, %v1852_v6  ;;  %v7395_v5 = vadd.f32 %v5821_v47, %v1782_v52  ;;  %v1875_v35 = vmul.f32 2.1237322e-06, %v7393_v41  ;;  %v1886_v21 = vmul.f32 3.8918573e-05, %v7393_v41 }
 0x399   :  { %v1842_v32 = vadd.f32 0.18741608, %v1841_v48  ;;  %v1803_v6 = vmul.f32 %v1802_v9, %v1794_v43 }
 0x39a   :  { %v1854_v62 = vmul.f32 %v1853_v56, %v1834_v51  ;;  %v7400_v4 = vmul.f32 0.70710677, %v7395_v5  ;;  %v1876_v63 = vadd.f32 0.00028619796, %v1875_v35  ;;  %v1887_v61 = vadd.f32 0.001143296, %v1886_v21 }
 0x39b   :  { %v1827_v56 = vand.u32 2147483648, %v7379_v34  ;;  %v1843_v46 = vmul.f32 %v1842_v32, %v1834_v51 }
 0x39c   :  { %v7384_v55 = vpop.eup %5870  ;;  %v1855_v53 = vadd.f32 1.0, %v1854_v62  ;;  %v1913_v38 = vmul.f32 %v7400_v4, %v7400_v4  ;;  %v1888_v27 = vmul.f32 %v1887_v61, %v7393_v41  ;;  %v1877_v19 = vmul.f32 %v1876_v63, %v7393_v41 }
 0x39d   :  { %v1817_v8 = vmul.f32 %v7384_v55, %v7379_v34  ;;  %vm1822_vm10 = vweird.f32 %v7384_v55  ;;  %v1844_v32 = vadd.f32 1.1283791, %v1843_v46 }
 0x39e   :  { %5872 = vrcp.f32 %v1855_v53  ;;  %v7409_v62 = vmin.f32 %v1913_v38, 16.0  ;;  %v1889_v49 = vadd.f32 0.014752088, %v1888_v27  ;;  %v1867_v48 = vand.u32 2147483648, %v1855_v53  ;;  %vm7419_vm14 = vmor %vm1821_vm15, %vm1822_vm10 }
 0x39f   :  { %v1818_v57 = vsub.f32 1.0, %v1817_v8  ;;  %v1865_v9 = vand.u32 2147483647, %v1855_v53  ;;  %v1878_v21 = vadd.f32 0.0036580483, %v1877_v19  ;;  %vm1861_vm8 = vweird.f32 %v1855_v53 }
 0x3a0   :  { %v1915_v43 = vmul.f32 2.1237322e-06, %v7409_v62  ;;  %v1926_v52 = vmul.f32 3.8918573e-05, %v7409_v62  ;;  %v1890_v35 = vmul.f32 %v1889_v49, %v7393_v41  ;;  %v1868_v27 = vor.u32 1.1754944e-38, %v1867_v48 }
 0x3a1   :  { %v1819_v10 = vmul.f32 %v7384_v55, %v1818_v57  ;;  %vm1866_vm10 = vcmp.eq.f32.partialorder %v1865_v9, 8.507059e+37  ;;  %vm1826_vm15 = vcmp.eq.f32.partialorder %v1825_v20, 8.507059e+37 }
 0x3a2   :  { %v1916_v63 = vadd.f32 0.00028619796, %v1915_v43  ;;  %v1927_v61 = vadd.f32 0.001143296, %v1926_v52  ;;  %v1891_v38 = vadd.f32 0.112945676, %v1890_v35 }
 0x3a3   :  { %v1820_v11 = vadd.f32 %v7384_v55, %v1819_v10  ;;  %v1828_v52 = vor.u32 1.1754944e-38, %v1827_v56 }
 0x3a4   :  { %v5873_v22 = vpop.eup %5872  ;;  %v1928_v34 = vmul.f32 %v1927_v61, %v7409_v62  ;;  %v1892_v43 = vmul.f32 %v1891_v38, %v7393_v41  ;;  %v5762_v38 = vld [vmem:[#allocation3 + $0xb4] sm:$0xff] }
 0x3a5   :  { %v1857_v47 = vmul.f32 %v5873_v22, %v1855_v53  ;;  %vm1862_vm12 = vweird.f32 %v5873_v22  ;;  %v1824_v19 = vsel %vm7419_vm14, %v7384_v55, %v1820_v11  ;;  %v1879_v53 = vmul.f32 %v1878_v21, %v7393_v41  ;;  %2008 = vmatpush.bf16.msra.mxu2 %v5762_v38 }
 0x3a6   :  { %vm1863_vm1 = vmor %vm1861_vm8, %vm1862_vm12  ;;  %v1893_v48 = vadd.f32 0.4994258, %v1892_v43  ;;  %v5760_v43 = vld [vmem:[#allocation3 + $0xa4] sm:$0xff]  ;;  %vm9015_vm8 = vcmask 523264  }
 0x3a7   :  { %v1858_v8 = vsub.f32 1.0, %v1857_v47  ;;  %v1804_v47 = vadd.f32 1.1283791, %v1803_v6  ;;  %v1845_v6 = vmul.f32 %v1844_v32, %v7375_v54  ;;  %v1880_v11 = vadd.f32 0.05243302, %v1879_v53 }
 0x3a8   :  { %v1786_v53 = vmul.f32 0.5, %v7372_v36 }
 0x3a9   :  { %v1859_v57 = vmul.f32 %v5873_v22, %v1858_v8  ;;  %v1917_v8 = vmul.f32 %v1916_v63, %v7409_v62  ;;  %v1829_v63 = vsel %vm1826_vm15, %v1828_v52, %v1824_v19  ;;  %v1805_v51 = vmul.f32 %v1804_v47, %v7368_v3 }
 0x3aa   :  { %v1881_v32 = vmul.f32 %v1880_v11, %v7393_v41 }
 0x3ab   :  { %v1860_v10 = vadd.f32 %v5873_v22, %v1859_v57  ;;  %v1929_v57 = vadd.f32 0.014752088, %v1928_v34  ;;  %v1918_v35 = vadd.f32 0.0036580483, %v1917_v8  ;;  %v1830_v56 = vmul.f32 %v1829_v63, %v1805_v51 }
 0x3ad   :  { %v1864_v49 = vsel %vm1863_vm1, %v5873_v22, %v1860_v10  ;;  %v1930_v61 = vmul.f32 %v1929_v57, %v7409_v62  ;;  %v1894_v22 = vmul.f32 %v1893_v48, %v7393_v41  ;;  %v1919_v21 = vmul.f32 %v1918_v35, %v7409_v62 }
 0x3ae   :  { %v1869_v46 = vsel %vm1866_vm10, %v1868_v27, %v1864_v49  ;;  %v5761_v27 = vld [vmem:[#allocation3 + $0xac] sm:$0xff]  ;;  %v5492_v8 = vclamps-f32 %v1830_v56, 1.0  ;;  %v1882_v49 = vadd.f32 0.18741608, %v1881_v32  ;;  %v1785_v35 = vmul.f32 0.5, %v7365_v24 }
 0x3af   :  { %v1870_v55 = vmul.f32 %v1869_v46, %v1845_v6  ;;  %v1931_v9 = vadd.f32 0.112945676, %v1930_v61  ;;  %v1895_v10 = vadd.f32 1.0, %v1894_v22  ;;  %v1920_v3 = vadd.f32 0.05243302, %v1919_v21  ;;  %2009 = vmatpush.bf16.msra.mxu2 %v5761_v27 }
 0x3b0   :  { %v1953_v46 = vadd.f32 1.0, %v5492_v8  ;;  %v1883_v61 = vmul.f32 %v1882_v49, %v7393_v41 }
 0x3b1   :  { %v1932_v20 = vmul.f32 %v1931_v9, %v7409_v62  ;;  %v5493_v54 = vclamps-f32 %v1870_v55, 1.0  ;;  %5874 = vrcp.f32 %v1895_v10  ;;  %v1921_v57 = vmul.f32 %v1920_v3, %v7409_v62  ;;  %v5759_v55 = vld [vmem:[#allocation3 + $0x9c] sm:$0xff] }
 0x3b2   :  { %v1957_v22 = vmul.f32 %v1953_v46, %v1785_v35  ;;  %v1907_v11 = vand.u32 2147483648, %v1895_v10  ;;  %v1905_v21 = vand.u32 2147483647, %v1895_v10  ;;  %vm1901_vm14 = vweird.f32 %v1895_v10 }
 0x3b3   :  { %v1933_v47 = vadd.f32 0.4994258, %v1932_v20  ;;  %v1954_v34 = vadd.f32 1.0, %v5493_v54  ;;  %2010 = vmatpush.bf16.msra.mxu2 %v5760_v43  ;;  %v1922_v9 = vadd.f32 0.18741608, %v1921_v57 }
 0x3b4   :  { %v1884_v20 = vadd.f32 1.1283791, %v1883_v61  ;;  %v1908_v54 = vor.u32 1.1754944e-38, %v1907_v11  ;;  %vm1906_vm10 = vcmp.eq.f32.partialorder %v1905_v21, 8.507059e+37  ;;  %v1787_v61 = vmul.f32 0.5, %v7382_v42 }
 0x3b5   :  { %v1934_v19 = vmul.f32 %v1933_v47, %v7409_v62  ;;  %v1958_v63 = vmul.f32 %v1954_v34, %v1786_v53  ;;  %v1923_v41 = vmul.f32 %v1922_v9, %v7409_v62 }
 0x3b6   :  { %v1885_v3 = vmul.f32 %v1884_v20, %v7387_v44 }
 0x3b7   :  { %v5875_v52 = vpop.eup %5874  ;;  %v1935_v6 = vadd.f32 1.0, %v1934_v19  ;;  %v1961_v36 = vpack.c.bf16 %v1958_v63, %v1957_v22  ;;  %2011 = vmatpush.bf16.msra.mxu2 %v5759_v55  ;;  %v1924_v34 = vadd.f32 1.1283791, %v1923_v41 }
 0x3b8   :  { %v1897_v48 = vmul.f32 %v5875_v52, %v1895_v10  ;;  %vm1902_vm12 = vweird.f32 %v5875_v52 }
 0x3b9   :  { %5876 = vrcp.f32 %v1935_v6  ;;  %vm1903_vm1 = vmor %vm1901_vm14, %vm1902_vm12  ;;  %v1947_v19 = vand.u32 2147483648, %v1935_v6  ;;  %v1945_v43 = vand.u32 2147483647, %v1935_v6  ;;  %vm1941_vm12 = vweird.f32 %v1935_v6 }
 0x3ba   :  { %v1898_v51 = vsub.f32 1.0, %v1897_v48  ;;  %5512 = vmatmul.msk.bf16.vlgmr.msra.gmra.mxu2 %vm9015_vm8, %v1961_v36 }
 0x3bb   :  { %v1948_v53 = vor.u32 1.1754944e-38, %v1947_v19  ;;  %v9348_v19 = vrot.slane %v7124_v58, 6 }
 0x3bc   :  { %v1899_v56 = vmul.f32 %v5875_v52, %v1898_v51  ;;  %v1788_v51 = vmul.f32 0.5, %v7395_v5 }
 0x3be   :  { %v1900_v38 = vadd.f32 %v5875_v52, %v1899_v56  ;;  %v7449_v56 = vld [vmem:[#allocation5 + $0x10] ss:$0 sm:$0xff] }
 0x3bf   :  { %v5877_v24 = vpop.eup %5876 }
 0x3c0   :  { %v1904_v32 = vsel %vm1903_vm1, %v5875_v52, %v1900_v38  ;;  %v1937_v27 = vmul.f32 %v5877_v24, %v1935_v6  ;;  %vm1942_vm15 = vweird.f32 %v5877_v24  ;;  %v1925_v52 = vmul.f32 %v1924_v34, %v7400_v4  ;;  %v5822_v6 = vld [vmem:[#allocation5 + $0xf] ss:$0 sm:$0xff] }
 0x3c1   :  { %v1909_v8 = vsel %vm1906_vm10, %v1908_v54, %v1904_v32  ;;  %vm1943_vm14 = vmor %vm1941_vm12, %vm1942_vm15  ;;  %vm1946_vm1 = vcmp.eq.f32.partialorder %v1945_v43, 8.507059e+37  ;;  %vm9344_vm10 = vcmask 261120   ;;  %v2043_v54 = vld [vmem:[#allocation5 + $0x11] sm:$0x7f]  ;;  %vm9347_vm12 = vcmask 1042432  }
 0x3c2   :  { %v1938_v47 = vsub.f32 1.0, %v1937_v27  ;;  %v1910_v49 = vmul.f32 %v1909_v8, %v1885_v3  ;;  %v7461_v32 = vperm.slane %v2043_v54, 0  ;;  %vm9345_vm15 = vmmov %vm9344_vm10  ;;  %v7465_v8 = vperm.slane %v2043_v54, 1 }
 0x3c3   :  { %v7476_v43 = vperm.slane %v2043_v54, 2 }
 0x3c4   :  { %v1939_v10 = vmul.f32 %v5877_v24, %v1938_v47  ;;  %v5494_v62 = vclamps-f32 %v1910_v49, 1.0  ;;  %v9346_v47 = vrot.slane %v7124_v58, 5  ;;  %v9350_v49 = vrot.slane %v7124_v58, 7 }
 0x3c6   :  { %v1940_v46 = vadd.f32 %v5877_v24, %v1939_v10  ;;  %v1955_v63 = vadd.f32 1.0, %v5494_v62 }
 0x3c8   :  { %v1944_v57 = vsel %vm1943_vm14, %v5877_v24, %v1940_v46  ;;  %v1959_v22 = vmul.f32 %v1955_v63, %v1787_v61  ;;  %vm9349_vm14 = vcmask 1041408   ;;  %v7489_v61 = vperm.slane %v2043_v54, 4 }
 0x3c9   :  { %v1949_v48 = vsel %vm1946_vm1, %v1948_v53, %v1944_v57  ;;  %vm9351_vm1 = vcmask 1040384  }
 0x3ca   :  { %v1950_v35 = vmul.f32 %v1949_v48, %v1925_v52  ;;  %v7484_v52 = vperm.slane %v2043_v54, 3 }
 0x3cc   :  { %v5495_v44 = vclamps-f32 %v1950_v35, 1.0 }
 0x3ce   :  { %v1956_v55 = vadd.f32 1.0, %v5495_v44 }
 0x3d0   :  { %v1960_v11 = vmul.f32 %v1956_v55, %v1788_v51  ;;  %v7491_v51 = vperm.slane %v2043_v54, 5 }
 0x3d2   :  { %v1962_v9 = vpack.c.bf16 %v1960_v11, %v1959_v22 }
 0x3d4   :  { %5513 = vmatmul.msk.bf16.gmra.mxu2 %vm9015_vm8, %v1962_v9  ;;  %vm9354_vm8 = vcmp.ge.s32.totalorder %v6130_v37, 0 }
 0x43d   :  { %v2013_v4 = vpop.f32.mrf.mxu2 }
 0x43e   :  { %v2014_v21 = vadd.f32 %v5822_v6, %v2013_v4 }
 0x440   :  { %v2025_v36 = vmul.f32 %v7449_v56, %v2014_v21 }
 0x442   :  { %v7453_v20 = vadd.f32 %v2025_v36, %v7116_v33 }
 0x444   :  { %2033 = vst.msk [vmem:[#allocation2 + $0x8] sm:$0xff] %vm9344_vm10, %v7453_v20  ;;  %vm9352_vm10 = vcmp.ge.s32.totalorder %v6080_v13, 0 }
 0x445   :  { %v2015_v42 = vpop.f32.mrf.mxu2 }
 0x446   :  { %v2016_v5 = vadd.f32 %v5822_v6, %v2015_v42 }
 0x448   :  { %v2026_v38 = vmul.f32 %v7449_v56, %v2016_v5 }
 0x44a   :  { %v7459_v24 = vadd.f32 %v2026_v38, %v7142_v26 }
 0x44b   :  { %v2038_v41 = vld [vmem:[#allocation2 + $0x8] sm:$0xff] }
 0x44c   :  { %2034 = vst.msk [vmem:[#allocation2 + $0x10] sm:$0xff] %vm9345_vm15, %v7459_v24  ;;  %v2050_v27 = vrot.slane %v2038_v41, 5  ;;  %v2072_v33 = vrot.slane %v2038_v41, 6  ;;  %v2098_v3 = vrot.slane %v2038_v41, 7  ;;  %vm9353_vm15 = vcmp.ge.s32.totalorder %v6086_v14, 0 }
 0x44d   :  { %v2128_v11 = vmul.f32 %v7484_v52, %v2038_v41  ;;  %v2137_v9 = vrot.slane %v2038_v41, 1  ;;  %v2163_v4 = vrot.slane %v2038_v41, 2 }
 0x44e   :  { %v2051_v34 = vsel %vm9347_vm12, %v9346_v47, %v2050_v27  ;;  %v2073_v26 = vsel %vm9349_vm14, %v9348_v19, %v2072_v33  ;;  %v2099_v10 = vsel %vm9351_vm1, %v9350_v49, %v2098_v3  ;;  %v2189_v47 = vrot.slane %v2038_v41, 3 }
 0x44f   :  { %v2062_v46 = vsel %vm9352_vm10, %v2051_v34, 0.0  ;;  %v2084_v53 = vsel %vm9353_vm15, %v2073_v26, 0.0  ;;  %v2110_v62 = vsel %vm9354_vm8, %v2099_v10, 0.0  ;;  %vm9355_vm8 = vcmask 1046528  }
 0x450   :  { %v2067_v48 = vmul.f32 %v7461_v32, %v2062_v46  ;;  %v2089_v58 = vmul.f32 %v7465_v8, %v2084_v53  ;;  %v2115_v44 = vmul.f32 %v7476_v43, %v2110_v62  ;;  %vm9356_vm12 = vcmask 261120  }
 0x451   :  { %v7511_v62 = vperm.slane %v2043_v54, 6  ;;  %vm9357_vm14 = vcmask 1042432   ;;  %vm9358_vm1 = vcmask 1044480   ;;  %vm9359_vm10 = vcmask 1041408  }
 0x452   :  { %v2093_v63 = vadd.f32 %v2089_v58, %v2067_v48  ;;  %vm9360_vm15 = vcmask 1040384  }
 0x453   :  { %v7494_v22 = vld [vmem:[#allocation2 + $0x10] sm:$0xff] }
 0x454   :  { %v2119_v21 = vadd.f32 %v2115_v44, %v2093_v63  ;;  %v2138_v36 = vrot.slane %v7494_v22, 1  ;;  %v2164_v42 = vrot.slane %v7494_v22, 2  ;;  %v2190_v5 = vrot.slane %v7494_v22, 3 }
 0x455   :  { %v2052_v34 = vrot.slane %v7494_v22, 5  ;;  %v2074_v19 = vrot.slane %v7494_v22, 6  ;;  %v2100_v46 = vrot.slane %v7494_v22, 7 }
 0x456   :  { %v2132_v26 = vadd.f32 %v2128_v11, %v2119_v21  ;;  %v2139_v49 = vsel %vm9355_vm8, %v2137_v9, %v2138_v36  ;;  %v2165_v10 = vsel %vm9023_vm4, %v2163_v4, %v2164_v42  ;;  %v7522_v4 = vld [vmem:[#allocation5 + $0x18] ss:$0 sm:$0xff]  ;;  %vm9361_vm8 = vmmov %vm9356_vm12 }
 0x457   :  { %v2018_v57 = vpop.f32.mrf.mxu2  ;;  %v2155_v53 = vmul.f32 %v7489_v61, %v2139_v49  ;;  %v2075_v58 = vsel %vm9359_vm10, %v2072_v33, %v2074_v19  ;;  %v2181_v44 = vmul.f32 %v7491_v51, %v2165_v10  ;;  %v2101_v11 = vsel %vm9360_vm15, %v2098_v3, %v2100_v46 }
 0x458   :  { %v2019_v35 = vadd.f32 %v5822_v6, %v2018_v57  ;;  %v2191_v57 = vsel %vm9358_vm1, %v2189_v47, %v2190_v5  ;;  %v2129_v49 = vmul.f32 %v7484_v52, %v7494_v22  ;;  %vm9364_vm1 = vcmp.lt.s32.totalorder %v6536_v23, 16 }
 0x459   :  { %v2159_v63 = vadd.f32 %v2155_v53, %v2132_v26  ;;  %vm9365_vm10 = vcmp.lt.s32.totalorder %v6921_v0, 16  ;;  %vm9366_vm15 = vcmask 1044480  }
 0x45a   :  { %v2027_v55 = vmul.f32 %v7449_v56, %v2019_v35 }
 0x45b   :  { %v2185_v9 = vadd.f32 %v2181_v44, %v2159_v63 }
 0x45c   :  { %v7501_v38 = vadd.f32 %v2027_v55, %v7204_v50  ;;  %v2053_v50 = vsel %vm9357_vm14, %v2050_v27, %v2052_v34  ;;  %v2090_v55 = vmul.f32 %v7465_v8, %v2075_v58  ;;  %v2207_v27 = vmul.f32 %v7511_v62, %v2191_v57 }
 0x45d   :  { %v2068_v48 = vmul.f32 %v7461_v32, %v2053_v50  ;;  %vm9363_vm14 = vcmask 1046528  }
 0x45e   :  { %2035 = vst.msk [vmem:[#allocation2 + $0x18] sm:$0xff] %vm9356_vm12, %v7501_v38  ;;  %v2211_v33 = vadd.f32 %v2207_v27, %v2185_v9  ;;  %vm9362_vm12 = vmmov %vm9361_vm8 }
 0x45f   :  { %v2020_v41 = vpop.f32.mrf.mxu2  ;;  %v2094_v21 = vadd.f32 %v2090_v55, %v2068_v48  ;;  %vm9368_vm11 = vmmov %vm9362_vm12 }
 0x460   :  { %v2021_v35 = vadd.f32 %v5822_v6, %v2020_v41  ;;  %v2116_v6 = vmul.f32 %v7476_v43, %v2101_v11 }
 0x462   :  { %v2028_v54 = vmul.f32 %v7449_v56, %v2021_v35  ;;  %v7533_v56 = vadd.f32 %v7522_v4, %v2211_v33  ;;  %v2120_v3 = vadd.f32 %v2116_v6, %v2094_v21 }
 0x464   :  { %v7525_v47 = vadd.f32 %v2028_v54, %v7225_v17  ;;  %v2223_v48 = vsel %vm9362_vm12, %v7533_v56, 0.0  ;;  %v2239_v58 = vmul.f32 %v7533_v56, %v7533_v56  ;;  %v2133_v9 = vadd.f32 %v2129_v49, %v2120_v3 }
 0x465   :  { %v2040_v26 = vld [vmem:[#allocation2 + $0x18] sm:$0xff]  ;;  %2224 = vadd.xlane.f32.xlu1 %v2223_v48  ;;  %vm9369_vm12 = vcmp.lt.s32.totalorder %v6118_v30, 16 }
 0x466   :  { %2036 = vst.msk [vmem:[#allocation2 + $0x20] sm:$0xff] %vm9361_vm8, %v7525_v47  ;;  %v2140_v10 = vrot.slane %v2040_v26, 1  ;;  %v2166_v53 = vrot.slane %v2040_v26, 2  ;;  %v2192_v50 = vrot.slane %v2040_v26, 3  ;;  %v2054_v41 = vrot.slane %v2040_v26, 5 }
 0x467   :  { %v2076_v17 = vrot.slane %v2040_v26, 6  ;;  %v2102_v57 = vrot.slane %v2040_v26, 7  ;;  %vm9367_vm8 = vcmask 1042432   ;;  %v2243_v54 = vsel %vm9368_vm11, %v2239_v58, 0.0 }
 0x468   :  { %v2141_v22 = vsel %vm9363_vm14, %v2138_v36, %v2140_v10  ;;  %v2167_v35 = vsel %vm9023_vm4, %v2164_v42, %v2166_v53  ;;  %v2193_v55 = vsel %vm9366_vm15, %v2190_v5, %v2192_v50  ;;  %v2055_v11 = vsel %vm9367_vm8, %v2052_v34, %v2054_v41  ;;  %v2042_v42 = vld [vmem:[#allocation2 + $0x28] sm:$0xff]  ;;  %2244 = vadd.xlane.f32.xlu0 %v2243_v54 }
 0x469   :  { %v2151_v63 = vsel %vm9364_vm1, %v2141_v22, 0.0  ;;  %v2177_v44 = vsel %vm9365_vm10, %v2167_v35, 0.0  ;;  %v2203_v36 = vsel %vm9369_vm12, %v2193_v55, 0.0  ;;  %vm9370_vm14 = vcmp.ge.s32.totalorder %v6107_v25, 0 }
 0x46a   :  { %v2156_v27 = vmul.f32 %v7489_v61, %v2151_v63  ;;  %v2182_v21 = vmul.f32 %v7491_v51, %v2177_v44  ;;  %v2064_v33 = vsel %vm9370_vm14, %v2055_v11, 0.0  ;;  %vm9371_vm1 = vcmask 1041408  }
 0x46b   :  { %v2077_v6 = vsel %vm9371_vm1, %v2074_v19, %v2076_v17  ;;  %vm9372_vm10 = vcmask 1040384   ;;  %v2069_v48 = vmul.f32 %v7461_v32, %v2064_v33  ;;  %vm9373_vm11 = vcmp.ge.s32.totalorder %v6121_v31, 0  ;;  %vm9377_vm14 = vmmov %vm9371_vm1 }
 0x46c   :  { %v2103_v5 = vsel %vm9372_vm10, %v2100_v46, %v2102_v57  ;;  %v2160_v34 = vadd.f32 %v2156_v27, %v2133_v9  ;;  %v2086_v49 = vsel %vm9373_vm11, %v2077_v6, 0.0  ;;  %vm9374_vm15 = vcmp.ge.s32.totalorder %v6240_v40, 0  ;;  %vm9378_vm1 = vmmov %vm9372_vm10 }
 0x46d   :  { %v2112_v3 = vsel %vm9374_vm15, %v2103_v5, 0.0  ;;  %v2208_v58 = vmul.f32 %v7511_v62, %v2203_v36  ;;  %v2041_v22 = vld [vmem:[#allocation2 + $0x20] sm:$0xff]  ;;  %v2091_v35 = vmul.f32 %v7465_v8, %v2086_v49  ;;  %v2144_v44 = vrot.slane %v2042_v42, 1 }
 0x46e   :  { %v2117_v63 = vmul.f32 %v7476_v43, %v2112_v3  ;;  %v2186_v19 = vadd.f32 %v2182_v21, %v2160_v34  ;;  %v2142_v55 = vrot.slane %v2041_v22, 1  ;;  %v2168_v46 = vrot.slane %v2041_v22, 2 }
 0x46f   :  { %v2194_v11 = vrot.slane %v2041_v22, 3  ;;  %v2095_v54 = vadd.f32 %v2091_v35, %v2069_v48  ;;  %v2056_v9 = vrot.slane %v2041_v22, 5  ;;  %v2078_v27 = vrot.slane %v2041_v22, 6 }
 0x470   :  { %v2104_v33 = vrot.slane %v2041_v22, 7  ;;  %v2212_v6 = vadd.f32 %v2208_v58, %v2186_v19  ;;  %vm9375_vm8 = vcmask 1046528   ;;  %v2170_v5 = vrot.slane %v2042_v42, 2 }
 0x471   :  { %v2143_v40 = vsel %vm9375_vm8, %v2140_v10, %v2142_v55  ;;  %v2196_v31 = vrot.slane %v2042_v42, 3  ;;  %v2121_v36 = vadd.f32 %v2117_v63, %v2095_v54  ;;  %v2130_v25 = vmul.f32 %v7484_v52, %v2040_v26  ;;  %vm9381_vm15 = vmmov %vm9375_vm8 }
 0x472   :  { %v2157_v49 = vmul.f32 %v7489_v61, %v2143_v40  ;;  %v2169_v3 = vsel %vm9023_vm4, %v2166_v53, %v2168_v46  ;;  %v7569_v21 = vadd.f32 %v7522_v4, %v2212_v6  ;;  %vm9376_vm12 = vcmask 1042432  }
 0x473   :  { %v2057_v34 = vsel %vm9376_vm12, %v2054_v41, %v2056_v9  ;;  %v2079_v48 = vsel %vm9377_vm14, %v2076_v17, %v2078_v27  ;;  %v2105_v58 = vsel %vm9378_vm1, %v2102_v57, %v2104_v33  ;;  %v2134_v35 = vadd.f32 %v2130_v25, %v2121_v36 }
 0x474   :  { %vm9379_vm10 = vcmask 1044480   ;;  %v2070_v42 = vmul.f32 %v7461_v32, %v2057_v34  ;;  %v2092_v26 = vmul.f32 %v7465_v8, %v2079_v48  ;;  %vm9380_vm11 = vcmask 261120  }
 0x475   :  { %v2195_v10 = vsel %vm9379_vm10, %v2192_v50, %v2194_v11  ;;  %v2226_v40 = vsel %vm9380_vm11, %v7569_v21, 0.0  ;;  %v2240_v53 = vmul.f32 %v7569_v21, %v7569_v21  ;;  %v2183_v63 = vmul.f32 %v7491_v51, %v2169_v3  ;;  %vm9382_vm8 = vmmov %vm9380_vm11 }
 0x476   :  { %v2145_v41 = vsel %vm9381_vm15, %v2142_v55, %v2144_v44  ;;  %2227 = vadd.xlane.f32.xlu2 %v2226_v40  ;;  %v2161_v17 = vadd.f32 %v2157_v49, %v2134_v35  ;;  %v2096_v57 = vadd.f32 %v2092_v26, %v2070_v42  ;;  %v2118_v25 = vmul.f32 %v7476_v43, %v2105_v58  ;;  %vm9384_vm14 = vmmov %vm9379_vm10 }
 0x477   :  { %v2171_v50 = vsel %vm9023_vm4, %v2168_v46, %v2170_v5  ;;  %v2246_v32 = vsel %vm9382_vm8, %v2240_v53, 0.0  ;;  %v2209_v8 = vmul.f32 %v7511_v62, %v2195_v10  ;;  %vm9383_vm12 = vcmp.lt.s32.totalorder %v6548_v39, 16  ;;  %vm9387_vm11 = vmmov %vm9382_vm8 }
 0x478   :  { %v2153_v19 = vsel %vm9383_vm12, %v2145_v41, 0.0  ;;  %2247 = vadd.xlane.f32.xlu1 %v2246_v32  ;;  %v2187_v54 = vadd.f32 %v2183_v63, %v2161_v17  ;;  %v2122_v9 = vadd.f32 %v2118_v25, %v2096_v57  ;;  %v2131_v27 = vmul.f32 %v7484_v52, %v2041_v22  ;;  %vm9388_vm15 = vmmov %vm9382_vm8 }
 0x479   :  { %v2197_v44 = vsel %vm9384_vm14, %v2194_v11, %v2196_v31  ;;  %vm9385_vm1 = vcmp.lt.s32.totalorder %v6924_v28, 16  ;;  %v2158_v46 = vmul.f32 %v7489_v61, %v2153_v19  ;;  %vm9386_vm10 = vcmp.lt.s32.totalorder %v6211_v15, 16  ;;  %vm9389_vm12 = vmmov %vm9382_vm8 }
 0x47a   :  { %v2179_v55 = vsel %vm9385_vm1, %v2171_v50, 0.0  ;;  %v2213_v43 = vadd.f32 %v2209_v8, %v2187_v54  ;;  %v2135_v33 = vadd.f32 %v2131_v27, %v2122_v9  ;;  %v2205_v6 = vsel %vm9386_vm10, %v2197_v44, 0.0 }
 0x47b   :  { %v2184_v49 = vmul.f32 %v7491_v51, %v2179_v55  ;;  %v2210_v11 = vmul.f32 %v7511_v62, %v2205_v6 }
 0x47c   :  { %v7597_v5 = vadd.f32 %v7522_v4, %v2213_v43  ;;  %v2162_v36 = vadd.f32 %v2158_v46, %v2135_v33  ;;  %v5763_v33 = vld [vmem:[#allocation3 + $0xbc] sm:$0xff] }
 0x47e   :  { %v2229_v52 = vsel %vm9387_vm11, %v7597_v5, 0.0  ;;  %v2241_v31 = vmul.f32 %v7597_v5, %v7597_v5  ;;  %v2188_v22 = vadd.f32 %v2184_v49, %v2162_v36 }
 0x47f   :  { %2230 = vadd.xlane.f32.xlu2 %v2229_v52 }
 0x480   :  { %v2249_v61 = vsel %vm9388_vm15, %v2241_v31, 0.0  ;;  %v2214_v3 = vadd.f32 %v2210_v11, %v2188_v22 }
 0x481   :  { %2250 = vadd.xlane.f32.xlu1 %v2249_v61 }
 0x482   :  { %v7607_v34 = vadd.f32 %v7522_v4, %v2214_v3  ;;  %v5764_v4 = vld [vmem:[#allocation3 + $0xc4] sm:$0xff] }
 0x483   :  { %2365 = vmatpush.bf16.msrb.mxu3 %v5764_v4 }
 0x484   :  { %v2232_v51 = vsel %vm9382_vm8, %v7607_v34, 0.0  ;;  %v2242_v48 = vmul.f32 %v7607_v34, %v7607_v34 }
 0x485   :  { %2233 = vadd.xlane.f32.xlu0 %v2232_v51 }
 0x486   :  { %v2252_v58 = vsel %vm9389_vm12, %v2242_v48, 0.0 }
 0x487   :  { %2253 = vadd.xlane.f32.xlu2 %v2252_v58  ;;  %2366 = vmatpush.bf16.msrb.mxu3 %v5763_v33 }
 0x4d8   :  { %v2225_v35 = vpop.xlane.xlu1 %2224 }
 0x4d9   :  { %v2235_v62 = vmul.f32 0.03125, %v2225_v35 }
 0x4db   :  { %v2245_v10 = vpop.xlane.xlu0 %2244  ;;  %v2259_v42 = vmul.f32 %v2235_v62, %v2235_v62  ;;  %v2271_v4 = vsub.f32 %v7533_v56, %v2235_v62 }
 0x4dc   :  { %v2255_v26 = vmul.f32 0.03125, %v2245_v10 }
 0x4de   :  { %v2263_v40 = vsub.f32 %v2255_v26, %v2259_v42 }
 0x4e0   :  { %v2267_v53 = vmax.f32 %v2263_v40, 0.0 }
 0x4e2   :  { %v2275_v63 = vadd.f32 1e-06, %v2267_v53 }
 0x4e4   :  { %5878 = vrsqrt.f32 %v2275_v63  ;;  %vm2285_vm1 = vweird.f32 %v2275_v63 }
 0x4e9   :  { %v2228_v41 = vpop.xlane.xlu2 %2227 }
 0x4ea   :  { %v2236_v17 = vmul.f32 0.03125, %v2228_v41  ;;  %v5879_v32 = vpop.eup %5878 }
 0x4eb   :  { %v2248_v57 = vpop.xlane.xlu1 %2247  ;;  %v2280_v19 = vmul.f32 %v5879_v32, %v2275_v63  ;;  %vm2286_vm14 = vweird.f32 %v5879_v32 }
 0x4ec   :  { %v2260_v25 = vmul.f32 %v2236_v17, %v2236_v17  ;;  %v2256_v50 = vmul.f32 0.03125, %v2248_v57  ;;  %vm2287_vm10 = vmor %vm2285_vm1, %vm2286_vm14 }
 0x4ed   :  { %v2281_v9 = vmul.f32 %v5879_v32, %v2280_v19 }
 0x4ee   :  { %v2264_v8 = vsub.f32 %v2256_v50, %v2260_v25  ;;  %v5825_v25 = vld [vmem:[#allocation5 + $0x19] ss:$0 sm:$0xff] }
 0x4ef   :  { %v2282_v55 = vmul.f32 0.5, %v2281_v9  ;;  %v2272_v9 = vsub.f32 %v7569_v21, %v2236_v17 }
 0x4f0   :  { %v2268_v54 = vmax.f32 %v2264_v8, 0.0 }
 0x4f1   :  { %v2283_v49 = vsub.f32 1.5, %v2282_v55 }
 0x4f2   :  { %v2276_v27 = vadd.f32 1e-06, %v2268_v54  ;;  %v2231_v44 = vpop.xlane.xlu2 %2230 }
 0x4f3   :  { %v7614_v43 = vmul.f32 0.03125, %v2231_v44  ;;  %v2284_v51 = vmul.f32 %v5879_v32, %v2283_v49 }
 0x4f4   :  { %5880 = vrsqrt.f32 %v2276_v27  ;;  %v2251_v46 = vpop.xlane.xlu1 %2250  ;;  %vm2295_vm15 = vweird.f32 %v2276_v27 }
 0x4f5   :  { %v2261_v6 = vmul.f32 %v7614_v43, %v7614_v43  ;;  %v2257_v36 = vmul.f32 0.03125, %v2251_v46  ;;  %v2288_v40 = vsel %vm2287_vm10, %v5879_v32, %v2284_v51  ;;  %v5826_v46 = vld [vmem:[#allocation5 + $0x1a] ss:$0 sm:$0xff]  ;;  %vm9390_vm10 = vcmask 261120  }
 0x4f6   :  { %v2319_v50 = vmul.f32 %v2288_v40, %v2271_v4 }
 0x4f7   :  { %v2265_v52 = vsub.f32 %v2257_v36, %v2261_v6 }
 0x4f8   :  { %v2234_v31 = vpop.xlane.xlu0 %2233  ;;  %v2324_v55 = vmul.f32 %v5825_v25, %v2319_v50 }
 0x4f9   :  { %v2269_v22 = vmax.f32 %v2265_v52, 0.0  ;;  %v2238_v11 = vmul.f32 0.03125, %v2234_v31 }
 0x4fa   :  { %v5881_v61 = vpop.eup %5880  ;;  %v2254_v3 = vpop.xlane.xlu2 %2253  ;;  %v2329_v49 = vadd.f32 %v5826_v46, %v2324_v55 }
 0x4fb   :  { %v2290_v48 = vmul.f32 %v5881_v61, %v2276_v27  ;;  %v2277_v58 = vadd.f32 1e-06, %v2269_v22  ;;  %v2262_v35 = vmul.f32 %v2238_v11, %v2238_v11  ;;  %v2258_v10 = vmul.f32 0.03125, %v2254_v3 }
 0x4fc   :  { %vm2296_vm11 = vweird.f32 %v5881_v61  ;;  %v2273_v3 = vsub.f32 %v7597_v5, %v7614_v43 }
 0x4fd   :  { %v2291_v42 = vmul.f32 %v5881_v61, %v2290_v48  ;;  %5882 = vrsqrt.f32 %v2277_v58  ;;  %v2266_v26 = vsub.f32 %v2258_v10, %v2262_v35  ;;  %vm2297_vm8 = vmor %vm2295_vm15, %vm2296_vm11  ;;  %vm2305_vm14 = vweird.f32 %v2277_v58 }
 0x4fe   :  { %v2274_v10 = vsub.f32 %v7607_v34, %v2238_v11 }
 0x4ff   :  { %v2292_v53 = vmul.f32 0.5, %v2291_v42  ;;  %v2270_v41 = vmax.f32 %v2266_v26, 0.0 }
 0x501   :  { %v2293_v57 = vsub.f32 1.5, %v2292_v53  ;;  %v2278_v8 = vadd.f32 1e-06, %v2270_v41 }
 0x503   :  { %v5883_v19 = vpop.eup %5882  ;;  %v2294_v54 = vmul.f32 %v5881_v61, %v2293_v57  ;;  %5884 = vrsqrt.f32 %v2278_v8  ;;  %vm2315_vm15 = vweird.f32 %v2278_v8  ;;  %v5827_v57 = vld [vmem:[#allocation5 + $0x1b] ss:$0 sm:$0xff] }
 0x504   :  { %v2300_v63 = vmul.f32 %v5883_v19, %v2277_v58  ;;  %vm2306_vm12 = vweird.f32 %v5883_v19 }
 0x505   :  { %v2298_v44 = vsel %vm2297_vm8, %v5881_v61, %v2294_v54  ;;  %vm2307_vm1 = vmor %vm2305_vm14, %vm2306_vm12 }
 0x506   :  { %v2320_v32 = vmul.f32 %v2298_v44, %v2272_v9  ;;  %v2301_v33 = vmul.f32 %v5883_v19, %v2300_v63  ;;  %vm9391_vm12 = vmmov %vm9390_vm10 }
 0x508   :  { %v2325_v56 = vmul.f32 %v5825_v25, %v2320_v32  ;;  %v2302_v62 = vmul.f32 0.5, %v2301_v33 }
 0x509   :  { %v5885_v6 = vpop.eup %5884 }
 0x50a   :  { %v2303_v36 = vsub.f32 1.5, %v2302_v62  ;;  %v2330_v52 = vadd.f32 %v5826_v46, %v2325_v56  ;;  %v2310_v31 = vmul.f32 %v5885_v6, %v2278_v8  ;;  %vm2316_vm11 = vweird.f32 %v5885_v6 }
 0x50b   :  { %vm2317_vm8 = vmor %vm2315_vm15, %vm2316_vm11 }
 0x50c   :  { %v2304_v22 = vmul.f32 %v5883_v19, %v2303_v36  ;;  %v2333_v27 = vpack.c.bf16 %v2330_v52, %v2329_v49  ;;  %v2311_v21 = vmul.f32 %v5885_v6, %v2310_v31 }
 0x50e   :  { %5522 = vmatmul.msk.bf16.vlgmr.msrb.gmra.mxu3 %vm9390_vm10, %v2333_v27  ;;  %v2312_v17 = vmul.f32 0.5, %v2311_v21  ;;  %v2308_v61 = vsel %vm2307_vm1, %v5883_v19, %v2304_v22 }
 0x50f   :  { %v2321_v48 = vmul.f32 %v2308_v61, %v2273_v3 }
 0x510   :  { %v2313_v51 = vsub.f32 1.5, %v2312_v17 }
 0x511   :  { %v2326_v58 = vmul.f32 %v5825_v25, %v2321_v48 }
 0x512   :  { %v2314_v35 = vmul.f32 %v5885_v6, %v2313_v51 }
 0x513   :  { %v2331_v53 = vadd.f32 %v5826_v46, %v2326_v58 }
 0x514   :  { %v2318_v42 = vsel %vm2317_vm8, %v5885_v6, %v2314_v35 }
 0x515   :  { %v2322_v26 = vmul.f32 %v2318_v42, %v2274_v10 }
 0x517   :  { %v2327_v40 = vmul.f32 %v5825_v25, %v2322_v26 }
 0x519   :  { %v2332_v4 = vadd.f32 %v5826_v46, %v2327_v40 }
 0x51b   :  { %v2334_v41 = vpack.c.bf16 %v2332_v4, %v2331_v53 }
 0x51e   :  { %5523 = vmatmul.msk.bf16.gmra.mxu3 %vm9391_vm12, %v2334_v41 }
 0x591   :  { %v2368_v50 = vpop.f32.mrf.mxu3 }
 0x592   :  { %v7625_v5 = vadd.f32 %v5827_v57, %v2368_v50 }
 0x594   :  { %v7628_v43 = vmul.f32 0.70710677, %v7625_v5 }
 0x596   :  { %v2386_v34 = vmul.f32 %v7628_v43, %v7628_v43 }
 0x598   :  { %v7632_v11 = vmin.f32 %v2386_v34, 16.0 }
 0x599   :  { %v2370_v8 = vpop.f32.mrf.mxu3 }
 0x59a   :  { %v2388_v25 = vmul.f32 2.1237322e-06, %v7632_v11  ;;  %v2399_v19 = vmul.f32 3.8918573e-05, %v7632_v11  ;;  %v7636_v54 = vadd.f32 %v5827_v57, %v2370_v8 }
 0x59c   :  { %v2389_v9 = vadd.f32 0.00028619796, %v2388_v25  ;;  %v2400_v63 = vadd.f32 0.001143296, %v2399_v19  ;;  %v7639_v44 = vmul.f32 0.70710677, %v7636_v54 }
 0x59e   :  { %v2401_v55 = vmul.f32 %v2400_v63, %v7632_v11  ;;  %v2390_v32 = vmul.f32 %v2389_v9, %v7632_v11  ;;  %v2426_v33 = vmul.f32 %v7639_v44, %v7639_v44 }
 0x5a0   :  { %v2402_v46 = vadd.f32 0.014752088, %v2401_v55  ;;  %v7645_v56 = vmin.f32 %v2426_v33, 16.0  ;;  %v2391_v49 = vadd.f32 0.0036580483, %v2390_v32 }
 0x5a1   :  { %v2373_v62 = vpop.f32.mrf.mxu3 }
 0x5a2   :  { %v2403_v6 = vmul.f32 %v2402_v46, %v7632_v11  ;;  %v7648_v36 = vadd.f32 %v5827_v57, %v2373_v62  ;;  %v2428_v52 = vmul.f32 2.1237322e-06, %v7645_v56  ;;  %v2439_v31 = vmul.f32 3.8918573e-05, %v7645_v56 }
 0x5a3   :  { %v2392_v3 = vmul.f32 %v2391_v49, %v7632_v11 }
 0x5a4   :  { %v2404_v22 = vadd.f32 0.112945676, %v2403_v6  ;;  %v2429_v27 = vadd.f32 0.00028619796, %v2428_v52  ;;  %v2440_v21 = vadd.f32 0.001143296, %v2439_v31 }
 0x5a5   :  { %v7653_v17 = vmul.f32 0.70710677, %v7648_v36  ;;  %v2393_v41 = vadd.f32 0.05243302, %v2392_v3 }
 0x5a6   :  { %v2405_v61 = vmul.f32 %v2404_v22, %v7632_v11  ;;  %v2430_v51 = vmul.f32 %v2429_v27, %v7645_v56  ;;  %v2441_v48 = vmul.f32 %v2440_v21, %v7645_v56 }
 0x5a7   :  { %v2466_v35 = vmul.f32 %v7653_v17, %v7653_v17  ;;  %v2394_v55 = vmul.f32 %v2393_v41, %v7632_v11 }
 0x5a8   :  { %v2406_v10 = vadd.f32 0.4994258, %v2405_v61  ;;  %v2431_v42 = vadd.f32 0.0036580483, %v2430_v51  ;;  %v2442_v26 = vadd.f32 0.014752088, %v2441_v48 }
 0x5a9   :  { %v7661_v58 = vmin.f32 %v2466_v35, 16.0  ;;  %v2375_v40 = vpop.f32.mrf.mxu3  ;;  %v2395_v31 = vadd.f32 0.18741608, %v2394_v55 }
 0x5aa   :  { %v2407_v53 = vmul.f32 %v2406_v10, %v7632_v11  ;;  %v7664_v4 = vadd.f32 %v5827_v57, %v2375_v40  ;;  %v2432_v50 = vmul.f32 %v2431_v42, %v7645_v56  ;;  %v2443_v34 = vmul.f32 %v2442_v26, %v7645_v56 }
 0x5ab   :  { %v2468_v8 = vmul.f32 2.1237322e-06, %v7661_v58  ;;  %v2479_v19 = vmul.f32 3.8918573e-05, %v7661_v58 }
 0x5ac   :  { %v2408_v25 = vadd.f32 1.0, %v2407_v53  ;;  %v7671_v9 = vmul.f32 0.70710677, %v7664_v4  ;;  %v2444_v63 = vadd.f32 0.112945676, %v2443_v34 }
 0x5ad   :  { %v2433_v32 = vadd.f32 0.05243302, %v2432_v50  ;;  %v2469_v33 = vadd.f32 0.00028619796, %v2468_v8  ;;  %v2480_v46 = vadd.f32 0.001143296, %v2479_v19  ;;  %v2396_v50 = vmul.f32 %v2395_v31, %v7632_v11 }
 0x5ae   :  { %5886 = vrcp.f32 %v2408_v25  ;;  %v2445_v57 = vmul.f32 %v2444_v63, %v7645_v56  ;;  %v2506_v62 = vmul.f32 %v7671_v9, %v7671_v9  ;;  %v2420_v41 = vand.u32 2147483648, %v2408_v25 }
 0x5af   :  { %v2481_v49 = vmul.f32 %v2480_v46, %v7661_v58  ;;  %v2434_v22 = vmul.f32 %v2433_v32, %v7645_v56  ;;  %v2470_v61 = vmul.f32 %v2469_v33, %v7661_v58  ;;  %vm2414_vm1 = vweird.f32 %v2408_v25 }
 0x5b0   :  { %v2446_v6 = vadd.f32 0.4994258, %v2445_v57  ;;  %v7678_v52 = vmin.f32 %v2506_v62, 16.0  ;;  %v2418_v57 = vand.u32 2147483647, %v2408_v25 }
 0x5b1   :  { %v2482_v3 = vadd.f32 0.014752088, %v2481_v49  ;;  %v2435_v34 = vadd.f32 0.18741608, %v2434_v22  ;;  %v2471_v8 = vadd.f32 0.0036580483, %v2470_v61 }
 0x5b2   :  { %v2447_v27 = vmul.f32 %v2446_v6, %v7645_v56  ;;  %v2508_v51 = vmul.f32 2.1237322e-06, %v7678_v52  ;;  %v2519_v48 = vmul.f32 3.8918573e-05, %v7678_v52  ;;  %v2397_v6 = vadd.f32 1.1283791, %v2396_v50 }
 0x5b3   :  { %v2483_v42 = vmul.f32 %v2482_v3, %v7661_v58  ;;  %v2436_v49 = vmul.f32 %v2435_v34, %v7645_v56  ;;  %v2472_v11 = vmul.f32 %v2471_v8, %v7661_v58  ;;  %v2421_v61 = vor.u32 1.1754944e-38, %v2420_v41 }
 0x5b4   :  { %v5887_v21 = vpop.eup %5886  ;;  %v7685_v10 = vadd.f32 1.0, %v2447_v27  ;;  %v2509_v26 = vadd.f32 0.00028619796, %v2508_v51  ;;  %v2520_v40 = vadd.f32 0.001143296, %v2519_v48  ;;  %vm2419_vm11 = vcmp.eq.f32.partialorder %v2418_v57, 8.507059e+37 }
 0x5b5   :  { %v2410_v35 = vmul.f32 %v5887_v21, %v2408_v25  ;;  %v2484_v19 = vadd.f32 0.112945676, %v2483_v42  ;;  %vm2415_vm14 = vweird.f32 %v5887_v21  ;;  %v2437_v56 = vadd.f32 1.1283791, %v2436_v49  ;;  %v5766_v49 = vld [vmem:[#allocation3 + $0xd4] sm:$0xff] }
 0x5b6   :  { %5888 = vrcp.f32 %v7685_v10  ;;  %v2510_v55 = vmul.f32 %v2509_v26, %v7678_v52  ;;  %v2521_v32 = vmul.f32 %v2520_v40, %v7678_v52  ;;  %vm2416_vm10 = vmor %vm2414_vm1, %vm2415_vm14  ;;  %v5768_v26 = vld [vmem:[#allocation3 + $0xe4] sm:$0xff]  ;;  %v2398_v40 = vmul.f32 %v2397_v6, %v7628_v43 }
 0x5b7   :  { %v2411_v53 = vsub.f32 1.0, %v2410_v35  ;;  %v2485_v33 = vmul.f32 %v2484_v19, %v7661_v58  ;;  %v2473_v50 = vadd.f32 0.05243302, %v2472_v11  ;;  %v2460_v34 = vand.u32 2147483648, %v7685_v10  ;;  %2600 = vmatpush.bf16.msrb.mxu0 %v5768_v26 }
 0x5b8   :  { %v2522_v62 = vadd.f32 0.014752088, %v2521_v32  ;;  %v2511_v3 = vadd.f32 0.0036580483, %v2510_v55  ;;  %v2458_v55 = vand.u32 2147483647, %v7685_v10  ;;  %vm2454_vm8 = vweird.f32 %v7685_v10 }
 0x5b9   :  { %v2412_v63 = vmul.f32 %v5887_v21, %v2411_v53  ;;  %v2486_v31 = vadd.f32 0.4994258, %v2485_v33  ;;  %v5767_v32 = vld [vmem:[#allocation3 + $0xdc] sm:$0xff]  ;;  %v2474_v43 = vmul.f32 %v2473_v50, %v7661_v58 }
 0x5ba   :  { %v2523_v51 = vmul.f32 %v2522_v62, %v7678_v52  ;;  %v2512_v41 = vmul.f32 %v2511_v3, %v7678_v52  ;;  %v2461_v62 = vor.u32 1.1754944e-38, %v2460_v34  ;;  %vm2459_vm14 = vcmp.eq.f32.partialorder %v2458_v55, 8.507059e+37 }
 0x5bb   :  { %v2413_v46 = vadd.f32 %v5887_v21, %v2412_v63  ;;  %v2487_v25 = vmul.f32 %v2486_v31, %v7661_v58  ;;  %2601 = vmatpush.bf16.msrb.mxu0 %v5767_v32 }
 0x5bc   :  { %v5889_v22 = vpop.eup %5888  ;;  %v2524_v42 = vadd.f32 0.112945676, %v2523_v51  ;;  %v2513_v6 = vadd.f32 0.05243302, %v2512_v41  ;;  %v2475_v51 = vadd.f32 0.18741608, %v2474_v43 }
 0x5bd   :  { %v2417_v27 = vsel %vm2416_vm10, %v5887_v21, %v2413_v46  ;;  %v2450_v48 = vmul.f32 %v5889_v22, %v7685_v10  ;;  %v2488_v21 = vadd.f32 1.0, %v2487_v25  ;;  %vm2455_vm15 = vweird.f32 %v5889_v22  ;;  %v5765_v25 = vld [vmem:[#allocation3 + $0xcc] sm:$0xff] }
 0x5be   :  { %v2422_v35 = vsel %vm2419_vm11, %v2421_v61, %v2417_v27  ;;  %v2525_v8 = vmul.f32 %v2524_v42, %v7678_v52  ;;  %v2438_v46 = vmul.f32 %v2437_v56, %v7639_v44  ;;  %vm2456_vm12 = vmor %vm2454_vm8, %vm2455_vm15  ;;  %vm9392_vm8 = vcmask 523264  }
 0x5bf   :  { %v2451_v53 = vsub.f32 1.0, %v2450_v48  ;;  %v2423_v19 = vmul.f32 %v2422_v35, %v2398_v40  ;;  %5890 = vrcp.f32 %v2488_v21  ;;  %v2514_v35 = vmul.f32 %v2513_v6, %v7678_v52  ;;  %2602 = vmatpush.bf16.msrb.mxu0 %v5766_v49 }
 0x5c0   :  { %v2526_v33 = vadd.f32 0.4994258, %v2525_v8  ;;  %v2378_v40 = vmul.f32 0.5, %v7625_v5  ;;  %v2498_v34 = vand.u32 2147483647, %v2488_v21  ;;  %v2500_v41 = vand.u32 2147483648, %v2488_v21 }
 0x5c1   :  { %v2452_v63 = vmul.f32 %v5889_v22, %v2451_v53  ;;  %v5524_v11 = vclamps-f32 %v2423_v19, 1.0  ;;  %v2476_v53 = vmul.f32 %v2475_v51, %v7661_v58  ;;  %v2515_v8 = vadd.f32 0.18741608, %v2514_v35 }
 0x5c2   :  { %v2527_v27 = vmul.f32 %v2526_v33, %v7678_v52  ;;  %vm2494_vm10 = vweird.f32 %v2488_v21  ;;  %v2501_v33 = vor.u32 1.1754944e-38, %v2500_v41  ;;  %vm2499_vm15 = vcmp.eq.f32.partialorder %v2498_v34, 8.507059e+37  ;;  %v5829_v34 = vld [vmem:[#allocation5 + $0x1d] ss:$0 sm:$0xff] }
 0x5c3   :  { %v2453_v57 = vadd.f32 %v5889_v22, %v2452_v63  ;;  %v2546_v44 = vadd.f32 1.0, %v5524_v11  ;;  %2603 = vmatpush.bf16.msrb.mxu0 %v5765_v25 }
 0x5c4   :  { %v2528_v48 = vadd.f32 1.0, %v2527_v27 }
 0x5c5   :  { %v2457_v31 = vsel %vm2456_vm12, %v5889_v22, %v2453_v57  ;;  %v5891_v10 = vpop.eup %5890  ;;  %v2379_v22 = vmul.f32 0.5, %v7636_v54  ;;  %v2550_v19 = vmul.f32 %v2546_v44, %v2378_v40  ;;  %v2477_v57 = vadd.f32 1.1283791, %v2476_v53 }
 0x5c6   :  { %v2462_v61 = vsel %vm2459_vm14, %v2461_v62, %v2457_v31  ;;  %v2490_v26 = vmul.f32 %v5891_v10, %v2488_v21  ;;  %5892 = vrcp.f32 %v2528_v48  ;;  %vm2495_vm1 = vweird.f32 %v5891_v10 }
 0x5c7   :  { %v2463_v3 = vmul.f32 %v2462_v61, %v2438_v46  ;;  %vm2496_vm11 = vmor %vm2494_vm10, %vm2495_vm1  ;;  %v2516_v54 = vmul.f32 %v2515_v8, %v7678_v52  ;;  %v2478_v6 = vmul.f32 %v2477_v57, %v7653_v17  ;;  %v2540_v31 = vand.u32 2147483648, %v2528_v48 }
 0x5c8   :  { %v2491_v50 = vsub.f32 1.0, %v2490_v26  ;;  %v2538_v21 = vand.u32 2147483647, %v2528_v48  ;;  %vm2534_vm14 = vweird.f32 %v2528_v48  ;;  %v2380_v26 = vmul.f32 0.5, %v7648_v36 }
 0x5c9   :  { %v5525_v42 = vclamps-f32 %v2463_v3, 1.0  ;;  %v2517_v11 = vadd.f32 1.1283791, %v2516_v54  ;;  %v2541_v51 = vor.u32 1.1754944e-38, %v2540_v31  ;;  %v2381_v40 = vmul.f32 0.5, %v7664_v4 }
 0x5ca   :  { %v2492_v55 = vmul.f32 %v5891_v10, %v2491_v50  ;;  %vm2539_vm10 = vcmp.eq.f32.partialorder %v2538_v21, 8.507059e+37 }
 0x5cb   :  { %v2547_v56 = vadd.f32 1.0, %v5525_v42 }
 0x5cc   :  { %v2493_v43 = vadd.f32 %v5891_v10, %v2492_v55  ;;  %v5893_v5 = vpop.eup %5892 }
 0x5cd   :  { %v2551_v63 = vmul.f32 %v2547_v56, %v2379_v22  ;;  %v2530_v58 = vmul.f32 %v5893_v5, %v2528_v48  ;;  %vm2535_vm12 = vweird.f32 %v5893_v5  ;;  %v5828_v48 = vld [vmem:[#allocation5 + $0x1c] ss:$0 sm:$0xff] }
 0x5ce   :  { %v2497_v46 = vsel %vm2496_vm11, %v5891_v10, %v2493_v43  ;;  %vm2536_vm1 = vmor %vm2534_vm14, %vm2535_vm12  ;;  %v2518_v10 = vmul.f32 %v2517_v11, %v7671_v9 }
 0x5cf   :  { %v2554_v32 = vpack.c.bf16 %v2551_v63, %v2550_v19  ;;  %v2502_v62 = vsel %vm2499_vm15, %v2501_v33, %v2497_v46  ;;  %v2531_v49 = vsub.f32 1.0, %v2530_v58  ;;  %vm9393_vm11 = vmmov %vm9392_vm8  ;;  %vm9394_vm15 = vcmask 261120  }
 0x5d0   :  { %v2503_v27 = vmul.f32 %v2502_v62, %v2478_v6 }
 0x5d1   :  { %5544 = vmatmul.msk.bf16.vlgmr.msrb.gmra.mxu0 %vm9392_vm8, %v2554_v32  ;;  %v2532_v61 = vmul.f32 %v5893_v5, %v2531_v49  ;;  %vm9395_vm8 = vmmov %vm9394_vm15 }
 0x5d2   :  { %v5526_v52 = vclamps-f32 %v2503_v27, 1.0  ;;  %vm9396_vm12 = vmmov %vm9395_vm8 }
 0x5d3   :  { %v2533_v3 = vadd.f32 %v5893_v5, %v2532_v61  ;;  %vm9397_vm14 = vmmov %vm9395_vm8 }
 0x5d4   :  { %v2548_v42 = vadd.f32 1.0, %v5526_v52 }
 0x5d5   :  { %v2537_v35 = vsel %vm2536_vm1, %v5893_v5, %v2533_v3  ;;  %vm9398_vm1 = vmmov %vm9395_vm8 }
 0x5d6   :  { %v2542_v25 = vsel %vm2539_vm10, %v2541_v51, %v2537_v35  ;;  %v2552_v56 = vmul.f32 %v2548_v42, %v2380_v26  ;;  %vm9399_vm10 = vmmov %vm9398_vm1 }
 0x5d7   :  { %v2543_v44 = vmul.f32 %v2542_v25, %v2518_v10 }
 0x5d9   :  { %v5527_v17 = vclamps-f32 %v2543_v44, 1.0 }
 0x5db   :  { %v2549_v22 = vadd.f32 1.0, %v5527_v17 }
 0x5dd   :  { %v2553_v53 = vmul.f32 %v2549_v22, %v2381_v40 }
 0x5df   :  { %v2555_v50 = vpack.c.bf16 %v2553_v53, %v2552_v56 }
 0x5e1   :  { %5545 = vmatmul.msk.bf16.gmra.mxu0 %vm9393_vm11, %v2555_v50  ;;  %vm9400_vm11 = vmmov %vm9398_vm1 }
 0x64e   :  { %v2605_v41 = vpop.f32.mrf.mxu0 }
 0x64f   :  { %v2606_v9 = vadd.f32 %v5828_v48, %v2605_v41 }
 0x651   :  { %v2617_v8 = vmul.f32 %v5829_v34, %v2606_v9 }
 0x653   :  { %v7719_v19 = vadd.f32 %v2617_v8, %v7453_v20 }
 0x655   :  { %v2627_v63 = vsel %vm9394_vm15, %v7719_v19, 0.0  ;;  %v2643_v36 = vmul.f32 %v7719_v19, %v7719_v19  ;;  %vm9401_vm15 = vmmov %vm9398_vm1 }
 0x656   :  { %v2607_v4 = vpop.f32.mrf.mxu0  ;;  %2628 = vadd.xlane.f32.xlu0 %v2627_v63 }
 0x657   :  { %v2608_v55 = vadd.f32 %v5828_v48, %v2607_v4  ;;  %v2647_v32 = vsel %vm9395_vm8, %v2643_v36, 0.0 }
 0x658   :  { %2648 = vadd.xlane.f32.xlu2 %v2647_v32 }
 0x659   :  { %v2618_v57 = vmul.f32 %v5829_v34, %v2608_v55 }
 0x65b   :  { %v7727_v43 = vadd.f32 %v2618_v57, %v7459_v24 }
 0x65d   :  { %v2630_v20 = vsel %vm9396_vm12, %v7727_v43, 0.0  ;;  %v2644_v5 = vmul.f32 %v7727_v43, %v7727_v43 }
 0x65e   :  { %2631 = vadd.xlane.f32.xlu1 %v2630_v20  ;;  %v2610_v54 = vpop.f32.mrf.mxu0  ;;  %v5769_v20 = vld [vmem:[#allocation3 + $0xec] sm:$0xff] }
 0x65f   :  { %v2650_v33 = vsel %vm9397_vm14, %v2644_v5, 0.0  ;;  %v2611_v46 = vadd.f32 %v5828_v48, %v2610_v54 }
 0x660   :  { %2651 = vadd.xlane.f32.xlu0 %v2650_v33 }
 0x661   :  { %v2619_v58 = vmul.f32 %v5829_v34, %v2611_v46 }
 0x663   :  { %v7735_v62 = vadd.f32 %v2619_v58, %v7501_v38 }
 0x665   :  { %v2633_v24 = vsel %vm9398_vm1, %v7735_v62, 0.0  ;;  %v2645_v6 = vmul.f32 %v7735_v62, %v7735_v62 }
 0x666   :  { %v2612_v49 = vpop.f32.mrf.mxu0  ;;  %2634 = vadd.xlane.f32.xlu1 %v2633_v24 }
 0x667   :  { %v2613_v11 = vadd.f32 %v5828_v48, %v2612_v49  ;;  %v2653_v31 = vsel %vm9399_vm10, %v2645_v6, 0.0 }
 0x668   :  { %2654 = vadd.xlane.f32.xlu0 %v2653_v31 }
 0x669   :  { %v2620_v27 = vmul.f32 %v5829_v34, %v2613_v11 }
 0x66b   :  { %v7743_v61 = vadd.f32 %v2620_v27, %v7525_v47  ;;  %v5770_v47 = vld [vmem:[#allocation3 + $0xf4] sm:$0xff] }
 0x66c   :  { %2769 = vmatpush.bf16.msrb.mxu1 %v5770_v47  ;;  %v2784_v47 = vld [vmem:[#allocation5 + $0x51] sm:$0xff] }
 0x66d   :  { %v2636_v38 = vsel %vm9400_vm11, %v7743_v61, 0.0  ;;  %v2646_v21 = vmul.f32 %v7743_v61, %v7743_v61 }
 0x66e   :  { %2637 = vadd.xlane.f32.xlu2 %v2636_v38 }
 0x66f   :  { %v2656_v3 = vsel %vm9401_vm15, %v2646_v21, 0.0 }
 0x670   :  { %2657 = vadd.xlane.f32.xlu1 %v2656_v3  ;;  %2770 = vmatpush.bf16.msrb.mxu1 %v5769_v20 }
 0x6c9   :  { %v2629_v51 = vpop.xlane.xlu0 %2628 }
 0x6ca   :  { %v2639_v52 = vmul.f32 0.03125, %v2629_v51 }
 0x6cb   :  { %v2649_v10 = vpop.xlane.xlu2 %2648 }
 0x6cc   :  { %v2663_v35 = vmul.f32 %v2639_v52, %v2639_v52  ;;  %v2659_v25 = vmul.f32 0.03125, %v2649_v10  ;;  %v2675_v3 = vsub.f32 %v7719_v19, %v2639_v52 }
 0x6ce   :  { %v2667_v44 = vsub.f32 %v2659_v25, %v2663_v35  ;;  %v5830_v25 = vld [vmem:[#allocation5 + $0x1e] ss:$0 sm:$0xff] }
 0x6d0   :  { %v2671_v42 = vmax.f32 %v2667_v44, 0.0 }
 0x6d1   :  { %v2632_v17 = vpop.xlane.xlu1 %2631 }
 0x6d2   :  { %v2679_v26 = vadd.f32 1e-06, %v2671_v42  ;;  %v2640_v40 = vmul.f32 0.03125, %v2632_v17  ;;  %v2785_v17 = vld [vmem:[#allocation5 + $0x59] sm:$0xff] }
 0x6d3   :  { %v2652_v22 = vpop.xlane.xlu0 %2651  ;;  %2812 = vmatpush.msrb.mxu2 %v2785_v17  ;;  %v7761_v17 = vld [vmem:[#allocation5 + $0x9a] sm:$0xff] }
 0x6d4   :  { %5894 = vrsqrt.f32 %v2679_v26  ;;  %v2664_v56 = vmul.f32 %v2640_v40, %v2640_v40  ;;  %v2660_v53 = vmul.f32 0.03125, %v2652_v22  ;;  %vm2689_vm12 = vweird.f32 %v2679_v26  ;;  %3209 = vmatpush.msra.mxu0 %v7761_v17 }
 0x6d5   :  { %v2676_v22 = vsub.f32 %v7727_v43, %v2640_v40  ;;  %2813 = vmatpush.msrb.mxu2 %v2784_v47 }
 0x6d6   :  { %v2668_v50 = vsub.f32 %v2660_v53, %v2664_v56  ;;  %v2783_v53 = vld [vmem:[#allocation5 + $0x49] sm:$0xff] }
 0x6d7   :  { %2814 = vmatpush.msrb.mxu2 %v2783_v53 }
 0x6d8   :  { %v2672_v48 = vmax.f32 %v2668_v50, 0.0 }
 0x6d9   :  { %v2635_v63 = vpop.xlane.xlu1 %2634 }
 0x6da   :  { %v5895_v34 = vpop.eup %5894  ;;  %v2680_v9 = vadd.f32 1e-06, %v2672_v48  ;;  %v7750_v36 = vmul.f32 0.03125, %v2635_v63  ;;  %v2782_v63 = vld [vmem:[#allocation5 + $0x41] sm:$0xff] }
 0x6db   :  { %v2684_v41 = vmul.f32 %v5895_v34, %v2679_v26  ;;  %v2655_v55 = vpop.xlane.xlu0 %2654  ;;  %vm2690_vm8 = vweird.f32 %v5895_v34  ;;  %2815 = vmatpush.msrb.mxu2 %v2782_v63 }
 0x6dc   :  { %5896 = vrsqrt.f32 %v2680_v9  ;;  %v2665_v32 = vmul.f32 %v7750_v36, %v7750_v36  ;;  %v2661_v57 = vmul.f32 0.03125, %v2655_v55  ;;  %vm2691_vm14 = vmor %vm2689_vm12, %vm2690_vm8  ;;  %vm2699_vm10 = vweird.f32 %v2680_v9 }
 0x6dd   :  { %v2685_v8 = vmul.f32 %v5895_v34, %v2684_v41 }
 0x6de   :  { %v2669_v33 = vsub.f32 %v2661_v57, %v2665_v32 }
 0x6df   :  { %v2686_v4 = vmul.f32 0.5, %v2685_v8  ;;  %v5831_v8 = vld [vmem:[#allocation5 + $0x1f] ss:$0 sm:$0xff] }
 0x6e0   :  { %v2673_v24 = vmax.f32 %v2669_v33, 0.0 }
 0x6e1   :  { %v2687_v5 = vsub.f32 1.5, %v2686_v4  ;;  %v2638_v6 = vpop.xlane.xlu2 %2637 }
 0x6e2   :  { %v5897_v54 = vpop.eup %5896  ;;  %v2681_v11 = vadd.f32 1e-06, %v2673_v24  ;;  %v2642_v31 = vmul.f32 0.03125, %v2638_v6  ;;  %v2677_v24 = vsub.f32 %v7735_v62, %v7750_v36  ;;  %v7763_v62 = vld [vmem:[#allocation5 + $0x92] sm:$0xff]  ;;  %v7765_v36 = vld [vmem:[#allocation5 + $0x8a] sm:$0xff] }
 0x6e3   :  { %v2688_v46 = vmul.f32 %v5895_v34, %v2687_v5  ;;  %v2694_v58 = vmul.f32 %v5897_v54, %v2680_v9  ;;  %v2658_v27 = vpop.xlane.xlu1 %2657  ;;  %vm2700_vm1 = vweird.f32 %v5897_v54  ;;  %3210 = vmatpush.msra.mxu0 %v7763_v62 }
 0x6e4   :  { %5898 = vrsqrt.f32 %v2681_v11  ;;  %v2666_v51 = vmul.f32 %v2642_v31, %v2642_v31  ;;  %v2662_v10 = vmul.f32 0.03125, %v2658_v27  ;;  %vm2701_vm11 = vmor %vm2699_vm10, %vm2700_vm1  ;;  %vm2709_vm12 = vweird.f32 %v2681_v11 }
 0x6e5   :  { %v2695_v49 = vmul.f32 %v5897_v54, %v2694_v58  ;;  %v2692_v38 = vsel %vm2691_vm14, %v5895_v34, %v2688_v46  ;;  %3211 = vmatpush.msra.mxu0 %v7765_v36 }
 0x6e6   :  { %v2723_v44 = vmul.f32 %v2692_v38, %v2675_v3  ;;  %v2670_v42 = vsub.f32 %v2662_v10, %v2666_v51  ;;  %v2678_v38 = vsub.f32 %v7743_v61, %v2642_v31  ;;  %v2909_v61 = vmul.f32 %v7761_v17, %v7761_v17 }
 0x6e7   :  { %v2696_v21 = vmul.f32 0.5, %v2695_v49  ;;  %v2908_v31 = vmul.f32 %v7763_v62, %v7763_v62 }
 0x6e8   :  { %v2674_v56 = vmax.f32 %v2670_v42, 0.0  ;;  %v2728_v19 = vmul.f32 %v5830_v25, %v2723_v44  ;;  %v5832_v42 = vld [vmem:[#allocation5 + $0x20] ss:$0 sm:$0xff] }
 0x6e9   :  { %v2697_v35 = vsub.f32 1.5, %v2696_v21 }
 0x6ea   :  { %v5899_v50 = vpop.eup %5898  ;;  %v2682_v41 = vadd.f32 1e-06, %v2674_v56  ;;  %v2733_v32 = vadd.f32 %v5831_v8, %v2728_v19  ;;  %v7781_v19 = vld [vmem:[#allocation5 + $0x72] sm:$0xff] }
 0x6eb   :  { %v2698_v26 = vmul.f32 %v5897_v54, %v2697_v35  ;;  %v2704_v34 = vmul.f32 %v5899_v50, %v2681_v11  ;;  %vm2710_vm8 = vweird.f32 %v5899_v50 }
 0x6ec   :  { %5900 = vrsqrt.f32 %v2682_v41  ;;  %vm2711_vm14 = vmor %vm2709_vm12, %vm2710_vm8  ;;  %vm2719_vm10 = vweird.f32 %v2682_v41  ;;  %vm9024_vm8 = vcmask 64512  }
 0x6ed   :  { %v2702_v48 = vsel %vm2701_vm11, %v5897_v54, %v2698_v26  ;;  %v2705_v55 = vmul.f32 %v5899_v50, %v2704_v34  ;;  %v2931_v56 = vsel %vm9024_vm8, %v2909_v61, 0.0  ;;  %v2928_v53 = vsel %vm9024_vm8, %v2908_v31, 0.0  ;;  %vm9402_vm12 = vmmov %vm9401_vm15 }
 0x6ee   :  { %v2724_v52 = vmul.f32 %v2702_v48, %v2676_v22  ;;  %v7774_v22 = vld [vmem:[#allocation5 + $0x82] sm:$0xff]  ;;  %v7779_v48 = vld [vmem:[#allocation5 + $0x7a] sm:$0xff]  ;;  %2932 = vadd.xlane.f32.xlu2 %v2931_v56  ;;  %2929 = vadd.xlane.f32.xlu0 %v2928_v53 }
 0x6ef   :  { %v2706_v9 = vmul.f32 0.5, %v2705_v55  ;;  %v2905_v34 = vmul.f32 %v7779_v48, %v7779_v48  ;;  %3212 = vmatpush.msra.mxu0 %v7774_v22 }
 0x6f0   :  { %v2729_v4 = vmul.f32 %v5830_v25, %v2724_v52  ;;  %v2906_v52 = vmul.f32 %v7774_v22, %v7774_v22 }
 0x6f1   :  { %v2707_v40 = vsub.f32 1.5, %v2706_v9  ;;  %v2919_v55 = vsel %vm9024_vm8, %v2905_v34, 0.0  ;;  %3213 = vmatpush.msra.mxu0 %v7779_v48 }
 0x6f2   :  { %v2734_v43 = vadd.f32 %v5831_v8, %v2729_v4  ;;  %v5901_v20 = vpop.eup %5900  ;;  %v2922_v63 = vsel %vm9024_vm8, %v2906_v52, 0.0 }
 0x6f3   :  { %v2708_v5 = vmul.f32 %v5899_v50, %v2707_v40  ;;  %v2714_v33 = vmul.f32 %v5901_v20, %v2682_v41  ;;  %vm2720_vm1 = vweird.f32 %v5901_v20  ;;  %v2904_v41 = vmul.f32 %v7781_v19, %v7781_v19  ;;  %3214 = vmatpush.msra.mxu0 %v7781_v19 }
 0x6f4   :  { %v2737_v57 = vpack.c.bf16 %v2734_v43, %v2733_v32  ;;  %vm2721_vm11 = vmor %vm2719_vm10, %vm2720_vm1  ;;  %v7796_v32 = vld [vmem:[#allocation5 + $0x6a] sm:$0xff]  ;;  %v7799_v43 = vld [vmem:[#allocation5 + $0x62] sm:$0xff] }
 0x6f5   :  { %v2715_v54 = vmul.f32 %v5901_v20, %v2714_v33  ;;  %v2712_v58 = vsel %vm2711_vm14, %v5899_v50, %v2708_v5  ;;  %v2916_v9 = vsel %vm9024_vm8, %v2904_v41, 0.0  ;;  %vm9403_vm14 = vmmov %vm9402_vm12  ;;  %v2903_v40 = vmul.f32 %v7796_v32, %v7796_v32  ;;  %3215 = vmatpush.msra.mxu0 %v7796_v32 }
 0x6f6   :  { %5554 = vmatmul.msk.bf16.vlgmr.msrb.gmra.mxu1 %vm9401_vm15, %v2737_v57  ;;  %v2725_v49 = vmul.f32 %v2712_v58, %v2677_v24  ;;  %2923 = vadd.xlane.f32.xlu2 %v2922_v63  ;;  %v2902_v57 = vmul.f32 %v7799_v43, %v7799_v43  ;;  %vm9404_vm1 = vmmov %vm9402_vm12  ;;  %v7813_v24 = vld [vmem:[#allocation5 + $0x61] ss:$0 sm:$0xff] }
 0x6f7   :  { %v2716_v46 = vmul.f32 0.5, %v2715_v54  ;;  %2920 = vadd.xlane.f32.xlu0 %v2919_v55  ;;  %3216 = vmatpush.msra.mxu0 %v7799_v43  ;;  %vm9405_vm10 = vmmov %vm9404_vm1 }
 0x6f8   :  { %v2730_v51 = vmul.f32 %v5830_v25, %v2725_v49  ;;  %v2910_v5 = vsel %vm9024_vm8, %v2902_v57, 0.0 }
 0x6f9   :  { %v2717_v6 = vsub.f32 1.5, %v2716_v46 }
 0x6fa   :  { %v2735_v11 = vadd.f32 %v5831_v8, %v2730_v51 }
 0x6fb   :  { %v2718_v27 = vmul.f32 %v5901_v20, %v2717_v6 }
 0x6fd   :  { %v2722_v21 = vsel %vm2721_vm11, %v5901_v20, %v2718_v27  ;;  %v2913_v20 = vsel %vm9024_vm8, %v2903_v40, 0.0 }
 0x6fe   :  { %v2726_v3 = vmul.f32 %v2722_v21, %v2678_v38  ;;  %2914 = vadd.xlane.f32.xlu2 %v2913_v20 }
 0x6ff   :  { %2911 = vadd.xlane.f32.xlu0 %v2910_v5 }
 0x700   :  { %v2731_v10 = vmul.f32 %v5830_v25, %v2726_v3  ;;  %v2907_v25 = vmul.f32 %v7765_v36, %v7765_v36 }
 0x702   :  { %v2736_v35 = vadd.f32 %v5831_v8, %v2731_v10  ;;  %v2925_v50 = vsel %vm9024_vm8, %v2907_v25, 0.0 }
 0x703   :  { %2926 = vadd.xlane.f32.xlu1 %v2925_v50 }
 0x704   :  { %v2738_v44 = vpack.c.bf16 %v2736_v35, %v2735_v11 }
 0x706   :  { %5555 = vmatmul.msk.bf16.gmra.mxu1 %vm9401_vm15, %v2738_v44 }
 0x70b   :  { %2917 = vadd.xlane.f32.xlu1 %v2916_v9 }
 0x761   :  { %v2933_v27 = vpop.xlane.xlu2 %2932  ;;  %v2930_v38 = vpop.xlane.xlu0 %2929 }
 0x762   :  { %v2941_v3 = vmax.f32 %v2933_v27, 1e-24  ;;  %v2940_v51 = vmax.f32 %v2930_v38, 1e-24 }
 0x764   :  { %5902 = vrsqrt.f32 %v2941_v3  ;;  %vm3018_vm11 = vweird.f32 %v2941_v3 }
 0x765   :  { %5904 = vrsqrt.f32 %v2940_v51 }
 0x76a   :  { %v2921_v61 = vpop.xlane.xlu0 %2920  ;;  %v5903_v31 = vpop.eup %5902 }
 0x76b   :  { %v7826_v56 = vmax.f32 %v2921_v61, 1e-24  ;;  %v5905_v50 = vpop.eup %5904  ;;  %v3013_v52 = vmul.f32 %v5903_v31, %v2941_v3  ;;  %vm3019_vm15 = vweird.f32 %v5903_v31 }
 0x76c   :  { %v3003_v63 = vmul.f32 %v5905_v50, %v2940_v51 }
 0x76e   :  { %v3004_v9 = vmul.f32 %v5905_v50, %v3003_v63 }
 0x770   :  { %v3005_v20 = vmul.f32 0.5, %v3004_v9 }
 0x773   :  { %v2772_v47 = vpop.f32.mrf.mxu1 }
 0x774   :  { %v2773_v26 = vadd.f32 %v5832_v42, %v2772_v47  ;;  %v2924_v47 = vpop.xlane.xlu2 %2923 }
 0x776   :  { %5556 = vmatmul.msk.f32.vlgmr.msrb.gmra.mxu2 %vm9402_vm12, %v2773_v26  ;;  %v2927_v10 = vpop.xlane.xlu1 %2926  ;;  %v2938_v26 = vmax.f32 %v2924_v47, 1e-24  ;;  %vm3008_vm12 = vweird.f32 %v2940_v51 }
 0x777   :  { %v2939_v11 = vmax.f32 %v2927_v10, 1e-24 }
 0x779   :  { %5906 = vrsqrt.f32 %v2939_v11 }
 0x77a   :  { %5908 = vrsqrt.f32 %v2938_v26 }
 0x77b   :  { %v2774_v8 = vpop.f32.mrf.mxu1  ;;  %5910 = vrsqrt.f32 %v7826_v56 }
 0x77c   :  { %v2775_v4 = vadd.f32 %v5832_v42, %v2774_v8 }
 0x77e   :  { %5557 = vmatmul.msk.f32.gmra.mxu2 %vm9403_vm14, %v2775_v4  ;;  %v2918_v53 = vpop.xlane.xlu1 %2917  ;;  %v3014_v4 = vmul.f32 %v5903_v31, %v3013_v52  ;;  %vm3009_vm14 = vweird.f32 %v5905_v50 }
 0x77f   :  { %v7828_v34 = vmax.f32 %v2918_v53, 1e-24  ;;  %v7830_v41 = vpop.eup %5906  ;;  %vm7841_vm4 = vmor %vm3008_vm12, %vm3009_vm14  ;;  %vm9412_vm14 = vcmask 64512  }
 0x780   :  { %v2993_v55 = vmul.f32 %v7830_v41, %v2939_v11  ;;  %v3015_v40 = vmul.f32 0.5, %v3014_v4 }
 0x781   :  { %5912 = vrsqrt.f32 %v7828_v34 }
 0x782   :  { %v2994_v57 = vmul.f32 %v7830_v41, %v2993_v55  ;;  %v3016_v5 = vsub.f32 1.5, %v3015_v40 }
 0x783   :  { %v2777_v33 = vpop.f32.mrf.mxu1 }
 0x784   :  { %v2778_v54 = vadd.f32 %v5832_v42, %v2777_v33  ;;  %v2995_v33 = vmul.f32 0.5, %v2994_v57  ;;  %v3017_v27 = vmul.f32 %v5903_v31, %v3016_v5 }
 0x786   :  { %5558 = vmatmul.msk.f32.gmra.mxu2 %vm9404_vm1, %v2778_v54  ;;  %v5909_v54 = vpop.eup %5908  ;;  %vm7837_vm1 = vmor %vm3018_vm11, %vm3019_vm15  ;;  %vm2988_vm15 = vweird.f32 %v2938_v26 }
 0x787   :  { %v2983_v3 = vmul.f32 %v5909_v54, %v2938_v26  ;;  %v5911_v51 = vpop.eup %5910  ;;  %v3021_v47 = vsel %vm7837_vm1, %v5903_v31, %v3017_v27  ;;  %vm2989_vm12 = vweird.f32 %v5909_v54  ;;  %vm9413_vm1 = vmmov %vm9412_vm14 }
 0x788   :  { %v2973_v53 = vmul.f32 %v5911_v51, %v7826_v56  ;;  %vm9417_vm7 = vmmov %vm9413_vm1 }
 0x789   :  { %vm9419_vm0 = vmmov %vm9413_vm1 }
 0x78a   :  { %v2974_v55 = vmul.f32 %v5911_v51, %v2973_v53 }
 0x78b   :  { %v2779_v46 = vpop.f32.mrf.mxu1 }
 0x78c   :  { %v2780_v58 = vadd.f32 %v5832_v42, %v2779_v46  ;;  %v2975_v57 = vmul.f32 0.5, %v2974_v55 }
 0x78e   :  { %5559 = vmatmul.msk.f32.gmra.mxu2 %vm9405_vm10, %v2780_v58  ;;  %v3006_v58 = vsub.f32 1.5, %v3005_v20  ;;  %vm2998_vm10 = vweird.f32 %v2939_v11  ;;  %v2976_v46 = vsub.f32 1.5, %v2975_v57 }
 0x790   :  { %v2977_v27 = vmul.f32 %v5911_v51, %v2976_v46 }
 0x7f9   :  { %v2817_v6 = vpop.f32.mrf.mxu2 }
 0x7fa   :  { %v7816_v49 = vadd.f32 %v7813_v24, %v2817_v6 }
 0x7fc   :  { %v2837_v21 = vmul.f32 %v7816_v49, %v7816_v49 }
 0x7fe   :  { %v2842_v35 = vsel %vm9024_vm8, %v2837_v21, 0.0  ;;  %v2996_v21 = vsub.f32 1.5, %v2995_v33 }
 0x7ff   :  { %2843 = vadd.xlane.f32.xlu1 %v2842_v35  ;;  %v3007_v35 = vmul.f32 %v5905_v50, %v3006_v58 }
 0x800   :  { %v2997_v61 = vmul.f32 %v7830_v41, %v2996_v21 }
 0x801   :  { %v2820_v44 = vpop.f32.mrf.mxu2  ;;  %v3011_v63 = vsel %vm7841_vm4, %v5905_v50, %v3007_v35  ;;  %vm7870_vm4 = vmor %vm2988_vm15, %vm2989_vm12  ;;  %vm2968_vm15 = vweird.f32 %v7828_v34 }
 0x802   :  { %v7822_v42 = vadd.f32 %v7813_v24, %v2820_v44  ;;  %v5913_v44 = vpop.eup %5912 }
 0x803   :  { %v2963_v9 = vmul.f32 %v5913_v44, %v7828_v34  ;;  %vm2969_vm12 = vweird.f32 %v5913_v44 }
 0x804   :  { %v2838_v25 = vmul.f32 %v7822_v42, %v7822_v42 }
 0x805   :  { %v2964_v20 = vmul.f32 %v5913_v44, %v2963_v9 }
 0x806   :  { %v2845_v8 = vsel %vm9024_vm8, %v2838_v25, 0.0  ;;  %vm2999_vm8 = vweird.f32 %v7830_v41  ;;  %v2984_v25 = vmul.f32 %v5909_v54, %v2983_v3 }
 0x807   :  { %2846 = vadd.xlane.f32.xlu2 %v2845_v8  ;;  %v3029_v8 = vmul.f32 %v3021_v47, %v7761_v17  ;;  %vm7859_vm11 = vmor %vm2998_vm10, %vm2999_vm8  ;;  %v3028_v17 = vmul.f32 %v3011_v63, %v7763_v62  ;;  %vm2978_vm8 = vweird.f32 %v7826_v56  ;;  %vm2979_vm10 = vweird.f32 %v5911_v51  ;;  %v2915_v47 = vpop.xlane.xlu2 %2914 }
 0x808   :  { %v2985_v31 = vmul.f32 0.5, %v2984_v25  ;;  %v3001_v11 = vsel %vm7859_vm11, %v7830_v41, %v2997_v61  ;;  %v2965_v58 = vmul.f32 0.5, %v2964_v20  ;;  %vm2980_vm11 = vmor %vm2978_vm8, %vm2979_vm10  ;;  %v2912_v61 = vpop.xlane.xlu0 %2911  ;;  %v2935_v25 = vmax.f32 %v2915_v47, 1e-24 }
 0x809   :  { %v2823_v6 = vpop.f32.mrf.mxu2  ;;  %5560 = vmatpush.xpose.msk.msra.mxu3 %vm9413_vm1, %v3029_v8  ;;  %v3027_v41 = vmul.f32 %v3001_v11, %v7765_v36  ;;  %v2981_v36 = vsel %vm2980_vm11, %v5911_v51, %v2977_v27  ;;  %vm9420_vm8 = vmmov %vm9419_vm0  ;;  %v2934_v53 = vmax.f32 %v2912_v61, 1e-24 }
 0x80a   :  { %v7847_v10 = vadd.f32 %v7813_v24, %v2823_v6  ;;  %v2986_v50 = vsub.f32 1.5, %v2985_v31  ;;  %v2966_v38 = vsub.f32 1.5, %v2965_v58  ;;  %5914 = vrsqrt.f32 %v2935_v25 }
 0x80b   :  { %5916 = vrsqrt.f32 %v2934_v53  ;;  %vm2948_vm10 = vweird.f32 %v2934_v53 }
 0x80c   :  { %v2839_v52 = vmul.f32 %v7847_v10, %v7847_v10  ;;  %v2987_v33 = vmul.f32 %v5909_v54, %v2986_v50  ;;  %v2967_v3 = vmul.f32 %v5913_v44, %v2966_v38 }
 0x80e   :  { %v2848_v40 = vsel %vm9412_vm14, %v2839_v52, 0.0  ;;  %vm9416_vm14 = vmmov %vm9413_vm1  ;;  %v2991_v6 = vsel %vm7870_vm4, %v5909_v54, %v2987_v33  ;;  %v3025_v54 = vmul.f32 %v2981_v36, %v7779_v48 }
 0x80f   :  { %2849 = vadd.xlane.f32.xlu0 %v2848_v40  ;;  %5561 = vmatpush.xpose.msk.msra.mxu3 %vm9416_vm14, %v3028_v17  ;;  %vm2970_vm14 = vmor %vm2968_vm15, %vm2969_vm12 }
 0x810   :  { %vm9418_vm4 = vmmov %vm9413_vm1  ;;  %v2971_v35 = vsel %vm2970_vm14, %v5913_v44, %v2967_v3 }
 0x811   :  { %v2826_v5 = vpop.f32.mrf.mxu2  ;;  %v3024_v34 = vmul.f32 %v2971_v35, %v7781_v19  ;;  %vm9421_vm14 = vmmov %vm9413_vm1 }
 0x812   :  { %v7876_v62 = vadd.f32 %v7813_v24, %v2826_v5  ;;  %v3026_v24 = vmul.f32 %v2991_v6, %v7774_v22  ;;  %v5915_v22 = vpop.eup %5914 }
 0x813   :  { %5562 = vmatpush.xpose.msk.msra.mxu3 %vm9417_vm7, %v3027_v41  ;;  %v5917_v51 = vpop.eup %5916  ;;  %v2953_v52 = vmul.f32 %v5915_v22, %v2935_v25  ;;  %vm2959_vm7 = vweird.f32 %v5915_v22 }
 0x814   :  { %v2840_v56 = vmul.f32 %v7876_v62, %v7876_v62  ;;  %v2943_v8 = vmul.f32 %v5917_v51, %v2934_v53  ;;  %vm2949_vm11 = vweird.f32 %v5917_v51 }
 0x815   :  { %v2954_v63 = vmul.f32 %v5915_v22, %v2953_v52  ;;  %vm2950_vm12 = vmor %vm2948_vm10, %vm2949_vm11 }
 0x816   :  { %v2851_v21 = vsel %vm9413_vm1, %v2840_v56, 0.0  ;;  %v2944_v4 = vmul.f32 %v5917_v51, %v2943_v8 }
 0x817   :  { %2852 = vadd.xlane.f32.xlu1 %v2851_v21  ;;  %5563 = vmatpush.xpose.msk.msra.mxu3 %vm9418_vm4, %v3026_v24  ;;  %v2955_v48 = vmul.f32 0.5, %v2954_v63 }
 0x818   :  { %v2945_v44 = vmul.f32 0.5, %v2944_v4 }
 0x819   :  { %v2956_v31 = vsub.f32 1.5, %v2955_v48 }
 0x81a   :  { %v2946_v19 = vsub.f32 1.5, %v2945_v44 }
 0x81b   :  { %5564 = vmatpush.xpose.msk.msra.mxu3 %vm9419_vm0, %v3025_v54  ;;  %vm2958_vm0 = vweird.f32 %v2935_v25  ;;  %v2957_v55 = vmul.f32 %v5915_v22, %v2956_v31 }
 0x81c   :  { %vm2960_vm15 = vmor %vm2958_vm0, %vm2959_vm7  ;;  %v2947_v9 = vmul.f32 %v5917_v51, %v2946_v19 }
 0x81d   :  { %v2961_v40 = vsel %vm2960_vm15, %v5915_v22, %v2957_v55  ;;  %vm9422_vm7 = vmmov %vm9413_vm1 }
 0x81e   :  { %v2951_v17 = vsel %vm2950_vm12, %v5917_v51, %v2947_v9  ;;  %v3023_v11 = vmul.f32 %v2961_v40, %v7796_v32  ;;  %vm9423_vm12 = vmmov %vm9413_vm1 }
 0x81f   :  { %5565 = vmatpush.xpose.msk.msra.mxu3 %vm9420_vm8, %v3024_v34  ;;  %v3022_v50 = vmul.f32 %v2951_v17, %v7799_v43 }
 0x823   :  { %5566 = vmatpush.xpose.msk.msra.mxu3 %vm9413_vm1, %v3023_v11 }
 0x827   :  { %5567 = vmatpush.xpose.msk.msra.mxu3 %vm9421_vm14, %v3022_v50 }
 0x872   :  { %v2844_v57 = vpop.xlane.xlu1 %2843 }
 0x873   :  { %v2854_v20 = vmax.f32 %v2844_v57, 1e-24 }
 0x875   :  { %5918 = vrsqrt.f32 %v2854_v20  ;;  %vm2864_vm8 = vweird.f32 %v2854_v20 }
 0x87a   :  { %v2847_v26 = vpop.xlane.xlu2 %2846 }
 0x87b   :  { %v5919_v5 = vpop.eup %5918  ;;  %v2855_v33 = vmax.f32 %v2847_v26, 1e-24 }
 0x87c   :  { %v2859_v46 = vmul.f32 %v5919_v5, %v2854_v20  ;;  %vm2865_vm4 = vweird.f32 %v5919_v5 }
 0x87d   :  { %5920 = vrsqrt.f32 %v2855_v33  ;;  %vm2866_vm0 = vmor %vm2864_vm8, %vm2865_vm4  ;;  %vm2874_vm11 = vweird.f32 %v2855_v33 }
 0x87e   :  { %v2860_v58 = vmul.f32 %v5919_v5, %v2859_v46  ;;  %vm9424_vm8 = vmmov %vm9422_vm7 }
 0x880   :  { %v2861_v41 = vmul.f32 0.5, %v2860_v58 }
 0x882   :  { %v2862_v6 = vsub.f32 1.5, %v2861_v41  ;;  %v2850_v21 = vpop.xlane.xlu0 %2849  ;;  %v9430_v41 = vlaneseq }
 0x883   :  { %v5921_v27 = vpop.eup %5920  ;;  %v2856_v36 = vmax.f32 %v2850_v21, 1e-24 }
 0x884   :  { %v2863_v32 = vmul.f32 %v5919_v5, %v2862_v6  ;;  %v2869_v38 = vmul.f32 %v5921_v27, %v2855_v33  ;;  %vm2875_vm10 = vweird.f32 %v5921_v27  ;;  %v7910_v6 = vand.u32 127, %v9430_v41 }
 0x885   :  { %5922 = vrsqrt.f32 %v2856_v36  ;;  %vm2876_vm15 = vmor %vm2874_vm11, %vm2875_vm10  ;;  %vm2884_vm14 = vweird.f32 %v2856_v36 }
 0x886   :  { %v2867_v43 = vsel %vm2866_vm0, %v5919_v5, %v2863_v32  ;;  %v2870_v56 = vmul.f32 %v5921_v27, %v2869_v38  ;;  %vm9425_vm11 = vmmov %vm9424_vm8  ;;  %9431 = vst [vmem:[#allocation58_spill] sm:$0xff] %v7910_v6 }
 0x887   :  { %v2898_v24 = vmul.f32 %v2867_v43, %v7816_v49 }
 0x888   :  { %v2871_v3 = vmul.f32 0.5, %v2870_v56 }
 0x889   :  { %5568 = vmatmul.msk.f32.vlgmr.msra.gmra.mxu3 %vm9422_vm7, %v2898_v24 }
 0x88a   :  { %v2872_v54 = vsub.f32 1.5, %v2871_v3  ;;  %v2853_v34 = vpop.xlane.xlu1 %2852 }
 0x88b   :  { %v5923_v61 = vpop.eup %5922  ;;  %v2857_v25 = vmax.f32 %v2853_v34, 1e-24 }
 0x88c   :  { %v2873_v35 = vmul.f32 %v5921_v27, %v2872_v54  ;;  %v2879_v22 = vmul.f32 %v5923_v61, %v2856_v36  ;;  %vm2885_vm1 = vweird.f32 %v5923_v61 }
 0x88d   :  { %5924 = vrsqrt.f32 %v2857_v25  ;;  %vm2886_vm4 = vmor %vm2884_vm14, %vm2885_vm1  ;;  %vm2894_vm7 = vweird.f32 %v2857_v25 }
 0x88e   :  { %v2877_v47 = vsel %vm2876_vm15, %v5921_v27, %v2873_v35  ;;  %v2880_v51 = vmul.f32 %v5923_v61, %v2879_v22  ;;  %vm9426_vm15 = vcmask 523264  }
 0x88f   :  { %v2899_v53 = vmul.f32 %v2877_v47, %v7822_v42 }
 0x890   :  { %v2881_v52 = vmul.f32 0.5, %v2880_v51 }
 0x891   :  { %5569 = vmatmul.msk.f32.gmra.mxu3 %vm9423_vm12, %v2899_v53  ;;  %vm9427_vm12 = vmmov %vm9426_vm15 }
 0x892   :  { %v2882_v8 = vsub.f32 1.5, %v2881_v52  ;;  %vm9428_vm1 = vmmov %vm9427_vm12 }
 0x893   :  { %v5925_v63 = vpop.eup %5924  ;;  %vm9429_vm14 = vmmov %vm9428_vm1 }
 0x894   :  { %v2889_v4 = vmul.f32 %v5925_v63, %v2857_v25  ;;  %v2883_v48 = vmul.f32 %v5923_v61, %v2882_v8  ;;  %vm2895_vm0 = vweird.f32 %v5925_v63 }
 0x895   :  { %vm2896_vm10 = vmor %vm2894_vm7, %vm2895_vm0 }
 0x896   :  { %v2890_v44 = vmul.f32 %v5925_v63, %v2889_v4  ;;  %v2887_v31 = vsel %vm2886_vm4, %v5923_v61, %v2883_v48  ;;  %vm9433_vm7 = vmmov %vm9428_vm1 }
 0x897   :  { %v2900_v19 = vmul.f32 %v2887_v31, %v7847_v10 }
 0x898   :  { %v2891_v55 = vmul.f32 0.5, %v2890_v44 }
 0x899   :  { %5570 = vmatmul.msk.f32.gmra.mxu3 %vm9424_vm8, %v2900_v19  ;;  %vm9432_vm8 = vmmov %vm9428_vm1 }
 0x89a   :  { %v2892_v9 = vsub.f32 1.5, %v2891_v55 }
 0x89c   :  { %v2893_v40 = vmul.f32 %v5925_v63, %v2892_v9 }
 0x89e   :  { %v2897_v17 = vsel %vm2896_vm10, %v5925_v63, %v2893_v40 }
 0x89f   :  { %v2901_v11 = vmul.f32 %v2897_v17, %v7876_v62 }
 0x8a1   :  { %5571 = vmatmul.msk.f32.gmra.mxu3 %vm9425_vm11, %v2901_v11  ;;  %vm9434_vm11 = vmmov %vm9428_vm1 }
 0x90c   :  { %v3083_v50 = vpop.f32.mrf.mxu3 }
 0x90d   :  { %v3095_v57 = vsel %vm9426_vm15, %v3083_v50, -inf }
 0x90e   :  { %3096 = vmax.xlane.f32.xlu2 %v3095_v57 }
 0x914   :  { %v3086_v20 = vpop.f32.mrf.mxu3 }
 0x915   :  { %v3098_v26 = vsel %vm9427_vm12, %v3086_v20, -inf  ;;  %vm9435_vm12 = vmmov %vm9428_vm1 }
 0x916   :  { %3099 = vmax.xlane.f32.xlu0 %v3098_v26 }
 0x91c   :  { %v3089_v5 = vpop.f32.mrf.mxu3 }
 0x91d   :  { %v3101_v33 = vsel %vm9428_vm1, %v3089_v5, -inf }
 0x91e   :  { %3102 = vmax.xlane.f32.xlu1 %v3101_v33 }
 0x924   :  { %v3092_v46 = vpop.f32.mrf.mxu3 }
 0x925   :  { %v3104_v58 = vsel %vm9429_vm14, %v3092_v46, -inf }
 0x926   :  { %3105 = vmax.xlane.f32.xlu2 %v3104_v58 }
 0x981   :  { %v3097_v27 = vpop.xlane.xlu2 %3096 }
 0x982   :  { %vm3109_vm4 = vcmp.ge.f32.partialorder %v3083_v50, %v3097_v27 }
 0x983   :  { %v3113_v32 = vsel %vm3109_vm4, %v7910_v6, 64 }
 0x984   :  { %v3117_v38 = vsel %vm9432_vm8, %v3113_v32, 2147483647  ;;  %v3259_v32 = vld [vmem:[#allocation5 + $0xa2] sm:$0xff] }
 0x985   :  { %v3119_v43 = vshra.s32 %v3117_v38, 16  ;;  %v3118_v63 = vand.u32 65535, %v3117_v38  ;;  %3289 = vmatpush.msra.mxu1 %v3259_v32 }
 0x987   :  { %v3121_v56 = vcvt.s32.f32 %v3119_v43  ;;  %v3120_v48 = vcvt.s32.f32 %v3118_v63  ;;  %v9437_v43 = vmov 0.0  }
 0x989   :  { %3122 = vmin.xlane.f32.xlu0 %v3121_v56  ;;  %v3100_v21 = vpop.xlane.xlu0 %3099 }
 0x98a   :  { %vm3110_vm0 = vcmp.ge.f32.partialorder %v3086_v20, %v3100_v21 }
 0x98b   :  { %v3114_v24 = vsel %vm3110_vm0, %v7910_v6, 64 }
 0x98c   :  { %v3132_v36 = vsel %vm9433_vm7, %v3114_v24, 2147483647 }
 0x98d   :  { %v3134_v3 = vshra.s32 %v3132_v36, 16  ;;  %v3133_v31 = vand.u32 65535, %v3132_v36 }
 0x98f   :  { %v3136_v54 = vcvt.s32.f32 %v3134_v3  ;;  %v3135_v55 = vcvt.s32.f32 %v3133_v31 }
 0x991   :  { %3137 = vmin.xlane.f32.xlu1 %v3136_v54  ;;  %v3103_v35 = vpop.xlane.xlu1 %3102 }
 0x992   :  { %vm3111_vm10 = vcmp.ge.f32.partialorder %v3089_v5, %v3103_v35 }
 0x993   :  { %v3115_v34 = vsel %vm3111_vm10, %v7910_v6, 64 }
 0x994   :  { %v3147_v47 = vsel %vm9434_vm11, %v3115_v34, 2147483647  ;;  %vm9439_vm11 = vmmov %vm9433_vm7 }
 0x995   :  { %v3149_v61 = vshra.s32 %v3147_v47, 16  ;;  %v3148_v40 = vand.u32 65535, %v3147_v47 }
 0x997   :  { %v3151_v25 = vcvt.s32.f32 %v3149_v61  ;;  %v3150_v11 = vcvt.s32.f32 %v3148_v40  ;;  %v5776_v40 = vld [vmem:[#allocation3 + $0x124] sm:$0xff] }
 0x998   :  { %3541 = vmatpush.bf16.msrb.mxu0 %v5776_v40 }
 0x999   :  { %3152 = vmin.xlane.f32.xlu2 %v3151_v25  ;;  %v3106_v53 = vpop.xlane.xlu2 %3105 }
 0x99a   :  { %vm3112_vm15 = vcmp.ge.f32.partialorder %v3092_v46, %v3106_v53 }
 0x99b   :  { %v3116_v22 = vsel %vm3112_vm15, %v7910_v6, 64 }
 0x99c   :  { %v3162_v51 = vsel %vm9435_vm12, %v3116_v22, 2147483647  ;;  %vm9441_vm12 = vmmov %vm9433_vm7 }
 0x99d   :  { %v3164_v52 = vshra.s32 %v3162_v51, 16  ;;  %v3163_v57 = vand.u32 65535, %v3162_v51 }
 0x99f   :  { %v3166_v8 = vcvt.s32.f32 %v3164_v52  ;;  %v3165_v26 = vcvt.s32.f32 %v3163_v57  ;;  %v5834_v57 = vld [vmem:[#allocation5 + $0xaa] ss:$0 sm:$0xff] }
 0x9a1   :  { %3167 = vmin.xlane.f32.xlu0 %v3166_v8 }
 0x9fc   :  { %v3123_v4 = vpop.xlane.xlu0 %3122 }
 0x9fd   :  { %vm3124_vm1 = vcmp.eq.f32.partialorder %v3121_v56, %v3123_v4  ;;  %v3129_v33 = vcvt.f32.s32 %v3123_v4 }
 0x9fe   :  { %v3125_v44 = vsel %vm3124_vm1, %v3120_v48, inf }
 0x9ff   :  { %3126 = vmin.xlane.f32.xlu1 %v3125_v44  ;;  %v3130_v58 = vshll.u32 %v3129_v33, 16 }
 0xa04   :  { %v3138_v19 = vpop.xlane.xlu1 %3137 }
 0xa05   :  { %vm3139_vm14 = vcmp.eq.f32.partialorder %v3136_v54, %v3138_v19  ;;  %v3144_v38 = vcvt.f32.s32 %v3138_v19 }
 0xa06   :  { %v3140_v9 = vsel %vm3139_vm14, %v3135_v55, inf  ;;  %vm9443_vm14 = vmmov %vm9433_vm7  ;;  %v5774_v55 = vld [vmem:[#allocation3 + $0x114] sm:$0xff] }
 0xa07   :  { %3141 = vmin.xlane.f32.xlu2 %v3140_v9  ;;  %v3145_v24 = vshll.u32 %v3144_v38, 16  ;;  %3380 = vmatpush.bf16.msra.mxu2 %v5774_v55  ;;  %v5772_v9 = vld [vmem:[#allocation3 + $0x104] sm:$0xff]  ;;  %v9463_v55 = vld [vmem:[#allocation12_spill] sm:$0xff] }
 0xa08   :  { %3456 = vmatpush.bf16.msrb.mxu3 %v5772_v9  ;;  %v9464_v9 = vunpack.c.l.b16 %v9463_v55 }
 0xa0c   :  { %v3153_v17 = vpop.xlane.xlu2 %3152 }
 0xa0d   :  { %vm3154_vm4 = vcmp.eq.f32.partialorder %v3151_v25, %v3153_v17  ;;  %v3159_v35 = vcvt.f32.s32 %v3153_v17  ;;  %v5778_v17 = vld [vmem:[#allocation3 + $0x134] sm:$0xff] }
 0xa0e   :  { %v3155_v50 = vsel %vm3154_vm4, %v3150_v11, inf  ;;  %vm9444_vm4 = vcmask 64512   ;;  %v5773_v11 = vld [vmem:[#allocation3 + $0x10c] sm:$0xff]  ;;  %3600 = vmatpush.bf16.msrb.mxu1 %v5778_v17  ;;  %v5779_v17 = vld [vmem:[#allocation3 + $0x13c] sm:$0xff] }
 0xa0f   :  { %3156 = vmin.xlane.f32.xlu0 %v3155_v50  ;;  %v3160_v47 = vshll.u32 %v3159_v35, 16  ;;  %v5777_v50 = vld [vmem:[#allocation3 + $0x12c] sm:$0xff]  ;;  %3381 = vmatpush.bf16.msra.mxu2 %v5773_v11 }
 0xa12   :  { %3601 = vmatpush.bf16.msrb.mxu1 %v5777_v50 }
 0xa14   :  { %v3168_v20 = vpop.xlane.xlu0 %3167 }
 0xa15   :  { %vm3169_vm8 = vcmp.eq.f32.partialorder %v3166_v8, %v3168_v20  ;;  %v3174_v53 = vcvt.f32.s32 %v3168_v20  ;;  %v5771_v20 = vld [vmem:[#allocation3 + $0xfc] sm:$0xff] }
 0xa16   :  { %v3170_v5 = vsel %vm3169_vm8, %v3165_v26, inf  ;;  %vm9445_vm8 = vmmov %vm9444_vm4  ;;  %v5775_v26 = vld [vmem:[#allocation3 + $0x11c] sm:$0xff]  ;;  %3457 = vmatpush.bf16.msrb.mxu3 %v5771_v20 }
 0xa17   :  { %3171 = vmin.xlane.f32.xlu1 %v3170_v5  ;;  %v3175_v52 = vshll.u32 %v3174_v53, 16  ;;  %3542 = vmatpush.bf16.msrb.mxu0 %v5775_v26 }
 0xa72   :  { %v3127_v46 = vpop.xlane.xlu1 %3126 }
 0xa73   :  { %v3128_v41 = vcvt.f32.s32 %v3127_v46 }
 0xa75   :  { %v7920_v27 = vadd.s32 %v3130_v58, %v3128_v41  ;;  %v5780_v41 = vld [vmem:[#allocation3 + $0x144] sm:$0xff] }
 0xa76   :  { %3683 = vmatpush.bf16.msrb.mxu2 %v5780_v41  ;;  %v9468_v41 = vld [vmem:[#allocation18_spill] sm:$0xff] }
 0xa77   :  { %9436 = vst [vmem:[#allocation59_spill] sm:$0xff] %v7920_v27  ;;  %vm3177_vm0 = vcmp.eq.s32.totalorder %v7910_v6, %v7920_v27 }
 0xa78   :  { %v5572_v56 = vsel %vm3177_vm0, 1.0, %v9437_v43  ;;  %vm9446_vm0 = vmmov %vm9444_vm4 }
 0xa79   :  { %5576 = vmatmul.msk.f32.vlgmr.msra.gmra.mxu0 %vm9433_vm7, %v5572_v56  ;;  %vm9447_vm7 = vmmov %vm9446_vm0  ;;  %v5784_v56 = vld [vmem:[#allocation3 + $0x164] sm:$0xff] }
 0xa7a   :  { %v3142_v21 = vpop.xlane.xlu2 %3141  ;;  %3840 = vmatpush.bf16.msra.mxu0 %v5784_v56  ;;  %3684 = vmatpush.bf16.msrb.mxu2 %v5779_v17  ;;  %v9490_v17 = vld [vmem:[#allocation26_spill] sm:$0xff] }
 0xa7b   :  { %v3143_v36 = vcvt.f32.s32 %v3142_v21 }
 0xa7d   :  { %v7926_v3 = vadd.s32 %v3145_v24, %v3143_v36 }
 0xa7f   :  { %9438 = vst [vmem:[#allocation60_spill] sm:$0xff] %v7926_v3  ;;  %vm3178_vm10 = vcmp.eq.s32.totalorder %v7910_v6, %v7926_v3 }
 0xa80   :  { %v5573_v54 = vsel %vm3178_vm10, 1.0, %v9437_v43  ;;  %vm9448_vm10 = vcmask 261120  }
 0xa81   :  { %5577 = vmatmul.msk.f32.gmra.mxu0 %vm9439_vm11, %v5573_v54  ;;  %vm9449_vm11 = vmmov %vm9448_vm10 }
 0xa82   :  { %v3157_v34 = vpop.xlane.xlu0 %3156 }
 0xa83   :  { %v3158_v61 = vcvt.f32.s32 %v3157_v34 }
 0xa85   :  { %v7932_v25 = vadd.s32 %v3160_v47, %v3158_v61 }
 0xa87   :  { %9440 = vst [vmem:[#allocation61_spill] sm:$0xff] %v7932_v25  ;;  %vm3179_vm15 = vcmp.eq.s32.totalorder %v7910_v6, %v7932_v25 }
 0xa88   :  { %v5574_v22 = vsel %vm3179_vm15, 1.0, %v9437_v43  ;;  %vm9450_vm15 = vnez %v9066_v2 }
 0xa89   :  { %5578 = vmatmul.msk.f32.gmra.mxu0 %vm9441_vm12, %v5574_v22  ;;  %vm9451_vm12 = vnez %v9064_v1  ;;  %v9454_v1 = vld [vmem:[#allocation28_spill] sm:$0xff] }
 0xa8a   :  { %v3172_v51 = vpop.xlane.xlu1 %3171 }
 0xa8b   :  { %v3173_v8 = vcvt.f32.s32 %v3172_v51 }
 0xa8d   :  { %v7938_v63 = vadd.s32 %v3175_v52, %v3173_v8  ;;  %v9458_v52 = vld [vmem:[#allocation15_spill] sm:$0xff]  ;;  %v9460_v8 = vld [vmem:[#allocation14_spill] sm:$0xff] }
 0xa8f   :  { %9442 = vst [vmem:[#allocation62_spill] sm:$0xff] %v7938_v63  ;;  %vm3180_vm1 = vcmp.eq.s32.totalorder %v7910_v6, %v7938_v63 }
 0xa90   :  { %v5575_v4 = vsel %vm3180_vm1, 1.0, %v9437_v43  ;;  %v5782_v43 = vld [vmem:[#allocation3 + $0x154] sm:$0xff]  ;;  %vm9452_vm1 = vmpackc.low %vm9450_vm15, %vm9451_vm12  ;;  %vm9469_vm12 = vnez %v9468_v41 }
 0xa91   :  { %5579 = vmatmul.msk.f32.gmra.mxu0 %vm9443_vm14, %v5575_v4  ;;  %3751 = vmatpush.bf16.msra.mxu3 %v5782_v43  ;;  %vm9453_vm14 = vnez %v9116_v7 }
 0xaf6   :  { %v7944_v48 = vpop.f32.mrf.mxu0 }
 0xaf7   :  { %5580 = vmatmul.msk.f32.vlgmr.msra.gmra.mxu1 %vm9444_vm4, %v7944_v48  ;;  %vm9455_vm4 = vnez %v9454_v1 }
 0xafe   :  { %v7948_v44 = vpop.f32.mrf.mxu0 }
 0xaff   :  { %5581 = vmatmul.msk.f32.gmra.mxu1 %vm9445_vm8, %v7948_v44  ;;  %vm9456_vm8 = vmpackc.low %vm9453_vm14, %vm9455_vm4 }
 0xb06   :  { %v7952_v31 = vpop.f32.mrf.mxu0 }
 0xb07   :  { %5582 = vmatmul.msk.f32.gmra.mxu1 %vm9446_vm0, %v7952_v31  ;;  %vm9457_vm0 = vmmov %vm9448_vm10 }
 0xb08   :  { %vm9465_vm15 = vmmov %vm9457_vm0 }
 0xb0e   :  { %v7956_v19 = vpop.f32.mrf.mxu0 }
 0xb0f   :  { %5583 = vmatmul.msk.f32.gmra.mxu1 %vm9447_vm7, %v7956_v19  ;;  %vm9459_vm7 = vnez %v9458_v52 }
 0xb74   :  { %v3291_v5 = vpop.f32.mrf.mxu1 }
 0xb75   :  { %v3292_v33 = vadd.f32 %v5834_v57, %v3291_v5  ;;  %v9466_v5 = vld [vmem:[#allocation30_spill] sm:$0xff] }
 0xb77   :  { %3304 = vst.msk [vmem:[#allocation2 + $0x8] sm:$0xff] %vm9448_vm10, %v3292_v33  ;;  %vm9461_vm10 = vnez %v9460_v8  ;;  %v9467_v33 = vunpack.c.l.b16 %v9466_v5 }
 0xb7c   :  { %v3294_v46 = vpop.f32.mrf.mxu1 }
 0xb7d   :  { %v3295_v58 = vadd.f32 %v5834_v57, %v3294_v46 }
 0xb7e   :  { %v3309_v32 = vld [vmem:[#allocation2 + $0x8] sm:$0xff] }
 0xb7f   :  { %3305 = vst.msk [vmem:[#allocation2 + $0x10] sm:$0xff] %vm9449_vm11, %v3295_v58  ;;  %v7962_v38 = vpack.c.bf16 %v3309_v32, %v3309_v32  ;;  %vm9462_vm11 = vmpackc.low %vm9459_vm7, %vm9461_vm10  ;;  %v9470_v32 = vld [vmem:[#allocation17_spill] sm:$0xff] }
 0xb80   :  { %vm9478_vm7 = vmmov %vm9465_vm15 }
 0xb81   :  { %v3321_v21 = vsel %vm9452_vm1, %v7962_v38, 0  ;;  %v3558_v54 = vsel %vm9229_vm13, %v7962_v38, 0  ;;  %v3470_v2 = vsel %vm9456_vm8, %v7962_v38, 0  ;;  %v3330_v4 = vsel %vm9462_vm11, %v7962_v38, 0  ;;  %vm9483_vm10 = vmpackc.low %vm6523_vm9, %vm6508_vm2 }
 0xb82   :  { %v3399_v34 = vunpack.c.l.b16 %v3321_v21  ;;  %v3570_v53 = vunpack.c.l.b16 %v3558_v54  ;;  %v3484_v7 = vunpack.c.l.b16 %v3470_v2  ;;  %v3344_v11 = vunpack.c.l.b16 %v3330_v4  ;;  %v9473_v21 = vld [vmem:[#allocation23_spill] sm:$0xff] }
 0xb83   :  { %vm9471_vm1 = vnez %v9470_v32  ;;  %vm9474_vm4 = vnez %v9473_v21 }
 0xb84   :  { %v3297_v35 = vpop.f32.mrf.mxu1  ;;  %v3403_v40 = vpack.c.b16 %v3399_v34, %v9464_v9  ;;  %v3488_v46 = vpack.c.b16 %v3484_v7, %v9467_v33  ;;  %vm9472_vm14 = vmpackc.low %vm9469_vm12, %vm9471_vm1  ;;  %v5783_v34 = vld [vmem:[#allocation3 + $0x15c] sm:$0xff]  ;;  %v9485_v9 = vld [vmem:[#allocation24_spill] sm:$0xff]  ;;  %vm9491_vm1 = vnez %v9490_v17 }
 0xb85   :  { %v3298_v47 = vadd.f32 %v5834_v57, %v3297_v35  ;;  %v5781_v35 = vld [vmem:[#allocation3 + $0x14c] sm:$0xff]  ;;  %3841 = vmatpush.bf16.msra.mxu0 %v5783_v34  ;;  %vm9486_vm11 = vnez %v9485_v9 }
 0xb86   :  { %v3310_v24 = vld [vmem:[#allocation2 + $0x10] sm:$0xff]  ;;  %v3407_v20 = vshrl.u32 %v3403_v40, 16  ;;  %v3410_v26 = vshll.u32 %v3403_v40, 16  ;;  %v3492_v4 = vshrl.u32 %v3488_v46, 16  ;;  %3752 = vmatpush.bf16.msra.mxu3 %v5781_v35  ;;  %v9488_v7 = vld [vmem:[#allocation27_spill] sm:$0xff] }
 0xb87   :  { %v7970_v36 = vpack.c.bf16 %v3310_v24, %v3310_v24  ;;  %3306 = vst.msk [vmem:[#allocation2 + $0x18] sm:$0xff] %vm9457_vm0, %v3298_v47  ;;  %v9475_v24 = vld [vmem:[#allocation22_spill] sm:$0xff]  ;;  %v9479_v47 = vld [vmem:[#allocation11_spill] sm:$0xff]  ;;  %vm9489_vm12 = vnez %v9488_v7 }
 0xb88   :  { %vm9476_vm8 = vnez %v9475_v24  ;;  %v3409_v52 = vrot.slane %v3407_v20, 2  ;;  %v3412_v8 = vrot.slane %v3410_v26, 3  ;;  %vm9492_vm2 = vmpackc.low %vm9489_vm12, %vm9491_vm1  ;;  %v9493_v20 = vld [vmem:[#allocation40_spill] sm:$0xff]  ;;  %v9495_v26 = vld [vmem:[#allocation37_spill] sm:$0xff]  ;;  %vm9510_vm1 = vnez %v9225_v59 }
 0xb89   :  { %v3559_v61 = vsel %vm9229_vm13, %v7970_v36, 0  ;;  %v3331_v43 = vsel %vm9472_vm14, %v7970_v36, 0  ;;  %vm9477_vm0 = vmpackc.low %vm9474_vm4, %vm9476_vm8  ;;  %vm9494_vm9 = vnez %v9493_v20  ;;  %vm9496_vm14 = vnez %v9495_v26  ;;  %v9506_v20 = vld [vmem:[#allocation35_spill] sm:$0xff] }
 0xb8a   :  { %v3571_v22 = vunpack.c.l.b16 %v3559_v61  ;;  %v3322_v54 = vsel %vm9477_vm0, %v7970_v36, 0  ;;  %v9480_v61 = vunpack.c.l.b16 %v9479_v47  ;;  %vm9497_vm4 = vmpackc.low %vm9494_vm9, %vm9496_vm14  ;;  %v3413_v34 = vor.u32 %v3412_v8, %v3409_v52 }
 0xb8b   :  { %v3494_v47 = vrot.slane %v3492_v4, 3  ;;  %vm9499_vm8 = vmmov %vm9478_vm7  ;;  %vm9500_vm0 = vnez %v9147_v45  ;;  %v9501_v4 = vld [vmem:[#allocation34_spill] sm:$0xff]  ;;  %vm9512_vm9 = vsmask.f32 5376 }
 0xb8c   :  { %v3574_v51 = vpack.c.b16 %v3571_v22, %v3570_v53  ;;  %v3300_v50 = vpop.f32.mrf.mxu1  ;;  %v3348_v1 = vpack.c.b16 %v3344_v11, %v9480_v61  ;;  %v3471_v22 = vsel %vm9483_vm10, %v7970_v36, 0  ;;  %vm9513_vm14 = vmmov %vm9499_vm8 }
 0xb8d   :  { %v3301_v58 = vadd.f32 %v5834_v57, %v3300_v50  ;;  %v3400_v50 = vunpack.c.l.b16 %v3322_v54  ;;  %v3485_v41 = vunpack.c.l.b16 %v3471_v22 }
 0xb8e   :  { %5622 = vmatmul.msk.bf16.vlgmr.msrb.gmra.mxu1 %vm9465_vm15, %v3574_v51  ;;  %v3311_v56 = vld [vmem:[#allocation2 + $0x18] sm:$0xff]  ;;  %v3345_v51 = vunpack.c.l.b16 %v3331_v43  ;;  %vm9487_vm15 = vmpackc.low %vm9161_vm3, %vm9486_vm11  ;;  %v3495_v43 = vshll.u32 %v3488_v46, 16  ;;  %v3351_v35 = vrot.slane %v3348_v1, 3  ;;  %vm9498_vm3 = vcmask 1044480  }
 0xb8f   :  { %3307 = vst.msk [vmem:[#allocation2 + $0x20] sm:$0xff] %vm9478_vm7, %v3301_v58  ;;  %v8009_v57 = vpack.c.bf16 %v3311_v56, %v3311_v56  ;;  %vm9502_vm7 = vnez %v9501_v4  ;;  %v9529_v4 = vld [vmem:[#allocation39_spill] sm:$0xff] }
 0xb90   :  { %v3497_v9 = vrot.slane %v3495_v43, 4  ;;  %vm9503_vm10 = vmpackc.low %vm9500_vm0, %vm9502_vm7  ;;  %vm9517_vm0 = vnez %v9207_v18  ;;  %vm9518_vm7 = vnez %v9205_v60  ;;  %v9526_v18 = vld [vmem:[#allocation44_spill] sm:$0xff] }
 0xb91   :  { %v3332_v40 = vsel %vm9487_vm15, %v8009_v57, 0  ;;  %v3323_v11 = vsel %vm9492_vm2, %v8009_v57, 0  ;;  %v3472_v5 = vsel %vm9497_vm4, %v8009_v57, 0  ;;  %v3560_v22 = vsel %vm9229_vm13, %v8009_v57, 0 }
 0xb92   :  { %v3346_v33 = vunpack.c.l.b16 %v3332_v40  ;;  %v3401_v58 = vunpack.c.l.b16 %v3323_v11  ;;  %v3486_v32 = vunpack.c.l.b16 %v3472_v5  ;;  %vm9507_vm15 = vnez %v9506_v20  ;;  %v9536_v20 = vld [vmem:[#allocation42_spill] sm:$0xff] }
 0xb93   :  { %v3498_v16 = vor.u32 %v3497_v9, %v3494_v47  ;;  %vm9514_vm4 = vsmask.f32 4352 }
 0xb94   :  { %v3349_v56 = vpack.c.b16 %v3346_v33, %v3345_v51  ;;  %v3404_v21 = vpack.c.b16 %v3401_v58, %v3400_v50  ;;  %v3489_v24 = vpack.c.b16 %v3486_v32, %v3485_v41  ;;  %v9504_v50 = vld [vmem:[#allocation36_spill] sm:$0xff]  ;;  %v3572_v33 = vunpack.c.l.b16 %v3560_v22 }
 0xb95   :  { %vm9505_vm11 = vnez %v9504_v50  ;;  %v9534_v50 = vld [vmem:[#allocation43_spill] sm:$0xff] }
 0xb96   :  { %v3352_v61 = vrot.slane %v3349_v56, 3  ;;  %v3415_v54 = vshrl.u32 %v3404_v21, 16  ;;  %v3418_v2 = vshll.u32 %v3404_v21, 16  ;;  %v3500_v53 = vshrl.u32 %v3489_v24, 16  ;;  %v3312_v55 = vld [vmem:[#allocation2 + $0x20] sm:$0xff]  ;;  %vm9508_vm12 = vmpackc.low %vm9505_vm11, %vm9507_vm15 }
 0xb97   :  { %v3503_v7 = vshll.u32 %v3489_v24, 16  ;;  %v8037_v17 = vpack.c.bf16 %v3312_v55, %v3312_v55  ;;  %vm9520_vm11 = vnez %v9202_v12 }
 0xb98   :  { %v3353_v46 = vsel %vm9498_vm3, %v3351_v35, %v3352_v61  ;;  %v3417_v51 = vrot.slane %v3415_v54, 2  ;;  %v3420_v40 = vrot.slane %v3418_v2, 3  ;;  %v3502_v1 = vrot.slane %v3500_v53, 3  ;;  %vm9515_vm3 = vmmov %vm9499_vm8 }
 0xb99   :  { %5592 = vmatmul.msk.bf16.vlgmr.msra.gmra.mxu2 %vm9499_vm8, %v3353_v46  ;;  %v3505_v52 = vrot.slane %v3503_v7, 4  ;;  %v3561_v8 = vsel %vm9229_vm13, %v8037_v17, 0  ;;  %v3333_v11 = vsel %vm9503_vm10, %v8037_v17, 0  ;;  %v3324_v26 = vsel %vm9508_vm12, %v8037_v17, 0  ;;  %vm9516_vm8 = vmmov %vm9515_vm3  ;;  %v9521_v46 = vld [vmem:[#allocation41_spill] sm:$0xff] }
 0xb9a   :  { %v3421_v5 = vor.u32 %v3420_v40, %v3417_v51  ;;  %v3573_v58 = vunpack.c.l.b16 %v3561_v8  ;;  %v3402_v41 = vunpack.c.l.b16 %v3324_v26  ;;  %vm9509_vm13 = vnez %v9227_v29  ;;  %vm9519_vm10 = vmpackc.low %vm9517_vm0, %vm9518_vm7 }
 0xb9b   :  { %v3506_v32 = vor.u32 %v3505_v52, %v3502_v1  ;;  %vm9511_vm2 = vmpackc.low %vm9509_vm13, %vm9510_vm1  ;;  %v3347_v21 = vunpack.c.l.b16 %v3333_v11  ;;  %vm9522_vm15 = vnez %v9521_v46  ;;  %v9524_v52 = vld [vmem:[#allocation45_spill] sm:$0xff]  ;;  %vm9527_vm1 = vnez %v9526_v18  ;;  %v9531_v11 = vld [vmem:[#allocation38_spill] sm:$0xff] }
 0xb9c   :  { %v3473_v45 = vsel %vm9511_vm2, %v8037_v17, 0  ;;  %v3422_v43 = vsel %vm9512_vm9, %v3413_v34, %v3421_v5  ;;  %v3575_v56 = vpack.c.b16 %v3573_v58, %v3572_v33  ;;  %v3405_v24 = vpack.c.b16 %v3402_v41, %v3402_v41  ;;  %vm9523_vm12 = vmpackc.low %vm9520_vm11, %vm9522_vm15  ;;  %v9539_v58 = vld [vmem:[#allocation21_spill] sm:$0xff]  ;;  %v9541_v41 = vld [vmem:[#allocation20_spill] sm:$0xff] }
 0xb9d   :  { %5602 = vmatmul.msk.bf16.vlgmr.msrb.gmra.mxu3 %vm9513_vm14, %v3422_v43  ;;  %v3507_v35 = vsel %vm9514_vm4, %v3498_v16, %v3506_v32  ;;  %v3487_v54 = vunpack.c.l.b16 %v3473_v45  ;;  %v3350_v29 = vpack.c.b16 %v3347_v21, %v3347_v21  ;;  %v3618_v34 = vsel %vm9519_vm10, %v7970_v36, 0  ;;  %v9545_v21 = vld [vmem:[#allocation33_spill] sm:$0xff] }
 0xb9e   :  { %5612 = vmatmul.msk.bf16.vlgmr.msrb.gmra.mxu0 %vm9515_vm3, %v3507_v35  ;;  %5623 = vmatmul.msk.bf16.gmra.mxu1 %vm9516_vm8, %v3575_v56  ;;  %v3424_v2 = vshrl.u32 %v3405_v24, 16  ;;  %v3427_v59 = vshll.u32 %v3405_v24, 16  ;;  %v3617_v51 = vsel %vm9523_vm12, %v7962_v38, 0  ;;  %vm9525_vm13 = vnez %v9524_v52  ;;  %v9547_v24 = vld [vmem:[#allocation29_spill] sm:$0xff] }
 0xb9f   :  { %v3490_v47 = vpack.c.b16 %v3487_v54, %v3487_v54  ;;  %v3354_v9 = vrot.slane %v3350_v29, 3  ;;  %vm9528_vm2 = vmpackc.low %vm9525_vm13, %vm9527_vm1  ;;  %v3632_v8 = vunpack.c.l.b16 %v3618_v34  ;;  %vm9530_vm9 = vnez %v9529_v4  ;;  %v9570_v4 = vld [vmem:[#allocation50_spill] sm:$0xff] }
 0xba0   :  { %v3426_v7 = vrot.slane %v3424_v2, 2  ;;  %v3429_v22 = vrot.slane %v3427_v59, 3  ;;  %v3620_v60 = vsel %vm9528_vm2, %v8037_v17, 0  ;;  %vm9532_vm14 = vnez %v9531_v11  ;;  %v9551_v59 = vld [vmem:[#allocation19_spill] sm:$0xff] }
 0xba1   :  { %v3509_v53 = vshrl.u32 %v3490_v47, 16  ;;  %v3512_v55 = vshll.u32 %v3490_v47, 16  ;;  %vm9533_vm4 = vmpackc.low %vm9530_vm9, %vm9532_vm14  ;;  %vm9535_vm3 = vnez %v9534_v50  ;;  %vm9537_vm8 = vnez %v9536_v20 }
 0xba2   :  { %v3771_v12 = vsel %vm9533_vm4, %v8037_v17, 0  ;;  %vm9538_vm0 = vmpackc.low %vm9535_vm3, %vm9537_vm8  ;;  %v3631_v33 = vunpack.c.l.b16 %v3617_v51  ;;  %vm9540_vm7 = vnez %v9539_v58  ;;  %vm9542_vm10 = vnez %v9541_v41  ;;  %v9560_v51 = vld [vmem:[#allocation52_spill] sm:$0xff] }
 0xba3   :  { %v3511_v40 = vrot.slane %v3509_v53, 3  ;;  %v3514_v1 = vrot.slane %v3512_v55, 4  ;;  %v3619_v26 = vsel %vm9538_vm0, %v8009_v57, 0  ;;  %vm9543_vm11 = vmpackc.low %vm9540_vm7, %vm9542_vm10  ;;  %vm9544_vm15 = vcmask 1044480   ;;  %v9553_v53 = vld [vmem:[#allocation16_spill] sm:$0xff] }
 0xba4   :  { %v3769_v16 = vsel %vm9543_vm11, %v7970_v36, 0  ;;  %v3355_v45 = vsel %vm9544_vm15, %v3352_v61, %v3354_v9  ;;  %v3430_v43 = vor.u32 %v3429_v22, %v3426_v7  ;;  %v3634_v56 = vunpack.c.l.b16 %v3620_v60 }
 0xba5   :  { %vm9546_vm12 = vnez %v9545_v21  ;;  %vm9548_vm13 = vnez %v9547_v24  ;;  %vm9550_vm2 = vcmask 261120   ;;  %v3515_v54 = vor.u32 %v3514_v1, %v3511_v40 }
 0xba6   :  { %vm9549_vm1 = vmpackc.low %vm9546_vm12, %vm9548_vm13  ;;  %v3785_v47 = vunpack.c.l.b16 %v3771_v12  ;;  %v3633_v29 = vunpack.c.l.b16 %v3619_v26  ;;  %v3636_v2 = vpack.c.b16 %v3632_v8, %v3631_v33  ;;  %vm9552_vm9 = vnez %v9551_v59  ;;  %v8142_v12 = vld [vmem:[#allocation2 + $0x28] sm:$0xff]  ;;  %v9573_v26 = vld [vmem:[#allocation55_spill] sm:$0xff] }
 0xba7   :  { %v3770_v35 = vsel %vm9549_vm1, %v8009_v57, 0  ;;  %vm9554_vm14 = vnez %v9553_v53  ;;  %v3783_v55 = vunpack.c.l.b16 %v3769_v16  ;;  %vm9556_vm3 = vsmask.f32 5376  ;;  %vm9557_vm8 = vmmov %vm9550_vm2  ;;  %v9575_v33 = vld [vmem:[#allocation54_spill] sm:$0xff]  ;;  %v9578_v53 = vld [vmem:[#allocation47_spill] sm:$0xff] }
 0xba8   :  { %vm9555_vm4 = vmpackc.low %vm9552_vm9, %vm9554_vm14  ;;  %v3784_v34 = vunpack.c.l.b16 %v3770_v35  ;;  %v3431_v9 = vsel %vm9556_vm3, %v3421_v5, %v3430_v43  ;;  %v3637_v7 = vpack.c.b16 %v3634_v56, %v3633_v29  ;;  %vm9558_vm0 = vsmask.f32 4352  ;;  %v9565_v5 = vld [vmem:[#allocation48_spill] sm:$0xff] }
 0xba9   :  { %5593 = vmatmul.msk.bf16.gmra.mxu2 %vm9550_vm2, %v3355_v45  ;;  %v3768_v61 = vsel %vm9555_vm4, %v7962_v38, 0  ;;  %v3516_v22 = vsel %vm9558_vm0, %v3506_v32, %v3515_v54  ;;  %vm9561_vm7 = vnez %v9560_v51  ;;  %vm9563_vm11 = vmmov %vm9550_vm2  ;;  %v3642_v18 = vshll.u32 %v3636_v2, 16  ;;  %v9568_v32 = vld [vmem:[#allocation51_spill] sm:$0xff] }
 0xbaa   :  { %vm9562_vm10 = vmpackc.low %vm6988_vm5, %vm9561_vm7  ;;  %v3782_v1 = vunpack.c.l.b16 %v3768_v61  ;;  %v3788_v52 = vpack.c.b16 %v3785_v47, %v3784_v34  ;;  %vm9566_vm15 = vnez %v9565_v5  ;;  %vm9569_vm13 = vnez %v9568_v32  ;;  %v9580_v34 = vld [vmem:[#allocation46_spill] sm:$0xff] }
 0xbab   :  { %v3703_v40 = vsel %vm9562_vm10, %v8037_v17, 0  ;;  %vm9567_vm12 = vmpackc.low %vm6967_vm6, %vm9566_vm15  ;;  %vm9571_vm1 = vnez %v9570_v4  ;;  %v3647_v50 = vshll.u32 %v3637_v7, 16  ;;  %vm9574_vm5 = vnez %v9573_v26  ;;  %v9586_v4 = vld [vmem:[#allocation57_spill] sm:$0xff] }
 0xbac   :  { %v3701_v8 = vsel %vm9567_vm12, %v7970_v36, 0  ;;  %vm9572_vm2 = vmpackc.low %vm9569_vm13, %vm9571_vm1  ;;  %v3787_v17 = vpack.c.b16 %v3783_v55, %v3782_v1  ;;  %v3717_v20 = vunpack.c.l.b16 %v3703_v40  ;;  %vm9576_vm9 = vnez %v9575_v33 }
 0xbad   :  { %5603 = vmatmul.msk.bf16.gmra.mxu3 %vm9557_vm8, %v3431_v9  ;;  %v3702_v11 = vsel %vm9572_vm2, %v8009_v57, 0  ;;  %vm9577_vm14 = vmpackc.low %vm9574_vm5, %vm9576_vm9  ;;  %v3799_v36 = vshrl.u32 %v3788_v52, 16  ;;  %v3802_v41 = vshll.u32 %v3788_v52, 16  ;;  %v3644_v16 = vrot.slane %v3642_v18, 1 }
 0xbae   :  { %5613 = vmatmul.msk.bf16.gmra.mxu0 %vm9563_vm11, %v3516_v22  ;;  %v3700_v58 = vsel %vm9577_vm14, %v7962_v38, 0  ;;  %v3715_v45 = vunpack.c.l.b16 %v3701_v8  ;;  %v3716_v43 = vunpack.c.l.b16 %v3702_v11  ;;  %v3319_v57 = vpack.c.bf16 %v8142_v12, %v8142_v12  ;;  %vm9584_vm7 = vmmov %vm9557_vm8  ;;  %v9588_v11 = vld [vmem:[#allocation56_spill] sm:$0xff] }
 0xbaf   :  { %v3791_v56 = vshrl.u32 %v3787_v17, 16  ;;  %v3794_v21 = vshll.u32 %v3787_v17, 16  ;;  %v3640_v24 = vshrl.u32 %v3636_v2, 16  ;;  %v3649_v35 = vrot.slane %v3647_v50, 1  ;;  %vm9591_vm13 = vmmov %vm9584_vm7 }
 0xbb0   :  { %v3714_v54 = vunpack.c.l.b16 %v3700_v58  ;;  %v3720_v47 = vpack.c.b16 %v3717_v20, %v3716_v43  ;;  %v3801_v29 = vrot.slane %v3799_v36, 1  ;;  %v3804_v59 = vrot.slane %v3802_v41, 2  ;;  %vm9593_vm2 = vmmov %vm9584_vm7 }
 0xbb1   :  { %vm9579_vm6 = vnez %v9578_v53  ;;  %v3645_v38 = vor.u32 %v3644_v16, %v3640_v24  ;;  %vm9581_vm4 = vnez %v9580_v34  ;;  %v3793_v22 = vrot.slane %v3791_v56, 1  ;;  %vm9595_vm9 = vmmov %vm9593_vm2 }
 0xbb2   :  { %v3621_v61 = vsel %vm9579_vm6, %v3319_v57, 0  ;;  %v3719_v55 = vpack.c.b16 %v3715_v45, %v3714_v54  ;;  %v3772_v9 = vsel %vm9581_vm4, %v3319_v57, 0  ;;  %v3796_v46 = vrot.slane %v3794_v21, 2  ;;  %vm9597_vm6 = vmmov %vm9593_vm2 }
 0xbb3   :  { %vm9582_vm3 = vsmask.f32 7424  ;;  %v3723_v40 = vrot.slane %v3720_v47, 1  ;;  %v3635_v1 = vunpack.c.l.b16 %v3621_v61  ;;  %v3805_v2 = vor.u32 %v3804_v59, %v3801_v29  ;;  %vm9598_vm4 = vmmov %vm9593_vm2 }
 0xbb4   :  { %v3650_v51 = vsel %vm9582_vm3, %v3645_v38, %v3649_v35  ;;  %v3786_v52 = vunpack.c.l.b16 %v3772_v9  ;;  %v3722_v18 = vrot.slane %v3719_v55, 1  ;;  %v3797_v60 = vor.u32 %v3796_v46, %v3793_v22  ;;  %vm9592_vm1 = vmmov %vm9582_vm3 }
 0xbb5   :  { %vm9583_vm0 = vcmask 1046528   ;;  %v3638_v8 = vpack.c.b16 %v3635_v1, %v3635_v1  ;;  %vm9585_vm10 = vsmask.f32 6400  ;;  %vm9587_vm11 = vnez %v9586_v4  ;;  %vm9599_vm3 = vmmov %vm9593_vm2 }
 0xbb6   :  { %v3724_v5 = vsel %vm9583_vm0, %v3722_v18, %v3723_v40  ;;  %v3806_v32 = vsel %vm9585_vm10, %v3797_v60, %v3805_v2  ;;  %vm9589_vm15 = vnez %v9588_v11  ;;  %v3789_v50 = vpack.c.b16 %v3786_v52, %v3786_v52  ;;  %vm9594_vm5 = vmmov %vm9583_vm0 }
 0xbb7   :  { %vm9590_vm12 = vmpackc.low %vm9587_vm11, %vm9589_vm15  ;;  %v3655_v20 = vshll.u32 %v3638_v8, 16  ;;  %v3651_v36 = vshrl.u32 %v3637_v7, 16 }
 0xbb8   :  { %v3704_v17 = vsel %vm9590_vm12, %v3319_v57, 0  ;;  %v3808_v33 = vshrl.u32 %v3789_v50, 16  ;;  %v3811_v58 = vshll.u32 %v3789_v50, 16  ;;  %vm9596_vm14 = vmmov %vm9585_vm10 }
 0xbb9   :  { %5632 = vmatmul.msk.bf16.vlgmr.msrb.gmra.mxu2 %vm9557_vm8, %v3650_v51  ;;  %v3718_v26 = vunpack.c.l.b16 %v3704_v17  ;;  %v3653_v41 = vor.u32 %v3651_v36, %v3649_v35  ;;  %v3657_v16 = vrot.slane %v3655_v20, 1  ;;  %v5835_v17 = vld [vmem:[#allocation5 + $0x21] ss:$0 sm:$0xff]  ;;  %vm9600_vm8 = vmmov %vm9593_vm2 }
 0xbba   :  { %v3810_v43 = vrot.slane %v3808_v33, 1  ;;  %v3813_v56 = vrot.slane %v3811_v58, 2  ;;  %vm9601_vm0 = vmmov %vm9593_vm2 }
 0xbbb   :  { %v3721_v45 = vpack.c.b16 %v3718_v26, %v3718_v26  ;;  %v3658_v21 = vsel %vm9592_vm1, %v3653_v41, %v3657_v16  ;;  %vm9603_vm10 = vmmov %vm9601_vm0 }
 0xbbc   :  { %v3814_v54 = vor.u32 %v3813_v56, %v3810_v43  ;;  %vm9604_vm11 = vmmov %vm9601_vm0 }
 0xbbd   :  { %5642 = vmatmul.msk.bf16.vlgmr.msra.gmra.mxu3 %vm9584_vm7, %v3724_v5  ;;  %v3725_v24 = vrot.slane %v3721_v45, 1  ;;  %vm9602_vm7 = vmmov %vm9601_vm0 }
 0xbbe   :  { %5652 = vmatmul.msk.bf16.vlgmr.msra.gmra.mxu0 %vm9591_vm13, %v3806_v32  ;;  %v3815_v47 = vsel %vm9596_vm14, %v3805_v2, %v3814_v54  ;;  %vm9605_vm15 = vmmov %vm9601_vm0 }
 0xbbf   :  { %v3726_v57 = vsel %vm9594_vm5, %v3723_v40, %v3725_v24  ;;  %vm9606_vm5 = vmmov %vm9601_vm0 }
 0xbc9   :  { %5633 = vmatmul.msk.bf16.gmra.mxu2 %vm9593_vm2, %v3658_v21 }
 0xbcd   :  { %5643 = vmatmul.msk.bf16.gmra.mxu3 %vm9595_vm9, %v3726_v57 }
 0xbce   :  { %5653 = vmatmul.msk.bf16.gmra.mxu0 %vm9597_vm6, %v3815_v47 }
 0xc0b   :  { %v3603_v51 = vpop.f32.mrf.mxu1 }
 0xc13   :  { %v3605_v8 = vpop.f32.mrf.mxu1 }
 0xc1b   :  { %v3544_v7 = vpop.f32.mrf.mxu0  ;;  %v3608_v54 = vpop.f32.mrf.mxu1 }
 0xc1c   :  { %v3383_v35 = vpop.f32.mrf.mxu2 }
 0xc20   :  { %v3459_v29 = vpop.f32.mrf.mxu3 }
 0xc21   :  { %v3460_v46 = vadd.f32 %v3459_v29, %v3383_v35 }
 0xc23   :  { %v3546_v59 = vpop.f32.mrf.mxu0  ;;  %v3554_v1 = vadd.f32 %v3544_v7, %v3460_v46 }
 0xc24   :  { %v3385_v53 = vpop.f32.mrf.mxu2 }
 0xc25   :  { %v3613_v60 = vadd.f32 %v3603_v51, %v3554_v1 }
 0xc28   :  { %v3461_v61 = vpop.f32.mrf.mxu3 }
 0xc29   :  { %v3462_v2 = vadd.f32 %v3461_v61, %v3385_v53 }
 0xc2b   :  { %v3549_v38 = vpop.f32.mrf.mxu0  ;;  %v3555_v4 = vadd.f32 %v3546_v59, %v3462_v2 }
 0xc2c   :  { %v3388_v55 = vpop.f32.mrf.mxu2 }
 0xc2d   :  { %v3614_v58 = vadd.f32 %v3605_v8, %v3555_v4 }
 0xc30   :  { %v3464_v34 = vpop.f32.mrf.mxu3 }
 0xc31   :  { %v3465_v26 = vadd.f32 %v3464_v34, %v3388_v55 }
 0xc33   :  { %v3551_v9 = vpop.f32.mrf.mxu0  ;;  %v3556_v56 = vadd.f32 %v3549_v38, %v3465_v26 }
 0xc34   :  { %v3390_v22 = vpop.f32.mrf.mxu2 }
 0xc35   :  { %v3615_v29 = vadd.f32 %v3608_v54, %v3556_v56 }
 0xc38   :  { %v3466_v40 = vpop.f32.mrf.mxu3 }
 0xc39   :  { %v3467_v7 = vadd.f32 %v3466_v40, %v3390_v22  ;;  %v3610_v22 = vpop.f32.mrf.mxu1 }
 0xc3b   :  { %v3843_v52 = vpop.f32.mrf.mxu0  ;;  %v3557_v34 = vadd.f32 %v3551_v9, %v3467_v7 }
 0xc3c   :  { %v3686_v18 = vpop.f32.mrf.mxu2 }
 0xc3d   :  { %v3696_v5 = vadd.f32 %v3686_v18, %v3613_v60  ;;  %v3616_v18 = vadd.f32 %v3610_v22, %v3557_v34 }
 0xc40   :  { %v3754_v32 = vpop.f32.mrf.mxu3 }
 0xc41   :  { %v3764_v11 = vadd.f32 %v3754_v32, %v3696_v5 }
 0xc43   :  { %v3853_v50 = vadd.f32 %v3843_v52, %v3764_v11  ;;  %v3845_v36 = vpop.f32.mrf.mxu0 }
 0xc44   :  { %v3688_v20 = vpop.f32.mrf.mxu2 }
 0xc45   :  { %v8173_v33 = vadd.f32 %v5835_v17, %v3853_v50  ;;  %v3697_v41 = vadd.f32 %v3688_v20, %v3614_v58 }
 0xc47   :  { %v3865_v16 = vsel %vm9598_vm4, %v8173_v33, 0.0  ;;  %v3881_v45 = vmul.f32 %v8173_v33, %v8173_v33 }
 0xc48   :  { %3866 = vadd.xlane.f32.xlu2 %v3865_v16  ;;  %v3756_v43 = vpop.f32.mrf.mxu3 }
 0xc49   :  { %v3765_v21 = vadd.f32 %v3756_v43, %v3697_v41  ;;  %v3885_v24 = vsel %vm9599_vm3, %v3881_v45, 0.0 }
 0xc4a   :  { %3886 = vadd.xlane.f32.xlu1 %v3885_v24 }
 0xc4b   :  { %v3854_v57 = vadd.f32 %v3845_v36, %v3765_v21  ;;  %v3848_v55 = vpop.f32.mrf.mxu0 }
 0xc4c   :  { %v3691_v47 = vpop.f32.mrf.mxu2 }
 0xc4d   :  { %v8180_v35 = vadd.f32 %v5835_v17, %v3854_v57  ;;  %v3698_v59 = vadd.f32 %v3691_v47, %v3615_v29 }
 0xc4f   :  { %v3868_v53 = vsel %vm9600_vm8, %v8180_v35, 0.0  ;;  %v3882_v61 = vmul.f32 %v8180_v35, %v8180_v35  ;;  %vm9607_vm8 = vmmov %vm9601_vm0 }
 0xc50   :  { %3869 = vadd.xlane.f32.xlu0 %v3868_v53  ;;  %v3759_v38 = vpop.f32.mrf.mxu3 }
 0xc51   :  { %v3766_v46 = vadd.f32 %v3759_v38, %v3698_v59  ;;  %v3888_v51 = vsel %vm9601_vm0, %v3882_v61, 0.0  ;;  %vm9608_vm0 = vcmask 1042432  }
 0xc52   :  { %3889 = vadd.xlane.f32.xlu2 %v3888_v51 }
 0xc53   :  { %v3855_v1 = vadd.f32 %v3848_v55, %v3766_v46  ;;  %v3850_v4 = vpop.f32.mrf.mxu0 }
 0xc54   :  { %v3693_v40 = vpop.f32.mrf.mxu2 }
 0xc55   :  { %v8187_v52 = vadd.f32 %v5835_v17, %v3855_v1  ;;  %v3699_v2 = vadd.f32 %v3693_v40, %v3616_v18 }
 0xc57   :  { %v3871_v60 = vsel %vm9602_vm7, %v8187_v52, 0.0  ;;  %v3883_v5 = vmul.f32 %v8187_v52, %v8187_v52  ;;  %vm9609_vm7 = vcmask 1041408  }
 0xc58   :  { %v3761_v8 = vpop.f32.mrf.mxu3  ;;  %3872 = vadd.xlane.f32.xlu0 %v3871_v60 }
 0xc59   :  { %v3767_v9 = vadd.f32 %v3761_v8, %v3699_v2  ;;  %v3891_v32 = vsel %vm9603_vm10, %v3883_v5, 0.0  ;;  %vm9610_vm10 = vcmp.ge.s32.totalorder %v6080_v13, 0 }
 0xc5a   :  { %3892 = vadd.xlane.f32.xlu1 %v3891_v32 }
 0xc5b   :  { %v3856_v11 = vadd.f32 %v3850_v4, %v3767_v9 }
 0xc5d   :  { %v8194_v50 = vadd.f32 %v5835_v17, %v3856_v11 }
 0xc5f   :  { %v3874_v20 = vsel %vm9604_vm11, %v8194_v50, 0.0  ;;  %v3884_v26 = vmul.f32 %v8194_v50, %v8194_v50  ;;  %vm9611_vm11 = vcmp.ge.s32.totalorder %v6086_v14, 0 }
 0xc60   :  { %3875 = vadd.xlane.f32.xlu2 %v3874_v20 }
 0xc61   :  { %v3894_v58 = vsel %vm9605_vm15, %v3884_v26, 0.0  ;;  %v8208_v26 = vld [vmem:[#allocation5 + $0x22] ss:$0 sm:$0xff]  ;;  %vm9612_vm15 = vcmask 1040384  }
 0xc62   :  { %3895 = vadd.xlane.f32.xlu0 %v3894_v58 }
 0xcbb   :  { %v3867_v36 = vpop.xlane.xlu2 %3866 }
 0xcbc   :  { %v3877_v41 = vmul.f32 0.03125, %v3867_v36 }
 0xcbd   :  { %v3887_v16 = vpop.xlane.xlu1 %3886 }
 0xcbe   :  { %v3901_v45 = vmul.f32 %v3877_v41, %v3877_v41  ;;  %v3897_v43 = vmul.f32 0.03125, %v3887_v16  ;;  %v3913_v20 = vsub.f32 %v8173_v33, %v3877_v41 }
 0xcc0   :  { %v3905_v56 = vsub.f32 %v3897_v43, %v3901_v45  ;;  %v8212_v43 = vld [vmem:[#allocation5 + $0x23] ss:$0 sm:$0xff] }
 0xcc2   :  { %v3909_v21 = vmax.f32 %v3905_v56, 0.0 }
 0xcc3   :  { %v3870_v24 = vpop.xlane.xlu0 %3869 }
 0xcc4   :  { %v3917_v17 = vadd.f32 1e-06, %v3909_v21  ;;  %v3878_v54 = vmul.f32 0.03125, %v3870_v24 }
 0xcc5   :  { %v3890_v57 = vpop.xlane.xlu2 %3889 }
 0xcc6   :  { %5926 = vrsqrt.f32 %v3917_v17  ;;  %v3902_v47 = vmul.f32 %v3878_v54, %v3878_v54  ;;  %v3898_v7 = vmul.f32 0.03125, %v3890_v57  ;;  %vm3927_vm13 = vweird.f32 %v3917_v17 }
 0xcc8   :  { %v3906_v29 = vsub.f32 %v3898_v7, %v3902_v47 }
 0xcca   :  { %v3910_v59 = vmax.f32 %v3906_v29, 0.0 }
 0xccb   :  { %v3873_v53 = vpop.xlane.xlu0 %3872 }
 0xccc   :  { %v5927_v61 = vpop.eup %5926  ;;  %v8201_v55 = vmul.f32 0.03125, %v3873_v53  ;;  %v3918_v34 = vadd.f32 1e-06, %v3910_v59 }
 0xccd   :  { %v3922_v38 = vmul.f32 %v5927_v61, %v3917_v17  ;;  %v3893_v46 = vpop.xlane.xlu1 %3892  ;;  %vm3928_vm12 = vweird.f32 %v5927_v61 }
 0xcce   :  { %v3903_v51 = vmul.f32 %v8201_v55, %v8201_v55  ;;  %v3899_v1 = vmul.f32 0.03125, %v3893_v46  ;;  %5928 = vrsqrt.f32 %v3918_v34  ;;  %vm3929_vm1 = vmor %vm3927_vm13, %vm3928_vm12  ;;  %vm3937_vm9 = vweird.f32 %v3918_v34 }
 0xccf   :  { %v3923_v22 = vmul.f32 %v5927_v61, %v3922_v38  ;;  %vm9613_vm13 = vcmp.ge.s32.totalorder %v6130_v37, 0 }
 0xcd0   :  { %v3907_v40 = vsub.f32 %v3899_v1, %v3903_v51 }
 0xcd1   :  { %v3924_v18 = vmul.f32 0.5, %v3923_v22  ;;  %v8224_v22 = vld [vmem:[#allocation2] sm:$0xff] }
 0xcd2   :  { %v3911_v2 = vmax.f32 %v3907_v40, 0.0 }
 0xcd3   :  { %v3925_v60 = vsub.f32 1.5, %v3924_v18  ;;  %v3876_v5 = vpop.xlane.xlu2 %3875 }
 0xcd4   :  { %v3919_v8 = vadd.f32 1e-06, %v3911_v2  ;;  %v8205_v9 = vmul.f32 0.03125, %v3876_v5  ;;  %v5929_v32 = vpop.eup %5928  ;;  %v3915_v2 = vsub.f32 %v8187_v52, %v8201_v55 }
 0xcd5   :  { %v3926_v4 = vmul.f32 %v5927_v61, %v3925_v60  ;;  %v3896_v11 = vpop.xlane.xlu0 %3895  ;;  %v3932_v58 = vmul.f32 %v5929_v32, %v3918_v34  ;;  %vm3938_vm2 = vweird.f32 %v5929_v32  ;;  %v3985_v34 = vld [vmem:[#allocation5 + $0x24] sm:$0x7f] }
 0xcd6   :  { %5930 = vrsqrt.f32 %v3919_v8  ;;  %v3904_v16 = vmul.f32 %v8205_v9, %v8205_v9  ;;  %v3900_v45 = vmul.f32 0.03125, %v3896_v11  ;;  %vm3939_vm14 = vmor %vm3937_vm9, %vm3938_vm2  ;;  %vm3947_vm4 = vweird.f32 %v3919_v8 }
 0xcd7   :  { %v3930_v36 = vsel %vm3929_vm1, %v5927_v61, %v3926_v4  ;;  %v3933_v21 = vmul.f32 %v5929_v32, %v3932_v58  ;;  %v3914_v61 = vsub.f32 %v8180_v35, %v3878_v54  ;;  %v9029_v35 = vrot.slane %v8224_v22, 5  ;;  %vm9614_vm2 = vmmov %vm9606_vm5 }
 0xcd8   :  { %v3961_v56 = vmul.f32 %v3930_v36, %v3913_v20  ;;  %v3908_v24 = vsub.f32 %v3900_v45, %v3904_v16  ;;  %v9028_v54 = vrot.slane %v8224_v22, 6  ;;  %v8236_v11 = vperm.slane %v3985_v34, 0 }
 0xcd9   :  { %v3934_v57 = vmul.f32 0.5, %v3933_v21  ;;  %v9027_v20 = vrot.slane %v8224_v22, 7  ;;  %v8242_v58 = vperm.slane %v3985_v34, 1  ;;  %v3916_v16 = vsub.f32 %v8194_v50, %v8205_v9 }
 0xcda   :  { %v3966_v17 = vmul.f32 %v8208_v26, %v3961_v56  ;;  %v3912_v47 = vmax.f32 %v3908_v24, 0.0  ;;  %v8249_v56 = vperm.slane %v3985_v34, 2  ;;  %vm9615_vm9 = vcmask 1046528  }
 0xcdb   :  { %v3935_v7 = vsub.f32 1.5, %v3934_v57 }
 0xcdc   :  { %v5931_v33 = vpop.eup %5930  ;;  %v8216_v41 = vadd.f32 %v8212_v43, %v3966_v17  ;;  %v8218_v59 = vadd.f32 1e-06, %v3912_v47 }
 0xcdd   :  { %v3942_v29 = vmul.f32 %v5931_v33, %v3919_v8  ;;  %v3936_v53 = vmul.f32 %v5929_v32, %v3935_v7  ;;  %vm3948_vm6 = vweird.f32 %v5931_v33 }
 0xcde   :  { %3975 = vst.msk [vmem:[#allocation2 + $0x8] sm:$0xff] %vm9606_vm5, %v8216_v41  ;;  %5932 = vrsqrt.f32 %v8218_v59  ;;  %vm3949_vm3 = vmor %vm3947_vm4, %vm3948_vm6  ;;  %vm3957_vm1 = vweird.f32 %v8218_v59  ;;  %vm9617_vm6 = vcmask 1044480  }
 0xcdf   :  { %v3943_v38 = vmul.f32 %v5931_v33, %v3942_v29  ;;  %v3940_v46 = vsel %vm3939_vm14, %v5929_v32, %v3936_v53  ;;  %vm9616_vm14 = vcmask 1045504   ;;  %vm9618_vm4 = vmmov %vm9608_vm0 }
 0xce0   :  { %v3962_v51 = vmul.f32 %v3940_v46, %v3914_v61  ;;  %v8271_v46 = vperm.slane %v3985_v34, 4 }
 0xce1   :  { %v3944_v1 = vmul.f32 0.5, %v3943_v38 }
 0xce2   :  { %v3967_v40 = vmul.f32 %v8208_v26, %v3962_v51  ;;  %v8273_v51 = vperm.slane %v3985_v34, 5 }
 0xce3   :  { %v3945_v18 = vsub.f32 1.5, %v3944_v1 }
 0xce4   :  { %v5933_v60 = vpop.eup %5932  ;;  %v8232_v5 = vadd.f32 %v8212_v43, %v3967_v40 }
 0xce5   :  { %v3946_v32 = vmul.f32 %v5931_v33, %v3945_v18  ;;  %v8234_v4 = vld [vmem:[#allocation2 + $0x8] sm:$0xff]  ;;  %v3952_v52 = vmul.f32 %v5933_v60, %v8218_v59  ;;  %vm3958_vm12 = vweird.f32 %v5933_v60 }
 0xce6   :  { %v3992_v55 = vrot.slane %v8234_v4, 5  ;;  %v4014_v8 = vrot.slane %v8234_v4, 6  ;;  %3976 = vst.msk [vmem:[#allocation2 + $0x10] sm:$0xff] %vm9607_vm8, %v8232_v5  ;;  %v4040_v45 = vrot.slane %v8234_v4, 7  ;;  %vm3959_vm5 = vmor %vm3957_vm1, %vm3958_vm12  ;;  %vm9628_vm1 = vcmp.lt.s32.totalorder %v6118_v30, 16 }
 0xce7   :  { %v3950_v36 = vsel %vm3949_vm3, %v5931_v33, %v3946_v32  ;;  %v3953_v24 = vmul.f32 %v5933_v60, %v3952_v52  ;;  %v8264_v33 = vperm.slane %v3985_v34, 3  ;;  %v4079_v52 = vrot.slane %v8234_v4, 1  ;;  %vm9619_vm3 = vmmov %vm9609_vm7 }
 0xce8   :  { %v3963_v21 = vmul.f32 %v3950_v36, %v3915_v2  ;;  %v3993_v17 = vsel %vm9608_vm0, %v9029_v35, %v3992_v55  ;;  %v4015_v57 = vsel %vm9609_vm7, %v9028_v54, %v4014_v8  ;;  %v4041_v9 = vsel %vm9612_vm15, %v9027_v20, %v4040_v45  ;;  %vm9620_vm8 = vmmov %vm9612_vm15 }
 0xce9   :  { %v4004_v47 = vsel %vm9610_vm10, %v3993_v17, 0.0  ;;  %v4026_v50 = vsel %vm9611_vm11, %v4015_v57, 0.0  ;;  %v3954_v29 = vmul.f32 0.5, %v3953_v24  ;;  %v4052_v38 = vsel %vm9613_vm13, %v4041_v9, 0.0  ;;  %vm9621_vm0 = vmmov %vm9614_vm2 }
 0xcea   :  { %v3968_v7 = vmul.f32 %v8208_v26, %v3963_v21  ;;  %v4009_v53 = vmul.f32 %v8236_v11, %v4004_v47  ;;  %v4031_v61 = vmul.f32 %v8242_v58, %v4026_v50  ;;  %v4057_v2 = vmul.f32 %v8249_v56, %v4052_v38  ;;  %vm9622_vm7 = vmmov %vm9615_vm9 }
 0xceb   :  { %v3955_v40 = vsub.f32 1.5, %v3954_v29  ;;  %v4070_v32 = vmul.f32 %v8264_v33, %v8234_v4  ;;  %v8283_v36 = vperm.slane %v3985_v34, 6  ;;  %v4105_v57 = vrot.slane %v8234_v4, 2  ;;  %vm9623_vm10 = vmmov %vm9616_vm14 }
 0xcec   :  { %v8276_v1 = vadd.f32 %v8212_v43, %v3968_v7  ;;  %v4035_v18 = vadd.f32 %v4031_v61, %v4009_v53  ;;  %v4131_v47 = vrot.slane %v8234_v4, 3  ;;  %vm9624_vm11 = vcmp.lt.s32.totalorder %v6536_v23, 16  ;;  %vm9626_vm12 = vmmov %vm9617_vm6 }
 0xced   :  { %v3956_v21 = vmul.f32 %v5933_v60, %v3955_v40  ;;  %v3981_v24 = vld [vmem:[#allocation2 + $0x10] sm:$0xff]  ;;  %vm9625_vm15 = vcmp.lt.s32.totalorder %v6921_v0, 16  ;;  %vm9627_vm13 = vmmov %vm9618_vm4 }
 0xcee   :  { %3977 = vst.msk [vmem:[#allocation2 + $0x18] sm:$0xff] %vm9614_vm2, %v8276_v1  ;;  %v4061_v17 = vadd.f32 %v4057_v2, %v4035_v18  ;;  %v4080_v59 = vrot.slane %v3981_v24, 1  ;;  %v4106_v50 = vrot.slane %v3981_v24, 2  ;;  %v4132_v9 = vrot.slane %v3981_v24, 3 }
 0xcef   :  { %v3994_v7 = vrot.slane %v3981_v24, 5  ;;  %v3960_v29 = vsel %vm3959_vm5, %v5933_v60, %v3956_v21  ;;  %v4016_v34 = vrot.slane %v3981_v24, 6  ;;  %v4042_v61 = vrot.slane %v3981_v24, 7  ;;  %vm9631_vm5 = vmmov %vm9619_vm3 }
 0xcf0   :  { %v4074_v53 = vadd.f32 %v4070_v32, %v4061_v17  ;;  %v3964_v38 = vmul.f32 %v3960_v29, %v3916_v16  ;;  %v4081_v20 = vsel %vm9615_vm9, %v4079_v52, %v4080_v59  ;;  %v4107_v40 = vsel %vm9616_vm14, %v4105_v57, %v4106_v50  ;;  %vm9632_vm9 = vmmov %vm9620_vm8 }
 0xcf1   :  { %v4133_v18 = vsel %vm9617_vm6, %v4131_v47, %v4132_v9  ;;  %v4097_v2 = vmul.f32 %v8271_v46, %v4081_v20  ;;  %v3995_v4 = vsel %vm9618_vm4, %v3992_v55, %v3994_v7  ;;  %v4017_v60 = vsel %vm9619_vm3, %v4014_v8, %v4016_v34  ;;  %vm9633_vm14 = vmmov %vm9621_vm0 }
 0xcf2   :  { %v3969_v54 = vmul.f32 %v8208_v26, %v3964_v38  ;;  %v4010_v35 = vmul.f32 %v8236_v11, %v3995_v4  ;;  %v4043_v32 = vsel %vm9620_vm8, %v4040_v45, %v4042_v61  ;;  %v4123_v16 = vmul.f32 %v8273_v51, %v4107_v40  ;;  %v8310_v45 = vld [vmem:[#allocation5 + $0x2b] ss:$0 sm:$0xff]  ;;  %vm9638_vm3 = vmmov %vm9621_vm0 }
 0xcf3   :  { %v4101_v21 = vadd.f32 %v4097_v2, %v4074_v53  ;;  %v4149_v52 = vmul.f32 %v8283_v36, %v4133_v18  ;;  %v4032_v17 = vmul.f32 %v8242_v58, %v4017_v60  ;;  %v4058_v26 = vmul.f32 %v8249_v56, %v4043_v32  ;;  %vm9639_vm8 = vmmov %vm9622_vm7 }
 0xcf4   :  { %v8303_v57 = vadd.f32 %v8212_v43, %v3969_v54  ;;  %v4071_v55 = vmul.f32 %v8264_v33, %v3981_v24 }
 0xcf5   :  { %v8305_v20 = vld [vmem:[#allocation2 + $0x18] sm:$0xff]  ;;  %v4127_v47 = vadd.f32 %v4123_v16, %v4101_v21  ;;  %v4036_v29 = vadd.f32 %v4032_v17, %v4010_v35 }
 0xcf6   :  { %v4082_v53 = vrot.slane %v8305_v20, 1  ;;  %v4108_v38 = vrot.slane %v8305_v20, 2  ;;  %3978 = vst.msk [vmem:[#allocation2 + $0x20] sm:$0xff] %vm9621_vm0, %v8303_v57  ;;  %v4134_v43 = vrot.slane %v8305_v20, 3  ;;  %v3996_v54 = vrot.slane %v8305_v20, 5  ;;  %vm9640_vm0 = vmmov %vm9627_vm13 }
 0xcf7   :  { %v4018_v40 = vrot.slane %v8305_v20, 6  ;;  %v4044_v24 = vrot.slane %v8305_v20, 7  ;;  %v4153_v18 = vadd.f32 %v4149_v52, %v4127_v47  ;;  %v4062_v2 = vadd.f32 %v4058_v26, %v4036_v29  ;;  %v9629_v26 = vld [vmem:[#allocation9_spill] sm:$0xff] }
 0xcf8   :  { %v4083_v4 = vsel %vm9622_vm7, %v4080_v59, %v4082_v53  ;;  %v4109_v35 = vsel %vm9623_vm10, %v4106_v50, %v4108_v38  ;;  %v4135_v21 = vsel %vm9626_vm12, %v4132_v9, %v4134_v43  ;;  %v3997_v16 = vsel %vm9627_vm13, %v3994_v7, %v3996_v54  ;;  %vm9641_vm7 = vmmov %vm9623_vm10 }
 0xcf9   :  { %v4093_v60 = vsel %vm9624_vm11, %v4083_v4, 0.0  ;;  %v4119_v32 = vsel %vm9625_vm15, %v4109_v35, 0.0  ;;  %v8329_v17 = vadd.f32 %v8310_v45, %v4153_v18  ;;  %v4075_v8 = vadd.f32 %v4071_v55, %v4062_v2  ;;  %vm9642_vm10 = vmmov %vm9626_vm12 }
 0xcfa   :  { %v4098_v52 = vmul.f32 %v8271_v46, %v4093_v60  ;;  %v4112_v59 = vrot.slane %v8142_v12, 2  ;;  %v4145_v50 = vsel %vm9628_vm1, %v4135_v21, 0.0  ;;  %vm9630_vm2 = vcmp.ge.s32.totalorder %v9629_v26, 0  ;;  %v9634_v60 = vld [vmem:[#allocation10_spill] sm:$0xff]  ;;  %vm9643_vm11 = vmmov %vm9631_vm5 }
 0xcfb   :  { %v4006_v47 = vsel %vm9630_vm2, %v3997_v16, 0.0  ;;  %v4019_v29 = vsel %vm9631_vm5, %v4016_v34, %v4018_v40  ;;  %v4045_v9 = vsel %vm9632_vm9, %v4042_v61, %v4044_v24  ;;  %v4165_v7 = vsel %vm9633_vm14, %v8329_v17, 0.0  ;;  %v9636_v34 = vld [vmem:[#allocation13_spill] sm:$0xff]  ;;  %vm9644_vm15 = vmmov %vm9632_vm9 }
 0xcfc   :  { %v4181_v55 = vmul.f32 %v8329_v17, %v8329_v17  ;;  %v4102_v18 = vadd.f32 %v4098_v52, %v4075_v8  ;;  %v4124_v2 = vmul.f32 %v8273_v51, %v4119_v32  ;;  %4166 = vadd.xlane.f32.xlu1 %v4165_v7  ;;  %v4150_v4 = vmul.f32 %v8283_v36, %v4145_v50  ;;  %vm9645_vm12 = vmmov %vm9638_vm3 }
 0xcfd   :  { %v4011_v35 = vmul.f32 %v8236_v11, %v4006_v47  ;;  %vm9635_vm6 = vcmp.ge.s32.totalorder %v9634_v60, 0  ;;  %vm9637_vm4 = vcmp.ge.s32.totalorder %v9636_v34, 0  ;;  %v3983_v25 = vld [vmem:[#allocation2 + $0x20] sm:$0xff]  ;;  %vm9647_vm13 = vmmov %vm9639_vm8  ;;  %vm9650_vm5 = vcmp.lt.s32.totalorder %v6548_v39, 16 }
 0xcfe   :  { %v4028_v21 = vsel %vm9635_vm6, %v4019_v29, 0.0  ;;  %v4054_v61 = vsel %vm9637_vm4, %v4045_v9, 0.0  ;;  %v4185_v16 = vsel %vm9638_vm3, %v4181_v55, 0.0  ;;  %v4128_v63 = vadd.f32 %v4124_v2, %v4102_v18  ;;  %vm9648_vm1 = vmmov %vm9638_vm3 }
 0xcff   :  { %v4033_v3 = vmul.f32 %v8242_v58, %v4028_v21  ;;  %v4059_v8 = vmul.f32 %v8249_v56, %v4054_v61  ;;  %4186 = vadd.xlane.f32.xlu0 %v4185_v16  ;;  %v4084_v32 = vrot.slane %v3983_v25, 1  ;;  %v4110_v52 = vrot.slane %v3983_v25, 2  ;;  %vm9649_vm2 = vmmov %vm9641_vm7 }
 0xd00   :  { %v4136_v50 = vrot.slane %v3983_v25, 3  ;;  %v3998_v7 = vrot.slane %v3983_v25, 5  ;;  %v4154_v47 = vadd.f32 %v4150_v4, %v4128_v63  ;;  %v4020_v27 = vrot.slane %v3983_v25, 6  ;;  %vm9651_vm9 = vmmov %vm9642_vm10 }
 0xd01   :  { %v4037_v6 = vadd.f32 %v4033_v3, %v4011_v35  ;;  %v4046_v29 = vrot.slane %v3983_v25, 7  ;;  %v4072_v9 = vmul.f32 %v8264_v33, %v8305_v20  ;;  %v4085_v55 = vsel %vm9639_vm8, %v4082_v53, %v4084_v32  ;;  %vm9654_vm4 = vmmov %vm9648_vm1 }
 0xd02   :  { %v3999_v18 = vsel %vm9640_vm0, %v3996_v54, %v3998_v7  ;;  %v4138_v2 = vrot.slane %v8142_v12, 3  ;;  %v8359_v21 = vadd.f32 %v8310_v45, %v4154_v47  ;;  %v4099_v16 = vmul.f32 %v8271_v46, %v4085_v55  ;;  %vm9655_vm3 = vmmov %vm9648_vm1 }
 0xd03   :  { %v4063_v61 = vadd.f32 %v4059_v8, %v4037_v6  ;;  %v4111_v63 = vsel %vm9641_vm7, %v4108_v38, %v4110_v52  ;;  %v4137_v3 = vsel %vm9642_vm10, %v4134_v43, %v4136_v50  ;;  %v4012_v4 = vmul.f32 %v8236_v11, %v3999_v18  ;;  %vm9656_vm8 = vmmov %vm9648_vm1 }
 0xd04   :  { %v4021_v20 = vsel %vm9643_vm11, %v4018_v40, %v4020_v27  ;;  %v4047_v53 = vsel %vm9644_vm15, %v4044_v24, %v4046_v29  ;;  %v4168_v54 = vsel %vm9645_vm12, %v8359_v21, 0.0  ;;  %v4182_v35 = vmul.f32 %v8359_v21, %v8359_v21  ;;  %vm9657_vm0 = vmmov %vm9648_vm1 }
 0xd05   :  { %v4076_v7 = vadd.f32 %v4072_v9, %v4063_v61  ;;  %v4034_v6 = vmul.f32 %v8242_v58, %v4021_v20  ;;  %4169 = vadd.xlane.f32.xlu2 %v4168_v54  ;;  %v4125_v38 = vmul.f32 %v8273_v51, %v4111_v63  ;;  %v4060_v43 = vmul.f32 %v8249_v56, %v4047_v53 }
 0xd06   :  { %v9646_v11 = vrot.slane %v8142_v12, 1  ;;  %v4188_v40 = vsel %vm9648_vm1, %v4182_v35, 0.0  ;;  %v4113_v47 = vsel %vm9649_vm2, %v4110_v52, %v4112_v59  ;;  %v4151_v29 = vmul.f32 %v8283_v36, %v4137_v3 }
 0xd07   :  { %v4103_v24 = vadd.f32 %v4099_v16, %v4076_v7  ;;  %v4038_v8 = vadd.f32 %v4034_v6, %v4012_v4  ;;  %4189 = vadd.xlane.f32.xlu1 %v4188_v40  ;;  %v4073_v56 = vmul.f32 %v8264_v33, %v3983_v25  ;;  %v4139_v12 = vsel %vm9651_vm9, %v4136_v50, %v4138_v2  ;;  %vm9658_vm9 = vmmov %vm9657_vm0 }
 0xd08   :  { %v4087_v27 = vsel %vm9647_vm13, %v4084_v32, %v9646_v11  ;;  %vm9652_vm14 = vcmp.lt.s32.totalorder %v6924_v28, 16  ;;  %vm9653_vm6 = vcmp.lt.s32.totalorder %v6211_v15, 16 }
 0xd09   :  { %v4095_v58 = vsel %vm9650_vm5, %v4087_v27, 0.0  ;;  %v4129_v9 = vadd.f32 %v4125_v38, %v4103_v24  ;;  %v4064_v55 = vadd.f32 %v4060_v43, %v4038_v8  ;;  %v4121_v32 = vsel %vm9652_vm14, %v4113_v47, 0.0 }
 0xd0a   :  { %v4100_v16 = vmul.f32 %v8271_v46, %v4095_v58  ;;  %v4147_v59 = vsel %vm9653_vm6, %v4139_v12, 0.0  ;;  %v4126_v3 = vmul.f32 %v8273_v51, %v4121_v32 }
 0xd0b   :  { %v4155_v18 = vadd.f32 %v4151_v29, %v4129_v9  ;;  %v4077_v61 = vadd.f32 %v4073_v56, %v4064_v55  ;;  %v4152_v2 = vmul.f32 %v8283_v36, %v4147_v59 }
 0xd0d   :  { %v8390_v52 = vadd.f32 %v8310_v45, %v4155_v18  ;;  %v4104_v63 = vadd.f32 %v4100_v16, %v4077_v61 }
 0xd0f   :  { %v4171_v25 = vsel %vm9654_vm4, %v8390_v52, 0.0  ;;  %v4183_v33 = vmul.f32 %v8390_v52, %v8390_v52  ;;  %v4130_v50 = vadd.f32 %v4126_v3, %v4104_v63 }
 0xd10   :  { %4172 = vadd.xlane.f32.xlu2 %v4171_v25  ;;  %v5785_v25 = vld [vmem:[#allocation3 + $0x16c] sm:$0xff] }
 0xd11   :  { %v4191_v46 = vsel %vm9655_vm3, %v4183_v33, 0.0  ;;  %v4156_v4 = vadd.f32 %v4152_v2, %v4130_v50  ;;  %vm9659_vm3 = vmmov %vm9657_vm0 }
 0xd12   :  { %4192 = vadd.xlane.f32.xlu1 %v4191_v46 }
 0xd13   :  { %v8400_v20 = vadd.f32 %v8310_v45, %v4156_v4  ;;  %v5786_v45 = vld [vmem:[#allocation3 + $0x174] sm:$0xff] }
 0xd14   :  { %4307 = vmatpush.bf16.msra.mxu1 %v5786_v45 }
 0xd15   :  { %v4174_v51 = vsel %vm9656_vm8, %v8400_v20, 0.0  ;;  %v4184_v53 = vmul.f32 %v8400_v20, %v8400_v20 }
 0xd16   :  { %4175 = vadd.xlane.f32.xlu0 %v4174_v51 }
 0xd17   :  { %v4194_v54 = vsel %vm9657_vm0, %v4184_v53, 0.0 }
 0xd18   :  { %4195 = vadd.xlane.f32.xlu2 %v4194_v54  ;;  %4308 = vmatpush.bf16.msra.mxu1 %v5785_v25  ;;  %v5840_v25 = vld [vmem:[#allocation5 + $0x2d] ss:$0 sm:$0xff] }
 0xd6f   :  { %v4167_v35 = vpop.xlane.xlu1 %4166 }
 0xd70   :  { %v4177_v36 = vmul.f32 0.03125, %v4167_v35 }
 0xd72   :  { %v4187_v7 = vpop.xlane.xlu0 %4186  ;;  %v4201_v6 = vmul.f32 %v4177_v36, %v4177_v36 }
 0xd73   :  { %v4197_v38 = vmul.f32 0.03125, %v4187_v7 }
 0xd75   :  { %v4205_v43 = vsub.f32 %v4197_v38, %v4201_v6 }
 0xd77   :  { %v4209_v11 = vmax.f32 %v4205_v43, 0.0 }
 0xd78   :  { %v4170_v27 = vpop.xlane.xlu2 %4169 }
 0xd79   :  { %v4217_v40 = vadd.f32 1e-06, %v4209_v11  ;;  %v4178_v24 = vmul.f32 0.03125, %v4170_v27 }
 0xd7a   :  { %v4190_v8 = vpop.xlane.xlu1 %4189 }
 0xd7b   :  { %5934 = vrsqrt.f32 %v4217_v40  ;;  %v4202_v47 = vmul.f32 %v4178_v24, %v4178_v24  ;;  %v4198_v29 = vmul.f32 0.03125, %v4190_v8  ;;  %vm4227_vm10 = vweird.f32 %v4217_v40 }
 0xd7c   :  { %v4213_v8 = vsub.f32 %v8329_v17, %v4177_v36 }
 0xd7d   :  { %v4206_v58 = vsub.f32 %v4198_v29, %v4202_v47 }
 0xd7f   :  { %v4210_v9 = vmax.f32 %v4206_v58, 0.0  ;;  %v5839_v58 = vld [vmem:[#allocation5 + $0x2c] ss:$0 sm:$0xff] }
 0xd81   :  { %v5935_v55 = vpop.eup %5934  ;;  %v4218_v12 = vadd.f32 1e-06, %v4210_v9 }
 0xd82   :  { %v4222_v56 = vmul.f32 %v5935_v55, %v4217_v40  ;;  %vm4228_vm7 = vweird.f32 %v5935_v55 }
 0xd83   :  { %v4173_v32 = vpop.xlane.xlu2 %4172  ;;  %5936 = vrsqrt.f32 %v4218_v12  ;;  %vm4229_vm11 = vmor %vm4227_vm10, %vm4228_vm7  ;;  %vm4237_vm12 = vweird.f32 %v4218_v12 }
 0xd84   :  { %v8407_v18 = vmul.f32 0.03125, %v4173_v32  ;;  %v4223_v61 = vmul.f32 %v5935_v55, %v4222_v56 }
 0xd85   :  { %v4193_v16 = vpop.xlane.xlu1 %4192 }
 0xd86   :  { %v4203_v59 = vmul.f32 %v8407_v18, %v8407_v18  ;;  %v4199_v63 = vmul.f32 0.03125, %v4193_v16  ;;  %v4224_v3 = vmul.f32 0.5, %v4223_v61  ;;  %v4214_v16 = vsub.f32 %v8359_v21, %v4178_v24 }
 0xd88   :  { %v4207_v33 = vsub.f32 %v4199_v63, %v4203_v59  ;;  %v4225_v50 = vsub.f32 1.5, %v4224_v3 }
 0xd89   :  { %v4176_v2 = vpop.xlane.xlu0 %4175  ;;  %v5937_v51 = vpop.eup %5936 }
 0xd8a   :  { %v4211_v46 = vmax.f32 %v4207_v33, 0.0  ;;  %v4180_v4 = vmul.f32 0.03125, %v4176_v2  ;;  %v4226_v54 = vmul.f32 %v5935_v55, %v4225_v50  ;;  %v4232_v35 = vmul.f32 %v5937_v51, %v4218_v12 }
 0xd8b   :  { %v4196_v53 = vpop.xlane.xlu2 %4195  ;;  %vm4238_vm15 = vweird.f32 %v5937_v51 }
 0xd8c   :  { %v4219_v7 = vadd.f32 1e-06, %v4211_v46  ;;  %v4204_v6 = vmul.f32 %v4180_v4, %v4180_v4  ;;  %v4200_v38 = vmul.f32 0.03125, %v4196_v53  ;;  %v4233_v43 = vmul.f32 %v5937_v51, %v4232_v35  ;;  %vm4239_vm13 = vmor %vm4237_vm12, %vm4238_vm15 }
 0xd8d   :  { %v4230_v27 = vsel %vm4229_vm11, %v5935_v55, %v4226_v54  ;;  %v4215_v35 = vsub.f32 %v8390_v52, %v8407_v18 }
 0xd8e   :  { %5938 = vrsqrt.f32 %v4219_v7  ;;  %v4208_v11 = vsub.f32 %v4200_v38, %v4204_v6  ;;  %v4234_v45 = vmul.f32 0.5, %v4233_v43  ;;  %v4261_v9 = vmul.f32 %v4230_v27, %v4213_v8 }
 0xd8f   :  { %vm4247_vm2 = vweird.f32 %v4219_v7 }
 0xd90   :  { %v4212_v47 = vmax.f32 %v4208_v11, 0.0  ;;  %v4235_v29 = vsub.f32 1.5, %v4234_v45  ;;  %v4266_v63 = vmul.f32 %v5839_v58, %v4261_v9  ;;  %v4216_v11 = vsub.f32 %v8400_v20, %v4180_v4 }
 0xd92   :  { %v4220_v56 = vadd.f32 1e-06, %v4212_v47  ;;  %v4236_v61 = vmul.f32 %v5937_v51, %v4235_v29  ;;  %v4271_v2 = vadd.f32 %v5840_v25, %v4266_v63 }
 0xd94   :  { %v5939_v32 = vpop.eup %5938  ;;  %5940 = vrsqrt.f32 %v4220_v56  ;;  %v4240_v59 = vsel %vm4239_vm13, %v5937_v51, %v4236_v61  ;;  %vm4257_vm6 = vweird.f32 %v4220_v56 }
 0xd95   :  { %v4242_v40 = vmul.f32 %v5939_v32, %v4219_v7  ;;  %v4262_v55 = vmul.f32 %v4240_v59, %v4214_v16  ;;  %vm4248_vm1 = vweird.f32 %v5939_v32 }
 0xd96   :  { %vm4249_vm5 = vmor %vm4247_vm2, %vm4248_vm1 }
 0xd97   :  { %v4243_v3 = vmul.f32 %v5939_v32, %v4242_v40  ;;  %v4267_v17 = vmul.f32 %v5839_v58, %v4262_v55 }
 0xd99   :  { %v4244_v36 = vmul.f32 0.5, %v4243_v3  ;;  %v4272_v46 = vadd.f32 %v5840_v25, %v4267_v17 }
 0xd9a   :  { %v5941_v33 = vpop.eup %5940 }
 0xd9b   :  { %v4245_v50 = vsub.f32 1.5, %v4244_v36  ;;  %v4252_v53 = vmul.f32 %v5941_v33, %v4220_v56  ;;  %v4275_v12 = vpack.c.bf16 %v4272_v46, %v4271_v2  ;;  %vm4258_vm14 = vweird.f32 %v5941_v33 }
 0xd9c   :  { %vm4259_vm4 = vmor %vm4257_vm6, %vm4258_vm14  ;;  %vm9660_vm14 = vcmask 523264  }
 0xd9d   :  { %v4246_v54 = vmul.f32 %v5939_v32, %v4245_v50  ;;  %v4253_v21 = vmul.f32 %v5941_v33, %v4252_v53  ;;  %5662 = vmatmul.msk.bf16.vlgmr.msra.gmra.mxu1 %vm9658_vm9, %v4275_v12 }
 0xd9f   :  { %v4250_v24 = vsel %vm4249_vm5, %v5939_v32, %v4246_v54  ;;  %v4254_v51 = vmul.f32 0.5, %v4253_v21  ;;  %v5841_v32 = vld [vmem:[#allocation5 + $0x2e] ss:$0 sm:$0xff] }
 0xda0   :  { %v4263_v38 = vmul.f32 %v4250_v24, %v4215_v35 }
 0xda1   :  { %v4255_v6 = vsub.f32 1.5, %v4254_v51 }
 0xda2   :  { %v4268_v7 = vmul.f32 %v5839_v58, %v4263_v38 }
 0xda3   :  { %v4256_v43 = vmul.f32 %v5941_v33, %v4255_v6 }
 0xda4   :  { %v4273_v47 = vadd.f32 %v5840_v25, %v4268_v7 }
 0xda5   :  { %v4260_v27 = vsel %vm4259_vm4, %v5941_v33, %v4256_v43 }
 0xda6   :  { %v4264_v45 = vmul.f32 %v4260_v27, %v4216_v11 }
 0xda8   :  { %v4269_v8 = vmul.f32 %v5839_v58, %v4264_v45 }
 0xdaa   :  { %v4274_v29 = vadd.f32 %v5840_v25, %v4269_v8 }
 0xdac   :  { %v4276_v9 = vpack.c.bf16 %v4274_v29, %v4273_v47 }
 0xdae   :  { %5663 = vmatmul.msk.bf16.gmra.mxu1 %vm9659_vm3, %v4276_v9 }
 0xe1a   :  { %v4310_v61 = vpop.f32.mrf.mxu1 }
 0xe1b   :  { %v8418_v52 = vadd.f32 %v5841_v32, %v4310_v61 }
 0xe1d   :  { %v8421_v18 = vmul.f32 0.70710677, %v8418_v52 }
 0xe1f   :  { %v4328_v20 = vmul.f32 %v8421_v18, %v8421_v18 }
 0xe21   :  { %v8425_v4 = vmin.f32 %v4328_v20, 16.0 }
 0xe22   :  { %v4312_v56 = vpop.f32.mrf.mxu1 }
 0xe23   :  { %v4330_v58 = vmul.f32 2.1237322e-06, %v8425_v4  ;;  %v4341_v16 = vmul.f32 3.8918573e-05, %v8425_v4  ;;  %v8429_v40 = vadd.f32 %v5841_v32, %v4312_v56 }
 0xe25   :  { %v4331_v59 = vadd.f32 0.00028619796, %v4330_v58  ;;  %v4342_v63 = vadd.f32 0.001143296, %v4341_v16  ;;  %v8432_v55 = vmul.f32 0.70710677, %v8429_v40 }
 0xe27   :  { %v4343_v3 = vmul.f32 %v4342_v63, %v8425_v4  ;;  %v4332_v25 = vmul.f32 %v4331_v59, %v8425_v4  ;;  %v4368_v17 = vmul.f32 %v8432_v55, %v8432_v55 }
 0xe29   :  { %v4344_v36 = vadd.f32 0.014752088, %v4343_v3  ;;  %v8438_v33 = vmin.f32 %v4368_v17, 16.0  ;;  %v4333_v53 = vadd.f32 0.0036580483, %v4332_v25 }
 0xe2b   :  { %v4315_v50 = vpop.f32.mrf.mxu1  ;;  %v4345_v2 = vmul.f32 %v4344_v36, %v8425_v4  ;;  %v4370_v54 = vmul.f32 2.1237322e-06, %v8438_v33  ;;  %v4381_v12 = vmul.f32 3.8918573e-05, %v8438_v33  ;;  %v4334_v38 = vmul.f32 %v4333_v53, %v8425_v4 }
 0xe2c   :  { %v8441_v46 = vadd.f32 %v5841_v32, %v4315_v50 }
 0xe2d   :  { %v4346_v21 = vadd.f32 0.112945676, %v4345_v2  ;;  %v4371_v24 = vadd.f32 0.00028619796, %v4370_v54  ;;  %v4382_v51 = vadd.f32 0.001143296, %v4381_v12 }
 0xe2e   :  { %v8446_v35 = vmul.f32 0.70710677, %v8441_v46  ;;  %v4335_v20 = vadd.f32 0.05243302, %v4334_v38 }
 0xe2f   :  { %v4347_v6 = vmul.f32 %v4346_v21, %v8425_v4  ;;  %v4372_v43 = vmul.f32 %v4371_v24, %v8438_v33  ;;  %v4383_v11 = vmul.f32 %v4382_v51, %v8438_v33 }
 0xe30   :  { %v4408_v27 = vmul.f32 %v8446_v35, %v8446_v35  ;;  %v4336_v17 = vmul.f32 %v4335_v20, %v8425_v4 }
 0xe31   :  { %v4348_v45 = vadd.f32 0.4994258, %v4347_v6  ;;  %v4373_v7 = vadd.f32 0.0036580483, %v4372_v43  ;;  %v4384_v8 = vadd.f32 0.014752088, %v4383_v11 }
 0xe32   :  { %v8454_v47 = vmin.f32 %v4408_v27, 16.0  ;;  %v4337_v24 = vadd.f32 0.18741608, %v4336_v17 }
 0xe33   :  { %v4317_v29 = vpop.f32.mrf.mxu1  ;;  %v4349_v9 = vmul.f32 %v4348_v45, %v8425_v4  ;;  %v4374_v56 = vmul.f32 %v4373_v7, %v8438_v33  ;;  %v4385_v58 = vmul.f32 %v4384_v8, %v8438_v33 }
 0xe34   :  { %v8457_v61 = vadd.f32 %v5841_v32, %v4317_v29  ;;  %v4410_v16 = vmul.f32 2.1237322e-06, %v8454_v47  ;;  %v4421_v63 = vmul.f32 3.8918573e-05, %v8454_v47 }
 0xe35   :  { %v4350_v59 = vadd.f32 1.0, %v4349_v9  ;;  %v4386_v25 = vadd.f32 0.112945676, %v4385_v58  ;;  %v4375_v36 = vadd.f32 0.05243302, %v4374_v56 }
 0xe36   :  { %v8464_v3 = vmul.f32 0.70710677, %v8457_v61  ;;  %v4411_v50 = vadd.f32 0.00028619796, %v4410_v16  ;;  %v4422_v2 = vadd.f32 0.001143296, %v4421_v63  ;;  %v4338_v16 = vmul.f32 %v4337_v24, %v8425_v4 }
 0xe37   :  { %5942 = vrcp.f32 %v4350_v59  ;;  %v4387_v32 = vmul.f32 %v4386_v25, %v8438_v33  ;;  %v4376_v51 = vmul.f32 %v4375_v36, %v8438_v33  ;;  %v4362_v63 = vand.u32 2147483648, %v4350_v59  ;;  %v5790_v36 = vld [vmem:[#allocation3 + $0x194] sm:$0xff] }
 0xe38   :  { %v4448_v53 = vmul.f32 %v8464_v3, %v8464_v3  ;;  %v4423_v12 = vmul.f32 %v4422_v2, %v8454_v47  ;;  %v4412_v43 = vmul.f32 %v4411_v50, %v8454_v47  ;;  %4542 = vmatpush.bf16.msra.mxu2 %v5790_v36  ;;  %vm4356_vm0 = vweird.f32 %v4350_v59  ;;  %v5788_v36 = vld [vmem:[#allocation3 + $0x184] sm:$0xff] }
 0xe39   :  { %v4388_v54 = vadd.f32 0.4994258, %v4387_v32  ;;  %v4377_v58 = vadd.f32 0.18741608, %v4376_v51 }
 0xe3a   :  { %v8471_v21 = vmin.f32 %v4448_v53, 16.0  ;;  %v4424_v11 = vadd.f32 0.014752088, %v4423_v12  ;;  %v4413_v25 = vadd.f32 0.0036580483, %v4412_v43 }
 0xe3b   :  { %v4389_v6 = vmul.f32 %v4388_v54, %v8438_v33  ;;  %v4360_v53 = vand.u32 2147483647, %v4350_v59  ;;  %v4378_v4 = vmul.f32 %v4377_v58, %v8438_v33 }
 0xe3c   :  { %v4450_v27 = vmul.f32 2.1237322e-06, %v8471_v21  ;;  %v4461_v45 = vmul.f32 3.8918573e-05, %v8471_v21  ;;  %v4425_v29 = vmul.f32 %v4424_v11, %v8454_v47  ;;  %v4414_v24 = vmul.f32 %v4413_v25, %v8454_v47  ;;  %v5789_v11 = vld [vmem:[#allocation3 + $0x18c] sm:$0xff] }
 0xe3d   :  { %v5943_v38 = vpop.eup %5942  ;;  %v8478_v8 = vadd.f32 1.0, %v4389_v6  ;;  %v4339_v6 = vadd.f32 1.1283791, %v4338_v16  ;;  %vm4361_vm10 = vcmp.eq.f32.partialorder %v4360_v53, 8.507059e+37  ;;  %4543 = vmatpush.bf16.msra.mxu2 %v5789_v11  ;;  %v4379_v58 = vadd.f32 1.1283791, %v4378_v4 }
 0xe3e   :  { %v4352_v7 = vmul.f32 %v5943_v38, %v4350_v59  ;;  %v4451_v9 = vadd.f32 0.00028619796, %v4450_v27  ;;  %v4462_v20 = vadd.f32 0.001143296, %v4461_v45  ;;  %v4426_v17 = vadd.f32 0.112945676, %v4425_v29 }
 0xe3f   :  { %5944 = vrcp.f32 %v8478_v8  ;;  %vm4357_vm8 = vweird.f32 %v5943_v38  ;;  %v4340_v33 = vmul.f32 %v4339_v6, %v8421_v18  ;;  %vm4396_vm15 = vweird.f32 %v8478_v8  ;;  %v5787_v6 = vld [vmem:[#allocation3 + $0x17c] sm:$0xff] }
 0xe40   :  { %v4353_v56 = vsub.f32 1.0, %v4352_v7  ;;  %v4452_v50 = vmul.f32 %v4451_v9, %v8471_v21  ;;  %v4463_v2 = vmul.f32 %v4462_v20, %v8471_v21  ;;  %v4427_v54 = vmul.f32 %v4426_v17, %v8454_v47  ;;  %vm4358_vm7 = vmor %vm4356_vm0, %vm4357_vm8 }
 0xe41   :  { %v4363_v7 = vor.u32 1.1754944e-38, %v4362_v63  ;;  %v4415_v17 = vadd.f32 0.05243302, %v4414_v24  ;;  %4544 = vmatpush.bf16.msra.mxu2 %v5788_v36  ;;  %v4380_v4 = vmul.f32 %v4379_v58, %v8432_v55  ;;  %v4320_v55 = vmul.f32 0.5, %v8418_v52  ;;  %vm9661_vm0 = vmmov %vm9660_vm14 }
 0xe42   :  { %v4354_v32 = vmul.f32 %v5943_v38, %v4353_v56  ;;  %v4464_v51 = vadd.f32 0.014752088, %v4463_v2  ;;  %v4428_v43 = vadd.f32 0.4994258, %v4427_v54  ;;  %v4453_v29 = vadd.f32 0.0036580483, %v4452_v50 }
 0xe43   :  { %v4400_v54 = vand.u32 2147483647, %v8478_v8  ;;  %v4416_v18 = vmul.f32 %v4415_v17, %v8454_v47  ;;  %v4321_v58 = vmul.f32 0.5, %v8429_v40 }
 0xe44   :  { %v4355_v12 = vadd.f32 %v5943_v38, %v4354_v32  ;;  %v4465_v9 = vmul.f32 %v4464_v51, %v8471_v21  ;;  %v4429_v56 = vmul.f32 %v4428_v43, %v8454_v47  ;;  %v4454_v32 = vmul.f32 %v4453_v29, %v8471_v21 }
 0xe45   :  { %v5945_v27 = vpop.eup %5944  ;;  %vm4401_vm13 = vcmp.eq.f32.partialorder %v4400_v54, 8.507059e+37  ;;  %4545 = vmatpush.bf16.msra.mxu2 %v5787_v6 }
 0xe46   :  { %v4359_v45 = vsel %vm4358_vm7, %v5943_v38, %v4355_v12  ;;  %v4392_v20 = vmul.f32 %v5945_v27, %v8478_v8  ;;  %v4466_v16 = vadd.f32 0.112945676, %v4465_v9  ;;  %v4402_v38 = vand.u32 2147483648, %v8478_v8 }
 0xe47   :  { %v4364_v59 = vsel %vm4361_vm10, %v4363_v7, %v4359_v45  ;;  %v4430_v63 = vadd.f32 1.0, %v4429_v56  ;;  %vm4397_vm11 = vweird.f32 %v5945_v27  ;;  %v4455_v43 = vadd.f32 0.05243302, %v4454_v32 }
 0xe48   :  { %v4393_v25 = vsub.f32 1.0, %v4392_v20  ;;  %v4467_v50 = vmul.f32 %v4466_v16, %v8471_v21  ;;  %v4365_v2 = vmul.f32 %v4364_v59, %v4340_v33  ;;  %vm4398_vm12 = vmor %vm4396_vm15, %vm4397_vm11  ;;  %v4403_v24 = vor.u32 1.1754944e-38, %v4402_v38 }
 0xe49   :  { %5946 = vrcp.f32 %v4430_v63  ;;  %v4417_v20 = vadd.f32 0.18741608, %v4416_v18  ;;  %v4456_v56 = vmul.f32 %v4455_v43, %v8471_v21  ;;  %v4440_v38 = vand.u32 2147483647, %v4430_v63 }
 0xe4a   :  { %v4394_v53 = vmul.f32 %v5945_v27, %v4393_v25  ;;  %v4468_v51 = vadd.f32 0.4994258, %v4467_v50  ;;  %v5664_v11 = vclamps-f32 %v4365_v2, 1.0  ;;  %v4442_v32 = vand.u32 2147483648, %v4430_v63 }
 0xe4b   :  { %v4418_v17 = vmul.f32 %v4417_v20, %v8454_v47  ;;  %v4457_v50 = vadd.f32 0.18741608, %v4456_v56  ;;  %vm4436_vm2 = vweird.f32 %v4430_v63  ;;  %vm4441_vm9 = vcmp.eq.f32.partialorder %v4440_v38, 8.507059e+37 }
 0xe4c   :  { %v4395_v12 = vadd.f32 %v5945_v27, %v4394_v53  ;;  %v4469_v7 = vmul.f32 %v4468_v51, %v8471_v21  ;;  %v4488_v16 = vadd.f32 1.0, %v5664_v11  ;;  %v4443_v52 = vor.u32 1.1754944e-38, %v4442_v32 }
 0xe4d   :  { %v4419_v18 = vadd.f32 1.1283791, %v4418_v17  ;;  %v4458_v40 = vmul.f32 %v4457_v50, %v8471_v21  ;;  %v8513_v50 = vld [vmem:[#allocation5 + $0x30] ss:$0 sm:$0xff]  ;;  %vm9662_vm7 = vcmask 261120   ;;  %vm9665_vm11 = vcmask 1042432  }
 0xe4e   :  { %v4399_v45 = vsel %vm4398_vm12, %v5945_v27, %v4395_v12  ;;  %v4470_v59 = vadd.f32 1.0, %v4469_v7  ;;  %v4492_v2 = vmul.f32 %v4488_v16, %v4320_v55  ;;  %vm9663_vm10 = vmmov %vm9662_vm7  ;;  %vm9667_vm15 = vcmask 1041408  }
 0xe4f   :  { %v4404_v29 = vsel %vm4401_vm13, %v4403_v24, %v4399_v45  ;;  %v5947_v8 = vpop.eup %5946  ;;  %v4420_v43 = vmul.f32 %v4419_v18, %v8446_v35  ;;  %v4459_v45 = vadd.f32 1.1283791, %v4458_v40  ;;  %vm9669_vm12 = vcmask 1040384  }
 0xe50   :  { %v4405_v9 = vmul.f32 %v4404_v29, %v4380_v4  ;;  %v4432_v25 = vmul.f32 %v5947_v8, %v4430_v63  ;;  %5948 = vrcp.f32 %v4470_v59  ;;  %vm4437_vm1 = vweird.f32 %v5947_v8 }
 0xe51   :  { %vm4438_vm5 = vmor %vm4436_vm2, %vm4437_vm1  ;;  %v4482_v7 = vand.u32 2147483648, %v4470_v59  ;;  %v4480_v63 = vand.u32 2147483647, %v4470_v59  ;;  %vm4476_vm4 = vweird.f32 %v4470_v59  ;;  %vm9670_vm13 = vcmp.ge.s32.totalorder %v6080_v13, 0 }
 0xe52   :  { %v5665_v33 = vclamps-f32 %v4405_v9, 1.0  ;;  %v4433_v36 = vsub.f32 1.0, %v4432_v25  ;;  %vm9671_vm1 = vcmp.ge.s32.totalorder %v6086_v14, 0  ;;  %vm9672_vm2 = vcmp.ge.s32.totalorder %v6130_v37, 0 }
 0xe53   :  { %v4483_v56 = vor.u32 1.1754944e-38, %v4482_v7  ;;  %vm4481_vm8 = vcmp.eq.f32.partialorder %v4480_v63, 8.507059e+37 }
 0xe54   :  { %v4489_v27 = vadd.f32 1.0, %v5665_v33  ;;  %v4434_v54 = vmul.f32 %v5947_v8, %v4433_v36 }
 0xe56   :  { %v4493_v53 = vmul.f32 %v4489_v27, %v4321_v58  ;;  %v4435_v51 = vadd.f32 %v5947_v8, %v4434_v54  ;;  %v5949_v6 = vpop.eup %5948  ;;  %v4322_v58 = vmul.f32 0.5, %v8441_v46  ;;  %v4323_v27 = vmul.f32 0.5, %v8457_v61 }
 0xe57   :  { %v4472_v47 = vmul.f32 %v5949_v6, %v4470_v59  ;;  %vm4477_vm6 = vweird.f32 %v5949_v6  ;;  %v8511_v59 = vld [vmem:[#allocation5 + $0x2f] ss:$0 sm:$0xff] }
 0xe58   :  { %v4496_v12 = vpack.c.bf16 %v4493_v53, %v4492_v2  ;;  %v4439_v4 = vsel %vm4438_vm5, %v5947_v8, %v4435_v51  ;;  %vm4478_vm3 = vmor %vm4476_vm4, %vm4477_vm6  ;;  %v4460_v8 = vmul.f32 %v4459_v45, %v8464_v3  ;;  %v4577_v51 = vld [vmem:[#allocation5 + $0x31] sm:$0x7f]  ;;  %v9668_v45 = vrot.slane %v8224_v22, 7 }
 0xe59   :  { %v4444_v24 = vsel %vm4441_vm9, %v4443_v52, %v4439_v4  ;;  %v4473_v11 = vsub.f32 1.0, %v4472_v47  ;;  %v8527_v52 = vperm.slane %v4577_v51, 0  ;;  %v8531_v4 = vperm.slane %v4577_v51, 1  ;;  %vm9676_vm6 = vmmov %vm9662_vm7 }
 0xe5a   :  { %5684 = vmatmul.msk.bf16.vlgmr.msra.gmra.mxu2 %vm9660_vm14, %v4496_v12  ;;  %v4445_v29 = vmul.f32 %v4444_v24, %v4420_v43  ;;  %v9664_v24 = vrot.slane %v8224_v22, 5  ;;  %vm9673_vm5 = vcmask 1046528   ;;  %vm9674_vm9 = vcmask 1045504   ;;  %vm9675_vm14 = vmmov %vm9665_vm11 }
 0xe5b   :  { %v4474_v9 = vmul.f32 %v5949_v6, %v4473_v11  ;;  %v9666_v11 = vrot.slane %v8224_v22, 6  ;;  %vm9677_vm4 = vcmask 1044480  }
 0xe5c   :  { %v5666_v21 = vclamps-f32 %v4445_v29, 1.0  ;;  %v8542_v29 = vperm.slane %v4577_v51, 2 }
 0xe5d   :  { %v4475_v20 = vadd.f32 %v5949_v6, %v4474_v9 }
 0xe5e   :  { %v4490_v55 = vadd.f32 1.0, %v5666_v21 }
 0xe5f   :  { %v4479_v16 = vsel %vm4478_vm3, %v5949_v6, %v4475_v20  ;;  %vm9678_vm3 = vmmov %vm9667_vm15 }
 0xe60   :  { %v4484_v33 = vsel %vm4481_vm8, %v4483_v56, %v4479_v16  ;;  %v4494_v36 = vmul.f32 %v4490_v55, %v4322_v58  ;;  %v8550_v56 = vperm.slane %v4577_v51, 3  ;;  %v8554_v16 = vperm.slane %v4577_v51, 4  ;;  %vm9679_vm8 = vmmov %vm9669_vm12 }
 0xe61   :  { %v4485_v25 = vmul.f32 %v4484_v33, %v4460_v8  ;;  %v8558_v55 = vperm.slane %v4577_v51, 5 }
 0xe63   :  { %v5667_v35 = vclamps-f32 %v4485_v25, 1.0 }
 0xe65   :  { %v4491_v17 = vadd.f32 1.0, %v5667_v35 }
 0xe67   :  { %v4495_v38 = vmul.f32 %v4491_v17, %v4323_v27 }
 0xe69   :  { %v4497_v32 = vpack.c.bf16 %v4495_v38, %v4494_v36 }
 0xe6b   :  { %5685 = vmatmul.msk.bf16.gmra.mxu2 %vm9661_vm0, %v4497_v32  ;;  %vm9680_vm0 = vmmov %vm9676_vm6 }
 0xedd   :  { %v4547_v3 = vpop.f32.mrf.mxu2 }
 0xede   :  { %v4548_v2 = vadd.f32 %v8511_v59, %v4547_v3 }
 0xee0   :  { %v4559_v53 = vmul.f32 %v8513_v50, %v4548_v2 }
 0xee2   :  { %v8518_v54 = vadd.f32 %v4559_v53, %v8216_v41 }
 0xee4   :  { %4567 = vst.msk [vmem:[#allocation2 + $0x8] sm:$0xff] %vm9662_vm7, %v8518_v54  ;;  %vm9681_vm7 = vmmov %vm9680_vm0 }
 0xee5   :  { %v4549_v46 = vpop.f32.mrf.mxu2 }
 0xee6   :  { %v4550_v61 = vadd.f32 %v8511_v59, %v4549_v46 }
 0xee8   :  { %v4560_v12 = vmul.f32 %v8513_v50, %v4550_v61 }
 0xeea   :  { %v8525_v18 = vadd.f32 %v4560_v12, %v8232_v5 }
 0xeeb   :  { %v4572_v6 = vld [vmem:[#allocation2 + $0x8] sm:$0xff] }
 0xeec   :  { %4568 = vst.msk [vmem:[#allocation2 + $0x10] sm:$0xff] %vm9663_vm10, %v8525_v18  ;;  %v4584_v41 = vrot.slane %v4572_v6, 5  ;;  %v4606_v40 = vrot.slane %v4572_v6, 6  ;;  %v4632_v47 = vrot.slane %v4572_v6, 7  ;;  %v4662_v37 = vmul.f32 %v8550_v56, %v4572_v6  ;;  %vm9682_vm10 = vmmov %vm9673_vm5 }
 0xeed   :  { %v4671_v35 = vrot.slane %v4572_v6, 1  ;;  %v4697_v58 = vrot.slane %v4572_v6, 2  ;;  %v4723_v27 = vrot.slane %v4572_v6, 3 }
 0xeee   :  { %v4585_v43 = vsel %vm9665_vm11, %v9664_v24, %v4584_v41  ;;  %v4607_v5 = vsel %vm9667_vm15, %v9666_v11, %v4606_v40  ;;  %v4633_v7 = vsel %vm9669_vm12, %v9668_v45, %v4632_v47  ;;  %v4552_v22 = vpop.f32.mrf.mxu2  ;;  %v8576_v11 = vperm.slane %v4577_v51, 6  ;;  %vm9683_vm11 = vmmov %vm9674_vm9 }
 0xeef   :  { %v4596_v9 = vsel %vm9670_vm13, %v4585_v43, 0.0  ;;  %v4618_v63 = vsel %vm9671_vm1, %v4607_v5, 0.0  ;;  %v4644_v20 = vsel %vm9672_vm2, %v4633_v7, 0.0  ;;  %v4553_v33 = vadd.f32 %v8511_v59, %v4552_v22  ;;  %vm9684_vm15 = vmmov %vm9677_vm4 }
 0xef0   :  { %v4601_v21 = vmul.f32 %v8527_v52, %v4596_v9  ;;  %v4623_v8 = vmul.f32 %v8531_v4, %v4618_v63  ;;  %v4649_v13 = vmul.f32 %v8542_v29, %v4644_v20  ;;  %vm9685_vm12 = vmmov %vm9675_vm14  ;;  %vm9687_vm1 = vcmp.lt.s32.totalorder %v6536_v23, 16 }
 0xef1   :  { %v4561_v17 = vmul.f32 %v8513_v50, %v4553_v33  ;;  %v8589_v33 = vld [vmem:[#allocation5 + $0x38] ss:$0 sm:$0xff]  ;;  %vm9686_vm13 = vmmov %vm9680_vm0  ;;  %vm9688_vm2 = vcmp.lt.s32.totalorder %v6921_v0, 16 }
 0xef2   :  { %v4627_v25 = vadd.f32 %v4623_v8, %v4601_v21 }
 0xef3   :  { %v8560_v14 = vld [vmem:[#allocation2 + $0x10] sm:$0xff]  ;;  %v8571_v61 = vadd.f32 %v4561_v17, %v8276_v1 }
 0xef4   :  { %v4653_v36 = vadd.f32 %v4649_v13, %v4627_v25  ;;  %v4672_v38 = vrot.slane %v8560_v14, 1  ;;  %v4698_v32 = vrot.slane %v8560_v14, 2  ;;  %v4724_v3 = vrot.slane %v8560_v14, 3 }
 0xef5   :  { %v4586_v2 = vrot.slane %v8560_v14, 5  ;;  %v4608_v53 = vrot.slane %v8560_v14, 6  ;;  %v4634_v46 = vrot.slane %v8560_v14, 7  ;;  %4569 = vst.msk [vmem:[#allocation2 + $0x18] sm:$0xff] %vm9676_vm6, %v8571_v61  ;;  %vm9692_vm6 = vmmov %vm9679_vm8 }
 0xef6   :  { %v4666_v12 = vadd.f32 %v4662_v37, %v4653_v36  ;;  %v4673_v6 = vsel %vm9673_vm5, %v4671_v35, %v4672_v38  ;;  %v4699_v24 = vsel %vm9674_vm9, %v4697_v58, %v4698_v32  ;;  %v4725_v45 = vsel %vm9677_vm4, %v4723_v27, %v4724_v3  ;;  %v4554_v9 = vpop.f32.mrf.mxu2 }
 0xef7   :  { %v4689_v43 = vmul.f32 %v8554_v16, %v4673_v6  ;;  %v4587_v5 = vsel %vm9675_vm14, %v4584_v41, %v4586_v2  ;;  %v4609_v1 = vsel %vm9678_vm3, %v4606_v40, %v4608_v53  ;;  %v4715_v20 = vmul.f32 %v8558_v55, %v4699_v24  ;;  %vm9691_vm14 = vmmov %vm9678_vm3 }
 0xef8   :  { %v4602_v7 = vmul.f32 %v8527_v52, %v4587_v5  ;;  %v4624_v21 = vmul.f32 %v8531_v4, %v4609_v1  ;;  %v4555_v51 = vadd.f32 %v8511_v59, %v4554_v9  ;;  %v4635_v8 = vsel %vm9679_vm8, %v4632_v47, %v4634_v46  ;;  %vm9695_vm8 = vmmov %vm9682_vm10 }
 0xef9   :  { %v4693_v63 = vadd.f32 %v4689_v43, %v4666_v12  ;;  %v4741_v22 = vmul.f32 %v8576_v11, %v4725_v45  ;;  %v4650_v40 = vmul.f32 %v8542_v29, %v4635_v8  ;;  %v4663_v47 = vmul.f32 %v8550_v56, %v8560_v14 }
 0xefa   :  { %v4628_v25 = vadd.f32 %v4624_v21, %v4602_v7  ;;  %v4562_v13 = vmul.f32 %v8513_v50, %v4555_v51  ;;  %vm9689_vm5 = vcmp.lt.s32.totalorder %v6118_v30, 16  ;;  %vm9690_vm9 = vcmp.ge.s32.totalorder %v9629_v26, 0 }
 0xefb   :  { %v4719_v41 = vadd.f32 %v4715_v20, %v4693_v63  ;;  %vm9693_vm4 = vcmp.ge.s32.totalorder %v9634_v60, 0  ;;  %vm9694_vm3 = vcmp.ge.s32.totalorder %v9636_v34, 0 }
 0xefc   :  { %v8594_v35 = vadd.f32 %v4562_v13, %v8303_v57  ;;  %v4574_v59 = vld [vmem:[#allocation2 + $0x18] sm:$0xff]  ;;  %v4654_v27 = vadd.f32 %v4650_v40, %v4628_v25 }
 0xefd   :  { %v4745_v37 = vadd.f32 %v4741_v22, %v4719_v41  ;;  %v4674_v17 = vrot.slane %v4574_v59, 1  ;;  %v4700_v36 = vrot.slane %v4574_v59, 2  ;;  %v4726_v50 = vrot.slane %v4574_v59, 3 }
 0xefe   :  { %4570 = vst.msk [vmem:[#allocation2 + $0x20] sm:$0xff] %vm9680_vm0, %v8594_v35  ;;  %v4588_v12 = vrot.slane %v4574_v59, 5  ;;  %v4610_v24 = vrot.slane %v4574_v59, 6  ;;  %v4636_v43 = vrot.slane %v4574_v59, 7  ;;  %v4667_v20 = vadd.f32 %v4663_v47, %v4654_v27  ;;  %vm9696_vm0 = vmmov %vm9683_vm11 }
 0xeff   :  { %v8597_v58 = vadd.f32 %v8589_v33, %v4745_v37  ;;  %v4675_v5 = vsel %vm9682_vm10, %v4672_v38, %v4674_v17  ;;  %v4701_v14 = vsel %vm9683_vm11, %v4698_v32, %v4700_v36  ;;  %v4727_v45 = vsel %vm9684_vm15, %v4724_v3, %v4726_v50  ;;  %v4576_v3 = vld [vmem:[#allocation2 + $0x28] sm:$0xff]  ;;  %vm9698_vm10 = vmmov %vm9691_vm14 }
 0xf00   :  { %v4589_v7 = vsel %vm9685_vm12, %v4586_v2, %v4588_v12  ;;  %v4685_v9 = vsel %vm9687_vm1, %v4675_v5, 0.0  ;;  %v4711_v63 = vsel %vm9688_vm2, %v4701_v14, 0.0  ;;  %v4737_v38 = vsel %vm9689_vm5, %v4727_v45, 0.0  ;;  %vm9699_vm11 = vmmov %vm9692_vm6 }
 0xf01   :  { %v4757_v6 = vsel %vm9681_vm7, %v8597_v58, 0.0  ;;  %v4773_v57 = vmul.f32 %v8597_v58, %v8597_v58  ;;  %v4690_v21 = vmul.f32 %v8554_v16, %v4685_v9  ;;  %v4598_v32 = vsel %vm9690_vm9, %v4589_v7, 0.0  ;;  %vm9697_vm7 = vmmov %vm9685_vm12 }
 0xf02   :  { %4758 = vadd.xlane.f32.xlu0 %v4757_v6  ;;  %v4603_v2 = vmul.f32 %v8527_v52, %v4598_v32  ;;  %v4611_v51 = vsel %vm9691_vm14, %v4608_v53, %v4610_v24  ;;  %v4637_v23 = vsel %vm9692_vm6, %v4634_v46, %v4636_v43  ;;  %v4716_v0 = vmul.f32 %v8558_v55, %v4711_v63  ;;  %vm9700_vm12 = vmmov %vm9686_vm13 }
 0xf03   :  { %v4777_v1 = vsel %vm9686_vm13, %v4773_v57, 0.0  ;;  %v4694_v8 = vadd.f32 %v4690_v21, %v4667_v20  ;;  %v4620_v41 = vsel %vm9693_vm4, %v4611_v51, 0.0  ;;  %v4646_v30 = vsel %vm9694_vm3, %v4637_v23, 0.0  ;;  %vm9701_vm13 = vmmov %vm9695_vm8 }
 0xf04   :  { %4778 = vadd.xlane.f32.xlu2 %v4777_v1  ;;  %v4742_v22 = vmul.f32 %v8576_v11, %v4737_v38  ;;  %v4625_v25 = vmul.f32 %v8531_v4, %v4620_v41  ;;  %v4651_v13 = vmul.f32 %v8542_v29, %v4646_v30  ;;  %v4678_v37 = vrot.slane %v4576_v3, 1  ;;  %vm9702_vm1 = vmmov %vm9696_vm0 }
 0xf05   :  { %v4575_v26 = vld [vmem:[#allocation2 + $0x20] sm:$0xff]  ;;  %v4720_v53 = vadd.f32 %v4716_v0, %v4694_v8  ;;  %v4704_v14 = vrot.slane %v4576_v3, 2  ;;  %v4730_v45 = vrot.slane %v4576_v3, 3  ;;  %v4664_v1 = vmul.f32 %v8550_v56, %v4574_v59  ;;  %vm9703_vm2 = vmmov %vm9700_vm12 }
 0xf06   :  { %v4676_v40 = vrot.slane %v4575_v26, 1  ;;  %v4702_v46 = vrot.slane %v4575_v26, 2  ;;  %v4728_v27 = vrot.slane %v4575_v26, 3  ;;  %v4629_v47 = vadd.f32 %v4625_v25, %v4603_v2  ;;  %vm9705_vm9 = vmmov %vm9684_vm15 }
 0xf07   :  { %v4590_v6 = vrot.slane %v4575_v26, 5  ;;  %v4612_v57 = vrot.slane %v4575_v26, 6  ;;  %v4638_v60 = vrot.slane %v4575_v26, 7  ;;  %v4746_v5 = vadd.f32 %v4742_v22, %v4720_v53  ;;  %vm9708_vm4 = vmmov %vm9703_vm2 }
 0xf08   :  { %v4677_v34 = vsel %vm9695_vm8, %v4674_v17, %v4676_v40  ;;  %v4655_v7 = vadd.f32 %v4651_v13, %v4629_v47  ;;  %v4703_v63 = vsel %vm9696_vm0, %v4700_v36, %v4702_v46  ;;  %v4729_v17 = vsel %vm9684_vm15, %v4726_v50, %v4728_v27  ;;  %vm9709_vm3 = vmmov %vm9703_vm2 }
 0xf09   :  { %v4691_v9 = vmul.f32 %v8554_v16, %v4677_v34  ;;  %v8637_v20 = vadd.f32 %v8589_v33, %v4746_v5  ;;  %v4591_v21 = vsel %vm9697_vm7, %v4588_v12, %v4590_v6  ;;  %v4613_v38 = vsel %vm9698_vm10, %v4610_v24, %v4612_v57  ;;  %vm9710_vm8 = vmmov %vm9703_vm2 }
 0xf0a   :  { %v4639_v32 = vsel %vm9699_vm11, %v4636_v43, %v4638_v60  ;;  %v4668_v2 = vadd.f32 %v4664_v1, %v4655_v7  ;;  %v4604_v3 = vmul.f32 %v8527_v52, %v4591_v21  ;;  %v4626_v59 = vmul.f32 %v8531_v4, %v4613_v38  ;;  %vm9711_vm0 = vmmov %vm9703_vm2  ;;  %v5792_v21 = vld [vmem:[#allocation3 + $0x1a4] sm:$0xff] }
 0xf0b   :  { %v4760_v51 = vsel %vm9700_vm12, %v8637_v20, 0.0  ;;  %v4774_v36 = vmul.f32 %v8637_v20, %v8637_v20  ;;  %v4717_v23 = vmul.f32 %v8558_v55, %v4703_v63  ;;  %v4679_v12 = vsel %vm9701_vm13, %v4676_v40, %v4678_v37  ;;  %4899 = vmatpush.bf16.msrb.mxu3 %v5792_v21 }
 0xf0c   :  { %4761 = vadd.xlane.f32.xlu1 %v4760_v51  ;;  %v4695_v24 = vadd.f32 %v4691_v9, %v4668_v2  ;;  %v4630_v43 = vadd.f32 %v4626_v59, %v4604_v3  ;;  %v4652_v8 = vmul.f32 %v8542_v29, %v4639_v32  ;;  %v4705_v50 = vsel %vm9702_vm1, %v4702_v46, %v4704_v14 }
 0xf0d   :  { %v4780_v52 = vsel %vm9703_vm2, %v4774_v36, 0.0  ;;  %v4743_v4 = vmul.f32 %v8576_v11, %v4729_v17  ;;  %vm9704_vm5 = vcmp.lt.s32.totalorder %v6548_v39, 16  ;;  %v4665_v22 = vmul.f32 %v8550_v56, %v4575_v26 }
 0xf0e   :  { %v4687_v0 = vsel %vm9704_vm5, %v4679_v12, 0.0  ;;  %4781 = vadd.xlane.f32.xlu0 %v4780_v52  ;;  %v4721_v41 = vadd.f32 %v4717_v23, %v4695_v24  ;;  %v4656_v30 = vadd.f32 %v4652_v8, %v4630_v43  ;;  %v4731_v25 = vsel %vm9705_vm9, %v4728_v27, %v4730_v45  ;;  %vm9712_vm9 = vmmov %vm9711_vm0 }
 0xf0f   :  { %vm9706_vm14 = vcmp.lt.s32.totalorder %v6924_v28, 16  ;;  %v4692_v53 = vmul.f32 %v8554_v16, %v4687_v0  ;;  %vm9707_vm6 = vcmp.lt.s32.totalorder %v6211_v15, 16 }
 0xf10   :  { %v4713_v13 = vsel %vm9706_vm14, %v4705_v50, 0.0  ;;  %v4747_v29 = vadd.f32 %v4743_v4, %v4721_v41  ;;  %v4669_v37 = vadd.f32 %v4665_v22, %v4656_v30  ;;  %v4739_v40 = vsel %vm9707_vm6, %v4731_v25, 0.0  ;;  %v5791_v4 = vld [vmem:[#allocation3 + $0x19c] sm:$0xff] }
 0xf11   :  { %v4718_v47 = vmul.f32 %v8558_v55, %v4713_v13  ;;  %v4744_v27 = vmul.f32 %v8576_v11, %v4739_v40  ;;  %4900 = vmatpush.bf16.msrb.mxu3 %v5791_v4 }
 0xf12   :  { %v8665_v39 = vadd.f32 %v8589_v33, %v4747_v29  ;;  %v4696_v46 = vadd.f32 %v4692_v53, %v4669_v37 }
 0xf14   :  { %v4763_v56 = vsel %vm9708_vm4, %v8665_v39, 0.0  ;;  %v4775_v28 = vmul.f32 %v8665_v39, %v8665_v39  ;;  %v4722_v26 = vadd.f32 %v4718_v47, %v4696_v46 }
 0xf15   :  { %4764 = vadd.xlane.f32.xlu1 %v4763_v56 }
 0xf16   :  { %v4783_v16 = vsel %vm9709_vm3, %v4775_v28, 0.0  ;;  %v4748_v15 = vadd.f32 %v4744_v27, %v4722_v26  ;;  %vm9713_vm3 = vmmov %vm9711_vm0 }
 0xf17   :  { %4784 = vadd.xlane.f32.xlu0 %v4783_v16 }
 0xf18   :  { %v8675_v6 = vadd.f32 %v8589_v33, %v4748_v15 }
 0xf1a   :  { %v4766_v55 = vsel %vm9710_vm8, %v8675_v6, 0.0  ;;  %v4776_v57 = vmul.f32 %v8675_v6, %v8675_v6 }
 0xf1b   :  { %4767 = vadd.xlane.f32.xlu2 %v4766_v55 }
 0xf1c   :  { %v4786_v60 = vsel %vm9711_vm0, %v4776_v57, 0.0  ;;  %v5845_v57 = vld [vmem:[#allocation5 + $0x39] ss:$0 sm:$0xff] }
 0xf1d   :  { %4787 = vadd.xlane.f32.xlu1 %v4786_v60 }
 0xf75   :  { %v4759_v5 = vpop.xlane.xlu0 %4758 }
 0xf76   :  { %v4769_v11 = vmul.f32 0.03125, %v4759_v5 }
 0xf77   :  { %v4779_v34 = vpop.xlane.xlu2 %4778 }
 0xf78   :  { %v4793_v14 = vmul.f32 %v4769_v11, %v4769_v11  ;;  %v4789_v45 = vmul.f32 0.03125, %v4779_v34  ;;  %v4805_v16 = vsub.f32 %v8597_v58, %v4769_v11 }
 0xf7a   :  { %v4797_v7 = vsub.f32 %v4789_v45, %v4793_v14 }
 0xf7c   :  { %v4801_v1 = vmax.f32 %v4797_v7, 0.0 }
 0xf7e   :  { %v4809_v9 = vadd.f32 1e-06, %v4801_v1 }
 0xf7f   :  { %v4762_v33 = vpop.xlane.xlu1 %4761 }
 0xf80   :  { %5950 = vrsqrt.f32 %v4809_v9  ;;  %v4770_v63 = vmul.f32 0.03125, %v4762_v33  ;;  %vm4819_vm10 = vweird.f32 %v4809_v9 }
 0xf81   :  { %v4782_v38 = vpop.xlane.xlu0 %4781 }
 0xf82   :  { %v4794_v32 = vmul.f32 %v4770_v63, %v4770_v63  ;;  %v4790_v2 = vmul.f32 0.03125, %v4782_v38  ;;  %v4806_v45 = vsub.f32 %v8637_v20, %v4770_v63 }
 0xf84   :  { %v4798_v59 = vsub.f32 %v4790_v2, %v4794_v32 }
 0xf86   :  { %v5951_v17 = vpop.eup %5950  ;;  %v4802_v36 = vmax.f32 %v4798_v59, 0.0 }
 0xf87   :  { %v4814_v3 = vmul.f32 %v5951_v17, %v4809_v9  ;;  %vm4820_vm7 = vweird.f32 %v5951_v17  ;;  %v5846_v9 = vld [vmem:[#allocation5 + $0x3a] ss:$0 sm:$0xff] }
 0xf88   :  { %v4810_v23 = vadd.f32 1e-06, %v4802_v36  ;;  %v4765_v12 = vpop.xlane.xlu1 %4764  ;;  %vm4821_vm11 = vmor %vm4819_vm10, %vm4820_vm7 }
 0xf89   :  { %v4815_v51 = vmul.f32 %v5951_v17, %v4814_v3  ;;  %v8682_v43 = vmul.f32 0.03125, %v4765_v12 }
 0xf8a   :  { %5952 = vrsqrt.f32 %v4810_v23  ;;  %v4785_v8 = vpop.xlane.xlu0 %4784  ;;  %vm4829_vm12 = vweird.f32 %v4810_v23 }
 0xf8b   :  { %v4816_v24 = vmul.f32 0.5, %v4815_v51  ;;  %v4795_v50 = vmul.f32 %v8682_v43, %v8682_v43  ;;  %v4791_v52 = vmul.f32 0.03125, %v4785_v8  ;;  %v4807_v12 = vsub.f32 %v8665_v39, %v8682_v43 }
 0xf8d   :  { %v4817_v0 = vsub.f32 1.5, %v4816_v24  ;;  %v4799_v41 = vsub.f32 %v4791_v52, %v4795_v50 }
 0xf8e   :  { %v4768_v30 = vpop.xlane.xlu2 %4767 }
 0xf8f   :  { %v4803_v22 = vmax.f32 %v4799_v41, 0.0  ;;  %v4772_v25 = vmul.f32 0.03125, %v4768_v30  ;;  %v4818_v37 = vmul.f32 %v5951_v17, %v4817_v0 }
 0xf90   :  { %v5953_v13 = vpop.eup %5952  ;;  %v4788_v29 = vpop.xlane.xlu1 %4787 }
 0xf91   :  { %v4824_v53 = vmul.f32 %v5953_v13, %v4810_v23  ;;  %v4811_v40 = vadd.f32 1e-06, %v4803_v22  ;;  %v4796_v46 = vmul.f32 %v4772_v25, %v4772_v25  ;;  %v4792_v47 = vmul.f32 0.03125, %v4788_v29 }
 0xf92   :  { %v4822_v26 = vsel %vm4821_vm11, %v5951_v17, %v4818_v37  ;;  %vm4830_vm15 = vweird.f32 %v5953_v13  ;;  %v4808_v52 = vsub.f32 %v8675_v6, %v4772_v25  ;;  %v5847_v37 = vld [vmem:[#allocation5 + $0x3b] ss:$0 sm:$0xff] }
 0xf93   :  { %v4825_v56 = vmul.f32 %v5953_v13, %v4824_v53  ;;  %5954 = vrsqrt.f32 %v4811_v40  ;;  %v4800_v28 = vsub.f32 %v4792_v47, %v4796_v46  ;;  %v4853_v60 = vmul.f32 %v4822_v26, %v4805_v16  ;;  %vm4831_vm13 = vmor %vm4829_vm12, %vm4830_vm15 }
 0xf94   :  { %vm4839_vm2 = vweird.f32 %v4811_v40 }
 0xf95   :  { %v4826_v27 = vmul.f32 0.5, %v4825_v56  ;;  %v4804_v15 = vmax.f32 %v4800_v28, 0.0  ;;  %v4858_v33 = vmul.f32 %v5845_v57, %v4853_v60 }
 0xf97   :  { %v4827_v55 = vsub.f32 1.5, %v4826_v27  ;;  %v4812_v5 = vadd.f32 1e-06, %v4804_v15  ;;  %v4863_v2 = vadd.f32 %v5846_v9, %v4858_v33 }
 0xf99   :  { %v5955_v34 = vpop.eup %5954  ;;  %v4828_v14 = vmul.f32 %v5953_v13, %v4827_v55  ;;  %5956 = vrsqrt.f32 %v4812_v5  ;;  %vm4849_vm6 = vweird.f32 %v4812_v5 }
 0xf9a   :  { %v4834_v7 = vmul.f32 %v5955_v34, %v4811_v40  ;;  %vm4840_vm1 = vweird.f32 %v5955_v34 }
 0xf9b   :  { %v4832_v1 = vsel %vm4831_vm13, %v5953_v13, %v4828_v14  ;;  %vm4841_vm5 = vmor %vm4839_vm2, %vm4840_vm1 }
 0xf9c   :  { %v4854_v21 = vmul.f32 %v4832_v1, %v4806_v45  ;;  %v4835_v38 = vmul.f32 %v5955_v34, %v4834_v7 }
 0xf9e   :  { %v4859_v58 = vmul.f32 %v5845_v57, %v4854_v21  ;;  %v4836_v11 = vmul.f32 0.5, %v4835_v38 }
 0xf9f   :  { %v5957_v32 = vpop.eup %5956 }
 0xfa0   :  { %v4864_v17 = vadd.f32 %v5846_v9, %v4859_v58  ;;  %v4837_v3 = vsub.f32 1.5, %v4836_v11  ;;  %v4844_v59 = vmul.f32 %v5957_v32, %v4812_v5  ;;  %vm4850_vm14 = vweird.f32 %v5957_v32 }
 0xfa1   :  { %vm4851_vm4 = vmor %vm4849_vm6, %vm4850_vm14  ;;  %vm9714_vm14 = vcmask 523264  }
 0xfa2   :  { %v4838_v51 = vmul.f32 %v5955_v34, %v4837_v3  ;;  %v4867_v36 = vpack.c.bf16 %v4864_v17, %v4863_v2  ;;  %v4845_v20 = vmul.f32 %v5957_v32, %v4844_v59 }
 0xfa4   :  { %5694 = vmatmul.msk.bf16.vlgmr.msrb.gmra.mxu3 %vm9712_vm9, %v4867_v36  ;;  %v4842_v63 = vsel %vm4841_vm5, %v5955_v34, %v4838_v51  ;;  %v4846_v23 = vmul.f32 0.5, %v4845_v20 }
 0xfa5   :  { %v4855_v8 = vmul.f32 %v4842_v63, %v4807_v12 }
 0xfa6   :  { %v4847_v24 = vsub.f32 1.5, %v4846_v23 }
 0xfa7   :  { %v4860_v41 = vmul.f32 %v5845_v57, %v4855_v8 }
 0xfa8   :  { %v4848_v50 = vmul.f32 %v5957_v32, %v4847_v24 }
 0xfa9   :  { %v4865_v22 = vadd.f32 %v5846_v9, %v4860_v41 }
 0xfaa   :  { %v4852_v4 = vsel %vm4851_vm4, %v5957_v32, %v4848_v50 }
 0xfab   :  { %v4856_v0 = vmul.f32 %v4852_v4, %v4808_v52 }
 0xfad   :  { %v4861_v30 = vmul.f32 %v5845_v57, %v4856_v0 }
 0xfaf   :  { %v4866_v13 = vadd.f32 %v5846_v9, %v4861_v30 }
 0xfb1   :  { %v4868_v29 = vpack.c.bf16 %v4866_v13, %v4865_v22 }
 0xfb4   :  { %5695 = vmatmul.msk.bf16.gmra.mxu3 %vm9713_vm3, %v4868_v29 }
0x1027   :  { %v4902_v53 = vpop.f32.mrf.mxu3 }
0x1028   :  { %v8693_v39 = vadd.f32 %v5847_v37, %v4902_v53 }
0x102a   :  { %v8696_v43 = vmul.f32 0.70710677, %v8693_v39 }
0x102c   :  { %v4920_v6 = vmul.f32 %v8696_v43, %v8696_v43 }
0x102e   :  { %v8700_v25 = vmin.f32 %v4920_v6, 16.0 }
0x102f   :  { %v4904_v40 = vpop.f32.mrf.mxu3 }
0x1030   :  { %v4922_v46 = vmul.f32 2.1237322e-06, %v8700_v25  ;;  %v4933_v47 = vmul.f32 3.8918573e-05, %v8700_v25  ;;  %v8704_v56 = vadd.f32 %v5847_v37, %v4904_v40 }
0x1032   :  { %v4923_v28 = vadd.f32 0.00028619796, %v4922_v46  ;;  %v4934_v26 = vadd.f32 0.001143296, %v4933_v47  ;;  %v8707_v27 = vmul.f32 0.70710677, %v8704_v56 }
0x1034   :  { %v4935_v16 = vmul.f32 %v4934_v26, %v8700_v25  ;;  %v4924_v15 = vmul.f32 %v4923_v28, %v8700_v25  ;;  %v4960_v55 = vmul.f32 %v8707_v27, %v8707_v27 }
0x1036   :  { %v4936_v57 = vadd.f32 0.014752088, %v4935_v16  ;;  %v8713_v60 = vmin.f32 %v4960_v55, 16.0  ;;  %v4925_v45 = vadd.f32 0.0036580483, %v4924_v15  ;;  %v5796_v16 = vld [vmem:[#allocation3 + $0x1c4] sm:$0xff] }
0x1037   :  { %v4907_v5 = vpop.f32.mrf.mxu3  ;;  %5134 = vmatpush.bf16.msrb.mxu0 %v5796_v16 }
0x1038   :  { %v4937_v34 = vmul.f32 %v4936_v57, %v8700_v25  ;;  %v8716_v14 = vadd.f32 %v5847_v37, %v4907_v5  ;;  %v4962_v7 = vmul.f32 2.1237322e-06, %v8713_v60  ;;  %v4973_v1 = vmul.f32 3.8918573e-05, %v8713_v60 }
0x1039   :  { %v4926_v11 = vmul.f32 %v4925_v45, %v8700_v25 }
0x103a   :  { %v4938_v9 = vadd.f32 0.112945676, %v4937_v34  ;;  %v4963_v33 = vadd.f32 0.00028619796, %v4962_v7  ;;  %v4974_v21 = vadd.f32 0.001143296, %v4973_v1 }
0x103b   :  { %v8721_v38 = vmul.f32 0.70710677, %v8716_v14  ;;  %v4927_v12 = vadd.f32 0.05243302, %v4926_v11  ;;  %v5795_v11 = vld [vmem:[#allocation3 + $0x1bc] sm:$0xff] }
0x103c   :  { %v4939_v58 = vmul.f32 %v4938_v9, %v8700_v25  ;;  %v4964_v32 = vmul.f32 %v4963_v33, %v8713_v60  ;;  %v4975_v2 = vmul.f32 %v4974_v21, %v8713_v60  ;;  %5135 = vmatpush.bf16.msrb.mxu0 %v5795_v11 }
0x103d   :  { %v5000_v17 = vmul.f32 %v8721_v38, %v8721_v38  ;;  %v4928_v30 = vmul.f32 %v4927_v12, %v8700_v25 }
0x103e   :  { %v4940_v3 = vadd.f32 0.4994258, %v4939_v58  ;;  %v4965_v59 = vadd.f32 0.0036580483, %v4964_v32  ;;  %v4976_v51 = vadd.f32 0.014752088, %v4975_v2 }
0x103f   :  { %v8729_v36 = vmin.f32 %v5000_v17, 16.0  ;;  %v4909_v20 = vpop.f32.mrf.mxu3  ;;  %v4929_v47 = vadd.f32 0.18741608, %v4928_v30 }
0x1040   :  { %v4941_v63 = vmul.f32 %v4940_v3, %v8700_v25  ;;  %v8732_v23 = vadd.f32 %v5847_v37, %v4909_v20  ;;  %v4966_v24 = vmul.f32 %v4965_v59, %v8713_v60  ;;  %v4977_v8 = vmul.f32 %v4976_v51, %v8713_v60 }
0x1041   :  { %v5002_v50 = vmul.f32 2.1237322e-06, %v8729_v36  ;;  %v5013_v4 = vmul.f32 3.8918573e-05, %v8729_v36  ;;  %v4930_v32 = vmul.f32 %v4929_v47, %v8700_v25 }
0x1042   :  { %v4942_v52 = vadd.f32 1.0, %v4941_v63  ;;  %v8739_v0 = vmul.f32 0.70710677, %v8732_v23  ;;  %v4978_v41 = vadd.f32 0.112945676, %v4977_v8 }
0x1043   :  { %v4967_v22 = vadd.f32 0.05243302, %v4966_v24  ;;  %v5003_v29 = vadd.f32 0.00028619796, %v5002_v50  ;;  %v5014_v37 = vadd.f32 0.001143296, %v5013_v4 }
0x1044   :  { %5958 = vrcp.f32 %v4942_v52  ;;  %v4979_v13 = vmul.f32 %v4978_v41, %v8713_v60  ;;  %v5040_v53 = vmul.f32 %v8739_v0, %v8739_v0  ;;  %v4954_v58 = vand.u32 2147483648, %v4942_v52  ;;  %v5794_v50 = vld [vmem:[#allocation3 + $0x1b4] sm:$0xff] }
0x1045   :  { %v5015_v40 = vmul.f32 %v5014_v37, %v8729_v36  ;;  %v4968_v28 = vmul.f32 %v4967_v22, %v8713_v60  ;;  %v5004_v55 = vmul.f32 %v5003_v29, %v8729_v36  ;;  %v4952_v63 = vand.u32 2147483647, %v4942_v52  ;;  %5136 = vmatpush.bf16.msrb.mxu0 %v5794_v50 }
0x1046   :  { %v4980_v6 = vadd.f32 0.4994258, %v4979_v13  ;;  %v8746_v46 = vmin.f32 %v5040_v53, 16.0  ;;  %vm4948_vm0 = vweird.f32 %v4942_v52  ;;  %v4931_v4 = vadd.f32 1.1283791, %v4930_v32 }
0x1047   :  { %v5016_v57 = vadd.f32 0.014752088, %v5015_v40  ;;  %v4969_v2 = vadd.f32 0.18741608, %v4968_v28  ;;  %v5005_v17 = vadd.f32 0.0036580483, %v5004_v55 }
0x1048   :  { %v4981_v26 = vmul.f32 %v4980_v6, %v8713_v60  ;;  %v5042_v5 = vmul.f32 2.1237322e-06, %v8746_v46  ;;  %v5053_v34 = vmul.f32 3.8918573e-05, %v8746_v46  ;;  %v4955_v29 = vor.u32 1.1754944e-38, %v4954_v58  ;;  %v5793_v28 = vld [vmem:[#allocation3 + $0x1ac] sm:$0xff] }
0x1049   :  { %v5017_v1 = vmul.f32 %v5016_v57, %v8729_v36  ;;  %v4970_v25 = vmul.f32 %v4969_v2, %v8713_v60  ;;  %v5006_v41 = vmul.f32 %v5005_v17, %v8729_v36  ;;  %vm4953_vm10 = vcmp.eq.f32.partialorder %v4952_v63, 8.507059e+37  ;;  %5137 = vmatpush.bf16.msrb.mxu0 %v5793_v28 }
0x104a   :  { %v5959_v15 = vpop.eup %5958  ;;  %v8753_v7 = vadd.f32 1.0, %v4981_v26  ;;  %v5043_v9 = vadd.f32 0.00028619796, %v5042_v5  ;;  %v5054_v33 = vadd.f32 0.001143296, %v5053_v34  ;;  %v4932_v60 = vmul.f32 %v4931_v4, %v8696_v43 }
0x104b   :  { %v4944_v45 = vmul.f32 %v5959_v15, %v4942_v52  ;;  %v5018_v3 = vadd.f32 0.112945676, %v5017_v1  ;;  %vm4949_vm8 = vweird.f32 %v5959_v15  ;;  %v4971_v26 = vadd.f32 1.1283791, %v4970_v25 }
0x104c   :  { %5960 = vrcp.f32 %v8753_v7  ;;  %v5044_v51 = vmul.f32 %v5043_v9, %v8746_v46  ;;  %v5055_v20 = vmul.f32 %v5054_v33, %v8746_v46  ;;  %vm4950_vm7 = vmor %vm4948_vm0, %vm4949_vm8  ;;  %v5007_v55 = vadd.f32 0.05243302, %v5006_v41 }
0x104d   :  { %v4945_v21 = vsub.f32 1.0, %v4944_v45  ;;  %v5019_v12 = vmul.f32 %v5018_v3, %v8729_v36  ;;  %v4992_v9 = vand.u32 2147483647, %v8753_v7  ;;  %vm4988_vm15 = vweird.f32 %v8753_v7  ;;  %vm9715_vm0 = vmmov %vm9714_vm14 }
0x104e   :  { %v5056_v8 = vadd.f32 0.014752088, %v5055_v20  ;;  %v5045_v37 = vadd.f32 0.0036580483, %v5044_v51  ;;  %v5008_v43 = vmul.f32 %v5007_v55, %v8729_v36  ;;  %v4972_v58 = vmul.f32 %v4971_v26, %v8707_v27 }
0x104f   :  { %v4946_v59 = vmul.f32 %v5959_v15, %v4945_v21  ;;  %v5020_v30 = vadd.f32 0.4994258, %v5019_v12  ;;  %vm4993_vm13 = vcmp.eq.f32.partialorder %v4992_v9, 8.507059e+37  ;;  %v4912_v27 = vmul.f32 0.5, %v8693_v39 }
0x1050   :  { %v5057_v53 = vmul.f32 %v5056_v8, %v8746_v46  ;;  %v5046_v5 = vmul.f32 %v5045_v37, %v8746_v46  ;;  %v5009_v20 = vadd.f32 0.18741608, %v5008_v43  ;;  %v4913_v4 = vmul.f32 0.5, %v8704_v56 }
0x1051   :  { %v4947_v24 = vadd.f32 %v5959_v15, %v4946_v59  ;;  %v5021_v40 = vmul.f32 %v5020_v30, %v8729_v36 }
0x1052   :  { %v5961_v22 = vpop.eup %5960  ;;  %v5058_v47 = vadd.f32 0.112945676, %v5057_v53  ;;  %v5047_v32 = vadd.f32 0.05243302, %v5046_v5  ;;  %v5010_v41 = vmul.f32 %v5009_v20, %v8729_v36  ;;  %v5848_v20 = vld [vmem:[#allocation5 + $0x3c] ss:$0 sm:$0xff] }
0x1053   :  { %v4951_v13 = vsel %vm4950_vm7, %v5959_v15, %v4947_v24  ;;  %v4984_v6 = vmul.f32 %v5961_v22, %v8753_v7  ;;  %v4994_v15 = vand.u32 2147483648, %v8753_v7  ;;  %v5022_v57 = vadd.f32 1.0, %v5021_v40 }
0x1054   :  { %v4956_v52 = vsel %vm4953_vm10, %v4955_v29, %v4951_v13  ;;  %v5059_v34 = vmul.f32 %v5058_v47, %v8746_v46  ;;  %vm4989_vm11 = vweird.f32 %v5961_v22  ;;  %v5048_v7 = vmul.f32 %v5047_v32, %v8746_v46 }
0x1055   :  { %v4985_v16 = vsub.f32 1.0, %v4984_v6  ;;  %v4957_v45 = vmul.f32 %v4956_v52, %v4932_v60  ;;  %5962 = vrcp.f32 %v5022_v57  ;;  %vm4990_vm12 = vmor %vm4988_vm15, %vm4989_vm11  ;;  %v4995_v11 = vor.u32 1.1754944e-38, %v4994_v15 }
0x1056   :  { %v5060_v21 = vadd.f32 0.4994258, %v5059_v34  ;;  %v5034_v13 = vand.u32 2147483648, %v5022_v57  ;;  %v5049_v29 = vadd.f32 0.18741608, %v5048_v7  ;;  %vm5028_vm2 = vweird.f32 %v5022_v57 }
0x1057   :  { %v4986_v1 = vmul.f32 %v5961_v22, %v4985_v16  ;;  %v5696_v2 = vclamps-f32 %v4957_v45, 1.0  ;;  %v5011_v40 = vadd.f32 1.1283791, %v5010_v41  ;;  %v4914_v32 = vmul.f32 0.5, %v8716_v14 }
0x1058   :  { %v5061_v3 = vmul.f32 %v5060_v21, %v8746_v46  ;;  %v5035_v39 = vor.u32 1.1754944e-38, %v5034_v13  ;;  %v5050_v56 = vmul.f32 %v5049_v29, %v8746_v46  ;;  %vm9716_vm7 = vcmask 261120  }
0x1059   :  { %v4987_v33 = vadd.f32 %v5961_v22, %v4986_v1  ;;  %v5080_v24 = vadd.f32 1.0, %v5696_v2  ;;  %v5012_v16 = vmul.f32 %v5011_v40, %v8721_v38  ;;  %v4915_v2 = vmul.f32 0.5, %v8732_v23  ;;  %vm9717_vm10 = vmmov %vm9716_vm7 }
0x105a   :  { %v5062_v63 = vadd.f32 1.0, %v5061_v3  ;;  %v5051_v15 = vadd.f32 1.1283791, %v5050_v56  ;;  %vm9718_vm11 = vmmov %vm9716_vm7  ;;  %v3230_v56 = vsub.f32 %v7816_v49, %v7944_v48  ;;  %v3233_v49 = vsub.f32 %v7876_v62, %v7956_v19 }
0x105b   :  { %v4991_v17 = vsel %vm4990_vm12, %v5961_v22, %v4987_v33  ;;  %v5963_v12 = vpop.eup %5962  ;;  %v5032_v22 = vand.u32 2147483647, %v5022_v57  ;;  %v5084_v37 = vmul.f32 %v5080_v24, %v4912_v27  ;;  %vm9719_vm15 = vmmov %vm9716_vm7 }
0x105c   :  { %v4996_v59 = vsel %vm4993_vm13, %v4995_v11, %v4991_v17  ;;  %v5024_v50 = vmul.f32 %v5963_v12, %v5022_v57  ;;  %5964 = vrcp.f32 %v5062_v63  ;;  %vm5029_vm1 = vweird.f32 %v5963_v12  ;;  %vm9720_vm12 = vmmov %vm9716_vm7 }
0x105d   :  { %v4997_v51 = vmul.f32 %v4996_v59, %v4972_v58  ;;  %vm5030_vm5 = vmor %vm5028_vm2, %vm5029_vm1  ;;  %vm5033_vm9 = vcmp.eq.f32.partialorder %v5032_v22, 8.507059e+37  ;;  %v5074_v5 = vand.u32 2147483648, %v5062_v63  ;;  %v5072_v57 = vand.u32 2147483647, %v5062_v63 }
0x105e   :  { %v5025_v30 = vsub.f32 1.0, %v5024_v50  ;;  %vm5068_vm4 = vweird.f32 %v5062_v63  ;;  %v5052_v33 = vmul.f32 %v5051_v15, %v8739_v0  ;;  %vm9721_vm13 = vmmov %vm9716_vm7  ;;  %vm9723_vm2 = vcmask 64512  }
0x105f   :  { %v5697_v8 = vclamps-f32 %v4997_v51, 1.0  ;;  %v5075_v9 = vor.u32 1.1754944e-38, %v5074_v5  ;;  %vm5073_vm8 = vcmp.eq.f32.partialorder %v5072_v57, 8.507059e+37  ;;  %vm9722_vm1 = vmmov %vm9716_vm7  ;;  %v3237_v15 = vmul.f32 %v3233_v49, %v3233_v49 }
0x1060   :  { %v5026_v6 = vmul.f32 %v5963_v12, %v5025_v30 }
0x1061   :  { %v5081_v25 = vadd.f32 1.0, %v5697_v8 }
0x1062   :  { %v5027_v47 = vadd.f32 %v5963_v12, %v5026_v6  ;;  %v5965_v28 = vpop.eup %5964 }
0x1063   :  { %v5085_v53 = vmul.f32 %v5081_v25, %v4913_v4  ;;  %v5064_v36 = vmul.f32 %v5965_v28, %v5062_v63  ;;  %vm5069_vm6 = vweird.f32 %v5965_v28  ;;  %v5849_v63 = vld [vmem:[#allocation5 + $0x3d] ss:$0 sm:$0xff] }
0x1064   :  { %v5031_v60 = vsel %vm5030_vm5, %v5963_v12, %v5027_v47  ;;  %vm5070_vm3 = vmor %vm5068_vm4, %vm5069_vm6 }
0x1065   :  { %v5088_v52 = vpack.c.bf16 %v5085_v53, %v5084_v37  ;;  %v5036_v26 = vsel %vm5033_vm9, %v5035_v39, %v5031_v60  ;;  %v5065_v55 = vsub.f32 1.0, %v5064_v36  ;;  %vm9724_vm5 = vmmov %vm9722_vm1 }
0x1066   :  { %v5037_v34 = vmul.f32 %v5036_v26, %v5012_v16  ;;  %vm9725_vm9 = vmmov %vm9723_vm2 }
0x1067   :  { %5716 = vmatmul.msk.bf16.vlgmr.msrb.gmra.mxu0 %vm9714_vm14, %v5088_v52  ;;  %v5066_v45 = vmul.f32 %v5965_v28, %v5065_v55  ;;  %v3231_v52 = vsub.f32 %v7822_v42, %v7948_v44  ;;  %v3232_v42 = vsub.f32 %v7847_v10, %v7952_v31  ;;  %vm9726_vm14 = vmmov %vm9723_vm2 }
0x1068   :  { %v5698_v46 = vclamps-f32 %v5037_v34, 1.0  ;;  %vm9727_vm6 = vmmov %vm9723_vm2 }
0x1069   :  { %v5067_v1 = vadd.f32 %v5965_v28, %v5066_v45  ;;  %v3235_v39 = vmul.f32 %v3231_v52, %v3231_v52  ;;  %v3236_v16 = vmul.f32 %v3232_v42, %v3232_v42  ;;  %v3247_v10 = vsel %vm9727_vm6, %v3237_v15, 0.0 }
0x106a   :  { %v5082_v11 = vadd.f32 1.0, %v5698_v46 }
0x106b   :  { %v5071_v43 = vsel %vm5070_vm3, %v5965_v28, %v5067_v1  ;;  %v3241_v44 = vsel %vm9723_vm2, %v3235_v39, 0.0  ;;  %v3244_v55 = vsel %vm9726_vm14, %v3236_v16, 0.0  ;;  %v5851_v16 = vld [vmem:[#allocation5 + $0x3f] ss:$0 sm:$0xff] }
0x106c   :  { %v5076_v21 = vsel %vm5073_vm8, %v5075_v9, %v5071_v43  ;;  %v5086_v3 = vmul.f32 %v5082_v11, %v4914_v32  ;;  %v5798_v43 = vld [vmem:[#allocation3 + $0x1d4] sm:$0xff] }
0x106d   :  { %v5077_v58 = vmul.f32 %v5076_v21, %v5052_v33  ;;  %5303 = vmatpush.bf16.msrb.mxu1 %v5798_v43 }
0x106f   :  { %v5699_v38 = vclamps-f32 %v5077_v58, 1.0 }
0x1071   :  { %v5083_v17 = vadd.f32 1.0, %v5699_v38 }
0x1073   :  { %v5087_v59 = vmul.f32 %v5083_v17, %v4915_v2 }
0x1075   :  { %v5089_v51 = vpack.c.bf16 %v5087_v59, %v5086_v3 }
0x1077   :  { %5717 = vmatmul.msk.bf16.gmra.mxu0 %vm9715_vm0, %v5089_v51 }
0x10e4   :  { %v5139_v12 = vpop.f32.mrf.mxu0 }
0x10e5   :  { %v5140_v0 = vadd.f32 %v5848_v20, %v5139_v12 }
0x10e7   :  { %v5151_v7 = vmul.f32 %v5849_v63, %v5140_v0 }
0x10e9   :  { %v8787_v24 = vadd.f32 %v5151_v7, %v8518_v54 }
0x10eb   :  { %v5161_v8 = vsel %vm9716_vm7, %v8787_v24, 0.0  ;;  %v5177_v14 = vmul.f32 %v8787_v24, %v8787_v24 }
0x10ec   :  { %v5141_v23 = vpop.f32.mrf.mxu0  ;;  %5162 = vadd.xlane.f32.xlu2 %v5161_v8 }
0x10ed   :  { %v5142_v50 = vadd.f32 %v5848_v20, %v5141_v23  ;;  %v5181_v27 = vsel %vm9717_vm10, %v5177_v14, 0.0  ;;  %v5797_v23 = vld [vmem:[#allocation3 + $0x1cc] sm:$0xff] }
0x10ee   :  { %5182 = vadd.xlane.f32.xlu1 %v5181_v27  ;;  %5304 = vmatpush.bf16.msrb.mxu1 %v5797_v23 }
0x10ef   :  { %v5152_v4 = vmul.f32 %v5849_v63, %v5142_v50 }
0x10f1   :  { %v8795_v25 = vadd.f32 %v5152_v4, %v8525_v18 }
0x10f3   :  { %v5164_v54 = vsel %vm9718_vm11, %v8795_v25, 0.0  ;;  %v5178_v41 = vmul.f32 %v8795_v25, %v8795_v25  ;;  %vm9728_vm11 = vmmov %vm9722_vm1 }
0x10f4   :  { %5165 = vadd.xlane.f32.xlu0 %v5164_v54  ;;  %v5144_v22 = vpop.f32.mrf.mxu0 }
0x10f5   :  { %v5184_v30 = vsel %vm9719_vm15, %v5178_v41, 0.0  ;;  %v5145_v13 = vadd.f32 %v5848_v20, %v5144_v22 }
0x10f6   :  { %5185 = vadd.xlane.f32.xlu2 %v5184_v30 }
0x10f7   :  { %v5153_v29 = vmul.f32 %v5849_v63, %v5145_v13 }
0x10f9   :  { %v8803_v37 = vadd.f32 %v5153_v29, %v8571_v61 }
0x10fb   :  { %v5167_v18 = vsel %vm9720_vm12, %v8803_v37, 0.0  ;;  %v5179_v53 = vmul.f32 %v8803_v37, %v8803_v37 }
0x10fc   :  { %v5146_v6 = vpop.f32.mrf.mxu0  ;;  %5168 = vadd.xlane.f32.xlu0 %v5167_v18 }
0x10fd   :  { %v5147_v40 = vadd.f32 %v5848_v20, %v5146_v6  ;;  %v5187_v47 = vsel %vm9721_vm13, %v5179_v53, 0.0 }
0x10fe   :  { %5188 = vadd.xlane.f32.xlu2 %v5187_v47  ;;  %v5850_v47 = vld [vmem:[#allocation5 + $0x3e] ss:$0 sm:$0xff] }
0x10ff   :  { %v5154_v28 = vmul.f32 %v5849_v63, %v5147_v40 }
0x1101   :  { %v8813_v61 = vadd.f32 %v5154_v28, %v8594_v35  ;;  %v3234_v35 = vmul.f32 %v3230_v56, %v3230_v56  ;;  %v5800_v56 = vld [vmem:[#allocation3 + $0x1e4] sm:$0xff] }
0x1102   :  { %5348 = vmatpush.bf16.msrb.mxu2 %v5800_v56  ;;  %v9733_v56 = vld [vmem:[#allocation58_spill] sm:$0xff] }
0x1103   :  { %v5170_v60 = vsel %vm9722_vm1, %v8813_v61, 0.0  ;;  %v5180_v36 = vmul.f32 %v8813_v61, %v8813_v61  ;;  %v3238_v48 = vsel %vm9725_vm9, %v3234_v35, 0.0  ;;  %vm9729_vm9 = vmmov %vm9728_vm11 }
0x1104   :  { %5171 = vadd.xlane.f32.xlu1 %v5170_v60  ;;  %vm9730_vm14 = vmmov %vm9729_vm9 }
0x1105   :  { %v5190_v26 = vsel %vm9724_vm5, %v5180_v36, 0.0  ;;  %vm9731_vm6 = vmmov %vm9729_vm9 }
0x1106   :  { %3242 = vadd.xlane.f32.xlu2 %v3241_v44  ;;  %5191 = vadd.xlane.f32.xlu0 %v5190_v26  ;;  %v5799_v44 = vld [vmem:[#allocation3 + $0x1dc] sm:$0xff] }
0x1107   :  { %5349 = vmatpush.bf16.msrb.mxu2 %v5799_v44 }
0x110c   :  { %3239 = vadd.xlane.f32.xlu1 %v3238_v48 }
0x110e   :  { %3245 = vadd.xlane.f32.xlu0 %v3244_v55 }
0x1114   :  { %3248 = vadd.xlane.f32.xlu1 %v3247_v10 }
0x115f   :  { %v5163_v31 = vpop.xlane.xlu2 %5162 }
0x1160   :  { %v5173_v5 = vmul.f32 0.03125, %v5163_v31 }
0x1161   :  { %v5183_v34 = vpop.xlane.xlu1 %5182 }
0x1162   :  { %v5197_v45 = vmul.f32 %v5173_v5, %v5173_v5  ;;  %v5193_v57 = vmul.f32 0.03125, %v5183_v34  ;;  %v5209_v53 = vsub.f32 %v8787_v24, %v5173_v5 }
0x1164   :  { %v5201_v1 = vsub.f32 %v5193_v57, %v5197_v45 }
0x1166   :  { %v5205_v9 = vmax.f32 %v5201_v1, 0.0 }
0x1167   :  { %v5166_v46 = vpop.xlane.xlu0 %5165 }
0x1168   :  { %v5213_v33 = vadd.f32 1e-06, %v5205_v9  ;;  %v5174_v62 = vmul.f32 0.03125, %v5166_v46 }
0x1169   :  { %v5186_v19 = vpop.xlane.xlu2 %5185 }
0x116a   :  { %5966 = vrsqrt.f32 %v5213_v33  ;;  %v5198_v21 = vmul.f32 %v5174_v62, %v5174_v62  ;;  %v5194_v58 = vmul.f32 0.03125, %v5186_v19  ;;  %vm5223_vm3 = vweird.f32 %v5213_v33 }
0x116b   :  { %v5210_v36 = vsub.f32 %v8795_v25, %v5174_v62 }
0x116c   :  { %v5202_v11 = vsub.f32 %v5194_v58, %v5198_v21 }
0x116e   :  { %v5206_v38 = vmax.f32 %v5202_v11, 0.0 }
0x116f   :  { %v5169_v59 = vpop.xlane.xlu0 %5168 }
0x1170   :  { %v5967_v32 = vpop.eup %5966  ;;  %v5214_v17 = vadd.f32 1e-06, %v5206_v38  ;;  %v8830_v51 = vmul.f32 0.03125, %v5169_v59 }
0x1171   :  { %v5218_v2 = vmul.f32 %v5967_v32, %v5213_v33  ;;  %v5189_v63 = vpop.xlane.xlu2 %5188  ;;  %vm5224_vm4 = vweird.f32 %v5967_v32 }
0x1172   :  { %5968 = vrsqrt.f32 %v5214_v17  ;;  %v5199_v12 = vmul.f32 %v8830_v51, %v8830_v51  ;;  %v5195_v0 = vmul.f32 0.03125, %v5189_v63  ;;  %vm5225_vm8 = vmor %vm5223_vm3, %vm5224_vm4  ;;  %vm5233_vm7 = vweird.f32 %v5214_v17 }
0x1173   :  { %v5219_v3 = vmul.f32 %v5967_v32, %v5218_v2  ;;  %v5211_v19 = vsub.f32 %v8803_v37, %v8830_v51  ;;  %vm5361_vm4 = vcmp.eq.s32.totalorder %v9733_v56, 126  ;;  %vm5374_vm3 = vcmp.eq.s32.totalorder %v9733_v56, 127 }
0x1174   :  { %v5203_v8 = vsub.f32 %v5195_v0, %v5199_v12  ;;  %v5852_v12 = vld [vmem:[#allocation5 + $0x40] ss:$0 sm:$0xff] }
0x1175   :  { %v5220_v20 = vmul.f32 0.5, %v5219_v3 }
0x1176   :  { %v5207_v4 = vmax.f32 %v5203_v8, 0.0 }
0x1177   :  { %v5221_v7 = vsub.f32 1.5, %v5220_v20  ;;  %v5172_v54 = vpop.xlane.xlu1 %5171 }
0x1178   :  { %v5969_v14 = vpop.eup %5968  ;;  %v5215_v30 = vadd.f32 1e-06, %v5207_v4  ;;  %v5176_v22 = vmul.f32 0.03125, %v5172_v54 }
0x1179   :  { %v5222_v50 = vmul.f32 %v5967_v32, %v5221_v7  ;;  %v5228_v27 = vmul.f32 %v5969_v14, %v5214_v17  ;;  %v5192_v13 = vpop.xlane.xlu0 %5191  ;;  %vm5234_vm0 = vweird.f32 %v5969_v14  ;;  %v3243_v4 = vpop.xlane.xlu2 %3242 }
0x117a   :  { %5970 = vrsqrt.f32 %v5215_v30  ;;  %v5200_v6 = vmul.f32 %v5176_v22, %v5176_v22  ;;  %v5196_v52 = vmul.f32 0.03125, %v5192_v13  ;;  %vm5235_vm10 = vmor %vm5233_vm7, %vm5234_vm0  ;;  %vm5243_vm12 = vweird.f32 %v5215_v30 }
0x117b   :  { %v5229_v41 = vmul.f32 %v5969_v14, %v5228_v27  ;;  %v5226_v29 = vsel %vm5225_vm8, %v5967_v32, %v5222_v50  ;;  %v5212_v11 = vsub.f32 %v8813_v61, %v5176_v22 }
0x117c   :  { %v5257_v28 = vmul.f32 %v5226_v29, %v5209_v53  ;;  %v5204_v39 = vsub.f32 %v5196_v52, %v5200_v6 }
0x117d   :  { %v5230_v18 = vmul.f32 0.5, %v5229_v41 }
0x117e   :  { %v5208_v42 = vmax.f32 %v5204_v39, 0.0  ;;  %v5262_v24 = vmul.f32 %v5850_v47, %v5257_v28  ;;  %v9732_v28 = vld [vmem:[#allocation59_spill] sm:$0xff] }
0x117f   :  { %v5231_v40 = vsub.f32 1.5, %v5230_v18  ;;  %v3240_v27 = vpop.xlane.xlu1 %3239  ;;  %v5362_v39 = vcvt.s32.f32 %v9732_v28 }
0x1180   :  { %v5971_v26 = vpop.eup %5970  ;;  %v5216_v55 = vadd.f32 1e-06, %v5208_v42  ;;  %v5267_v31 = vadd.f32 %v5851_v16, %v5262_v24  ;;  %v3250_v54 = vadd.f32 %v3243_v4, %v3240_v27  ;;  %v9734_v24 = vld [vmem:[#allocation60_spill] sm:$0xff] }
0x1181   :  { %v5232_v60 = vmul.f32 %v5969_v14, %v5231_v40  ;;  %v5238_v48 = vmul.f32 %v5971_v26, %v5215_v30  ;;  %vm5244_vm15 = vweird.f32 %v5971_v26  ;;  %v3246_v41 = vpop.xlane.xlu0 %3245  ;;  %v5366_v44 = vsel %vm5361_vm4, %v5362_v39, 0.0 }
0x1182   :  { %5972 = vrsqrt.f32 %v5216_v55  ;;  %vm5245_vm13 = vmor %vm5243_vm12, %vm5244_vm15  ;;  %vm5253_vm2 = vweird.f32 %v5216_v55  ;;  %v3251_v22 = vadd.f32 %v3250_v54, %v3246_v41 }
0x1183   :  { %v5236_v35 = vsel %vm5235_vm10, %v5969_v14, %v5232_v60  ;;  %v5239_v10 = vmul.f32 %v5971_v26, %v5238_v48 }
0x1184   :  { %v5258_v49 = vmul.f32 %v5236_v35, %v5210_v36 }
0x1185   :  { %v5240_v34 = vmul.f32 0.5, %v5239_v10 }
0x1186   :  { %v5263_v15 = vmul.f32 %v5850_v47, %v5258_v49  ;;  %v5363_v49 = vcvt.s32.f32 %v9734_v24 }
0x1187   :  { %v5241_v45 = vsub.f32 1.5, %v5240_v34  ;;  %v3249_v30 = vpop.xlane.xlu1 %3248 }
0x1188   :  { %v5268_v5 = vadd.f32 %v5851_v16, %v5263_v15  ;;  %v5973_v57 = vpop.eup %5972  ;;  %v3252_v13 = vadd.f32 %v3251_v22, %v3249_v30  ;;  %v5367_v15 = vsel %vm5361_vm4, %v5363_v49, 0.0 }
0x1189   :  { %v5242_v1 = vmul.f32 %v5971_v26, %v5241_v45  ;;  %v5248_v9 = vmul.f32 %v5973_v57, %v5216_v55  ;;  %vm5254_vm1 = vweird.f32 %v5973_v57 }
0x118a   :  { %v5271_v25 = vpack.c.bf16 %v5268_v5, %v5267_v31  ;;  %vm5255_vm5 = vmor %vm5253_vm2, %vm5254_vm1  ;;  %v3253_v29 = vrot.slane %v3252_v13, 4  ;;  %v9735_v5 = vld [vmem:[#allocation61_spill] sm:$0xff] }
0x118b   :  { %v5249_v46 = vmul.f32 %v5973_v57, %v5248_v9  ;;  %v5246_v33 = vsel %vm5245_vm13, %v5971_v26, %v5242_v1  ;;  %v5364_v34 = vcvt.s32.f32 %v9735_v5 }
0x118c   :  { %5726 = vmatmul.msk.bf16.vlgmr.msrb.gmra.mxu1 %vm9728_vm11, %v5271_v25  ;;  %v5259_v21 = vmul.f32 %v5246_v33, %v5211_v19  ;;  %v3254_v18 = vadd.f32 %v3253_v29, %v3252_v13 }
0x118d   :  { %v5250_v62 = vmul.f32 0.5, %v5249_v46  ;;  %v9736_v46 = vld [vmem:[#allocation62_spill] sm:$0xff] }
0x118e   :  { %v5264_v2 = vmul.f32 %v5850_v47, %v5259_v21  ;;  %v3255_v53 = vrot.slane %v3254_v18, 2  ;;  %v5365_v33 = vcvt.s32.f32 %v9736_v46 }
0x118f   :  { %v5251_v43 = vsub.f32 1.5, %v5250_v62 }
0x1190   :  { %v5269_v3 = vadd.f32 %v5851_v16, %v5264_v2  ;;  %v3256_v6 = vadd.f32 %v3255_v53, %v3254_v18 }
0x1191   :  { %v5252_v58 = vmul.f32 %v5973_v57, %v5251_v43  ;;  %v5369_v43 = vsel %vm5361_vm4, %v5365_v33, 0.0 }
0x1192   :  { %v3257_v52 = vrot.slane %v3256_v6, 1 }
0x1193   :  { %v5256_v38 = vsel %vm5255_vm5, %v5973_v57, %v5252_v58  ;;  %v5368_v57 = vsel %vm5361_vm4, %v5364_v34, 0.0 }
0x1194   :  { %v5260_v32 = vmul.f32 %v5256_v38, %v5212_v11  ;;  %v3258_v40 = vadd.f32 %v3257_v52, %v3256_v6 }
0x1196   :  { %v5265_v17 = vmul.f32 %v5850_v47, %v5260_v32  ;;  %v5853_v47 = vld [vmem:[#allocation5 + $0xab] ss:$0 sm:$0xff]  ;;  %v3303_v60 = vmul.f32 0.0044921874, %v3258_v40 }
0x1198   :  { %v5270_v59 = vadd.f32 %v5851_v16, %v5265_v17  ;;  %v5375_v35 = vsel %vm5374_vm3, %v3303_v60, 0.0 }
0x119a   :  { %v5272_v20 = vpack.c.bf16 %v5270_v59, %v5269_v3 }
0x119c   :  { %5727 = vmatmul.msk.bf16.gmra.mxu1 %vm9729_vm9, %v5272_v20 }
0x1209   :  { %v5306_v63 = vpop.f32.mrf.mxu1 }
0x120a   :  { %v5307_v51 = vadd.f32 %v5852_v12, %v5306_v63 }
0x1211   :  { %v5308_v37 = vpop.f32.mrf.mxu1 }
0x1212   :  { %v5309_v0 = vadd.f32 %v5852_v12, %v5308_v37 }
0x1214   :  { %v5316_v7 = vpack.c.bf16 %v5309_v0, %v5307_v51 }
0x1216   :  { %5736 = vmatmul.msk.bf16.vlgmr.msrb.gmra.mxu2 %vm9730_vm14, %v5316_v7 }
0x1219   :  { %v5311_v8 = vpop.f32.mrf.mxu1 }
0x121a   :  { %v5312_v14 = vadd.f32 %v5852_v12, %v5311_v8 }
0x1221   :  { %v5313_v61 = vpop.f32.mrf.mxu1 }
0x1222   :  { %v5314_v23 = vadd.f32 %v5852_v12, %v5313_v61 }
0x1224   :  { %v5317_v50 = vpack.c.bf16 %v5314_v23, %v5312_v14 }
0x1226   :  { %5737 = vmatmul.msk.bf16.gmra.mxu2 %vm9731_vm6, %v5317_v50 }
0x1299   :  { %v5351_v36 = vpop.f32.mrf.mxu2 }
0x129a   :  { %v5352_v42 = vadd.f32 %v5853_v47, %v5351_v36 }
0x129c   :  { %v5370_v26 = vadd.f32 %v5366_v44, %v5352_v42 }
0x129e   :  { %v5376_v16 = vadd.f32 %v5375_v35, %v5370_v26 }
0x12a0   :  { %5380 = vst [vmem:[%s8872_s3] sm:$0xff] %v5376_v16 }
0x12a1   :  { %v5353_v48 = vpop.f32.mrf.mxu2 }
0x12a2   :  { %v5354_v55 = vadd.f32 %v5853_v47, %v5353_v48 }
0x12a4   :  { %v5371_v10 = vadd.f32 %v5367_v15, %v5354_v55 }
0x12a6   :  { %v5377_v31 = vadd.f32 %v5375_v35, %v5371_v10 }
0x12a8   :  { %5381 = vst [vmem:[%s8872_s3 + $0x8] sm:$0xff] %v5377_v31 }
0x12a9   :  { %v5356_v45 = vpop.f32.mrf.mxu2 }
0x12aa   :  { %v5357_v25 = vadd.f32 %v5853_v47, %v5356_v45 }
0x12ac   :  { %v5372_v1 = vadd.f32 %v5368_v57, %v5357_v25 }
0x12ae   :  { %v5378_v9 = vadd.f32 %v5375_v35, %v5372_v1 }
0x12b0   :  { %5382 = vst [vmem:[%s8872_s3 + $0x10] sm:$0xff] %v5378_v9 }
0x12b1   :  { %v5358_v62 = vpop.f32.mrf.mxu2 }
0x12b2   :  { %v5359_v19 = vadd.f32 %v5853_v47, %v5358_v62 }
0x12b4   :  { %v5373_v21 = vadd.f32 %v5369_v43, %v5359_v19 }
0x12b6   :  { %v5379_v58 = vadd.f32 %v5375_v35, %v5373_v21 }
0x12b8   :  { %5383 = vst [vmem:[%s8872_s3 + $0x18] sm:$0xff] %v5379_v58 }
0x12b9   :  { %5388 = vsyncpa [#allocation4], 1 }
0x12ba   :  { %5389 = vsyncpa [#allocation6], 1 }

</bundles_post_ra>
